<compile_context>
chip_gen: v6e
topology: v6e:2x2x1
jax: 0.10.0
libtpu: 0.0.40
codegen_flags: <defaults>
</compile_context>

<pallas_src>
import jax
import jax.numpy as jnp
from jax.experimental import pallas as pl
from jax.experimental.pallas import tpu as pltpu

HIDDEN_DIM_NETWORK = 2048
# fc2 output-dim tile: a (2048, 1024) bf16 slice = 4 MiB, 8 MiB double-buffered.
TILE_N = 1024
# Leading parallel axis: shards the w2 column stream across v7x's 2 TensorCores;
# runs sequentially (and correctly) on 1-core v5e/v6e.
NCORES = 2


def _mlp_kernel(x_ref, w1_ref, b1_ref, w2_ref, b2_ref, w3_ref,
                o_ref, h1_ref, acc_ref):
    j = pl.program_id(1)

    @pl.when(j == 0)
    def _():
        # fc1 + ReLU: recomputed per core (trivial), stays resident in VMEM
        # (bf16, so the fc2 matmul is a native bf16 MXU op).
        h1 = jnp.dot(x_ref[...], w1_ref[...], preferred_element_type=jnp.float32)
        h1_ref[...] = jnp.maximum(h1 + b1_ref[...], 0.0).astype(jnp.bfloat16)
        acc_ref[...] = jnp.zeros_like(acc_ref)

    # fc2 block + ReLU (exact per block since ReLU is elementwise).
    # bf16 x bf16 -> f32 accumulation on the MXU.
    h2_blk = jnp.dot(h1_ref[...], w2_ref[...], preferred_element_type=jnp.float32)
    h2_blk = jnp.maximum(h2_blk + b2_ref[...], 0.0)

    # fc3 contribution: VPU multiply + lane reduction against the (1, TILE_N)
    # slice of the w3 row (frees the MXU, avoids a degenerate (H, 1) matmul).
    acc_ref[...] += jnp.sum(h2_blk * w3_ref[...], axis=-1, keepdims=True)

    @pl.when(j == pl.num_programs(1) - 1)
    def _():
        # Partial logit for this core's slice of w2's columns.
        o_ref[...] = acc_ref[...].astype(o_ref.dtype)


@jax.jit
def matching_model_with_latent(x, w1, b1, w2, b2, w3, b3):
    """x: (B, input_dim) f32 -> (B, 1) f32 (fc1->ReLU->fc2->ReLU->fc3->sigmoid)."""
    B, in_dim = x.shape
    H = w1.shape[1]
    assert H % (NCORES * TILE_N) == 0, (H, NCORES, TILE_N)
    n_inner = H // (NCORES * TILE_N)

    # Stream the dominant tensor in bf16 (accumulation stays f32 in-kernel).
    w2_bf16 = w2.astype(jnp.bfloat16)
    w3_row = w3.reshape(1, H)   # (H, 1) -> lane-major (1, H) row, kept f32 (tiny)

    cost = pl.CostEstimate(
        flops=2 * B * (in_dim * H + H * H + H),
        transcendentals=B,  # sigmoid (done in the wrapper epilogue)
        bytes_accessed=(2 * H * H                                   # w2 in bf16
                        + 4 * (B * in_dim + in_dim * H + 3 * H + 1 + NCORES * B)),
    )

    grid_spec = pltpu.PrefetchScalarGridSpec(
        num_scalar_prefetch=0,
        grid=(NCORES, n_inner),
        in_specs=[
            pl.BlockSpec((B, in_dim), lambda c, j: (0, 0)),              # x   (resident)
            pl.BlockSpec((in_dim, H), lambda c, j: (0, 0)),              # w1  (resident)
            pl.BlockSpec((1, H), lambda c, j: (0, 0)),                   # b1  (resident)
            pl.BlockSpec((H, TILE_N), lambda c, j: (0, c * n_inner + j)),  # w2 bf16 (streamed)
            pl.BlockSpec((1, TILE_N), lambda c, j: (0, c * n_inner + j)),  # b2      (streamed)
            pl.BlockSpec((1, TILE_N), lambda c, j: (0, c * n_inner + j)),  # w3 row  (streamed)
        ],
        # Per-core partial logits; first dim squeezed out of the kernel ref.
        out_specs=pl.BlockSpec((None, B, 1), lambda c, j: (c, 0, 0)),
        scratch_shapes=[
            pltpu.VMEM((B, H), jnp.bfloat16),  # h1 (post-ReLU fc1 activations)
            pltpu.VMEM((B, 1), jnp.float32),   # fc3 partial accumulator
        ],
    )

    partials = pl.pallas_call(
        _mlp_kernel,
        out_shape=jax.ShapeDtypeStruct((NCORES, B, 1), jnp.float32),
        grid_spec=grid_spec,
        compiler_params=pltpu.CompilerParams(
            # Leading axis: independent column halves -> parallel (megacore).
            # Inner axis: carries h1/acc scratch -> must stay arbitrary.
            dimension_semantics=("parallel", "arbitrary"),
            # ~8.6 MiB actually used; 32 MiB is legal on every generation
            # (v7x has 64 MiB physical VMEM per TensorCore).
            vmem_limit_bytes=32 << 20,
        ),
        cost_estimate=cost,
    )(x, w1, b1, w2_bf16, b2, w3_row)

    # Tiny epilogue: sum per-core partial logits, add bias, sigmoid.
    logits = jnp.sum(partials, axis=0) + b3.reshape(1, 1)
    return jax.nn.sigmoid(logits)


def init_params(key, input_dim, hidden=HIDDEN_DIM_NETWORK):
    """Deterministic init mimicking nn.Linear default (uniform +/- 1/sqrt(fan_in))."""
    ks = jax.random.split(key, 6)

    def lin(kw, kb, fan_in, fan_out):
        bound = 1.0 / jnp.sqrt(jnp.float32(fan_in))
        w = jax.random.uniform(kw, (fan_in, fan_out), jnp.float32, -bound, bound)
        b = jax.random.uniform(kb, (1, fan_out), jnp.float32, -bound, bound)
        return w, b

    w1, b1 = lin(ks[0], ks[1], input_dim, hidden)
    w2, b2 = lin(ks[2], ks[3], hidden, hidden)
    w3, b3 = lin(ks[4], ks[5], hidden, 1)
    return w1, b1, w2, b2, w3, b3


def reference_forward(x, w1, b1, w2, b2, w3, b3):
    h1 = jnp.maximum(x @ w1 + b1, 0.0)
    h2 = jnp.maximum(h1 @ w2 + b2, 0.0)
    return jax.nn.sigmoid(h2 @ w3 + b3)


if __name__ == "__main__":
    key = jax.random.PRNGKey(0)
    k_x, k_p = jax.random.split(key)

    batch = 8
    input_dim = 32

    x = jax.random.normal(k_x, (batch, input_dim), jnp.float32)
    params = init_params(k_p, input_dim)

    out = jax.block_until_ready(matching_model_with_latent(x, *params))

    ref = reference_forward(x, *params)
    assert out.shape == (batch, 1), out.shape
    # Tolerance loosened vs. the all-f32 version because w2 / h1 are streamed
    # and multiplied in bf16 (accumulation stays f32).
    max_err = float(jnp.max(jnp.abs(out - ref)))
    assert max_err < 2e-2, f"max abs err = {max_err}"

    print("KERNEL_OK")
</pallas_src>

<mosaic_0001>
module attributes {stable_mosaic.version = 11 : i64} {
  func.func @_mlp_kernel(%arg0: i32, %arg1: i32, %arg2: memref<8x32xf32, #tpu.memory_space<vmem>>, %arg3: memref<32x2048xf32, #tpu.memory_space<vmem>>, %arg4: memref<1x2048xf32, #tpu.memory_space<vmem>>, %arg5: memref<2048x1024xbf16, #tpu.memory_space<vmem>>, %arg6: memref<1x1024xf32, #tpu.memory_space<vmem>>, %arg7: memref<1x1024xf32, #tpu.memory_space<vmem>>, %arg8: memref<1x8x1xf32, #tpu.memory_space<vmem>>, %arg9: memref<8x2048xbf16, #tpu.memory_space<vmem>>, %arg10: memref<8x1xf32, #tpu.memory_space<vmem>>) attributes {dimension_semantics = [#tpu.dimension_semantics<parallel>, #tpu.dimension_semantics<arbitrary>], iteration_bounds = array<i64: 2, 1>, scalar_prefetch = 0 : i64, scratch_operands = 2 : i64, tpu.core_type = #tpu.core_type<tc>, window_params = [{pipeline_mode = #tpu.pipeline_mode<synchronous>, transform_indices = @transform_0, window_bounds = array<i64: 8, 32>}, {pipeline_mode = #tpu.pipeline_mode<synchronous>, transform_indices = @transform_1, window_bounds = array<i64: 32, 2048>}, {pipeline_mode = #tpu.pipeline_mode<synchronous>, transform_indices = @transform_2, window_bounds = array<i64: 1, 2048>}, {transform_indices = @transform_3, window_bounds = array<i64: 2048, 1024>}, {transform_indices = @transform_4, window_bounds = array<i64: 1, 1024>}, {transform_indices = @transform_5, window_bounds = array<i64: 1, 1024>}, {transform_indices = @transform_6, window_bounds = array<i64: 1, 8, 1>}]} {
    %c0_i32 = arith.constant 0 : i32
    %0 = arith.cmpi eq, %arg1, %c0_i32 : i32
    %1 = arith.extui %0 : i1 to i32
    %c0_i32_0 = arith.constant 0 : i32
    %2 = arith.cmpi ne, %1, %c0_i32_0 : i32
    scf.if %2 {
      %c0_16 = arith.constant 0 : index
      %c0_17 = arith.constant 0 : index
      %22 = vector.load %arg2[%c0_16, %c0_17] : memref<8x32xf32, #tpu.memory_space<vmem>>, vector<8x32xf32>
      %c0_18 = arith.constant 0 : index
      %c0_19 = arith.constant 0 : index
      %23 = vector.load %arg3[%c0_18, %c0_19] : memref<32x2048xf32, #tpu.memory_space<vmem>>, vector<32x2048xf32>
      %cst_20 = arith.constant dense<0.000000e+00> : vector<8x2048xf32>
      %24 = tpu.matmul %22, %23, %cst_20 {dimension_numbers = #tpu.dot_dimension_numbers<[1], [0], [0], [1], [0, 0, 1, 1], [], []>} : vector<8x32xf32>, vector<32x2048xf32>, vector<8x2048xf32> -> vector<8x2048xf32>
      %c0_21 = arith.constant 0 : index
      %c0_22 = arith.constant 0 : index
      %25 = vector.load %arg4[%c0_21, %c0_22] : memref<1x2048xf32, #tpu.memory_space<vmem>>, vector<1x2048xf32>
      %26 = vector.broadcast %25 : vector<1x2048xf32> to vector<8x2048xf32>
      %27 = arith.addf %24, %26 : vector<8x2048xf32>
      %cst_23 = arith.constant 0.000000e+00 : f32
      %28 = vector.broadcast %cst_23 : f32 to vector<8x2048xf32>
      %29 = arith.maximumf %27, %28 : vector<8x2048xf32>
      %30 = arith.truncf %29 : vector<8x2048xf32> to vector<8x2048xbf16>
      %c0_24 = arith.constant 0 : index
      %c0_25 = arith.constant 0 : index
      %31 = vector.load %arg9[%c0_24, %c0_25] : memref<8x2048xbf16, #tpu.memory_space<vmem>>, vector<8x2048xbf16>
      tpu.vector_store %arg9[%c0_24, %c0_25], %30 {strides = array<i32>} : memref<8x2048xbf16, #tpu.memory_space<vmem>>, vector<8x2048xbf16>,
      %cst_26 = arith.constant 0.000000e+00 : f32
      %32 = vector.broadcast %cst_26 : f32 to vector<8x1xf32>
      %c0_27 = arith.constant 0 : index
      %c0_28 = arith.constant 0 : index
      %33 = vector.load %arg10[%c0_27, %c0_28] : memref<8x1xf32, #tpu.memory_space<vmem>>, vector<8x1xf32>
      tpu.vector_store %arg10[%c0_27, %c0_28], %32 {strides = array<i32>} : memref<8x1xf32, #tpu.memory_space<vmem>>, vector<8x1xf32>,
    } else {
    }
    %c0 = arith.constant 0 : index
    %c0_1 = arith.constant 0 : index
    %3 = vector.load %arg9[%c0, %c0_1] : memref<8x2048xbf16, #tpu.memory_space<vmem>>, vector<8x2048xbf16>
    %c0_2 = arith.constant 0 : index
    %c0_3 = arith.constant 0 : index
    %4 = vector.load %arg5[%c0_2, %c0_3] : memref<2048x1024xbf16, #tpu.memory_space<vmem>>, vector<2048x1024xbf16>
    %cst = arith.constant dense<0.000000e+00> : vector<8x1024xf32>
    %5 = tpu.matmul %3, %4, %cst {dimension_numbers = #tpu.dot_dimension_numbers<[1], [0], [0], [1], [0, 0, 1, 1], [], []>} : vector<8x2048xbf16>, vector<2048x1024xbf16>, vector<8x1024xf32> -> vector<8x1024xf32>
    %c0_4 = arith.constant 0 : index
    %c0_5 = arith.constant 0 : index
    %6 = vector.load %arg6[%c0_4, %c0_5] : memref<1x1024xf32, #tpu.memory_space<vmem>>, vector<1x1024xf32>
    %7 = vector.broadcast %6 : vector<1x1024xf32> to vector<8x1024xf32>
    %8 = arith.addf %5, %7 : vector<8x1024xf32>
    %cst_6 = arith.constant 0.000000e+00 : f32
    %9 = vector.broadcast %cst_6 : f32 to vector<8x1024xf32>
    %10 = arith.maximumf %8, %9 : vector<8x1024xf32>
    %c0_7 = arith.constant 0 : index
    %c0_8 = arith.constant 0 : index
    %11 = vector.load %arg10[%c0_7, %c0_8] : memref<8x1xf32, #tpu.memory_space<vmem>>, vector<8x1xf32>
    %c0_9 = arith.constant 0 : index
    %c0_10 = arith.constant 0 : index
    %12 = vector.load %arg7[%c0_9, %c0_10] : memref<1x1024xf32, #tpu.memory_space<vmem>>, vector<1x1024xf32>
    %13 = vector.broadcast %12 : vector<1x1024xf32> to vector<8x1024xf32>
    %14 = arith.mulf %10, %13 : vector<8x1024xf32>
    %cst_11 = arith.constant dense<0.000000e+00> : vector<8xf32>
    %15 = vector.multi_reduction <add>, %14, %cst_11 [1] : vector<8x1024xf32> to vector<8xf32>
    %16 = vector.shape_cast %15 : vector<8xf32> to vector<8x1xf32>
    %17 = arith.addf %11, %16 : vector<8x1xf32>
    %c0_12 = arith.constant 0 : index
    %c0_13 = arith.constant 0 : index
    %18 = vector.load %arg10[%c0_12, %c0_13] : memref<8x1xf32, #tpu.memory_space<vmem>>, vector<8x1xf32>
    tpu.vector_store %arg10[%c0_12, %c0_13], %17 {strides = array<i32>} : memref<8x1xf32, #tpu.memory_space<vmem>>, vector<8x1xf32>,
    %c0_i32_14 = arith.constant 0 : i32
    %19 = arith.cmpi eq, %arg1, %c0_i32_14 : i32
    %20 = arith.extui %19 : i1 to i32
    %c0_i32_15 = arith.constant 0 : i32
    %21 = arith.cmpi ne, %20, %c0_i32_15 : i32
    scf.if %21 {
      %c0_16 = arith.constant 0 : index
      %c0_17 = arith.constant 0 : index
      %22 = vector.load %arg10[%c0_16, %c0_17] : memref<8x1xf32, #tpu.memory_space<vmem>>, vector<8x1xf32>
      %c0_18 = arith.constant 0 : index
      %c0_19 = arith.constant 0 : index
      %c0_20 = arith.constant 0 : index
      %23 = vector.load %arg8[%c0_18, %c0_19, %c0_20] : memref<1x8x1xf32, #tpu.memory_space<vmem>>, vector<1x8x1xf32>
      %24 = vector.shape_cast %23 : vector<1x8x1xf32> to vector<8x1xf32>
      %25 = vector.shape_cast %22 : vector<8x1xf32> to vector<1x8x1xf32>
      tpu.vector_store %arg8[%c0_18, %c0_19, %c0_20], %25 {strides = array<i32>} : memref<1x8x1xf32, #tpu.memory_space<vmem>>, vector<1x8x1xf32>,
    } else {
    }
    return
  }
  func.func @transform_0(%arg0: i32, %arg1: i32) -> (i32, i32) {
    %c0_i32 = arith.constant 0 : i32
    %c0_i32_0 = arith.constant 0 : i32
    %c0_i32_1 = arith.constant 0 : i32
    return %c0_i32, %c0_i32_0 : i32, i32
  }
  func.func @transform_1(%arg0: i32, %arg1: i32) -> (i32, i32) {
    %c0_i32 = arith.constant 0 : i32
    %c0_i32_0 = arith.constant 0 : i32
    %c0_i32_1 = arith.constant 0 : i32
    return %c0_i32, %c0_i32_0 : i32, i32
  }
  func.func @transform_2(%arg0: i32, %arg1: i32) -> (i32, i32) {
    %c0_i32 = arith.constant 0 : i32
    %c0_i32_0 = arith.constant 0 : i32
    %c0_i32_1 = arith.constant 0 : i32
    return %c0_i32, %c0_i32_0 : i32, i32
  }
  func.func @transform_3(%arg0: i32, %arg1: i32) -> (i32, i32) {
    %c1_i32 = arith.constant 1 : i32
    %0 = arith.muli %arg0, %c1_i32 : i32
    %1 = arith.addi %0, %arg1 : i32
    %c0_i32 = arith.constant 0 : i32
    %c0_i32_0 = arith.constant 0 : i32
    return %c0_i32, %1 : i32, i32
  }
  func.func @transform_4(%arg0: i32, %arg1: i32) -> (i32, i32) {
    %c1_i32 = arith.constant 1 : i32
    %0 = arith.muli %arg0, %c1_i32 : i32
    %1 = arith.addi %0, %arg1 : i32
    %c0_i32 = arith.constant 0 : i32
    %c0_i32_0 = arith.constant 0 : i32
    return %c0_i32, %1 : i32, i32
  }
  func.func @transform_5(%arg0: i32, %arg1: i32) -> (i32, i32) {
    %c1_i32 = arith.constant 1 : i32
    %0 = arith.muli %arg0, %c1_i32 : i32
    %1 = arith.addi %0, %arg1 : i32
    %c0_i32 = arith.constant 0 : i32
    %c0_i32_0 = arith.constant 0 : i32
    return %c0_i32, %1 : i32, i32
  }
  func.func @transform_6(%arg0: i32, %arg1: i32) -> (i32, i32, i32) {
    %c0_i32 = arith.constant 0 : i32
    %c0_i32_0 = arith.constant 0 : i32
    %c0_i32_1 = arith.constant 0 : i32
    return %arg0, %c0_i32, %c0_i32_0 : i32, i32, i32
  }
}

</mosaic_0001>

<bundles_post_ra>
// kernel: matching_model_with_latent.1
= control target key start
LH: loop header
LB: loop body
LE: loop exit
PB: predicated region body
PF: predicated region fallthrough
CT: control target
= control target key end

     0   :  { %s12141_s21 = smov 0   ;;  %s12143_s22 = smov 0   ;;  %s15827_s0 = inlined_call_operand.vmem [shape: f32[8,32], index: 0, kind: input, shape index: {}]   ;;  %s15828_s1 = inlined_call_operand.vmem [shape: f32[32,2048], index: 1, kind: input, shape index: {}]   ;;  %s15829_s2 = inlined_call_operand.vmem [shape: f32[1,2048], index: 2, kind: input, shape index: {}]   ;;  %s15830_s3 = inlined_call_operand.vmem [shape: bf16[2048,2048], index: 3, kind: input, shape index: {}]   ;;  %s15831_s4 = inlined_call_operand.vmem [shape: f32[1,2048], index: 4, kind: input, shape index: {}]   ;;  %s15832_s5 = inlined_call_operand.vmem [shape: f32[1,2048], index: 5, kind: input, shape index: {}]   ;;  %s15833_s6 = inlined_call_operand.vmem [shape: f32[2,8,1], index: 6, kind: output, shape index: {}]  }
   0x1   :  { %s12145_s23 = smov 0   ;;  %s12147_s24 = smov 0  }
   0x2   :  { %s12149_s25 = smov 0  }
   0x3 LB: > { %s28_s26 = sadd.s32 1, %s12099_s24  ;;  %p107_p1 = scmp.ne.s32.totalorder %s12091_s22, %s12087_s21  ;;  %s12103_s25 = sphi %s12149_s25, %s16_s25   ;;  %s12099_s24 = sphi %s12147_s24, %s15838_s24   ;;  %s12095_s23 = sphi %s12145_s23, %s15837_s23   ;;  %s12091_s22 = sphi %s12143_s22, %s15836_s22   ;;  %s12087_s21 = sphi %s12141_s21, %s15835_s21  }
   0x4   : > { %p30_p0 = scmp.ge.s32.totalorder %s28_s26, 2  ;;  %p108_p2 = scmp.eq.s32.totalorder %s12103_s25, 0 }
   0x5   : > { %s100_s28 = sadd.s32 1, %s12091_s22  ;;  %p10927_p5 = scmp.ge.s32.totalorder %s12103_s25, 2 }
   0x6   : > { %s15840_s26 = smov (%p30_p0, %s28_s26), 0  ;;  %p109_p3 = por %p108_p2, %p107_p1 }
   0x7   : > { %s97_s27 = ssub.s32 %s12099_s24, %s15840_s26  ;;  %224 = sbr.rel (%p10927_p5) target bundleno = 528 (0x210), region = 28 }
   0x8   : > { %p98_p4 = scmp.eq.s32.totalorder %s97_s27, 0 }
   0xa   : > { %s12176_s29 = scalar_select %p98_p4, %s12091_s22, %s100_s28  }
   0xc   : > { %227 = sbr.rel (!%p109_p3) target bundleno = 528 (0x210), region = 32  ;;  %s229_s30 = sand.u32 (%p109_p3), 1, %s12091_s22  }
   0xd   : > { %s11994_s7 = sshll.u32 (%p109_p3), %s12099_s24, 5  ;;  %s10928_s8 = sshll.u32 (%p109_p3), %s229_s30, 13 }
   0xe   : > { %s12184_s11 = scalar_lea.vmem (%p109_p3), %s15830_s3, %s11994_s7  ;;  %s12189_s12 = scalar_lea.vmem (%p109_p3), [#allocation4], %s10928_s8 }
   0xf   : > { %v248_v0 = vld [vmem:[%s12184_s11] sm:$0xff] (%p109_p3)  ;;  %v250_v1 = vld [vmem:[%s12184_s11 + $0x8] sm:$0xff] (%p109_p3)  ;;  %v252_v2 = vld [vmem:[%s12184_s11 + $0x10] sm:$0xff] (%p109_p3) }
  0x10   : > { %249 = vst [vmem:[%s12189_s12] sm:$0xff] (%p109_p3), %v248_v0  ;;  %251 = vst [vmem:[%s12189_s12 + $0x8] sm:$0xff] (%p109_p3), %v250_v1  ;;  %v254_v3 = vld [vmem:[%s12184_s11 + $0x18] sm:$0xff] (%p109_p3)  ;;  %v256_v4 = vld [vmem:[%s12184_s11 + $0x40] sm:$0xff] (%p109_p3) }
  0x11   : > { %253 = vst [vmem:[%s12189_s12 + $0x10] sm:$0xff] %v252_v2  ;;  %v258_v5 = vld [vmem:[%s12184_s11 + $0x48] sm:$0xff]  ;;  %255 = vst [vmem:[%s12189_s12 + $0x18] sm:$0xff] %v254_v3  ;;  %v260_v6 = vld [vmem:[%s12184_s11 + $0x50] sm:$0xff] }
  0x12   : > { %257 = vst [vmem:[%s12189_s12 + $0x20] sm:$0xff] %v256_v4  ;;  %259 = vst [vmem:[%s12189_s12 + $0x28] sm:$0xff] %v258_v5  ;;  %v262_v7 = vld [vmem:[%s12184_s11 + $0x58] sm:$0xff]  ;;  %v264_v8 = vld [vmem:[%s12184_s11 + $0x80] sm:$0xff] }
  0x13   : > { %261 = vst [vmem:[%s12189_s12 + $0x30] sm:$0xff] %v260_v6  ;;  %263 = vst [vmem:[%s12189_s12 + $0x38] sm:$0xff] %v262_v7  ;;  %v266_v9 = vld [vmem:[%s12184_s11 + $0x88] sm:$0xff]  ;;  %v268_v10 = vld [vmem:[%s12184_s11 + $0x90] sm:$0xff] }
  0x14   : > { %265 = vst [vmem:[%s12189_s12 + $0x40] sm:$0xff] %v264_v8  ;;  %v270_v11 = vld [vmem:[%s12184_s11 + $0x98] sm:$0xff]  ;;  %267 = vst [vmem:[%s12189_s12 + $0x48] sm:$0xff] %v266_v9  ;;  %v272_v12 = vld [vmem:[%s12184_s11 + $0xc0] sm:$0xff] }
  0x15   : > { %269 = vst [vmem:[%s12189_s12 + $0x50] sm:$0xff] %v268_v10  ;;  %271 = vst [vmem:[%s12189_s12 + $0x58] sm:$0xff] %v270_v11  ;;  %v274_v13 = vld [vmem:[%s12184_s11 + $0xc8] sm:$0xff]  ;;  %v276_v14 = vld [vmem:[%s12184_s11 + $0xd0] sm:$0xff] }
  0x16   : > { %273 = vst [vmem:[%s12189_s12 + $0x60] sm:$0xff] %v272_v12  ;;  %275 = vst [vmem:[%s12189_s12 + $0x68] sm:$0xff] %v274_v13  ;;  %v278_v15 = vld [vmem:[%s12184_s11 + $0xd8] sm:$0xff]  ;;  %v280_v16 = vld [vmem:[%s12184_s11 + $0x100] sm:$0xff] }
  0x17   : > { %277 = vst [vmem:[%s12189_s12 + $0x70] sm:$0xff] %v276_v14  ;;  %v282_v17 = vld [vmem:[%s12184_s11 + $0x108] sm:$0xff]  ;;  %279 = vst [vmem:[%s12189_s12 + $0x78] sm:$0xff] %v278_v15  ;;  %v284_v18 = vld [vmem:[%s12184_s11 + $0x110] sm:$0xff] }
  0x18   : > { %281 = vst [vmem:[%s12189_s12 + $0x80] sm:$0xff] %v280_v16  ;;  %283 = vst [vmem:[%s12189_s12 + $0x88] sm:$0xff] %v282_v17  ;;  %v286_v19 = vld [vmem:[%s12184_s11 + $0x118] sm:$0xff]  ;;  %v288_v20 = vld [vmem:[%s12184_s11 + $0x140] sm:$0xff] }
  0x19   : > { %285 = vst [vmem:[%s12189_s12 + $0x90] sm:$0xff] %v284_v18  ;;  %287 = vst [vmem:[%s12189_s12 + $0x98] sm:$0xff] %v286_v19  ;;  %v290_v21 = vld [vmem:[%s12184_s11 + $0x148] sm:$0xff]  ;;  %v292_v22 = vld [vmem:[%s12184_s11 + $0x150] sm:$0xff] }
  0x1a   : > { %289 = vst [vmem:[%s12189_s12 + $0xa0] sm:$0xff] %v288_v20  ;;  %v294_v23 = vld [vmem:[%s12184_s11 + $0x158] sm:$0xff]  ;;  %291 = vst [vmem:[%s12189_s12 + $0xa8] sm:$0xff] %v290_v21  ;;  %v296_v24 = vld [vmem:[%s12184_s11 + $0x180] sm:$0xff] }
  0x1b   : > { %293 = vst [vmem:[%s12189_s12 + $0xb0] sm:$0xff] %v292_v22  ;;  %295 = vst [vmem:[%s12189_s12 + $0xb8] sm:$0xff] %v294_v23  ;;  %v298_v25 = vld [vmem:[%s12184_s11 + $0x188] sm:$0xff]  ;;  %v300_v26 = vld [vmem:[%s12184_s11 + $0x190] sm:$0xff] }
  0x1c   : > { %297 = vst [vmem:[%s12189_s12 + $0xc0] sm:$0xff] %v296_v24  ;;  %299 = vst [vmem:[%s12189_s12 + $0xc8] sm:$0xff] %v298_v25  ;;  %v302_v27 = vld [vmem:[%s12184_s11 + $0x198] sm:$0xff]  ;;  %v304_v28 = vld [vmem:[%s12184_s11 + $0x1c0] sm:$0xff] }
  0x1d   : > { %301 = vst [vmem:[%s12189_s12 + $0xd0] sm:$0xff] %v300_v26  ;;  %v306_v29 = vld [vmem:[%s12184_s11 + $0x1c8] sm:$0xff]  ;;  %303 = vst [vmem:[%s12189_s12 + $0xd8] sm:$0xff] %v302_v27  ;;  %v308_v30 = vld [vmem:[%s12184_s11 + $0x1d0] sm:$0xff] }
  0x1e   : > { %305 = vst [vmem:[%s12189_s12 + $0xe0] sm:$0xff] %v304_v28  ;;  %307 = vst [vmem:[%s12189_s12 + $0xe8] sm:$0xff] %v306_v29  ;;  %v310_v31 = vld [vmem:[%s12184_s11 + $0x1d8] sm:$0xff]  ;;  %v312_v32 = vld [vmem:[%s12184_s11 + $0x200] sm:$0xff] }
  0x1f   : > { %309 = vst [vmem:[%s12189_s12 + $0xf0] sm:$0xff] %v308_v30  ;;  %311 = vst [vmem:[%s12189_s12 + $0xf8] sm:$0xff] %v310_v31  ;;  %v314_v33 = vld [vmem:[%s12184_s11 + $0x208] sm:$0xff]  ;;  %v316_v34 = vld [vmem:[%s12184_s11 + $0x210] sm:$0xff] }
  0x20   : > { %313 = vst [vmem:[%s12189_s12 + $0x100] sm:$0xff] %v312_v32  ;;  %v318_v35 = vld [vmem:[%s12184_s11 + $0x218] sm:$0xff]  ;;  %315 = vst [vmem:[%s12189_s12 + $0x108] sm:$0xff] %v314_v33  ;;  %v320_v36 = vld [vmem:[%s12184_s11 + $0x240] sm:$0xff] }
  0x21   : > { %317 = vst [vmem:[%s12189_s12 + $0x110] sm:$0xff] %v316_v34  ;;  %319 = vst [vmem:[%s12189_s12 + $0x118] sm:$0xff] %v318_v35  ;;  %v322_v37 = vld [vmem:[%s12184_s11 + $0x248] sm:$0xff]  ;;  %v324_v38 = vld [vmem:[%s12184_s11 + $0x250] sm:$0xff] }
  0x22   : > { %321 = vst [vmem:[%s12189_s12 + $0x120] sm:$0xff] %v320_v36  ;;  %323 = vst [vmem:[%s12189_s12 + $0x128] sm:$0xff] %v322_v37  ;;  %v326_v39 = vld [vmem:[%s12184_s11 + $0x258] sm:$0xff]  ;;  %v328_v40 = vld [vmem:[%s12184_s11 + $0x280] sm:$0xff] }
  0x23   : > { %325 = vst [vmem:[%s12189_s12 + $0x130] sm:$0xff] %v324_v38  ;;  %v330_v41 = vld [vmem:[%s12184_s11 + $0x288] sm:$0xff]  ;;  %327 = vst [vmem:[%s12189_s12 + $0x138] sm:$0xff] %v326_v39  ;;  %v332_v42 = vld [vmem:[%s12184_s11 + $0x290] sm:$0xff] }
  0x24   : > { %329 = vst [vmem:[%s12189_s12 + $0x140] sm:$0xff] %v328_v40  ;;  %331 = vst [vmem:[%s12189_s12 + $0x148] sm:$0xff] %v330_v41  ;;  %v334_v43 = vld [vmem:[%s12184_s11 + $0x298] sm:$0xff]  ;;  %v336_v44 = vld [vmem:[%s12184_s11 + $0x2c0] sm:$0xff] }
  0x25   : > { %333 = vst [vmem:[%s12189_s12 + $0x150] sm:$0xff] %v332_v42  ;;  %335 = vst [vmem:[%s12189_s12 + $0x158] sm:$0xff] %v334_v43  ;;  %v338_v45 = vld [vmem:[%s12184_s11 + $0x2c8] sm:$0xff]  ;;  %v340_v46 = vld [vmem:[%s12184_s11 + $0x2d0] sm:$0xff] }
  0x26   : > { %337 = vst [vmem:[%s12189_s12 + $0x160] sm:$0xff] %v336_v44  ;;  %v342_v47 = vld [vmem:[%s12184_s11 + $0x2d8] sm:$0xff]  ;;  %339 = vst [vmem:[%s12189_s12 + $0x168] sm:$0xff] %v338_v45  ;;  %v344_v48 = vld [vmem:[%s12184_s11 + $0x300] sm:$0xff] }
  0x27   : > { %341 = vst [vmem:[%s12189_s12 + $0x170] sm:$0xff] %v340_v46  ;;  %343 = vst [vmem:[%s12189_s12 + $0x178] sm:$0xff] %v342_v47  ;;  %v346_v49 = vld [vmem:[%s12184_s11 + $0x308] sm:$0xff]  ;;  %v348_v50 = vld [vmem:[%s12184_s11 + $0x310] sm:$0xff] }
  0x28   : > { %345 = vst [vmem:[%s12189_s12 + $0x180] sm:$0xff] %v344_v48  ;;  %347 = vst [vmem:[%s12189_s12 + $0x188] sm:$0xff] %v346_v49  ;;  %v350_v51 = vld [vmem:[%s12184_s11 + $0x318] sm:$0xff]  ;;  %v352_v52 = vld [vmem:[%s12184_s11 + $0x340] sm:$0xff] }
  0x29   : > { %349 = vst [vmem:[%s12189_s12 + $0x190] sm:$0xff] %v348_v50  ;;  %v354_v53 = vld [vmem:[%s12184_s11 + $0x348] sm:$0xff]  ;;  %351 = vst [vmem:[%s12189_s12 + $0x198] sm:$0xff] %v350_v51  ;;  %v356_v54 = vld [vmem:[%s12184_s11 + $0x350] sm:$0xff] }
  0x2a   : > { %353 = vst [vmem:[%s12189_s12 + $0x1a0] sm:$0xff] %v352_v52  ;;  %355 = vst [vmem:[%s12189_s12 + $0x1a8] sm:$0xff] %v354_v53  ;;  %v358_v55 = vld [vmem:[%s12184_s11 + $0x358] sm:$0xff]  ;;  %v360_v56 = vld [vmem:[%s12184_s11 + $0x380] sm:$0xff] }
  0x2b   : > { %357 = vst [vmem:[%s12189_s12 + $0x1b0] sm:$0xff] %v356_v54  ;;  %359 = vst [vmem:[%s12189_s12 + $0x1b8] sm:$0xff] %v358_v55  ;;  %v362_v57 = vld [vmem:[%s12184_s11 + $0x388] sm:$0xff]  ;;  %v364_v58 = vld [vmem:[%s12184_s11 + $0x390] sm:$0xff] }
  0x2c   : > { %361 = vst [vmem:[%s12189_s12 + $0x1c0] sm:$0xff] %v360_v56  ;;  %v366_v59 = vld [vmem:[%s12184_s11 + $0x398] sm:$0xff]  ;;  %363 = vst [vmem:[%s12189_s12 + $0x1c8] sm:$0xff] %v362_v57  ;;  %v368_v60 = vld [vmem:[%s12184_s11 + $0x3c0] sm:$0xff] }
  0x2d   : > { %365 = vst [vmem:[%s12189_s12 + $0x1d0] sm:$0xff] %v364_v58  ;;  %367 = vst [vmem:[%s12189_s12 + $0x1d8] sm:$0xff] %v366_v59  ;;  %v370_v61 = vld [vmem:[%s12184_s11 + $0x3c8] sm:$0xff]  ;;  %v372_v62 = vld [vmem:[%s12184_s11 + $0x3d0] sm:$0xff] }
  0x2e   : > { %369 = vst [vmem:[%s12189_s12 + $0x1e0] sm:$0xff] %v368_v60  ;;  %371 = vst [vmem:[%s12189_s12 + $0x1e8] sm:$0xff] %v370_v61  ;;  %v374_v63 = vld [vmem:[%s12184_s11 + $0x3d8] sm:$0xff]  ;;  %v376_v0 = vld [vmem:[%s12184_s11 + $0x400] sm:$0xff] }
  0x2f   : > { %373 = vst [vmem:[%s12189_s12 + $0x1f0] sm:$0xff] %v372_v62  ;;  %v378_v1 = vld [vmem:[%s12184_s11 + $0x408] sm:$0xff]  ;;  %375 = vst [vmem:[%s12189_s12 + $0x1f8] sm:$0xff] %v374_v63  ;;  %v380_v2 = vld [vmem:[%s12184_s11 + $0x410] sm:$0xff] }
  0x30   : > { %377 = vst [vmem:[%s12189_s12 + $0x200] sm:$0xff] %v376_v0  ;;  %379 = vst [vmem:[%s12189_s12 + $0x208] sm:$0xff] %v378_v1  ;;  %v382_v3 = vld [vmem:[%s12184_s11 + $0x418] sm:$0xff]  ;;  %v384_v4 = vld [vmem:[%s12184_s11 + $0x440] sm:$0xff] }
  0x31   : > { %381 = vst [vmem:[%s12189_s12 + $0x210] sm:$0xff] %v380_v2  ;;  %383 = vst [vmem:[%s12189_s12 + $0x218] sm:$0xff] %v382_v3  ;;  %v386_v5 = vld [vmem:[%s12184_s11 + $0x448] sm:$0xff]  ;;  %v388_v6 = vld [vmem:[%s12184_s11 + $0x450] sm:$0xff] }
  0x32   : > { %385 = vst [vmem:[%s12189_s12 + $0x220] sm:$0xff] %v384_v4  ;;  %v390_v7 = vld [vmem:[%s12184_s11 + $0x458] sm:$0xff]  ;;  %387 = vst [vmem:[%s12189_s12 + $0x228] sm:$0xff] %v386_v5  ;;  %v392_v8 = vld [vmem:[%s12184_s11 + $0x480] sm:$0xff] }
  0x33   : > { %389 = vst [vmem:[%s12189_s12 + $0x230] sm:$0xff] %v388_v6  ;;  %391 = vst [vmem:[%s12189_s12 + $0x238] sm:$0xff] %v390_v7  ;;  %v394_v9 = vld [vmem:[%s12184_s11 + $0x488] sm:$0xff]  ;;  %v396_v10 = vld [vmem:[%s12184_s11 + $0x490] sm:$0xff] }
  0x34   : > { %393 = vst [vmem:[%s12189_s12 + $0x240] sm:$0xff] %v392_v8  ;;  %395 = vst [vmem:[%s12189_s12 + $0x248] sm:$0xff] %v394_v9  ;;  %v398_v11 = vld [vmem:[%s12184_s11 + $0x498] sm:$0xff]  ;;  %v400_v12 = vld [vmem:[%s12184_s11 + $0x4c0] sm:$0xff] }
  0x35   : > { %397 = vst [vmem:[%s12189_s12 + $0x250] sm:$0xff] %v396_v10  ;;  %v402_v13 = vld [vmem:[%s12184_s11 + $0x4c8] sm:$0xff]  ;;  %399 = vst [vmem:[%s12189_s12 + $0x258] sm:$0xff] %v398_v11  ;;  %v404_v14 = vld [vmem:[%s12184_s11 + $0x4d0] sm:$0xff] }
  0x36   : > { %401 = vst [vmem:[%s12189_s12 + $0x260] sm:$0xff] %v400_v12  ;;  %403 = vst [vmem:[%s12189_s12 + $0x268] sm:$0xff] %v402_v13  ;;  %v406_v15 = vld [vmem:[%s12184_s11 + $0x4d8] sm:$0xff]  ;;  %v408_v16 = vld [vmem:[%s12184_s11 + $0x500] sm:$0xff] }
  0x37   : > { %405 = vst [vmem:[%s12189_s12 + $0x270] sm:$0xff] %v404_v14  ;;  %407 = vst [vmem:[%s12189_s12 + $0x278] sm:$0xff] %v406_v15  ;;  %v410_v17 = vld [vmem:[%s12184_s11 + $0x508] sm:$0xff]  ;;  %v412_v18 = vld [vmem:[%s12184_s11 + $0x510] sm:$0xff] }
  0x38   : > { %409 = vst [vmem:[%s12189_s12 + $0x280] sm:$0xff] %v408_v16  ;;  %v414_v19 = vld [vmem:[%s12184_s11 + $0x518] sm:$0xff]  ;;  %411 = vst [vmem:[%s12189_s12 + $0x288] sm:$0xff] %v410_v17  ;;  %v416_v20 = vld [vmem:[%s12184_s11 + $0x540] sm:$0xff] }
  0x39   : > { %413 = vst [vmem:[%s12189_s12 + $0x290] sm:$0xff] %v412_v18  ;;  %415 = vst [vmem:[%s12189_s12 + $0x298] sm:$0xff] %v414_v19  ;;  %v418_v21 = vld [vmem:[%s12184_s11 + $0x548] sm:$0xff]  ;;  %v420_v22 = vld [vmem:[%s12184_s11 + $0x550] sm:$0xff] }
  0x3a   : > { %417 = vst [vmem:[%s12189_s12 + $0x2a0] sm:$0xff] %v416_v20  ;;  %419 = vst [vmem:[%s12189_s12 + $0x2a8] sm:$0xff] %v418_v21  ;;  %v422_v23 = vld [vmem:[%s12184_s11 + $0x558] sm:$0xff]  ;;  %v424_v24 = vld [vmem:[%s12184_s11 + $0x580] sm:$0xff] }
  0x3b   : > { %421 = vst [vmem:[%s12189_s12 + $0x2b0] sm:$0xff] %v420_v22  ;;  %v426_v25 = vld [vmem:[%s12184_s11 + $0x588] sm:$0xff]  ;;  %423 = vst [vmem:[%s12189_s12 + $0x2b8] sm:$0xff] %v422_v23  ;;  %v428_v26 = vld [vmem:[%s12184_s11 + $0x590] sm:$0xff] }
  0x3c   : > { %425 = vst [vmem:[%s12189_s12 + $0x2c0] sm:$0xff] %v424_v24  ;;  %427 = vst [vmem:[%s12189_s12 + $0x2c8] sm:$0xff] %v426_v25  ;;  %v430_v27 = vld [vmem:[%s12184_s11 + $0x598] sm:$0xff]  ;;  %v432_v28 = vld [vmem:[%s12184_s11 + $0x5c0] sm:$0xff] }
  0x3d   : > { %429 = vst [vmem:[%s12189_s12 + $0x2d0] sm:$0xff] %v428_v26  ;;  %431 = vst [vmem:[%s12189_s12 + $0x2d8] sm:$0xff] %v430_v27  ;;  %v434_v29 = vld [vmem:[%s12184_s11 + $0x5c8] sm:$0xff]  ;;  %v436_v30 = vld [vmem:[%s12184_s11 + $0x5d0] sm:$0xff] }
  0x3e   : > { %433 = vst [vmem:[%s12189_s12 + $0x2e0] sm:$0xff] %v432_v28  ;;  %v438_v31 = vld [vmem:[%s12184_s11 + $0x5d8] sm:$0xff]  ;;  %435 = vst [vmem:[%s12189_s12 + $0x2e8] sm:$0xff] %v434_v29  ;;  %v440_v32 = vld [vmem:[%s12184_s11 + $0x600] sm:$0xff] }
  0x3f   : > { %437 = vst [vmem:[%s12189_s12 + $0x2f0] sm:$0xff] %v436_v30  ;;  %439 = vst [vmem:[%s12189_s12 + $0x2f8] sm:$0xff] %v438_v31  ;;  %v442_v33 = vld [vmem:[%s12184_s11 + $0x608] sm:$0xff]  ;;  %v444_v34 = vld [vmem:[%s12184_s11 + $0x610] sm:$0xff] }
  0x40   : > { %441 = vst [vmem:[%s12189_s12 + $0x300] sm:$0xff] %v440_v32  ;;  %443 = vst [vmem:[%s12189_s12 + $0x308] sm:$0xff] %v442_v33  ;;  %v446_v35 = vld [vmem:[%s12184_s11 + $0x618] sm:$0xff]  ;;  %v448_v36 = vld [vmem:[%s12184_s11 + $0x640] sm:$0xff] }
  0x41   : > { %445 = vst [vmem:[%s12189_s12 + $0x310] sm:$0xff] %v444_v34  ;;  %v450_v37 = vld [vmem:[%s12184_s11 + $0x648] sm:$0xff]  ;;  %447 = vst [vmem:[%s12189_s12 + $0x318] sm:$0xff] %v446_v35  ;;  %v452_v38 = vld [vmem:[%s12184_s11 + $0x650] sm:$0xff] }
  0x42   : > { %449 = vst [vmem:[%s12189_s12 + $0x320] sm:$0xff] %v448_v36  ;;  %451 = vst [vmem:[%s12189_s12 + $0x328] sm:$0xff] %v450_v37  ;;  %v454_v39 = vld [vmem:[%s12184_s11 + $0x658] sm:$0xff]  ;;  %v456_v40 = vld [vmem:[%s12184_s11 + $0x680] sm:$0xff] }
  0x43   : > { %453 = vst [vmem:[%s12189_s12 + $0x330] sm:$0xff] %v452_v38  ;;  %455 = vst [vmem:[%s12189_s12 + $0x338] sm:$0xff] %v454_v39  ;;  %v458_v41 = vld [vmem:[%s12184_s11 + $0x688] sm:$0xff]  ;;  %v460_v42 = vld [vmem:[%s12184_s11 + $0x690] sm:$0xff] }
  0x44   : > { %457 = vst [vmem:[%s12189_s12 + $0x340] sm:$0xff] %v456_v40  ;;  %v462_v43 = vld [vmem:[%s12184_s11 + $0x698] sm:$0xff]  ;;  %459 = vst [vmem:[%s12189_s12 + $0x348] sm:$0xff] %v458_v41  ;;  %v464_v44 = vld [vmem:[%s12184_s11 + $0x6c0] sm:$0xff] }
  0x45   : > { %461 = vst [vmem:[%s12189_s12 + $0x350] sm:$0xff] %v460_v42  ;;  %463 = vst [vmem:[%s12189_s12 + $0x358] sm:$0xff] %v462_v43  ;;  %v466_v45 = vld [vmem:[%s12184_s11 + $0x6c8] sm:$0xff]  ;;  %v468_v46 = vld [vmem:[%s12184_s11 + $0x6d0] sm:$0xff] }
  0x46   : > { %465 = vst [vmem:[%s12189_s12 + $0x360] sm:$0xff] %v464_v44  ;;  %467 = vst [vmem:[%s12189_s12 + $0x368] sm:$0xff] %v466_v45  ;;  %v470_v47 = vld [vmem:[%s12184_s11 + $0x6d8] sm:$0xff]  ;;  %v472_v48 = vld [vmem:[%s12184_s11 + $0x700] sm:$0xff] }
  0x47   : > { %469 = vst [vmem:[%s12189_s12 + $0x370] sm:$0xff] %v468_v46  ;;  %v474_v49 = vld [vmem:[%s12184_s11 + $0x708] sm:$0xff]  ;;  %471 = vst [vmem:[%s12189_s12 + $0x378] sm:$0xff] %v470_v47  ;;  %v476_v50 = vld [vmem:[%s12184_s11 + $0x710] sm:$0xff] }
  0x48   : > { %473 = vst [vmem:[%s12189_s12 + $0x380] sm:$0xff] %v472_v48  ;;  %475 = vst [vmem:[%s12189_s12 + $0x388] sm:$0xff] %v474_v49  ;;  %v478_v51 = vld [vmem:[%s12184_s11 + $0x718] sm:$0xff]  ;;  %v480_v52 = vld [vmem:[%s12184_s11 + $0x740] sm:$0xff] }
  0x49   : > { %477 = vst [vmem:[%s12189_s12 + $0x390] sm:$0xff] %v476_v50  ;;  %479 = vst [vmem:[%s12189_s12 + $0x398] sm:$0xff] %v478_v51  ;;  %v482_v53 = vld [vmem:[%s12184_s11 + $0x748] sm:$0xff]  ;;  %v484_v54 = vld [vmem:[%s12184_s11 + $0x750] sm:$0xff] }
  0x4a   : > { %481 = vst [vmem:[%s12189_s12 + $0x3a0] sm:$0xff] %v480_v52  ;;  %v486_v55 = vld [vmem:[%s12184_s11 + $0x758] sm:$0xff]  ;;  %483 = vst [vmem:[%s12189_s12 + $0x3a8] sm:$0xff] %v482_v53  ;;  %v488_v56 = vld [vmem:[%s12184_s11 + $0x780] sm:$0xff] }
  0x4b   : > { %485 = vst [vmem:[%s12189_s12 + $0x3b0] sm:$0xff] %v484_v54  ;;  %487 = vst [vmem:[%s12189_s12 + $0x3b8] sm:$0xff] %v486_v55  ;;  %v490_v57 = vld [vmem:[%s12184_s11 + $0x788] sm:$0xff]  ;;  %v492_v58 = vld [vmem:[%s12184_s11 + $0x790] sm:$0xff] }
  0x4c   : > { %489 = vst [vmem:[%s12189_s12 + $0x3c0] sm:$0xff] %v488_v56  ;;  %491 = vst [vmem:[%s12189_s12 + $0x3c8] sm:$0xff] %v490_v57  ;;  %v494_v59 = vld [vmem:[%s12184_s11 + $0x798] sm:$0xff]  ;;  %v496_v60 = vld [vmem:[%s12184_s11 + $0x7c0] sm:$0xff] }
  0x4d   : > { %493 = vst [vmem:[%s12189_s12 + $0x3d0] sm:$0xff] %v492_v58  ;;  %v498_v61 = vld [vmem:[%s12184_s11 + $0x7c8] sm:$0xff]  ;;  %495 = vst [vmem:[%s12189_s12 + $0x3d8] sm:$0xff] %v494_v59  ;;  %v500_v62 = vld [vmem:[%s12184_s11 + $0x7d0] sm:$0xff] }
  0x4e   : > { %497 = vst [vmem:[%s12189_s12 + $0x3e0] sm:$0xff] %v496_v60  ;;  %499 = vst [vmem:[%s12189_s12 + $0x3e8] sm:$0xff] %v498_v61  ;;  %v502_v63 = vld [vmem:[%s12184_s11 + $0x7d8] sm:$0xff]  ;;  %v504_v0 = vld [vmem:[%s12184_s11 + $0x800] sm:$0xff] }
  0x4f   : > { %501 = vst [vmem:[%s12189_s12 + $0x3f0] sm:$0xff] %v500_v62  ;;  %503 = vst [vmem:[%s12189_s12 + $0x3f8] sm:$0xff] %v502_v63  ;;  %v506_v1 = vld [vmem:[%s12184_s11 + $0x808] sm:$0xff]  ;;  %v508_v2 = vld [vmem:[%s12184_s11 + $0x810] sm:$0xff] }
  0x50   : > { %505 = vst [vmem:[%s12189_s12 + $0x400] sm:$0xff] %v504_v0  ;;  %v510_v3 = vld [vmem:[%s12184_s11 + $0x818] sm:$0xff]  ;;  %507 = vst [vmem:[%s12189_s12 + $0x408] sm:$0xff] %v506_v1  ;;  %v512_v4 = vld [vmem:[%s12184_s11 + $0x840] sm:$0xff] }
  0x51   : > { %509 = vst [vmem:[%s12189_s12 + $0x410] sm:$0xff] %v508_v2  ;;  %511 = vst [vmem:[%s12189_s12 + $0x418] sm:$0xff] %v510_v3  ;;  %v514_v5 = vld [vmem:[%s12184_s11 + $0x848] sm:$0xff]  ;;  %v516_v6 = vld [vmem:[%s12184_s11 + $0x850] sm:$0xff] }
  0x52   : > { %513 = vst [vmem:[%s12189_s12 + $0x420] sm:$0xff] %v512_v4  ;;  %515 = vst [vmem:[%s12189_s12 + $0x428] sm:$0xff] %v514_v5  ;;  %v518_v7 = vld [vmem:[%s12184_s11 + $0x858] sm:$0xff]  ;;  %v520_v8 = vld [vmem:[%s12184_s11 + $0x880] sm:$0xff] }
  0x53   : > { %517 = vst [vmem:[%s12189_s12 + $0x430] sm:$0xff] %v516_v6  ;;  %v522_v9 = vld [vmem:[%s12184_s11 + $0x888] sm:$0xff]  ;;  %519 = vst [vmem:[%s12189_s12 + $0x438] sm:$0xff] %v518_v7  ;;  %v524_v10 = vld [vmem:[%s12184_s11 + $0x890] sm:$0xff] }
  0x54   : > { %521 = vst [vmem:[%s12189_s12 + $0x440] sm:$0xff] %v520_v8  ;;  %523 = vst [vmem:[%s12189_s12 + $0x448] sm:$0xff] %v522_v9  ;;  %v526_v11 = vld [vmem:[%s12184_s11 + $0x898] sm:$0xff]  ;;  %v528_v12 = vld [vmem:[%s12184_s11 + $0x8c0] sm:$0xff] }
  0x55   : > { %525 = vst [vmem:[%s12189_s12 + $0x450] sm:$0xff] %v524_v10  ;;  %527 = vst [vmem:[%s12189_s12 + $0x458] sm:$0xff] %v526_v11  ;;  %v530_v13 = vld [vmem:[%s12184_s11 + $0x8c8] sm:$0xff]  ;;  %v532_v14 = vld [vmem:[%s12184_s11 + $0x8d0] sm:$0xff] }
  0x56   : > { %529 = vst [vmem:[%s12189_s12 + $0x460] sm:$0xff] %v528_v12  ;;  %v534_v15 = vld [vmem:[%s12184_s11 + $0x8d8] sm:$0xff]  ;;  %531 = vst [vmem:[%s12189_s12 + $0x468] sm:$0xff] %v530_v13  ;;  %v536_v16 = vld [vmem:[%s12184_s11 + $0x900] sm:$0xff] }
  0x57   : > { %533 = vst [vmem:[%s12189_s12 + $0x470] sm:$0xff] %v532_v14  ;;  %535 = vst [vmem:[%s12189_s12 + $0x478] sm:$0xff] %v534_v15  ;;  %v538_v17 = vld [vmem:[%s12184_s11 + $0x908] sm:$0xff]  ;;  %v540_v18 = vld [vmem:[%s12184_s11 + $0x910] sm:$0xff] }
  0x58   : > { %537 = vst [vmem:[%s12189_s12 + $0x480] sm:$0xff] %v536_v16  ;;  %539 = vst [vmem:[%s12189_s12 + $0x488] sm:$0xff] %v538_v17  ;;  %v542_v19 = vld [vmem:[%s12184_s11 + $0x918] sm:$0xff]  ;;  %v544_v20 = vld [vmem:[%s12184_s11 + $0x940] sm:$0xff] }
  0x59   : > { %541 = vst [vmem:[%s12189_s12 + $0x490] sm:$0xff] %v540_v18  ;;  %v546_v21 = vld [vmem:[%s12184_s11 + $0x948] sm:$0xff]  ;;  %543 = vst [vmem:[%s12189_s12 + $0x498] sm:$0xff] %v542_v19  ;;  %v548_v22 = vld [vmem:[%s12184_s11 + $0x950] sm:$0xff] }
  0x5a   : > { %545 = vst [vmem:[%s12189_s12 + $0x4a0] sm:$0xff] %v544_v20  ;;  %547 = vst [vmem:[%s12189_s12 + $0x4a8] sm:$0xff] %v546_v21  ;;  %v550_v23 = vld [vmem:[%s12184_s11 + $0x958] sm:$0xff]  ;;  %v552_v24 = vld [vmem:[%s12184_s11 + $0x980] sm:$0xff] }
  0x5b   : > { %549 = vst [vmem:[%s12189_s12 + $0x4b0] sm:$0xff] %v548_v22  ;;  %551 = vst [vmem:[%s12189_s12 + $0x4b8] sm:$0xff] %v550_v23  ;;  %v554_v25 = vld [vmem:[%s12184_s11 + $0x988] sm:$0xff]  ;;  %v556_v26 = vld [vmem:[%s12184_s11 + $0x990] sm:$0xff] }
  0x5c   : > { %553 = vst [vmem:[%s12189_s12 + $0x4c0] sm:$0xff] %v552_v24  ;;  %v558_v27 = vld [vmem:[%s12184_s11 + $0x998] sm:$0xff]  ;;  %555 = vst [vmem:[%s12189_s12 + $0x4c8] sm:$0xff] %v554_v25  ;;  %v560_v28 = vld [vmem:[%s12184_s11 + $0x9c0] sm:$0xff] }
  0x5d   : > { %557 = vst [vmem:[%s12189_s12 + $0x4d0] sm:$0xff] %v556_v26  ;;  %559 = vst [vmem:[%s12189_s12 + $0x4d8] sm:$0xff] %v558_v27  ;;  %v562_v29 = vld [vmem:[%s12184_s11 + $0x9c8] sm:$0xff]  ;;  %v564_v30 = vld [vmem:[%s12184_s11 + $0x9d0] sm:$0xff] }
  0x5e   : > { %561 = vst [vmem:[%s12189_s12 + $0x4e0] sm:$0xff] %v560_v28  ;;  %563 = vst [vmem:[%s12189_s12 + $0x4e8] sm:$0xff] %v562_v29  ;;  %v566_v31 = vld [vmem:[%s12184_s11 + $0x9d8] sm:$0xff]  ;;  %v568_v32 = vld [vmem:[%s12184_s11 + $0xa00] sm:$0xff] }
  0x5f   : > { %565 = vst [vmem:[%s12189_s12 + $0x4f0] sm:$0xff] %v564_v30  ;;  %v570_v33 = vld [vmem:[%s12184_s11 + $0xa08] sm:$0xff]  ;;  %567 = vst [vmem:[%s12189_s12 + $0x4f8] sm:$0xff] %v566_v31  ;;  %v572_v34 = vld [vmem:[%s12184_s11 + $0xa10] sm:$0xff] }
  0x60   : > { %569 = vst [vmem:[%s12189_s12 + $0x500] sm:$0xff] %v568_v32  ;;  %571 = vst [vmem:[%s12189_s12 + $0x508] sm:$0xff] %v570_v33  ;;  %v574_v35 = vld [vmem:[%s12184_s11 + $0xa18] sm:$0xff]  ;;  %v576_v36 = vld [vmem:[%s12184_s11 + $0xa40] sm:$0xff] }
  0x61   : > { %573 = vst [vmem:[%s12189_s12 + $0x510] sm:$0xff] %v572_v34  ;;  %575 = vst [vmem:[%s12189_s12 + $0x518] sm:$0xff] %v574_v35  ;;  %v578_v37 = vld [vmem:[%s12184_s11 + $0xa48] sm:$0xff]  ;;  %v580_v38 = vld [vmem:[%s12184_s11 + $0xa50] sm:$0xff] }
  0x62   : > { %577 = vst [vmem:[%s12189_s12 + $0x520] sm:$0xff] %v576_v36  ;;  %v582_v39 = vld [vmem:[%s12184_s11 + $0xa58] sm:$0xff]  ;;  %579 = vst [vmem:[%s12189_s12 + $0x528] sm:$0xff] %v578_v37  ;;  %v584_v40 = vld [vmem:[%s12184_s11 + $0xa80] sm:$0xff] }
  0x63   : > { %581 = vst [vmem:[%s12189_s12 + $0x530] sm:$0xff] %v580_v38  ;;  %583 = vst [vmem:[%s12189_s12 + $0x538] sm:$0xff] %v582_v39  ;;  %v586_v41 = vld [vmem:[%s12184_s11 + $0xa88] sm:$0xff]  ;;  %v588_v42 = vld [vmem:[%s12184_s11 + $0xa90] sm:$0xff] }
  0x64   : > { %585 = vst [vmem:[%s12189_s12 + $0x540] sm:$0xff] %v584_v40  ;;  %587 = vst [vmem:[%s12189_s12 + $0x548] sm:$0xff] %v586_v41  ;;  %v590_v43 = vld [vmem:[%s12184_s11 + $0xa98] sm:$0xff]  ;;  %v592_v44 = vld [vmem:[%s12184_s11 + $0xac0] sm:$0xff] }
  0x65   : > { %589 = vst [vmem:[%s12189_s12 + $0x550] sm:$0xff] %v588_v42  ;;  %v594_v45 = vld [vmem:[%s12184_s11 + $0xac8] sm:$0xff]  ;;  %591 = vst [vmem:[%s12189_s12 + $0x558] sm:$0xff] %v590_v43  ;;  %v596_v46 = vld [vmem:[%s12184_s11 + $0xad0] sm:$0xff] }
  0x66   : > { %593 = vst [vmem:[%s12189_s12 + $0x560] sm:$0xff] %v592_v44  ;;  %595 = vst [vmem:[%s12189_s12 + $0x568] sm:$0xff] %v594_v45  ;;  %v598_v47 = vld [vmem:[%s12184_s11 + $0xad8] sm:$0xff]  ;;  %v600_v48 = vld [vmem:[%s12184_s11 + $0xb00] sm:$0xff] }
  0x67   : > { %597 = vst [vmem:[%s12189_s12 + $0x570] sm:$0xff] %v596_v46  ;;  %599 = vst [vmem:[%s12189_s12 + $0x578] sm:$0xff] %v598_v47  ;;  %v602_v49 = vld [vmem:[%s12184_s11 + $0xb08] sm:$0xff]  ;;  %v604_v50 = vld [vmem:[%s12184_s11 + $0xb10] sm:$0xff] }
  0x68   : > { %601 = vst [vmem:[%s12189_s12 + $0x580] sm:$0xff] %v600_v48  ;;  %v606_v51 = vld [vmem:[%s12184_s11 + $0xb18] sm:$0xff]  ;;  %603 = vst [vmem:[%s12189_s12 + $0x588] sm:$0xff] %v602_v49  ;;  %v608_v52 = vld [vmem:[%s12184_s11 + $0xb40] sm:$0xff] }
  0x69   : > { %605 = vst [vmem:[%s12189_s12 + $0x590] sm:$0xff] %v604_v50  ;;  %607 = vst [vmem:[%s12189_s12 + $0x598] sm:$0xff] %v606_v51  ;;  %v610_v53 = vld [vmem:[%s12184_s11 + $0xb48] sm:$0xff]  ;;  %v612_v54 = vld [vmem:[%s12184_s11 + $0xb50] sm:$0xff] }
  0x6a   : > { %609 = vst [vmem:[%s12189_s12 + $0x5a0] sm:$0xff] %v608_v52  ;;  %611 = vst [vmem:[%s12189_s12 + $0x5a8] sm:$0xff] %v610_v53  ;;  %v614_v55 = vld [vmem:[%s12184_s11 + $0xb58] sm:$0xff]  ;;  %v616_v56 = vld [vmem:[%s12184_s11 + $0xb80] sm:$0xff] }
  0x6b   : > { %613 = vst [vmem:[%s12189_s12 + $0x5b0] sm:$0xff] %v612_v54  ;;  %v618_v57 = vld [vmem:[%s12184_s11 + $0xb88] sm:$0xff]  ;;  %615 = vst [vmem:[%s12189_s12 + $0x5b8] sm:$0xff] %v614_v55  ;;  %v620_v58 = vld [vmem:[%s12184_s11 + $0xb90] sm:$0xff] }
  0x6c   : > { %617 = vst [vmem:[%s12189_s12 + $0x5c0] sm:$0xff] %v616_v56  ;;  %619 = vst [vmem:[%s12189_s12 + $0x5c8] sm:$0xff] %v618_v57  ;;  %v622_v59 = vld [vmem:[%s12184_s11 + $0xb98] sm:$0xff]  ;;  %v624_v60 = vld [vmem:[%s12184_s11 + $0xbc0] sm:$0xff] }
  0x6d   : > { %621 = vst [vmem:[%s12189_s12 + $0x5d0] sm:$0xff] %v620_v58  ;;  %623 = vst [vmem:[%s12189_s12 + $0x5d8] sm:$0xff] %v622_v59  ;;  %v626_v61 = vld [vmem:[%s12184_s11 + $0xbc8] sm:$0xff]  ;;  %v628_v62 = vld [vmem:[%s12184_s11 + $0xbd0] sm:$0xff] }
  0x6e   : > { %625 = vst [vmem:[%s12189_s12 + $0x5e0] sm:$0xff] %v624_v60  ;;  %v630_v63 = vld [vmem:[%s12184_s11 + $0xbd8] sm:$0xff]  ;;  %627 = vst [vmem:[%s12189_s12 + $0x5e8] sm:$0xff] %v626_v61  ;;  %v632_v0 = vld [vmem:[%s12184_s11 + $0xc00] sm:$0xff] }
  0x6f   : > { %629 = vst [vmem:[%s12189_s12 + $0x5f0] sm:$0xff] %v628_v62  ;;  %631 = vst [vmem:[%s12189_s12 + $0x5f8] sm:$0xff] %v630_v63  ;;  %v634_v1 = vld [vmem:[%s12184_s11 + $0xc08] sm:$0xff]  ;;  %v636_v2 = vld [vmem:[%s12184_s11 + $0xc10] sm:$0xff] }
  0x70   : > { %633 = vst [vmem:[%s12189_s12 + $0x600] sm:$0xff] %v632_v0  ;;  %635 = vst [vmem:[%s12189_s12 + $0x608] sm:$0xff] %v634_v1  ;;  %v638_v3 = vld [vmem:[%s12184_s11 + $0xc18] sm:$0xff]  ;;  %v640_v4 = vld [vmem:[%s12184_s11 + $0xc40] sm:$0xff] }
  0x71   : > { %637 = vst [vmem:[%s12189_s12 + $0x610] sm:$0xff] %v636_v2  ;;  %v642_v5 = vld [vmem:[%s12184_s11 + $0xc48] sm:$0xff]  ;;  %639 = vst [vmem:[%s12189_s12 + $0x618] sm:$0xff] %v638_v3  ;;  %v644_v6 = vld [vmem:[%s12184_s11 + $0xc50] sm:$0xff] }
  0x72   : > { %641 = vst [vmem:[%s12189_s12 + $0x620] sm:$0xff] %v640_v4  ;;  %643 = vst [vmem:[%s12189_s12 + $0x628] sm:$0xff] %v642_v5  ;;  %v646_v7 = vld [vmem:[%s12184_s11 + $0xc58] sm:$0xff]  ;;  %v648_v8 = vld [vmem:[%s12184_s11 + $0xc80] sm:$0xff] }
  0x73   : > { %645 = vst [vmem:[%s12189_s12 + $0x630] sm:$0xff] %v644_v6  ;;  %647 = vst [vmem:[%s12189_s12 + $0x638] sm:$0xff] %v646_v7  ;;  %v650_v9 = vld [vmem:[%s12184_s11 + $0xc88] sm:$0xff]  ;;  %v652_v10 = vld [vmem:[%s12184_s11 + $0xc90] sm:$0xff] }
  0x74   : > { %649 = vst [vmem:[%s12189_s12 + $0x640] sm:$0xff] %v648_v8  ;;  %v654_v11 = vld [vmem:[%s12184_s11 + $0xc98] sm:$0xff]  ;;  %651 = vst [vmem:[%s12189_s12 + $0x648] sm:$0xff] %v650_v9  ;;  %v656_v12 = vld [vmem:[%s12184_s11 + $0xcc0] sm:$0xff] }
  0x75   : > { %653 = vst [vmem:[%s12189_s12 + $0x650] sm:$0xff] %v652_v10  ;;  %655 = vst [vmem:[%s12189_s12 + $0x658] sm:$0xff] %v654_v11  ;;  %v658_v13 = vld [vmem:[%s12184_s11 + $0xcc8] sm:$0xff]  ;;  %v660_v14 = vld [vmem:[%s12184_s11 + $0xcd0] sm:$0xff] }
  0x76   : > { %657 = vst [vmem:[%s12189_s12 + $0x660] sm:$0xff] %v656_v12  ;;  %659 = vst [vmem:[%s12189_s12 + $0x668] sm:$0xff] %v658_v13  ;;  %v662_v15 = vld [vmem:[%s12184_s11 + $0xcd8] sm:$0xff]  ;;  %v664_v16 = vld [vmem:[%s12184_s11 + $0xd00] sm:$0xff] }
  0x77   : > { %661 = vst [vmem:[%s12189_s12 + $0x670] sm:$0xff] %v660_v14  ;;  %v666_v17 = vld [vmem:[%s12184_s11 + $0xd08] sm:$0xff]  ;;  %663 = vst [vmem:[%s12189_s12 + $0x678] sm:$0xff] %v662_v15  ;;  %v668_v18 = vld [vmem:[%s12184_s11 + $0xd10] sm:$0xff] }
  0x78   : > { %665 = vst [vmem:[%s12189_s12 + $0x680] sm:$0xff] %v664_v16  ;;  %667 = vst [vmem:[%s12189_s12 + $0x688] sm:$0xff] %v666_v17  ;;  %v670_v19 = vld [vmem:[%s12184_s11 + $0xd18] sm:$0xff]  ;;  %v672_v20 = vld [vmem:[%s12184_s11 + $0xd40] sm:$0xff] }
  0x79   : > { %669 = vst [vmem:[%s12189_s12 + $0x690] sm:$0xff] %v668_v18  ;;  %671 = vst [vmem:[%s12189_s12 + $0x698] sm:$0xff] %v670_v19  ;;  %v674_v21 = vld [vmem:[%s12184_s11 + $0xd48] sm:$0xff]  ;;  %v676_v22 = vld [vmem:[%s12184_s11 + $0xd50] sm:$0xff] }
  0x7a   : > { %673 = vst [vmem:[%s12189_s12 + $0x6a0] sm:$0xff] %v672_v20  ;;  %v678_v23 = vld [vmem:[%s12184_s11 + $0xd58] sm:$0xff]  ;;  %675 = vst [vmem:[%s12189_s12 + $0x6a8] sm:$0xff] %v674_v21  ;;  %v680_v24 = vld [vmem:[%s12184_s11 + $0xd80] sm:$0xff] }
  0x7b   : > { %677 = vst [vmem:[%s12189_s12 + $0x6b0] sm:$0xff] %v676_v22  ;;  %679 = vst [vmem:[%s12189_s12 + $0x6b8] sm:$0xff] %v678_v23  ;;  %v682_v25 = vld [vmem:[%s12184_s11 + $0xd88] sm:$0xff]  ;;  %v684_v26 = vld [vmem:[%s12184_s11 + $0xd90] sm:$0xff] }
  0x7c   : > { %681 = vst [vmem:[%s12189_s12 + $0x6c0] sm:$0xff] %v680_v24  ;;  %683 = vst [vmem:[%s12189_s12 + $0x6c8] sm:$0xff] %v682_v25  ;;  %v686_v27 = vld [vmem:[%s12184_s11 + $0xd98] sm:$0xff]  ;;  %v688_v28 = vld [vmem:[%s12184_s11 + $0xdc0] sm:$0xff] }
  0x7d   : > { %685 = vst [vmem:[%s12189_s12 + $0x6d0] sm:$0xff] %v684_v26  ;;  %v690_v29 = vld [vmem:[%s12184_s11 + $0xdc8] sm:$0xff]  ;;  %687 = vst [vmem:[%s12189_s12 + $0x6d8] sm:$0xff] %v686_v27  ;;  %v692_v30 = vld [vmem:[%s12184_s11 + $0xdd0] sm:$0xff] }
  0x7e   : > { %689 = vst [vmem:[%s12189_s12 + $0x6e0] sm:$0xff] %v688_v28  ;;  %691 = vst [vmem:[%s12189_s12 + $0x6e8] sm:$0xff] %v690_v29  ;;  %v694_v31 = vld [vmem:[%s12184_s11 + $0xdd8] sm:$0xff]  ;;  %v696_v32 = vld [vmem:[%s12184_s11 + $0xe00] sm:$0xff] }
  0x7f   : > { %693 = vst [vmem:[%s12189_s12 + $0x6f0] sm:$0xff] %v692_v30  ;;  %695 = vst [vmem:[%s12189_s12 + $0x6f8] sm:$0xff] %v694_v31  ;;  %v698_v33 = vld [vmem:[%s12184_s11 + $0xe08] sm:$0xff]  ;;  %v700_v34 = vld [vmem:[%s12184_s11 + $0xe10] sm:$0xff] }
  0x80   : > { %697 = vst [vmem:[%s12189_s12 + $0x700] sm:$0xff] %v696_v32  ;;  %v702_v35 = vld [vmem:[%s12184_s11 + $0xe18] sm:$0xff]  ;;  %699 = vst [vmem:[%s12189_s12 + $0x708] sm:$0xff] %v698_v33  ;;  %v704_v36 = vld [vmem:[%s12184_s11 + $0xe40] sm:$0xff] }
  0x81   : > { %701 = vst [vmem:[%s12189_s12 + $0x710] sm:$0xff] %v700_v34  ;;  %703 = vst [vmem:[%s12189_s12 + $0x718] sm:$0xff] %v702_v35  ;;  %v706_v37 = vld [vmem:[%s12184_s11 + $0xe48] sm:$0xff]  ;;  %v708_v38 = vld [vmem:[%s12184_s11 + $0xe50] sm:$0xff] }
  0x82   : > { %705 = vst [vmem:[%s12189_s12 + $0x720] sm:$0xff] %v704_v36  ;;  %707 = vst [vmem:[%s12189_s12 + $0x728] sm:$0xff] %v706_v37  ;;  %v710_v39 = vld [vmem:[%s12184_s11 + $0xe58] sm:$0xff]  ;;  %v712_v40 = vld [vmem:[%s12184_s11 + $0xe80] sm:$0xff] }
  0x83   : > { %709 = vst [vmem:[%s12189_s12 + $0x730] sm:$0xff] %v708_v38  ;;  %v714_v41 = vld [vmem:[%s12184_s11 + $0xe88] sm:$0xff]  ;;  %711 = vst [vmem:[%s12189_s12 + $0x738] sm:$0xff] %v710_v39  ;;  %v716_v42 = vld [vmem:[%s12184_s11 + $0xe90] sm:$0xff] }
  0x84   : > { %713 = vst [vmem:[%s12189_s12 + $0x740] sm:$0xff] %v712_v40  ;;  %715 = vst [vmem:[%s12189_s12 + $0x748] sm:$0xff] %v714_v41  ;;  %v718_v43 = vld [vmem:[%s12184_s11 + $0xe98] sm:$0xff]  ;;  %v720_v44 = vld [vmem:[%s12184_s11 + $0xec0] sm:$0xff] }
  0x85   : > { %717 = vst [vmem:[%s12189_s12 + $0x750] sm:$0xff] %v716_v42  ;;  %719 = vst [vmem:[%s12189_s12 + $0x758] sm:$0xff] %v718_v43  ;;  %v722_v45 = vld [vmem:[%s12184_s11 + $0xec8] sm:$0xff]  ;;  %v724_v46 = vld [vmem:[%s12184_s11 + $0xed0] sm:$0xff] }
  0x86   : > { %721 = vst [vmem:[%s12189_s12 + $0x760] sm:$0xff] %v720_v44  ;;  %v726_v47 = vld [vmem:[%s12184_s11 + $0xed8] sm:$0xff]  ;;  %723 = vst [vmem:[%s12189_s12 + $0x768] sm:$0xff] %v722_v45  ;;  %v728_v48 = vld [vmem:[%s12184_s11 + $0xf00] sm:$0xff] }
  0x87   : > { %725 = vst [vmem:[%s12189_s12 + $0x770] sm:$0xff] %v724_v46  ;;  %727 = vst [vmem:[%s12189_s12 + $0x778] sm:$0xff] %v726_v47  ;;  %v730_v49 = vld [vmem:[%s12184_s11 + $0xf08] sm:$0xff]  ;;  %v732_v50 = vld [vmem:[%s12184_s11 + $0xf10] sm:$0xff] }
  0x88   : > { %729 = vst [vmem:[%s12189_s12 + $0x780] sm:$0xff] %v728_v48  ;;  %731 = vst [vmem:[%s12189_s12 + $0x788] sm:$0xff] %v730_v49  ;;  %v734_v51 = vld [vmem:[%s12184_s11 + $0xf18] sm:$0xff]  ;;  %v736_v52 = vld [vmem:[%s12184_s11 + $0xf40] sm:$0xff] }
  0x89   : > { %733 = vst [vmem:[%s12189_s12 + $0x790] sm:$0xff] %v732_v50  ;;  %v738_v53 = vld [vmem:[%s12184_s11 + $0xf48] sm:$0xff]  ;;  %735 = vst [vmem:[%s12189_s12 + $0x798] sm:$0xff] %v734_v51  ;;  %v740_v54 = vld [vmem:[%s12184_s11 + $0xf50] sm:$0xff] }
  0x8a   : > { %737 = vst [vmem:[%s12189_s12 + $0x7a0] sm:$0xff] %v736_v52  ;;  %739 = vst [vmem:[%s12189_s12 + $0x7a8] sm:$0xff] %v738_v53  ;;  %v742_v55 = vld [vmem:[%s12184_s11 + $0xf58] sm:$0xff]  ;;  %v744_v56 = vld [vmem:[%s12184_s11 + $0xf80] sm:$0xff] }
  0x8b   : > { %741 = vst [vmem:[%s12189_s12 + $0x7b0] sm:$0xff] %v740_v54  ;;  %743 = vst [vmem:[%s12189_s12 + $0x7b8] sm:$0xff] %v742_v55  ;;  %v746_v57 = vld [vmem:[%s12184_s11 + $0xf88] sm:$0xff]  ;;  %v748_v58 = vld [vmem:[%s12184_s11 + $0xf90] sm:$0xff] }
  0x8c   : > { %745 = vst [vmem:[%s12189_s12 + $0x7c0] sm:$0xff] %v744_v56  ;;  %v750_v59 = vld [vmem:[%s12184_s11 + $0xf98] sm:$0xff]  ;;  %747 = vst [vmem:[%s12189_s12 + $0x7c8] sm:$0xff] %v746_v57  ;;  %v752_v60 = vld [vmem:[%s12184_s11 + $0xfc0] sm:$0xff] }
  0x8d   : > { %749 = vst [vmem:[%s12189_s12 + $0x7d0] sm:$0xff] %v748_v58  ;;  %751 = vst [vmem:[%s12189_s12 + $0x7d8] sm:$0xff] %v750_v59  ;;  %v754_v61 = vld [vmem:[%s12184_s11 + $0xfc8] sm:$0xff]  ;;  %v756_v62 = vld [vmem:[%s12184_s11 + $0xfd0] sm:$0xff] }
  0x8e   : > { %753 = vst [vmem:[%s12189_s12 + $0x7e0] sm:$0xff] %v752_v60  ;;  %755 = vst [vmem:[%s12189_s12 + $0x7e8] sm:$0xff] %v754_v61  ;;  %v758_v63 = vld [vmem:[%s12184_s11 + $0xfd8] sm:$0xff]  ;;  %v760_v0 = vld [vmem:[%s12184_s11 + $0x1000] sm:$0xff] }
  0x8f   : > { %757 = vst [vmem:[%s12189_s12 + $0x7f0] sm:$0xff] %v756_v62  ;;  %v762_v1 = vld [vmem:[%s12184_s11 + $0x1008] sm:$0xff]  ;;  %759 = vst [vmem:[%s12189_s12 + $0x7f8] sm:$0xff] %v758_v63  ;;  %v764_v2 = vld [vmem:[%s12184_s11 + $0x1010] sm:$0xff] }
  0x90   : > { %761 = vst [vmem:[%s12189_s12 + $0x800] sm:$0xff] %v760_v0  ;;  %763 = vst [vmem:[%s12189_s12 + $0x808] sm:$0xff] %v762_v1  ;;  %v766_v3 = vld [vmem:[%s12184_s11 + $0x1018] sm:$0xff]  ;;  %v768_v4 = vld [vmem:[%s12184_s11 + $0x1040] sm:$0xff] }
  0x91   : > { %765 = vst [vmem:[%s12189_s12 + $0x810] sm:$0xff] %v764_v2  ;;  %767 = vst [vmem:[%s12189_s12 + $0x818] sm:$0xff] %v766_v3  ;;  %v770_v5 = vld [vmem:[%s12184_s11 + $0x1048] sm:$0xff]  ;;  %v772_v6 = vld [vmem:[%s12184_s11 + $0x1050] sm:$0xff] }
  0x92   : > { %769 = vst [vmem:[%s12189_s12 + $0x820] sm:$0xff] %v768_v4  ;;  %v774_v7 = vld [vmem:[%s12184_s11 + $0x1058] sm:$0xff]  ;;  %771 = vst [vmem:[%s12189_s12 + $0x828] sm:$0xff] %v770_v5  ;;  %v776_v8 = vld [vmem:[%s12184_s11 + $0x1080] sm:$0xff] }
  0x93   : > { %773 = vst [vmem:[%s12189_s12 + $0x830] sm:$0xff] %v772_v6  ;;  %775 = vst [vmem:[%s12189_s12 + $0x838] sm:$0xff] %v774_v7  ;;  %v778_v9 = vld [vmem:[%s12184_s11 + $0x1088] sm:$0xff]  ;;  %v780_v10 = vld [vmem:[%s12184_s11 + $0x1090] sm:$0xff] }
  0x94   : > { %777 = vst [vmem:[%s12189_s12 + $0x840] sm:$0xff] %v776_v8  ;;  %779 = vst [vmem:[%s12189_s12 + $0x848] sm:$0xff] %v778_v9  ;;  %v782_v11 = vld [vmem:[%s12184_s11 + $0x1098] sm:$0xff]  ;;  %v784_v12 = vld [vmem:[%s12184_s11 + $0x10c0] sm:$0xff] }
  0x95   : > { %781 = vst [vmem:[%s12189_s12 + $0x850] sm:$0xff] %v780_v10  ;;  %v786_v13 = vld [vmem:[%s12184_s11 + $0x10c8] sm:$0xff]  ;;  %783 = vst [vmem:[%s12189_s12 + $0x858] sm:$0xff] %v782_v11  ;;  %v788_v14 = vld [vmem:[%s12184_s11 + $0x10d0] sm:$0xff] }
  0x96   : > { %785 = vst [vmem:[%s12189_s12 + $0x860] sm:$0xff] %v784_v12  ;;  %787 = vst [vmem:[%s12189_s12 + $0x868] sm:$0xff] %v786_v13  ;;  %v790_v15 = vld [vmem:[%s12184_s11 + $0x10d8] sm:$0xff]  ;;  %v792_v16 = vld [vmem:[%s12184_s11 + $0x1100] sm:$0xff] }
  0x97   : > { %789 = vst [vmem:[%s12189_s12 + $0x870] sm:$0xff] %v788_v14  ;;  %791 = vst [vmem:[%s12189_s12 + $0x878] sm:$0xff] %v790_v15  ;;  %v794_v17 = vld [vmem:[%s12184_s11 + $0x1108] sm:$0xff]  ;;  %v796_v18 = vld [vmem:[%s12184_s11 + $0x1110] sm:$0xff] }
  0x98   : > { %793 = vst [vmem:[%s12189_s12 + $0x880] sm:$0xff] %v792_v16  ;;  %v798_v19 = vld [vmem:[%s12184_s11 + $0x1118] sm:$0xff]  ;;  %795 = vst [vmem:[%s12189_s12 + $0x888] sm:$0xff] %v794_v17  ;;  %v800_v20 = vld [vmem:[%s12184_s11 + $0x1140] sm:$0xff] }
  0x99   : > { %797 = vst [vmem:[%s12189_s12 + $0x890] sm:$0xff] %v796_v18  ;;  %799 = vst [vmem:[%s12189_s12 + $0x898] sm:$0xff] %v798_v19  ;;  %v802_v21 = vld [vmem:[%s12184_s11 + $0x1148] sm:$0xff]  ;;  %v804_v22 = vld [vmem:[%s12184_s11 + $0x1150] sm:$0xff] }
  0x9a   : > { %801 = vst [vmem:[%s12189_s12 + $0x8a0] sm:$0xff] %v800_v20  ;;  %803 = vst [vmem:[%s12189_s12 + $0x8a8] sm:$0xff] %v802_v21  ;;  %v806_v23 = vld [vmem:[%s12184_s11 + $0x1158] sm:$0xff]  ;;  %v808_v24 = vld [vmem:[%s12184_s11 + $0x1180] sm:$0xff] }
  0x9b   : > { %805 = vst [vmem:[%s12189_s12 + $0x8b0] sm:$0xff] %v804_v22  ;;  %v810_v25 = vld [vmem:[%s12184_s11 + $0x1188] sm:$0xff]  ;;  %807 = vst [vmem:[%s12189_s12 + $0x8b8] sm:$0xff] %v806_v23  ;;  %v812_v26 = vld [vmem:[%s12184_s11 + $0x1190] sm:$0xff] }
  0x9c   : > { %809 = vst [vmem:[%s12189_s12 + $0x8c0] sm:$0xff] %v808_v24  ;;  %811 = vst [vmem:[%s12189_s12 + $0x8c8] sm:$0xff] %v810_v25  ;;  %v814_v27 = vld [vmem:[%s12184_s11 + $0x1198] sm:$0xff]  ;;  %v816_v28 = vld [vmem:[%s12184_s11 + $0x11c0] sm:$0xff] }
  0x9d   : > { %813 = vst [vmem:[%s12189_s12 + $0x8d0] sm:$0xff] %v812_v26  ;;  %815 = vst [vmem:[%s12189_s12 + $0x8d8] sm:$0xff] %v814_v27  ;;  %v818_v29 = vld [vmem:[%s12184_s11 + $0x11c8] sm:$0xff]  ;;  %v820_v30 = vld [vmem:[%s12184_s11 + $0x11d0] sm:$0xff] }
  0x9e   : > { %817 = vst [vmem:[%s12189_s12 + $0x8e0] sm:$0xff] %v816_v28  ;;  %v822_v31 = vld [vmem:[%s12184_s11 + $0x11d8] sm:$0xff]  ;;  %819 = vst [vmem:[%s12189_s12 + $0x8e8] sm:$0xff] %v818_v29  ;;  %v824_v32 = vld [vmem:[%s12184_s11 + $0x1200] sm:$0xff] }
  0x9f   : > { %821 = vst [vmem:[%s12189_s12 + $0x8f0] sm:$0xff] %v820_v30  ;;  %823 = vst [vmem:[%s12189_s12 + $0x8f8] sm:$0xff] %v822_v31  ;;  %v826_v33 = vld [vmem:[%s12184_s11 + $0x1208] sm:$0xff]  ;;  %v828_v34 = vld [vmem:[%s12184_s11 + $0x1210] sm:$0xff] }
  0xa0   : > { %825 = vst [vmem:[%s12189_s12 + $0x900] sm:$0xff] %v824_v32  ;;  %827 = vst [vmem:[%s12189_s12 + $0x908] sm:$0xff] %v826_v33  ;;  %v830_v35 = vld [vmem:[%s12184_s11 + $0x1218] sm:$0xff]  ;;  %v832_v36 = vld [vmem:[%s12184_s11 + $0x1240] sm:$0xff] }
  0xa1   : > { %829 = vst [vmem:[%s12189_s12 + $0x910] sm:$0xff] %v828_v34  ;;  %v834_v37 = vld [vmem:[%s12184_s11 + $0x1248] sm:$0xff]  ;;  %831 = vst [vmem:[%s12189_s12 + $0x918] sm:$0xff] %v830_v35  ;;  %v836_v38 = vld [vmem:[%s12184_s11 + $0x1250] sm:$0xff] }
  0xa2   : > { %833 = vst [vmem:[%s12189_s12 + $0x920] sm:$0xff] %v832_v36  ;;  %835 = vst [vmem:[%s12189_s12 + $0x928] sm:$0xff] %v834_v37  ;;  %v838_v39 = vld [vmem:[%s12184_s11 + $0x1258] sm:$0xff]  ;;  %v840_v40 = vld [vmem:[%s12184_s11 + $0x1280] sm:$0xff] }
  0xa3   : > { %837 = vst [vmem:[%s12189_s12 + $0x930] sm:$0xff] %v836_v38  ;;  %839 = vst [vmem:[%s12189_s12 + $0x938] sm:$0xff] %v838_v39  ;;  %v842_v41 = vld [vmem:[%s12184_s11 + $0x1288] sm:$0xff]  ;;  %v844_v42 = vld [vmem:[%s12184_s11 + $0x1290] sm:$0xff] }
  0xa4   : > { %841 = vst [vmem:[%s12189_s12 + $0x940] sm:$0xff] %v840_v40  ;;  %v846_v43 = vld [vmem:[%s12184_s11 + $0x1298] sm:$0xff]  ;;  %843 = vst [vmem:[%s12189_s12 + $0x948] sm:$0xff] %v842_v41  ;;  %v848_v44 = vld [vmem:[%s12184_s11 + $0x12c0] sm:$0xff] }
  0xa5   : > { %845 = vst [vmem:[%s12189_s12 + $0x950] sm:$0xff] %v844_v42  ;;  %847 = vst [vmem:[%s12189_s12 + $0x958] sm:$0xff] %v846_v43  ;;  %v850_v45 = vld [vmem:[%s12184_s11 + $0x12c8] sm:$0xff]  ;;  %v852_v46 = vld [vmem:[%s12184_s11 + $0x12d0] sm:$0xff] }
  0xa6   : > { %849 = vst [vmem:[%s12189_s12 + $0x960] sm:$0xff] %v848_v44  ;;  %851 = vst [vmem:[%s12189_s12 + $0x968] sm:$0xff] %v850_v45  ;;  %v854_v47 = vld [vmem:[%s12184_s11 + $0x12d8] sm:$0xff]  ;;  %v856_v48 = vld [vmem:[%s12184_s11 + $0x1300] sm:$0xff] }
  0xa7   : > { %853 = vst [vmem:[%s12189_s12 + $0x970] sm:$0xff] %v852_v46  ;;  %v858_v49 = vld [vmem:[%s12184_s11 + $0x1308] sm:$0xff]  ;;  %855 = vst [vmem:[%s12189_s12 + $0x978] sm:$0xff] %v854_v47  ;;  %v860_v50 = vld [vmem:[%s12184_s11 + $0x1310] sm:$0xff] }
  0xa8   : > { %857 = vst [vmem:[%s12189_s12 + $0x980] sm:$0xff] %v856_v48  ;;  %859 = vst [vmem:[%s12189_s12 + $0x988] sm:$0xff] %v858_v49  ;;  %v862_v51 = vld [vmem:[%s12184_s11 + $0x1318] sm:$0xff]  ;;  %v864_v52 = vld [vmem:[%s12184_s11 + $0x1340] sm:$0xff] }
  0xa9   : > { %861 = vst [vmem:[%s12189_s12 + $0x990] sm:$0xff] %v860_v50  ;;  %863 = vst [vmem:[%s12189_s12 + $0x998] sm:$0xff] %v862_v51  ;;  %v866_v53 = vld [vmem:[%s12184_s11 + $0x1348] sm:$0xff]  ;;  %v868_v54 = vld [vmem:[%s12184_s11 + $0x1350] sm:$0xff] }
  0xaa   : > { %865 = vst [vmem:[%s12189_s12 + $0x9a0] sm:$0xff] %v864_v52  ;;  %v870_v55 = vld [vmem:[%s12184_s11 + $0x1358] sm:$0xff]  ;;  %867 = vst [vmem:[%s12189_s12 + $0x9a8] sm:$0xff] %v866_v53  ;;  %v872_v56 = vld [vmem:[%s12184_s11 + $0x1380] sm:$0xff] }
  0xab   : > { %869 = vst [vmem:[%s12189_s12 + $0x9b0] sm:$0xff] %v868_v54  ;;  %871 = vst [vmem:[%s12189_s12 + $0x9b8] sm:$0xff] %v870_v55  ;;  %v874_v57 = vld [vmem:[%s12184_s11 + $0x1388] sm:$0xff]  ;;  %v876_v58 = vld [vmem:[%s12184_s11 + $0x1390] sm:$0xff] }
  0xac   : > { %873 = vst [vmem:[%s12189_s12 + $0x9c0] sm:$0xff] %v872_v56  ;;  %875 = vst [vmem:[%s12189_s12 + $0x9c8] sm:$0xff] %v874_v57  ;;  %v878_v59 = vld [vmem:[%s12184_s11 + $0x1398] sm:$0xff]  ;;  %v880_v60 = vld [vmem:[%s12184_s11 + $0x13c0] sm:$0xff] }
  0xad   : > { %877 = vst [vmem:[%s12189_s12 + $0x9d0] sm:$0xff] %v876_v58  ;;  %v882_v61 = vld [vmem:[%s12184_s11 + $0x13c8] sm:$0xff]  ;;  %879 = vst [vmem:[%s12189_s12 + $0x9d8] sm:$0xff] %v878_v59  ;;  %v884_v62 = vld [vmem:[%s12184_s11 + $0x13d0] sm:$0xff] }
  0xae   : > { %881 = vst [vmem:[%s12189_s12 + $0x9e0] sm:$0xff] %v880_v60  ;;  %883 = vst [vmem:[%s12189_s12 + $0x9e8] sm:$0xff] %v882_v61  ;;  %v886_v63 = vld [vmem:[%s12184_s11 + $0x13d8] sm:$0xff]  ;;  %v888_v0 = vld [vmem:[%s12184_s11 + $0x1400] sm:$0xff] }
  0xaf   : > { %885 = vst [vmem:[%s12189_s12 + $0x9f0] sm:$0xff] %v884_v62  ;;  %887 = vst [vmem:[%s12189_s12 + $0x9f8] sm:$0xff] %v886_v63  ;;  %v890_v1 = vld [vmem:[%s12184_s11 + $0x1408] sm:$0xff]  ;;  %v892_v2 = vld [vmem:[%s12184_s11 + $0x1410] sm:$0xff] }
  0xb0   : > { %889 = vst [vmem:[%s12189_s12 + $0xa00] sm:$0xff] %v888_v0  ;;  %v894_v3 = vld [vmem:[%s12184_s11 + $0x1418] sm:$0xff]  ;;  %891 = vst [vmem:[%s12189_s12 + $0xa08] sm:$0xff] %v890_v1  ;;  %v896_v4 = vld [vmem:[%s12184_s11 + $0x1440] sm:$0xff] }
  0xb1   : > { %893 = vst [vmem:[%s12189_s12 + $0xa10] sm:$0xff] %v892_v2  ;;  %895 = vst [vmem:[%s12189_s12 + $0xa18] sm:$0xff] %v894_v3  ;;  %v898_v5 = vld [vmem:[%s12184_s11 + $0x1448] sm:$0xff]  ;;  %v900_v6 = vld [vmem:[%s12184_s11 + $0x1450] sm:$0xff] }
  0xb2   : > { %897 = vst [vmem:[%s12189_s12 + $0xa20] sm:$0xff] %v896_v4  ;;  %899 = vst [vmem:[%s12189_s12 + $0xa28] sm:$0xff] %v898_v5  ;;  %v902_v7 = vld [vmem:[%s12184_s11 + $0x1458] sm:$0xff]  ;;  %v904_v8 = vld [vmem:[%s12184_s11 + $0x1480] sm:$0xff] }
  0xb3   : > { %901 = vst [vmem:[%s12189_s12 + $0xa30] sm:$0xff] %v900_v6  ;;  %v906_v9 = vld [vmem:[%s12184_s11 + $0x1488] sm:$0xff]  ;;  %903 = vst [vmem:[%s12189_s12 + $0xa38] sm:$0xff] %v902_v7  ;;  %v908_v10 = vld [vmem:[%s12184_s11 + $0x1490] sm:$0xff] }
  0xb4   : > { %905 = vst [vmem:[%s12189_s12 + $0xa40] sm:$0xff] %v904_v8  ;;  %907 = vst [vmem:[%s12189_s12 + $0xa48] sm:$0xff] %v906_v9  ;;  %v910_v11 = vld [vmem:[%s12184_s11 + $0x1498] sm:$0xff]  ;;  %v912_v12 = vld [vmem:[%s12184_s11 + $0x14c0] sm:$0xff] }
  0xb5   : > { %909 = vst [vmem:[%s12189_s12 + $0xa50] sm:$0xff] %v908_v10  ;;  %911 = vst [vmem:[%s12189_s12 + $0xa58] sm:$0xff] %v910_v11  ;;  %v914_v13 = vld [vmem:[%s12184_s11 + $0x14c8] sm:$0xff]  ;;  %v916_v14 = vld [vmem:[%s12184_s11 + $0x14d0] sm:$0xff] }
  0xb6   : > { %913 = vst [vmem:[%s12189_s12 + $0xa60] sm:$0xff] %v912_v12  ;;  %v918_v15 = vld [vmem:[%s12184_s11 + $0x14d8] sm:$0xff]  ;;  %915 = vst [vmem:[%s12189_s12 + $0xa68] sm:$0xff] %v914_v13  ;;  %v920_v16 = vld [vmem:[%s12184_s11 + $0x1500] sm:$0xff] }
  0xb7   : > { %917 = vst [vmem:[%s12189_s12 + $0xa70] sm:$0xff] %v916_v14  ;;  %919 = vst [vmem:[%s12189_s12 + $0xa78] sm:$0xff] %v918_v15  ;;  %v922_v17 = vld [vmem:[%s12184_s11 + $0x1508] sm:$0xff]  ;;  %v924_v18 = vld [vmem:[%s12184_s11 + $0x1510] sm:$0xff] }
  0xb8   : > { %921 = vst [vmem:[%s12189_s12 + $0xa80] sm:$0xff] %v920_v16  ;;  %923 = vst [vmem:[%s12189_s12 + $0xa88] sm:$0xff] %v922_v17  ;;  %v926_v19 = vld [vmem:[%s12184_s11 + $0x1518] sm:$0xff]  ;;  %v928_v20 = vld [vmem:[%s12184_s11 + $0x1540] sm:$0xff] }
  0xb9   : > { %925 = vst [vmem:[%s12189_s12 + $0xa90] sm:$0xff] %v924_v18  ;;  %v930_v21 = vld [vmem:[%s12184_s11 + $0x1548] sm:$0xff]  ;;  %927 = vst [vmem:[%s12189_s12 + $0xa98] sm:$0xff] %v926_v19  ;;  %v932_v22 = vld [vmem:[%s12184_s11 + $0x1550] sm:$0xff] }
  0xba   : > { %929 = vst [vmem:[%s12189_s12 + $0xaa0] sm:$0xff] %v928_v20  ;;  %931 = vst [vmem:[%s12189_s12 + $0xaa8] sm:$0xff] %v930_v21  ;;  %v934_v23 = vld [vmem:[%s12184_s11 + $0x1558] sm:$0xff]  ;;  %v936_v24 = vld [vmem:[%s12184_s11 + $0x1580] sm:$0xff] }
  0xbb   : > { %933 = vst [vmem:[%s12189_s12 + $0xab0] sm:$0xff] %v932_v22  ;;  %935 = vst [vmem:[%s12189_s12 + $0xab8] sm:$0xff] %v934_v23  ;;  %v938_v25 = vld [vmem:[%s12184_s11 + $0x1588] sm:$0xff]  ;;  %v940_v26 = vld [vmem:[%s12184_s11 + $0x1590] sm:$0xff] }
  0xbc   : > { %937 = vst [vmem:[%s12189_s12 + $0xac0] sm:$0xff] %v936_v24  ;;  %v942_v27 = vld [vmem:[%s12184_s11 + $0x1598] sm:$0xff]  ;;  %939 = vst [vmem:[%s12189_s12 + $0xac8] sm:$0xff] %v938_v25  ;;  %v944_v28 = vld [vmem:[%s12184_s11 + $0x15c0] sm:$0xff] }
  0xbd   : > { %941 = vst [vmem:[%s12189_s12 + $0xad0] sm:$0xff] %v940_v26  ;;  %943 = vst [vmem:[%s12189_s12 + $0xad8] sm:$0xff] %v942_v27  ;;  %v946_v29 = vld [vmem:[%s12184_s11 + $0x15c8] sm:$0xff]  ;;  %v948_v30 = vld [vmem:[%s12184_s11 + $0x15d0] sm:$0xff] }
  0xbe   : > { %945 = vst [vmem:[%s12189_s12 + $0xae0] sm:$0xff] %v944_v28  ;;  %947 = vst [vmem:[%s12189_s12 + $0xae8] sm:$0xff] %v946_v29  ;;  %v950_v31 = vld [vmem:[%s12184_s11 + $0x15d8] sm:$0xff]  ;;  %v952_v32 = vld [vmem:[%s12184_s11 + $0x1600] sm:$0xff] }
  0xbf   : > { %949 = vst [vmem:[%s12189_s12 + $0xaf0] sm:$0xff] %v948_v30  ;;  %v954_v33 = vld [vmem:[%s12184_s11 + $0x1608] sm:$0xff]  ;;  %951 = vst [vmem:[%s12189_s12 + $0xaf8] sm:$0xff] %v950_v31  ;;  %v956_v34 = vld [vmem:[%s12184_s11 + $0x1610] sm:$0xff] }
  0xc0   : > { %953 = vst [vmem:[%s12189_s12 + $0xb00] sm:$0xff] %v952_v32  ;;  %955 = vst [vmem:[%s12189_s12 + $0xb08] sm:$0xff] %v954_v33  ;;  %v958_v35 = vld [vmem:[%s12184_s11 + $0x1618] sm:$0xff]  ;;  %v960_v36 = vld [vmem:[%s12184_s11 + $0x1640] sm:$0xff] }
  0xc1   : > { %957 = vst [vmem:[%s12189_s12 + $0xb10] sm:$0xff] %v956_v34  ;;  %959 = vst [vmem:[%s12189_s12 + $0xb18] sm:$0xff] %v958_v35  ;;  %v962_v37 = vld [vmem:[%s12184_s11 + $0x1648] sm:$0xff]  ;;  %v964_v38 = vld [vmem:[%s12184_s11 + $0x1650] sm:$0xff] }
  0xc2   : > { %961 = vst [vmem:[%s12189_s12 + $0xb20] sm:$0xff] %v960_v36  ;;  %v966_v39 = vld [vmem:[%s12184_s11 + $0x1658] sm:$0xff]  ;;  %963 = vst [vmem:[%s12189_s12 + $0xb28] sm:$0xff] %v962_v37  ;;  %v968_v40 = vld [vmem:[%s12184_s11 + $0x1680] sm:$0xff] }
  0xc3   : > { %965 = vst [vmem:[%s12189_s12 + $0xb30] sm:$0xff] %v964_v38  ;;  %967 = vst [vmem:[%s12189_s12 + $0xb38] sm:$0xff] %v966_v39  ;;  %v970_v41 = vld [vmem:[%s12184_s11 + $0x1688] sm:$0xff]  ;;  %v972_v42 = vld [vmem:[%s12184_s11 + $0x1690] sm:$0xff] }
  0xc4   : > { %969 = vst [vmem:[%s12189_s12 + $0xb40] sm:$0xff] %v968_v40  ;;  %971 = vst [vmem:[%s12189_s12 + $0xb48] sm:$0xff] %v970_v41  ;;  %v974_v43 = vld [vmem:[%s12184_s11 + $0x1698] sm:$0xff]  ;;  %v976_v44 = vld [vmem:[%s12184_s11 + $0x16c0] sm:$0xff] }
  0xc5   : > { %973 = vst [vmem:[%s12189_s12 + $0xb50] sm:$0xff] %v972_v42  ;;  %v978_v45 = vld [vmem:[%s12184_s11 + $0x16c8] sm:$0xff]  ;;  %975 = vst [vmem:[%s12189_s12 + $0xb58] sm:$0xff] %v974_v43  ;;  %v980_v46 = vld [vmem:[%s12184_s11 + $0x16d0] sm:$0xff] }
  0xc6   : > { %977 = vst [vmem:[%s12189_s12 + $0xb60] sm:$0xff] %v976_v44  ;;  %979 = vst [vmem:[%s12189_s12 + $0xb68] sm:$0xff] %v978_v45  ;;  %v982_v47 = vld [vmem:[%s12184_s11 + $0x16d8] sm:$0xff]  ;;  %v984_v48 = vld [vmem:[%s12184_s11 + $0x1700] sm:$0xff] }
  0xc7   : > { %981 = vst [vmem:[%s12189_s12 + $0xb70] sm:$0xff] %v980_v46  ;;  %983 = vst [vmem:[%s12189_s12 + $0xb78] sm:$0xff] %v982_v47  ;;  %v986_v49 = vld [vmem:[%s12184_s11 + $0x1708] sm:$0xff]  ;;  %v988_v50 = vld [vmem:[%s12184_s11 + $0x1710] sm:$0xff] }
  0xc8   : > { %985 = vst [vmem:[%s12189_s12 + $0xb80] sm:$0xff] %v984_v48  ;;  %v990_v51 = vld [vmem:[%s12184_s11 + $0x1718] sm:$0xff]  ;;  %987 = vst [vmem:[%s12189_s12 + $0xb88] sm:$0xff] %v986_v49  ;;  %v992_v52 = vld [vmem:[%s12184_s11 + $0x1740] sm:$0xff] }
  0xc9   : > { %989 = vst [vmem:[%s12189_s12 + $0xb90] sm:$0xff] %v988_v50  ;;  %991 = vst [vmem:[%s12189_s12 + $0xb98] sm:$0xff] %v990_v51  ;;  %v994_v53 = vld [vmem:[%s12184_s11 + $0x1748] sm:$0xff]  ;;  %v996_v54 = vld [vmem:[%s12184_s11 + $0x1750] sm:$0xff] }
  0xca   : > { %993 = vst [vmem:[%s12189_s12 + $0xba0] sm:$0xff] %v992_v52  ;;  %995 = vst [vmem:[%s12189_s12 + $0xba8] sm:$0xff] %v994_v53  ;;  %v998_v55 = vld [vmem:[%s12184_s11 + $0x1758] sm:$0xff]  ;;  %v1000_v56 = vld [vmem:[%s12184_s11 + $0x1780] sm:$0xff] }
  0xcb   : > { %997 = vst [vmem:[%s12189_s12 + $0xbb0] sm:$0xff] %v996_v54  ;;  %v1002_v57 = vld [vmem:[%s12184_s11 + $0x1788] sm:$0xff]  ;;  %999 = vst [vmem:[%s12189_s12 + $0xbb8] sm:$0xff] %v998_v55  ;;  %v1004_v58 = vld [vmem:[%s12184_s11 + $0x1790] sm:$0xff] }
  0xcc   : > { %1001 = vst [vmem:[%s12189_s12 + $0xbc0] sm:$0xff] %v1000_v56  ;;  %1003 = vst [vmem:[%s12189_s12 + $0xbc8] sm:$0xff] %v1002_v57  ;;  %v1006_v59 = vld [vmem:[%s12184_s11 + $0x1798] sm:$0xff]  ;;  %v1008_v60 = vld [vmem:[%s12184_s11 + $0x17c0] sm:$0xff] }
  0xcd   : > { %1005 = vst [vmem:[%s12189_s12 + $0xbd0] sm:$0xff] %v1004_v58  ;;  %1007 = vst [vmem:[%s12189_s12 + $0xbd8] sm:$0xff] %v1006_v59  ;;  %v1010_v61 = vld [vmem:[%s12184_s11 + $0x17c8] sm:$0xff]  ;;  %v1012_v62 = vld [vmem:[%s12184_s11 + $0x17d0] sm:$0xff] }
  0xce   : > { %1009 = vst [vmem:[%s12189_s12 + $0xbe0] sm:$0xff] %v1008_v60  ;;  %v1014_v63 = vld [vmem:[%s12184_s11 + $0x17d8] sm:$0xff]  ;;  %1011 = vst [vmem:[%s12189_s12 + $0xbe8] sm:$0xff] %v1010_v61  ;;  %v1016_v0 = vld [vmem:[%s12184_s11 + $0x1800] sm:$0xff] }
  0xcf   : > { %1013 = vst [vmem:[%s12189_s12 + $0xbf0] sm:$0xff] %v1012_v62  ;;  %1015 = vst [vmem:[%s12189_s12 + $0xbf8] sm:$0xff] %v1014_v63  ;;  %v1018_v1 = vld [vmem:[%s12184_s11 + $0x1808] sm:$0xff]  ;;  %v1020_v2 = vld [vmem:[%s12184_s11 + $0x1810] sm:$0xff] }
  0xd0   : > { %1017 = vst [vmem:[%s12189_s12 + $0xc00] sm:$0xff] %v1016_v0  ;;  %1019 = vst [vmem:[%s12189_s12 + $0xc08] sm:$0xff] %v1018_v1  ;;  %v1022_v3 = vld [vmem:[%s12184_s11 + $0x1818] sm:$0xff]  ;;  %v1024_v4 = vld [vmem:[%s12184_s11 + $0x1840] sm:$0xff] }
  0xd1   : > { %1021 = vst [vmem:[%s12189_s12 + $0xc10] sm:$0xff] %v1020_v2  ;;  %v1026_v5 = vld [vmem:[%s12184_s11 + $0x1848] sm:$0xff]  ;;  %1023 = vst [vmem:[%s12189_s12 + $0xc18] sm:$0xff] %v1022_v3  ;;  %v1028_v6 = vld [vmem:[%s12184_s11 + $0x1850] sm:$0xff] }
  0xd2   : > { %1025 = vst [vmem:[%s12189_s12 + $0xc20] sm:$0xff] %v1024_v4  ;;  %1027 = vst [vmem:[%s12189_s12 + $0xc28] sm:$0xff] %v1026_v5  ;;  %v1030_v7 = vld [vmem:[%s12184_s11 + $0x1858] sm:$0xff]  ;;  %v1032_v8 = vld [vmem:[%s12184_s11 + $0x1880] sm:$0xff] }
  0xd3   : > { %1029 = vst [vmem:[%s12189_s12 + $0xc30] sm:$0xff] %v1028_v6  ;;  %1031 = vst [vmem:[%s12189_s12 + $0xc38] sm:$0xff] %v1030_v7  ;;  %v1034_v9 = vld [vmem:[%s12184_s11 + $0x1888] sm:$0xff]  ;;  %v1036_v10 = vld [vmem:[%s12184_s11 + $0x1890] sm:$0xff] }
  0xd4   : > { %1033 = vst [vmem:[%s12189_s12 + $0xc40] sm:$0xff] %v1032_v8  ;;  %v1038_v11 = vld [vmem:[%s12184_s11 + $0x1898] sm:$0xff]  ;;  %1035 = vst [vmem:[%s12189_s12 + $0xc48] sm:$0xff] %v1034_v9  ;;  %v1040_v12 = vld [vmem:[%s12184_s11 + $0x18c0] sm:$0xff] }
  0xd5   : > { %1037 = vst [vmem:[%s12189_s12 + $0xc50] sm:$0xff] %v1036_v10  ;;  %1039 = vst [vmem:[%s12189_s12 + $0xc58] sm:$0xff] %v1038_v11  ;;  %v1042_v13 = vld [vmem:[%s12184_s11 + $0x18c8] sm:$0xff]  ;;  %v1044_v14 = vld [vmem:[%s12184_s11 + $0x18d0] sm:$0xff] }
  0xd6   : > { %1041 = vst [vmem:[%s12189_s12 + $0xc60] sm:$0xff] %v1040_v12  ;;  %1043 = vst [vmem:[%s12189_s12 + $0xc68] sm:$0xff] %v1042_v13  ;;  %v1046_v15 = vld [vmem:[%s12184_s11 + $0x18d8] sm:$0xff]  ;;  %v1048_v16 = vld [vmem:[%s12184_s11 + $0x1900] sm:$0xff] }
  0xd7   : > { %1045 = vst [vmem:[%s12189_s12 + $0xc70] sm:$0xff] %v1044_v14  ;;  %v1050_v17 = vld [vmem:[%s12184_s11 + $0x1908] sm:$0xff]  ;;  %1047 = vst [vmem:[%s12189_s12 + $0xc78] sm:$0xff] %v1046_v15  ;;  %v1052_v18 = vld [vmem:[%s12184_s11 + $0x1910] sm:$0xff] }
  0xd8   : > { %1049 = vst [vmem:[%s12189_s12 + $0xc80] sm:$0xff] %v1048_v16  ;;  %1051 = vst [vmem:[%s12189_s12 + $0xc88] sm:$0xff] %v1050_v17  ;;  %v1054_v19 = vld [vmem:[%s12184_s11 + $0x1918] sm:$0xff]  ;;  %v1056_v20 = vld [vmem:[%s12184_s11 + $0x1940] sm:$0xff] }
  0xd9   : > { %1053 = vst [vmem:[%s12189_s12 + $0xc90] sm:$0xff] %v1052_v18  ;;  %1055 = vst [vmem:[%s12189_s12 + $0xc98] sm:$0xff] %v1054_v19  ;;  %v1058_v21 = vld [vmem:[%s12184_s11 + $0x1948] sm:$0xff]  ;;  %v1060_v22 = vld [vmem:[%s12184_s11 + $0x1950] sm:$0xff] }
  0xda   : > { %1057 = vst [vmem:[%s12189_s12 + $0xca0] sm:$0xff] %v1056_v20  ;;  %v1062_v23 = vld [vmem:[%s12184_s11 + $0x1958] sm:$0xff]  ;;  %1059 = vst [vmem:[%s12189_s12 + $0xca8] sm:$0xff] %v1058_v21  ;;  %v1064_v24 = vld [vmem:[%s12184_s11 + $0x1980] sm:$0xff] }
  0xdb   : > { %1061 = vst [vmem:[%s12189_s12 + $0xcb0] sm:$0xff] %v1060_v22  ;;  %1063 = vst [vmem:[%s12189_s12 + $0xcb8] sm:$0xff] %v1062_v23  ;;  %v1066_v25 = vld [vmem:[%s12184_s11 + $0x1988] sm:$0xff]  ;;  %v1068_v26 = vld [vmem:[%s12184_s11 + $0x1990] sm:$0xff] }
  0xdc   : > { %1065 = vst [vmem:[%s12189_s12 + $0xcc0] sm:$0xff] %v1064_v24  ;;  %1067 = vst [vmem:[%s12189_s12 + $0xcc8] sm:$0xff] %v1066_v25  ;;  %v1070_v27 = vld [vmem:[%s12184_s11 + $0x1998] sm:$0xff]  ;;  %v1072_v28 = vld [vmem:[%s12184_s11 + $0x19c0] sm:$0xff] }
  0xdd   : > { %1069 = vst [vmem:[%s12189_s12 + $0xcd0] sm:$0xff] %v1068_v26  ;;  %v1074_v29 = vld [vmem:[%s12184_s11 + $0x19c8] sm:$0xff]  ;;  %1071 = vst [vmem:[%s12189_s12 + $0xcd8] sm:$0xff] %v1070_v27  ;;  %v1076_v30 = vld [vmem:[%s12184_s11 + $0x19d0] sm:$0xff] }
  0xde   : > { %1073 = vst [vmem:[%s12189_s12 + $0xce0] sm:$0xff] %v1072_v28  ;;  %1075 = vst [vmem:[%s12189_s12 + $0xce8] sm:$0xff] %v1074_v29  ;;  %v1078_v31 = vld [vmem:[%s12184_s11 + $0x19d8] sm:$0xff]  ;;  %v1080_v32 = vld [vmem:[%s12184_s11 + $0x1a00] sm:$0xff] }
  0xdf   : > { %1077 = vst [vmem:[%s12189_s12 + $0xcf0] sm:$0xff] %v1076_v30  ;;  %1079 = vst [vmem:[%s12189_s12 + $0xcf8] sm:$0xff] %v1078_v31  ;;  %v1082_v33 = vld [vmem:[%s12184_s11 + $0x1a08] sm:$0xff]  ;;  %v1084_v34 = vld [vmem:[%s12184_s11 + $0x1a10] sm:$0xff] }
  0xe0   : > { %1081 = vst [vmem:[%s12189_s12 + $0xd00] sm:$0xff] %v1080_v32  ;;  %v1086_v35 = vld [vmem:[%s12184_s11 + $0x1a18] sm:$0xff]  ;;  %1083 = vst [vmem:[%s12189_s12 + $0xd08] sm:$0xff] %v1082_v33  ;;  %v1088_v36 = vld [vmem:[%s12184_s11 + $0x1a40] sm:$0xff] }
  0xe1   : > { %1085 = vst [vmem:[%s12189_s12 + $0xd10] sm:$0xff] %v1084_v34  ;;  %1087 = vst [vmem:[%s12189_s12 + $0xd18] sm:$0xff] %v1086_v35  ;;  %v1090_v37 = vld [vmem:[%s12184_s11 + $0x1a48] sm:$0xff]  ;;  %v1092_v38 = vld [vmem:[%s12184_s11 + $0x1a50] sm:$0xff] }
  0xe2   : > { %1089 = vst [vmem:[%s12189_s12 + $0xd20] sm:$0xff] %v1088_v36  ;;  %1091 = vst [vmem:[%s12189_s12 + $0xd28] sm:$0xff] %v1090_v37  ;;  %v1094_v39 = vld [vmem:[%s12184_s11 + $0x1a58] sm:$0xff]  ;;  %v1096_v40 = vld [vmem:[%s12184_s11 + $0x1a80] sm:$0xff] }
  0xe3   : > { %1093 = vst [vmem:[%s12189_s12 + $0xd30] sm:$0xff] %v1092_v38  ;;  %v1098_v41 = vld [vmem:[%s12184_s11 + $0x1a88] sm:$0xff]  ;;  %1095 = vst [vmem:[%s12189_s12 + $0xd38] sm:$0xff] %v1094_v39  ;;  %v1100_v42 = vld [vmem:[%s12184_s11 + $0x1a90] sm:$0xff] }
  0xe4   : > { %1097 = vst [vmem:[%s12189_s12 + $0xd40] sm:$0xff] %v1096_v40  ;;  %1099 = vst [vmem:[%s12189_s12 + $0xd48] sm:$0xff] %v1098_v41  ;;  %v1102_v43 = vld [vmem:[%s12184_s11 + $0x1a98] sm:$0xff]  ;;  %v1104_v44 = vld [vmem:[%s12184_s11 + $0x1ac0] sm:$0xff] }
  0xe5   : > { %1101 = vst [vmem:[%s12189_s12 + $0xd50] sm:$0xff] %v1100_v42  ;;  %1103 = vst [vmem:[%s12189_s12 + $0xd58] sm:$0xff] %v1102_v43  ;;  %v1106_v45 = vld [vmem:[%s12184_s11 + $0x1ac8] sm:$0xff]  ;;  %v1108_v46 = vld [vmem:[%s12184_s11 + $0x1ad0] sm:$0xff] }
  0xe6   : > { %1105 = vst [vmem:[%s12189_s12 + $0xd60] sm:$0xff] %v1104_v44  ;;  %v1110_v47 = vld [vmem:[%s12184_s11 + $0x1ad8] sm:$0xff]  ;;  %1107 = vst [vmem:[%s12189_s12 + $0xd68] sm:$0xff] %v1106_v45  ;;  %v1112_v48 = vld [vmem:[%s12184_s11 + $0x1b00] sm:$0xff] }
  0xe7   : > { %1109 = vst [vmem:[%s12189_s12 + $0xd70] sm:$0xff] %v1108_v46  ;;  %1111 = vst [vmem:[%s12189_s12 + $0xd78] sm:$0xff] %v1110_v47  ;;  %v1114_v49 = vld [vmem:[%s12184_s11 + $0x1b08] sm:$0xff]  ;;  %v1116_v50 = vld [vmem:[%s12184_s11 + $0x1b10] sm:$0xff] }
  0xe8   : > { %1113 = vst [vmem:[%s12189_s12 + $0xd80] sm:$0xff] %v1112_v48  ;;  %1115 = vst [vmem:[%s12189_s12 + $0xd88] sm:$0xff] %v1114_v49  ;;  %v1118_v51 = vld [vmem:[%s12184_s11 + $0x1b18] sm:$0xff]  ;;  %v1120_v52 = vld [vmem:[%s12184_s11 + $0x1b40] sm:$0xff] }
  0xe9   : > { %1117 = vst [vmem:[%s12189_s12 + $0xd90] sm:$0xff] %v1116_v50  ;;  %v1122_v53 = vld [vmem:[%s12184_s11 + $0x1b48] sm:$0xff]  ;;  %1119 = vst [vmem:[%s12189_s12 + $0xd98] sm:$0xff] %v1118_v51  ;;  %v1124_v54 = vld [vmem:[%s12184_s11 + $0x1b50] sm:$0xff] }
  0xea   : > { %1121 = vst [vmem:[%s12189_s12 + $0xda0] sm:$0xff] %v1120_v52  ;;  %1123 = vst [vmem:[%s12189_s12 + $0xda8] sm:$0xff] %v1122_v53  ;;  %v1126_v55 = vld [vmem:[%s12184_s11 + $0x1b58] sm:$0xff]  ;;  %v1128_v56 = vld [vmem:[%s12184_s11 + $0x1b80] sm:$0xff] }
  0xeb   : > { %1125 = vst [vmem:[%s12189_s12 + $0xdb0] sm:$0xff] %v1124_v54  ;;  %1127 = vst [vmem:[%s12189_s12 + $0xdb8] sm:$0xff] %v1126_v55  ;;  %v1130_v57 = vld [vmem:[%s12184_s11 + $0x1b88] sm:$0xff]  ;;  %v1132_v58 = vld [vmem:[%s12184_s11 + $0x1b90] sm:$0xff] }
  0xec   : > { %1129 = vst [vmem:[%s12189_s12 + $0xdc0] sm:$0xff] %v1128_v56  ;;  %v1134_v59 = vld [vmem:[%s12184_s11 + $0x1b98] sm:$0xff]  ;;  %1131 = vst [vmem:[%s12189_s12 + $0xdc8] sm:$0xff] %v1130_v57  ;;  %v1136_v60 = vld [vmem:[%s12184_s11 + $0x1bc0] sm:$0xff] }
  0xed   : > { %1133 = vst [vmem:[%s12189_s12 + $0xdd0] sm:$0xff] %v1132_v58  ;;  %1135 = vst [vmem:[%s12189_s12 + $0xdd8] sm:$0xff] %v1134_v59  ;;  %v1138_v61 = vld [vmem:[%s12184_s11 + $0x1bc8] sm:$0xff]  ;;  %v1140_v62 = vld [vmem:[%s12184_s11 + $0x1bd0] sm:$0xff] }
  0xee   : > { %1137 = vst [vmem:[%s12189_s12 + $0xde0] sm:$0xff] %v1136_v60  ;;  %1139 = vst [vmem:[%s12189_s12 + $0xde8] sm:$0xff] %v1138_v61  ;;  %v1142_v63 = vld [vmem:[%s12184_s11 + $0x1bd8] sm:$0xff]  ;;  %v1144_v0 = vld [vmem:[%s12184_s11 + $0x1c00] sm:$0xff] }
  0xef   : > { %1141 = vst [vmem:[%s12189_s12 + $0xdf0] sm:$0xff] %v1140_v62  ;;  %v1146_v1 = vld [vmem:[%s12184_s11 + $0x1c08] sm:$0xff]  ;;  %1143 = vst [vmem:[%s12189_s12 + $0xdf8] sm:$0xff] %v1142_v63  ;;  %v1148_v2 = vld [vmem:[%s12184_s11 + $0x1c10] sm:$0xff] }
  0xf0   : > { %1145 = vst [vmem:[%s12189_s12 + $0xe00] sm:$0xff] %v1144_v0  ;;  %1147 = vst [vmem:[%s12189_s12 + $0xe08] sm:$0xff] %v1146_v1  ;;  %v1150_v3 = vld [vmem:[%s12184_s11 + $0x1c18] sm:$0xff]  ;;  %v1152_v4 = vld [vmem:[%s12184_s11 + $0x1c40] sm:$0xff] }
  0xf1   : > { %1149 = vst [vmem:[%s12189_s12 + $0xe10] sm:$0xff] %v1148_v2  ;;  %1151 = vst [vmem:[%s12189_s12 + $0xe18] sm:$0xff] %v1150_v3  ;;  %v1154_v5 = vld [vmem:[%s12184_s11 + $0x1c48] sm:$0xff]  ;;  %v1156_v6 = vld [vmem:[%s12184_s11 + $0x1c50] sm:$0xff] }
  0xf2   : > { %1153 = vst [vmem:[%s12189_s12 + $0xe20] sm:$0xff] %v1152_v4  ;;  %v1158_v7 = vld [vmem:[%s12184_s11 + $0x1c58] sm:$0xff]  ;;  %1155 = vst [vmem:[%s12189_s12 + $0xe28] sm:$0xff] %v1154_v5  ;;  %v1160_v8 = vld [vmem:[%s12184_s11 + $0x1c80] sm:$0xff] }
  0xf3   : > { %1157 = vst [vmem:[%s12189_s12 + $0xe30] sm:$0xff] %v1156_v6  ;;  %1159 = vst [vmem:[%s12189_s12 + $0xe38] sm:$0xff] %v1158_v7  ;;  %v1162_v9 = vld [vmem:[%s12184_s11 + $0x1c88] sm:$0xff]  ;;  %v1164_v10 = vld [vmem:[%s12184_s11 + $0x1c90] sm:$0xff] }
  0xf4   : > { %1161 = vst [vmem:[%s12189_s12 + $0xe40] sm:$0xff] %v1160_v8  ;;  %1163 = vst [vmem:[%s12189_s12 + $0xe48] sm:$0xff] %v1162_v9  ;;  %v1166_v11 = vld [vmem:[%s12184_s11 + $0x1c98] sm:$0xff]  ;;  %v1168_v12 = vld [vmem:[%s12184_s11 + $0x1cc0] sm:$0xff] }
  0xf5   : > { %1165 = vst [vmem:[%s12189_s12 + $0xe50] sm:$0xff] %v1164_v10  ;;  %v1170_v13 = vld [vmem:[%s12184_s11 + $0x1cc8] sm:$0xff]  ;;  %1167 = vst [vmem:[%s12189_s12 + $0xe58] sm:$0xff] %v1166_v11  ;;  %v1172_v14 = vld [vmem:[%s12184_s11 + $0x1cd0] sm:$0xff] }
  0xf6   : > { %1169 = vst [vmem:[%s12189_s12 + $0xe60] sm:$0xff] %v1168_v12  ;;  %1171 = vst [vmem:[%s12189_s12 + $0xe68] sm:$0xff] %v1170_v13  ;;  %v1174_v15 = vld [vmem:[%s12184_s11 + $0x1cd8] sm:$0xff]  ;;  %v1176_v16 = vld [vmem:[%s12184_s11 + $0x1d00] sm:$0xff] }
  0xf7   : > { %1173 = vst [vmem:[%s12189_s12 + $0xe70] sm:$0xff] %v1172_v14  ;;  %1175 = vst [vmem:[%s12189_s12 + $0xe78] sm:$0xff] %v1174_v15  ;;  %v1178_v17 = vld [vmem:[%s12184_s11 + $0x1d08] sm:$0xff]  ;;  %v1180_v18 = vld [vmem:[%s12184_s11 + $0x1d10] sm:$0xff] }
  0xf8   : > { %1177 = vst [vmem:[%s12189_s12 + $0xe80] sm:$0xff] %v1176_v16  ;;  %v1182_v19 = vld [vmem:[%s12184_s11 + $0x1d18] sm:$0xff]  ;;  %1179 = vst [vmem:[%s12189_s12 + $0xe88] sm:$0xff] %v1178_v17  ;;  %v1184_v20 = vld [vmem:[%s12184_s11 + $0x1d40] sm:$0xff] }
  0xf9   : > { %1181 = vst [vmem:[%s12189_s12 + $0xe90] sm:$0xff] %v1180_v18  ;;  %1183 = vst [vmem:[%s12189_s12 + $0xe98] sm:$0xff] %v1182_v19  ;;  %v1186_v21 = vld [vmem:[%s12184_s11 + $0x1d48] sm:$0xff]  ;;  %v1188_v22 = vld [vmem:[%s12184_s11 + $0x1d50] sm:$0xff] }
  0xfa   : > { %1185 = vst [vmem:[%s12189_s12 + $0xea0] sm:$0xff] %v1184_v20  ;;  %1187 = vst [vmem:[%s12189_s12 + $0xea8] sm:$0xff] %v1186_v21  ;;  %v1190_v23 = vld [vmem:[%s12184_s11 + $0x1d58] sm:$0xff]  ;;  %v1192_v24 = vld [vmem:[%s12184_s11 + $0x1d80] sm:$0xff] }
  0xfb   : > { %1189 = vst [vmem:[%s12189_s12 + $0xeb0] sm:$0xff] %v1188_v22  ;;  %v1194_v25 = vld [vmem:[%s12184_s11 + $0x1d88] sm:$0xff]  ;;  %1191 = vst [vmem:[%s12189_s12 + $0xeb8] sm:$0xff] %v1190_v23  ;;  %v1196_v26 = vld [vmem:[%s12184_s11 + $0x1d90] sm:$0xff] }
  0xfc   : > { %1193 = vst [vmem:[%s12189_s12 + $0xec0] sm:$0xff] %v1192_v24  ;;  %1195 = vst [vmem:[%s12189_s12 + $0xec8] sm:$0xff] %v1194_v25  ;;  %v1198_v27 = vld [vmem:[%s12184_s11 + $0x1d98] sm:$0xff]  ;;  %v1200_v28 = vld [vmem:[%s12184_s11 + $0x1dc0] sm:$0xff] }
  0xfd   : > { %1197 = vst [vmem:[%s12189_s12 + $0xed0] sm:$0xff] %v1196_v26  ;;  %1199 = vst [vmem:[%s12189_s12 + $0xed8] sm:$0xff] %v1198_v27  ;;  %v1202_v29 = vld [vmem:[%s12184_s11 + $0x1dc8] sm:$0xff]  ;;  %v1204_v30 = vld [vmem:[%s12184_s11 + $0x1dd0] sm:$0xff] }
  0xfe   : > { %1201 = vst [vmem:[%s12189_s12 + $0xee0] sm:$0xff] %v1200_v28  ;;  %v1206_v31 = vld [vmem:[%s12184_s11 + $0x1dd8] sm:$0xff]  ;;  %1203 = vst [vmem:[%s12189_s12 + $0xee8] sm:$0xff] %v1202_v29  ;;  %v1208_v32 = vld [vmem:[%s12184_s11 + $0x1e00] sm:$0xff] }
  0xff   : > { %1205 = vst [vmem:[%s12189_s12 + $0xef0] sm:$0xff] %v1204_v30  ;;  %1207 = vst [vmem:[%s12189_s12 + $0xef8] sm:$0xff] %v1206_v31  ;;  %v1210_v33 = vld [vmem:[%s12184_s11 + $0x1e08] sm:$0xff]  ;;  %v1212_v34 = vld [vmem:[%s12184_s11 + $0x1e10] sm:$0xff] }
 0x100   : > { %1209 = vst [vmem:[%s12189_s12 + $0xf00] sm:$0xff] %v1208_v32  ;;  %1211 = vst [vmem:[%s12189_s12 + $0xf08] sm:$0xff] %v1210_v33  ;;  %v1214_v35 = vld [vmem:[%s12184_s11 + $0x1e18] sm:$0xff]  ;;  %v1216_v36 = vld [vmem:[%s12184_s11 + $0x1e40] sm:$0xff] }
 0x101   : > { %1213 = vst [vmem:[%s12189_s12 + $0xf10] sm:$0xff] %v1212_v34  ;;  %v1218_v37 = vld [vmem:[%s12184_s11 + $0x1e48] sm:$0xff]  ;;  %1215 = vst [vmem:[%s12189_s12 + $0xf18] sm:$0xff] %v1214_v35  ;;  %v1220_v38 = vld [vmem:[%s12184_s11 + $0x1e50] sm:$0xff] }
 0x102   : > { %1217 = vst [vmem:[%s12189_s12 + $0xf20] sm:$0xff] %v1216_v36  ;;  %1219 = vst [vmem:[%s12189_s12 + $0xf28] sm:$0xff] %v1218_v37  ;;  %v1222_v39 = vld [vmem:[%s12184_s11 + $0x1e58] sm:$0xff]  ;;  %v1224_v40 = vld [vmem:[%s12184_s11 + $0x1e80] sm:$0xff] }
 0x103   : > { %1221 = vst [vmem:[%s12189_s12 + $0xf30] sm:$0xff] %v1220_v38  ;;  %1223 = vst [vmem:[%s12189_s12 + $0xf38] sm:$0xff] %v1222_v39  ;;  %v1226_v41 = vld [vmem:[%s12184_s11 + $0x1e88] sm:$0xff]  ;;  %v1228_v42 = vld [vmem:[%s12184_s11 + $0x1e90] sm:$0xff] }
 0x104   : > { %1225 = vst [vmem:[%s12189_s12 + $0xf40] sm:$0xff] %v1224_v40  ;;  %v1230_v43 = vld [vmem:[%s12184_s11 + $0x1e98] sm:$0xff]  ;;  %1227 = vst [vmem:[%s12189_s12 + $0xf48] sm:$0xff] %v1226_v41  ;;  %v1232_v44 = vld [vmem:[%s12184_s11 + $0x1ec0] sm:$0xff] }
 0x105   : > { %1229 = vst [vmem:[%s12189_s12 + $0xf50] sm:$0xff] %v1228_v42  ;;  %1231 = vst [vmem:[%s12189_s12 + $0xf58] sm:$0xff] %v1230_v43  ;;  %v1234_v45 = vld [vmem:[%s12184_s11 + $0x1ec8] sm:$0xff]  ;;  %v1236_v46 = vld [vmem:[%s12184_s11 + $0x1ed0] sm:$0xff] }
 0x106   : > { %1233 = vst [vmem:[%s12189_s12 + $0xf60] sm:$0xff] %v1232_v44  ;;  %1235 = vst [vmem:[%s12189_s12 + $0xf68] sm:$0xff] %v1234_v45  ;;  %v1238_v47 = vld [vmem:[%s12184_s11 + $0x1ed8] sm:$0xff]  ;;  %v1240_v48 = vld [vmem:[%s12184_s11 + $0x1f00] sm:$0xff] }
 0x107   : > { %1237 = vst [vmem:[%s12189_s12 + $0xf70] sm:$0xff] %v1236_v46  ;;  %v1242_v49 = vld [vmem:[%s12184_s11 + $0x1f08] sm:$0xff]  ;;  %1239 = vst [vmem:[%s12189_s12 + $0xf78] sm:$0xff] %v1238_v47  ;;  %v1244_v50 = vld [vmem:[%s12184_s11 + $0x1f10] sm:$0xff] }
 0x108   : > { %1241 = vst [vmem:[%s12189_s12 + $0xf80] sm:$0xff] %v1240_v48  ;;  %1243 = vst [vmem:[%s12189_s12 + $0xf88] sm:$0xff] %v1242_v49  ;;  %v1246_v51 = vld [vmem:[%s12184_s11 + $0x1f18] sm:$0xff]  ;;  %v1248_v52 = vld [vmem:[%s12184_s11 + $0x1f40] sm:$0xff] }
 0x109   : > { %1245 = vst [vmem:[%s12189_s12 + $0xf90] sm:$0xff] %v1244_v50  ;;  %1247 = vst [vmem:[%s12189_s12 + $0xf98] sm:$0xff] %v1246_v51  ;;  %v1250_v53 = vld [vmem:[%s12184_s11 + $0x1f48] sm:$0xff]  ;;  %v1252_v54 = vld [vmem:[%s12184_s11 + $0x1f50] sm:$0xff] }
 0x10a   : > { %1249 = vst [vmem:[%s12189_s12 + $0xfa0] sm:$0xff] %v1248_v52  ;;  %v1254_v55 = vld [vmem:[%s12184_s11 + $0x1f58] sm:$0xff]  ;;  %1251 = vst [vmem:[%s12189_s12 + $0xfa8] sm:$0xff] %v1250_v53  ;;  %v1256_v56 = vld [vmem:[%s12184_s11 + $0x1f80] sm:$0xff] }
 0x10b   : > { %1253 = vst [vmem:[%s12189_s12 + $0xfb0] sm:$0xff] %v1252_v54  ;;  %1255 = vst [vmem:[%s12189_s12 + $0xfb8] sm:$0xff] %v1254_v55  ;;  %v1258_v57 = vld [vmem:[%s12184_s11 + $0x1f88] sm:$0xff]  ;;  %v1260_v58 = vld [vmem:[%s12184_s11 + $0x1f90] sm:$0xff] }
 0x10c   : > { %1257 = vst [vmem:[%s12189_s12 + $0xfc0] sm:$0xff] %v1256_v56  ;;  %1259 = vst [vmem:[%s12189_s12 + $0xfc8] sm:$0xff] %v1258_v57  ;;  %v1262_v59 = vld [vmem:[%s12184_s11 + $0x1f98] sm:$0xff]  ;;  %v1264_v60 = vld [vmem:[%s12184_s11 + $0x1fc0] sm:$0xff] }
 0x10d   : > { %1261 = vst [vmem:[%s12189_s12 + $0xfd0] sm:$0xff] %v1260_v58  ;;  %v1266_v61 = vld [vmem:[%s12184_s11 + $0x1fc8] sm:$0xff]  ;;  %1263 = vst [vmem:[%s12189_s12 + $0xfd8] sm:$0xff] %v1262_v59  ;;  %v1268_v62 = vld [vmem:[%s12184_s11 + $0x1fd0] sm:$0xff] }
 0x10e   : > { %1265 = vst [vmem:[%s12189_s12 + $0xfe0] sm:$0xff] %v1264_v60  ;;  %1267 = vst [vmem:[%s12189_s12 + $0xfe8] sm:$0xff] %v1266_v61  ;;  %v1270_v63 = vld [vmem:[%s12184_s11 + $0x1fd8] sm:$0xff]  ;;  %v1272_v0 = vld [vmem:[%s12184_s11 + $0x2000] sm:$0xff] }
 0x10f   : > { %1269 = vst [vmem:[%s12189_s12 + $0xff0] sm:$0xff] %v1268_v62  ;;  %1271 = vst [vmem:[%s12189_s12 + $0xff8] sm:$0xff] %v1270_v63  ;;  %v1274_v1 = vld [vmem:[%s12184_s11 + $0x2008] sm:$0xff]  ;;  %v1276_v2 = vld [vmem:[%s12184_s11 + $0x2010] sm:$0xff] }
 0x110   : > { %1273 = vst [vmem:[%s12189_s12 + $0x1000] sm:$0xff] %v1272_v0  ;;  %v1278_v3 = vld [vmem:[%s12184_s11 + $0x2018] sm:$0xff]  ;;  %1275 = vst [vmem:[%s12189_s12 + $0x1008] sm:$0xff] %v1274_v1  ;;  %v1280_v4 = vld [vmem:[%s12184_s11 + $0x2040] sm:$0xff] }
 0x111   : > { %1277 = vst [vmem:[%s12189_s12 + $0x1010] sm:$0xff] %v1276_v2  ;;  %1279 = vst [vmem:[%s12189_s12 + $0x1018] sm:$0xff] %v1278_v3  ;;  %v1282_v5 = vld [vmem:[%s12184_s11 + $0x2048] sm:$0xff]  ;;  %v1284_v6 = vld [vmem:[%s12184_s11 + $0x2050] sm:$0xff] }
 0x112   : > { %1281 = vst [vmem:[%s12189_s12 + $0x1020] sm:$0xff] %v1280_v4  ;;  %1283 = vst [vmem:[%s12189_s12 + $0x1028] sm:$0xff] %v1282_v5  ;;  %v1286_v7 = vld [vmem:[%s12184_s11 + $0x2058] sm:$0xff]  ;;  %v1288_v8 = vld [vmem:[%s12184_s11 + $0x2080] sm:$0xff] }
 0x113   : > { %1285 = vst [vmem:[%s12189_s12 + $0x1030] sm:$0xff] %v1284_v6  ;;  %v1290_v9 = vld [vmem:[%s12184_s11 + $0x2088] sm:$0xff]  ;;  %1287 = vst [vmem:[%s12189_s12 + $0x1038] sm:$0xff] %v1286_v7  ;;  %v1292_v10 = vld [vmem:[%s12184_s11 + $0x2090] sm:$0xff] }
 0x114   : > { %1289 = vst [vmem:[%s12189_s12 + $0x1040] sm:$0xff] %v1288_v8  ;;  %1291 = vst [vmem:[%s12189_s12 + $0x1048] sm:$0xff] %v1290_v9  ;;  %v1294_v11 = vld [vmem:[%s12184_s11 + $0x2098] sm:$0xff]  ;;  %v1296_v12 = vld [vmem:[%s12184_s11 + $0x20c0] sm:$0xff] }
 0x115   : > { %1293 = vst [vmem:[%s12189_s12 + $0x1050] sm:$0xff] %v1292_v10  ;;  %1295 = vst [vmem:[%s12189_s12 + $0x1058] sm:$0xff] %v1294_v11  ;;  %v1298_v13 = vld [vmem:[%s12184_s11 + $0x20c8] sm:$0xff]  ;;  %v1300_v14 = vld [vmem:[%s12184_s11 + $0x20d0] sm:$0xff] }
 0x116   : > { %1297 = vst [vmem:[%s12189_s12 + $0x1060] sm:$0xff] %v1296_v12  ;;  %v1302_v15 = vld [vmem:[%s12184_s11 + $0x20d8] sm:$0xff]  ;;  %1299 = vst [vmem:[%s12189_s12 + $0x1068] sm:$0xff] %v1298_v13  ;;  %v1304_v16 = vld [vmem:[%s12184_s11 + $0x2100] sm:$0xff] }
 0x117   : > { %1301 = vst [vmem:[%s12189_s12 + $0x1070] sm:$0xff] %v1300_v14  ;;  %1303 = vst [vmem:[%s12189_s12 + $0x1078] sm:$0xff] %v1302_v15  ;;  %v1306_v17 = vld [vmem:[%s12184_s11 + $0x2108] sm:$0xff]  ;;  %v1308_v18 = vld [vmem:[%s12184_s11 + $0x2110] sm:$0xff] }
 0x118   : > { %1305 = vst [vmem:[%s12189_s12 + $0x1080] sm:$0xff] %v1304_v16  ;;  %1307 = vst [vmem:[%s12189_s12 + $0x1088] sm:$0xff] %v1306_v17  ;;  %v1310_v19 = vld [vmem:[%s12184_s11 + $0x2118] sm:$0xff]  ;;  %v1312_v20 = vld [vmem:[%s12184_s11 + $0x2140] sm:$0xff] }
 0x119   : > { %1309 = vst [vmem:[%s12189_s12 + $0x1090] sm:$0xff] %v1308_v18  ;;  %v1314_v21 = vld [vmem:[%s12184_s11 + $0x2148] sm:$0xff]  ;;  %1311 = vst [vmem:[%s12189_s12 + $0x1098] sm:$0xff] %v1310_v19  ;;  %v1316_v22 = vld [vmem:[%s12184_s11 + $0x2150] sm:$0xff] }
 0x11a   : > { %1313 = vst [vmem:[%s12189_s12 + $0x10a0] sm:$0xff] %v1312_v20  ;;  %1315 = vst [vmem:[%s12189_s12 + $0x10a8] sm:$0xff] %v1314_v21  ;;  %v1318_v23 = vld [vmem:[%s12184_s11 + $0x2158] sm:$0xff]  ;;  %v1320_v24 = vld [vmem:[%s12184_s11 + $0x2180] sm:$0xff] }
 0x11b   : > { %1317 = vst [vmem:[%s12189_s12 + $0x10b0] sm:$0xff] %v1316_v22  ;;  %1319 = vst [vmem:[%s12189_s12 + $0x10b8] sm:$0xff] %v1318_v23  ;;  %v1322_v25 = vld [vmem:[%s12184_s11 + $0x2188] sm:$0xff]  ;;  %v1324_v26 = vld [vmem:[%s12184_s11 + $0x2190] sm:$0xff] }
 0x11c   : > { %1321 = vst [vmem:[%s12189_s12 + $0x10c0] sm:$0xff] %v1320_v24  ;;  %v1326_v27 = vld [vmem:[%s12184_s11 + $0x2198] sm:$0xff]  ;;  %1323 = vst [vmem:[%s12189_s12 + $0x10c8] sm:$0xff] %v1322_v25  ;;  %v1328_v28 = vld [vmem:[%s12184_s11 + $0x21c0] sm:$0xff] }
 0x11d   : > { %1325 = vst [vmem:[%s12189_s12 + $0x10d0] sm:$0xff] %v1324_v26  ;;  %1327 = vst [vmem:[%s12189_s12 + $0x10d8] sm:$0xff] %v1326_v27  ;;  %v1330_v29 = vld [vmem:[%s12184_s11 + $0x21c8] sm:$0xff]  ;;  %v1332_v30 = vld [vmem:[%s12184_s11 + $0x21d0] sm:$0xff] }
 0x11e   : > { %1329 = vst [vmem:[%s12189_s12 + $0x10e0] sm:$0xff] %v1328_v28  ;;  %1331 = vst [vmem:[%s12189_s12 + $0x10e8] sm:$0xff] %v1330_v29  ;;  %v1334_v31 = vld [vmem:[%s12184_s11 + $0x21d8] sm:$0xff]  ;;  %v1336_v32 = vld [vmem:[%s12184_s11 + $0x2200] sm:$0xff] }
 0x11f   : > { %1333 = vst [vmem:[%s12189_s12 + $0x10f0] sm:$0xff] %v1332_v30  ;;  %v1338_v33 = vld [vmem:[%s12184_s11 + $0x2208] sm:$0xff]  ;;  %1335 = vst [vmem:[%s12189_s12 + $0x10f8] sm:$0xff] %v1334_v31  ;;  %v1340_v34 = vld [vmem:[%s12184_s11 + $0x2210] sm:$0xff] }
 0x120   : > { %1337 = vst [vmem:[%s12189_s12 + $0x1100] sm:$0xff] %v1336_v32  ;;  %1339 = vst [vmem:[%s12189_s12 + $0x1108] sm:$0xff] %v1338_v33  ;;  %v1342_v35 = vld [vmem:[%s12184_s11 + $0x2218] sm:$0xff]  ;;  %v1344_v36 = vld [vmem:[%s12184_s11 + $0x2240] sm:$0xff] }
 0x121   : > { %1341 = vst [vmem:[%s12189_s12 + $0x1110] sm:$0xff] %v1340_v34  ;;  %1343 = vst [vmem:[%s12189_s12 + $0x1118] sm:$0xff] %v1342_v35  ;;  %v1346_v37 = vld [vmem:[%s12184_s11 + $0x2248] sm:$0xff]  ;;  %v1348_v38 = vld [vmem:[%s12184_s11 + $0x2250] sm:$0xff] }
 0x122   : > { %1345 = vst [vmem:[%s12189_s12 + $0x1120] sm:$0xff] %v1344_v36  ;;  %v1350_v39 = vld [vmem:[%s12184_s11 + $0x2258] sm:$0xff]  ;;  %1347 = vst [vmem:[%s12189_s12 + $0x1128] sm:$0xff] %v1346_v37  ;;  %v1352_v40 = vld [vmem:[%s12184_s11 + $0x2280] sm:$0xff] }
 0x123   : > { %1349 = vst [vmem:[%s12189_s12 + $0x1130] sm:$0xff] %v1348_v38  ;;  %1351 = vst [vmem:[%s12189_s12 + $0x1138] sm:$0xff] %v1350_v39  ;;  %v1354_v41 = vld [vmem:[%s12184_s11 + $0x2288] sm:$0xff]  ;;  %v1356_v42 = vld [vmem:[%s12184_s11 + $0x2290] sm:$0xff] }
 0x124   : > { %1353 = vst [vmem:[%s12189_s12 + $0x1140] sm:$0xff] %v1352_v40  ;;  %1355 = vst [vmem:[%s12189_s12 + $0x1148] sm:$0xff] %v1354_v41  ;;  %v1358_v43 = vld [vmem:[%s12184_s11 + $0x2298] sm:$0xff]  ;;  %v1360_v44 = vld [vmem:[%s12184_s11 + $0x22c0] sm:$0xff] }
 0x125   : > { %1357 = vst [vmem:[%s12189_s12 + $0x1150] sm:$0xff] %v1356_v42  ;;  %v1362_v45 = vld [vmem:[%s12184_s11 + $0x22c8] sm:$0xff]  ;;  %1359 = vst [vmem:[%s12189_s12 + $0x1158] sm:$0xff] %v1358_v43  ;;  %v1364_v46 = vld [vmem:[%s12184_s11 + $0x22d0] sm:$0xff] }
 0x126   : > { %1361 = vst [vmem:[%s12189_s12 + $0x1160] sm:$0xff] %v1360_v44  ;;  %1363 = vst [vmem:[%s12189_s12 + $0x1168] sm:$0xff] %v1362_v45  ;;  %v1366_v47 = vld [vmem:[%s12184_s11 + $0x22d8] sm:$0xff]  ;;  %v1368_v48 = vld [vmem:[%s12184_s11 + $0x2300] sm:$0xff] }
 0x127   : > { %1365 = vst [vmem:[%s12189_s12 + $0x1170] sm:$0xff] %v1364_v46  ;;  %1367 = vst [vmem:[%s12189_s12 + $0x1178] sm:$0xff] %v1366_v47  ;;  %v1370_v49 = vld [vmem:[%s12184_s11 + $0x2308] sm:$0xff]  ;;  %v1372_v50 = vld [vmem:[%s12184_s11 + $0x2310] sm:$0xff] }
 0x128   : > { %1369 = vst [vmem:[%s12189_s12 + $0x1180] sm:$0xff] %v1368_v48  ;;  %v1374_v51 = vld [vmem:[%s12184_s11 + $0x2318] sm:$0xff]  ;;  %1371 = vst [vmem:[%s12189_s12 + $0x1188] sm:$0xff] %v1370_v49  ;;  %v1376_v52 = vld [vmem:[%s12184_s11 + $0x2340] sm:$0xff] }
 0x129   : > { %1373 = vst [vmem:[%s12189_s12 + $0x1190] sm:$0xff] %v1372_v50  ;;  %1375 = vst [vmem:[%s12189_s12 + $0x1198] sm:$0xff] %v1374_v51  ;;  %v1378_v53 = vld [vmem:[%s12184_s11 + $0x2348] sm:$0xff]  ;;  %v1380_v54 = vld [vmem:[%s12184_s11 + $0x2350] sm:$0xff] }
 0x12a   : > { %1377 = vst [vmem:[%s12189_s12 + $0x11a0] sm:$0xff] %v1376_v52  ;;  %1379 = vst [vmem:[%s12189_s12 + $0x11a8] sm:$0xff] %v1378_v53  ;;  %v1382_v55 = vld [vmem:[%s12184_s11 + $0x2358] sm:$0xff]  ;;  %v1384_v56 = vld [vmem:[%s12184_s11 + $0x2380] sm:$0xff] }
 0x12b   : > { %1381 = vst [vmem:[%s12189_s12 + $0x11b0] sm:$0xff] %v1380_v54  ;;  %v1386_v57 = vld [vmem:[%s12184_s11 + $0x2388] sm:$0xff]  ;;  %1383 = vst [vmem:[%s12189_s12 + $0x11b8] sm:$0xff] %v1382_v55  ;;  %v1388_v58 = vld [vmem:[%s12184_s11 + $0x2390] sm:$0xff] }
 0x12c   : > { %1385 = vst [vmem:[%s12189_s12 + $0x11c0] sm:$0xff] %v1384_v56  ;;  %1387 = vst [vmem:[%s12189_s12 + $0x11c8] sm:$0xff] %v1386_v57  ;;  %v1390_v59 = vld [vmem:[%s12184_s11 + $0x2398] sm:$0xff]  ;;  %v1392_v60 = vld [vmem:[%s12184_s11 + $0x23c0] sm:$0xff] }
 0x12d   : > { %1389 = vst [vmem:[%s12189_s12 + $0x11d0] sm:$0xff] %v1388_v58  ;;  %1391 = vst [vmem:[%s12189_s12 + $0x11d8] sm:$0xff] %v1390_v59  ;;  %v1394_v61 = vld [vmem:[%s12184_s11 + $0x23c8] sm:$0xff]  ;;  %v1396_v62 = vld [vmem:[%s12184_s11 + $0x23d0] sm:$0xff] }
 0x12e   : > { %1393 = vst [vmem:[%s12189_s12 + $0x11e0] sm:$0xff] %v1392_v60  ;;  %v1398_v63 = vld [vmem:[%s12184_s11 + $0x23d8] sm:$0xff]  ;;  %1395 = vst [vmem:[%s12189_s12 + $0x11e8] sm:$0xff] %v1394_v61  ;;  %v1400_v0 = vld [vmem:[%s12184_s11 + $0x2400] sm:$0xff] }
 0x12f   : > { %1397 = vst [vmem:[%s12189_s12 + $0x11f0] sm:$0xff] %v1396_v62  ;;  %1399 = vst [vmem:[%s12189_s12 + $0x11f8] sm:$0xff] %v1398_v63  ;;  %v1402_v1 = vld [vmem:[%s12184_s11 + $0x2408] sm:$0xff]  ;;  %v1404_v2 = vld [vmem:[%s12184_s11 + $0x2410] sm:$0xff] }
 0x130   : > { %1401 = vst [vmem:[%s12189_s12 + $0x1200] sm:$0xff] %v1400_v0  ;;  %1403 = vst [vmem:[%s12189_s12 + $0x1208] sm:$0xff] %v1402_v1  ;;  %v1406_v3 = vld [vmem:[%s12184_s11 + $0x2418] sm:$0xff]  ;;  %v1408_v4 = vld [vmem:[%s12184_s11 + $0x2440] sm:$0xff] }
 0x131   : > { %1405 = vst [vmem:[%s12189_s12 + $0x1210] sm:$0xff] %v1404_v2  ;;  %v1410_v5 = vld [vmem:[%s12184_s11 + $0x2448] sm:$0xff]  ;;  %1407 = vst [vmem:[%s12189_s12 + $0x1218] sm:$0xff] %v1406_v3  ;;  %v1412_v6 = vld [vmem:[%s12184_s11 + $0x2450] sm:$0xff] }
 0x132   : > { %1409 = vst [vmem:[%s12189_s12 + $0x1220] sm:$0xff] %v1408_v4  ;;  %1411 = vst [vmem:[%s12189_s12 + $0x1228] sm:$0xff] %v1410_v5  ;;  %v1414_v7 = vld [vmem:[%s12184_s11 + $0x2458] sm:$0xff]  ;;  %v1416_v8 = vld [vmem:[%s12184_s11 + $0x2480] sm:$0xff] }
 0x133   : > { %1413 = vst [vmem:[%s12189_s12 + $0x1230] sm:$0xff] %v1412_v6  ;;  %1415 = vst [vmem:[%s12189_s12 + $0x1238] sm:$0xff] %v1414_v7  ;;  %v1418_v9 = vld [vmem:[%s12184_s11 + $0x2488] sm:$0xff]  ;;  %v1420_v10 = vld [vmem:[%s12184_s11 + $0x2490] sm:$0xff] }
 0x134   : > { %1417 = vst [vmem:[%s12189_s12 + $0x1240] sm:$0xff] %v1416_v8  ;;  %v1422_v11 = vld [vmem:[%s12184_s11 + $0x2498] sm:$0xff]  ;;  %1419 = vst [vmem:[%s12189_s12 + $0x1248] sm:$0xff] %v1418_v9  ;;  %v1424_v12 = vld [vmem:[%s12184_s11 + $0x24c0] sm:$0xff] }
 0x135   : > { %1421 = vst [vmem:[%s12189_s12 + $0x1250] sm:$0xff] %v1420_v10  ;;  %1423 = vst [vmem:[%s12189_s12 + $0x1258] sm:$0xff] %v1422_v11  ;;  %v1426_v13 = vld [vmem:[%s12184_s11 + $0x24c8] sm:$0xff]  ;;  %v1428_v14 = vld [vmem:[%s12184_s11 + $0x24d0] sm:$0xff] }
 0x136   : > { %1425 = vst [vmem:[%s12189_s12 + $0x1260] sm:$0xff] %v1424_v12  ;;  %1427 = vst [vmem:[%s12189_s12 + $0x1268] sm:$0xff] %v1426_v13  ;;  %v1430_v15 = vld [vmem:[%s12184_s11 + $0x24d8] sm:$0xff]  ;;  %v1432_v16 = vld [vmem:[%s12184_s11 + $0x2500] sm:$0xff] }
 0x137   : > { %1429 = vst [vmem:[%s12189_s12 + $0x1270] sm:$0xff] %v1428_v14  ;;  %v1434_v17 = vld [vmem:[%s12184_s11 + $0x2508] sm:$0xff]  ;;  %1431 = vst [vmem:[%s12189_s12 + $0x1278] sm:$0xff] %v1430_v15  ;;  %v1436_v18 = vld [vmem:[%s12184_s11 + $0x2510] sm:$0xff] }
 0x138   : > { %1433 = vst [vmem:[%s12189_s12 + $0x1280] sm:$0xff] %v1432_v16  ;;  %1435 = vst [vmem:[%s12189_s12 + $0x1288] sm:$0xff] %v1434_v17  ;;  %v1438_v19 = vld [vmem:[%s12184_s11 + $0x2518] sm:$0xff]  ;;  %v1440_v20 = vld [vmem:[%s12184_s11 + $0x2540] sm:$0xff] }
 0x139   : > { %1437 = vst [vmem:[%s12189_s12 + $0x1290] sm:$0xff] %v1436_v18  ;;  %1439 = vst [vmem:[%s12189_s12 + $0x1298] sm:$0xff] %v1438_v19  ;;  %v1442_v21 = vld [vmem:[%s12184_s11 + $0x2548] sm:$0xff]  ;;  %v1444_v22 = vld [vmem:[%s12184_s11 + $0x2550] sm:$0xff] }
 0x13a   : > { %1441 = vst [vmem:[%s12189_s12 + $0x12a0] sm:$0xff] %v1440_v20  ;;  %v1446_v23 = vld [vmem:[%s12184_s11 + $0x2558] sm:$0xff]  ;;  %1443 = vst [vmem:[%s12189_s12 + $0x12a8] sm:$0xff] %v1442_v21  ;;  %v1448_v24 = vld [vmem:[%s12184_s11 + $0x2580] sm:$0xff] }
 0x13b   : > { %1445 = vst [vmem:[%s12189_s12 + $0x12b0] sm:$0xff] %v1444_v22  ;;  %1447 = vst [vmem:[%s12189_s12 + $0x12b8] sm:$0xff] %v1446_v23  ;;  %v1450_v25 = vld [vmem:[%s12184_s11 + $0x2588] sm:$0xff]  ;;  %v1452_v26 = vld [vmem:[%s12184_s11 + $0x2590] sm:$0xff] }
 0x13c   : > { %1449 = vst [vmem:[%s12189_s12 + $0x12c0] sm:$0xff] %v1448_v24  ;;  %1451 = vst [vmem:[%s12189_s12 + $0x12c8] sm:$0xff] %v1450_v25  ;;  %v1454_v27 = vld [vmem:[%s12184_s11 + $0x2598] sm:$0xff]  ;;  %v1456_v28 = vld [vmem:[%s12184_s11 + $0x25c0] sm:$0xff] }
 0x13d   : > { %1453 = vst [vmem:[%s12189_s12 + $0x12d0] sm:$0xff] %v1452_v26  ;;  %v1458_v29 = vld [vmem:[%s12184_s11 + $0x25c8] sm:$0xff]  ;;  %1455 = vst [vmem:[%s12189_s12 + $0x12d8] sm:$0xff] %v1454_v27  ;;  %v1460_v30 = vld [vmem:[%s12184_s11 + $0x25d0] sm:$0xff] }
 0x13e   : > { %1457 = vst [vmem:[%s12189_s12 + $0x12e0] sm:$0xff] %v1456_v28  ;;  %1459 = vst [vmem:[%s12189_s12 + $0x12e8] sm:$0xff] %v1458_v29  ;;  %v1462_v31 = vld [vmem:[%s12184_s11 + $0x25d8] sm:$0xff]  ;;  %v1464_v32 = vld [vmem:[%s12184_s11 + $0x2600] sm:$0xff] }
 0x13f   : > { %1461 = vst [vmem:[%s12189_s12 + $0x12f0] sm:$0xff] %v1460_v30  ;;  %1463 = vst [vmem:[%s12189_s12 + $0x12f8] sm:$0xff] %v1462_v31  ;;  %v1466_v33 = vld [vmem:[%s12184_s11 + $0x2608] sm:$0xff]  ;;  %v1468_v34 = vld [vmem:[%s12184_s11 + $0x2610] sm:$0xff] }
 0x140   : > { %1465 = vst [vmem:[%s12189_s12 + $0x1300] sm:$0xff] %v1464_v32  ;;  %v1470_v35 = vld [vmem:[%s12184_s11 + $0x2618] sm:$0xff]  ;;  %1467 = vst [vmem:[%s12189_s12 + $0x1308] sm:$0xff] %v1466_v33  ;;  %v1472_v36 = vld [vmem:[%s12184_s11 + $0x2640] sm:$0xff] }
 0x141   : > { %1469 = vst [vmem:[%s12189_s12 + $0x1310] sm:$0xff] %v1468_v34  ;;  %1471 = vst [vmem:[%s12189_s12 + $0x1318] sm:$0xff] %v1470_v35  ;;  %v1474_v37 = vld [vmem:[%s12184_s11 + $0x2648] sm:$0xff]  ;;  %v1476_v38 = vld [vmem:[%s12184_s11 + $0x2650] sm:$0xff] }
 0x142   : > { %1473 = vst [vmem:[%s12189_s12 + $0x1320] sm:$0xff] %v1472_v36  ;;  %1475 = vst [vmem:[%s12189_s12 + $0x1328] sm:$0xff] %v1474_v37  ;;  %v1478_v39 = vld [vmem:[%s12184_s11 + $0x2658] sm:$0xff]  ;;  %v1480_v40 = vld [vmem:[%s12184_s11 + $0x2680] sm:$0xff] }
 0x143   : > { %1477 = vst [vmem:[%s12189_s12 + $0x1330] sm:$0xff] %v1476_v38  ;;  %v1482_v41 = vld [vmem:[%s12184_s11 + $0x2688] sm:$0xff]  ;;  %1479 = vst [vmem:[%s12189_s12 + $0x1338] sm:$0xff] %v1478_v39  ;;  %v1484_v42 = vld [vmem:[%s12184_s11 + $0x2690] sm:$0xff] }
 0x144   : > { %1481 = vst [vmem:[%s12189_s12 + $0x1340] sm:$0xff] %v1480_v40  ;;  %1483 = vst [vmem:[%s12189_s12 + $0x1348] sm:$0xff] %v1482_v41  ;;  %v1486_v43 = vld [vmem:[%s12184_s11 + $0x2698] sm:$0xff]  ;;  %v1488_v44 = vld [vmem:[%s12184_s11 + $0x26c0] sm:$0xff] }
 0x145   : > { %1485 = vst [vmem:[%s12189_s12 + $0x1350] sm:$0xff] %v1484_v42  ;;  %1487 = vst [vmem:[%s12189_s12 + $0x1358] sm:$0xff] %v1486_v43  ;;  %v1490_v45 = vld [vmem:[%s12184_s11 + $0x26c8] sm:$0xff]  ;;  %v1492_v46 = vld [vmem:[%s12184_s11 + $0x26d0] sm:$0xff] }
 0x146   : > { %1489 = vst [vmem:[%s12189_s12 + $0x1360] sm:$0xff] %v1488_v44  ;;  %v1494_v47 = vld [vmem:[%s12184_s11 + $0x26d8] sm:$0xff]  ;;  %1491 = vst [vmem:[%s12189_s12 + $0x1368] sm:$0xff] %v1490_v45  ;;  %v1496_v48 = vld [vmem:[%s12184_s11 + $0x2700] sm:$0xff] }
 0x147   : > { %1493 = vst [vmem:[%s12189_s12 + $0x1370] sm:$0xff] %v1492_v46  ;;  %1495 = vst [vmem:[%s12189_s12 + $0x1378] sm:$0xff] %v1494_v47  ;;  %v1498_v49 = vld [vmem:[%s12184_s11 + $0x2708] sm:$0xff]  ;;  %v1500_v50 = vld [vmem:[%s12184_s11 + $0x2710] sm:$0xff] }
 0x148   : > { %1497 = vst [vmem:[%s12189_s12 + $0x1380] sm:$0xff] %v1496_v48  ;;  %1499 = vst [vmem:[%s12189_s12 + $0x1388] sm:$0xff] %v1498_v49  ;;  %v1502_v51 = vld [vmem:[%s12184_s11 + $0x2718] sm:$0xff]  ;;  %v1504_v52 = vld [vmem:[%s12184_s11 + $0x2740] sm:$0xff] }
 0x149   : > { %1501 = vst [vmem:[%s12189_s12 + $0x1390] sm:$0xff] %v1500_v50  ;;  %v1506_v53 = vld [vmem:[%s12184_s11 + $0x2748] sm:$0xff]  ;;  %1503 = vst [vmem:[%s12189_s12 + $0x1398] sm:$0xff] %v1502_v51  ;;  %v1508_v54 = vld [vmem:[%s12184_s11 + $0x2750] sm:$0xff] }
 0x14a   : > { %1505 = vst [vmem:[%s12189_s12 + $0x13a0] sm:$0xff] %v1504_v52  ;;  %1507 = vst [vmem:[%s12189_s12 + $0x13a8] sm:$0xff] %v1506_v53  ;;  %v1510_v55 = vld [vmem:[%s12184_s11 + $0x2758] sm:$0xff]  ;;  %v1512_v56 = vld [vmem:[%s12184_s11 + $0x2780] sm:$0xff] }
 0x14b   : > { %1509 = vst [vmem:[%s12189_s12 + $0x13b0] sm:$0xff] %v1508_v54  ;;  %1511 = vst [vmem:[%s12189_s12 + $0x13b8] sm:$0xff] %v1510_v55  ;;  %v1514_v57 = vld [vmem:[%s12184_s11 + $0x2788] sm:$0xff]  ;;  %v1516_v58 = vld [vmem:[%s12184_s11 + $0x2790] sm:$0xff] }
 0x14c   : > { %1513 = vst [vmem:[%s12189_s12 + $0x13c0] sm:$0xff] %v1512_v56  ;;  %v1518_v59 = vld [vmem:[%s12184_s11 + $0x2798] sm:$0xff]  ;;  %1515 = vst [vmem:[%s12189_s12 + $0x13c8] sm:$0xff] %v1514_v57  ;;  %v1520_v60 = vld [vmem:[%s12184_s11 + $0x27c0] sm:$0xff] }
 0x14d   : > { %1517 = vst [vmem:[%s12189_s12 + $0x13d0] sm:$0xff] %v1516_v58  ;;  %1519 = vst [vmem:[%s12189_s12 + $0x13d8] sm:$0xff] %v1518_v59  ;;  %v1522_v61 = vld [vmem:[%s12184_s11 + $0x27c8] sm:$0xff]  ;;  %v1524_v62 = vld [vmem:[%s12184_s11 + $0x27d0] sm:$0xff] }
 0x14e   : > { %1521 = vst [vmem:[%s12189_s12 + $0x13e0] sm:$0xff] %v1520_v60  ;;  %1523 = vst [vmem:[%s12189_s12 + $0x13e8] sm:$0xff] %v1522_v61  ;;  %v1526_v63 = vld [vmem:[%s12184_s11 + $0x27d8] sm:$0xff]  ;;  %v1528_v0 = vld [vmem:[%s12184_s11 + $0x2800] sm:$0xff] }
 0x14f   : > { %1525 = vst [vmem:[%s12189_s12 + $0x13f0] sm:$0xff] %v1524_v62  ;;  %v1530_v1 = vld [vmem:[%s12184_s11 + $0x2808] sm:$0xff]  ;;  %1527 = vst [vmem:[%s12189_s12 + $0x13f8] sm:$0xff] %v1526_v63  ;;  %v1532_v2 = vld [vmem:[%s12184_s11 + $0x2810] sm:$0xff] }
 0x150   : > { %1529 = vst [vmem:[%s12189_s12 + $0x1400] sm:$0xff] %v1528_v0  ;;  %1531 = vst [vmem:[%s12189_s12 + $0x1408] sm:$0xff] %v1530_v1  ;;  %v1534_v3 = vld [vmem:[%s12184_s11 + $0x2818] sm:$0xff]  ;;  %v1536_v4 = vld [vmem:[%s12184_s11 + $0x2840] sm:$0xff] }
 0x151   : > { %1533 = vst [vmem:[%s12189_s12 + $0x1410] sm:$0xff] %v1532_v2  ;;  %1535 = vst [vmem:[%s12189_s12 + $0x1418] sm:$0xff] %v1534_v3  ;;  %v1538_v5 = vld [vmem:[%s12184_s11 + $0x2848] sm:$0xff]  ;;  %v1540_v6 = vld [vmem:[%s12184_s11 + $0x2850] sm:$0xff] }
 0x152   : > { %1537 = vst [vmem:[%s12189_s12 + $0x1420] sm:$0xff] %v1536_v4  ;;  %v1542_v7 = vld [vmem:[%s12184_s11 + $0x2858] sm:$0xff]  ;;  %1539 = vst [vmem:[%s12189_s12 + $0x1428] sm:$0xff] %v1538_v5  ;;  %v1544_v8 = vld [vmem:[%s12184_s11 + $0x2880] sm:$0xff] }
 0x153   : > { %1541 = vst [vmem:[%s12189_s12 + $0x1430] sm:$0xff] %v1540_v6  ;;  %1543 = vst [vmem:[%s12189_s12 + $0x1438] sm:$0xff] %v1542_v7  ;;  %v1546_v9 = vld [vmem:[%s12184_s11 + $0x2888] sm:$0xff]  ;;  %v1548_v10 = vld [vmem:[%s12184_s11 + $0x2890] sm:$0xff] }
 0x154   : > { %1545 = vst [vmem:[%s12189_s12 + $0x1440] sm:$0xff] %v1544_v8  ;;  %1547 = vst [vmem:[%s12189_s12 + $0x1448] sm:$0xff] %v1546_v9  ;;  %v1550_v11 = vld [vmem:[%s12184_s11 + $0x2898] sm:$0xff]  ;;  %v1552_v12 = vld [vmem:[%s12184_s11 + $0x28c0] sm:$0xff] }
 0x155   : > { %1549 = vst [vmem:[%s12189_s12 + $0x1450] sm:$0xff] %v1548_v10  ;;  %v1554_v13 = vld [vmem:[%s12184_s11 + $0x28c8] sm:$0xff]  ;;  %1551 = vst [vmem:[%s12189_s12 + $0x1458] sm:$0xff] %v1550_v11  ;;  %v1556_v14 = vld [vmem:[%s12184_s11 + $0x28d0] sm:$0xff] }
 0x156   : > { %1553 = vst [vmem:[%s12189_s12 + $0x1460] sm:$0xff] %v1552_v12  ;;  %1555 = vst [vmem:[%s12189_s12 + $0x1468] sm:$0xff] %v1554_v13  ;;  %v1558_v15 = vld [vmem:[%s12184_s11 + $0x28d8] sm:$0xff]  ;;  %v1560_v16 = vld [vmem:[%s12184_s11 + $0x2900] sm:$0xff] }
 0x157   : > { %1557 = vst [vmem:[%s12189_s12 + $0x1470] sm:$0xff] %v1556_v14  ;;  %1559 = vst [vmem:[%s12189_s12 + $0x1478] sm:$0xff] %v1558_v15  ;;  %v1562_v17 = vld [vmem:[%s12184_s11 + $0x2908] sm:$0xff]  ;;  %v1564_v18 = vld [vmem:[%s12184_s11 + $0x2910] sm:$0xff] }
 0x158   : > { %1561 = vst [vmem:[%s12189_s12 + $0x1480] sm:$0xff] %v1560_v16  ;;  %v1566_v19 = vld [vmem:[%s12184_s11 + $0x2918] sm:$0xff]  ;;  %1563 = vst [vmem:[%s12189_s12 + $0x1488] sm:$0xff] %v1562_v17  ;;  %v1568_v20 = vld [vmem:[%s12184_s11 + $0x2940] sm:$0xff] }
 0x159   : > { %1565 = vst [vmem:[%s12189_s12 + $0x1490] sm:$0xff] %v1564_v18  ;;  %1567 = vst [vmem:[%s12189_s12 + $0x1498] sm:$0xff] %v1566_v19  ;;  %v1570_v21 = vld [vmem:[%s12184_s11 + $0x2948] sm:$0xff]  ;;  %v1572_v22 = vld [vmem:[%s12184_s11 + $0x2950] sm:$0xff] }
 0x15a   : > { %1569 = vst [vmem:[%s12189_s12 + $0x14a0] sm:$0xff] %v1568_v20  ;;  %1571 = vst [vmem:[%s12189_s12 + $0x14a8] sm:$0xff] %v1570_v21  ;;  %v1574_v23 = vld [vmem:[%s12184_s11 + $0x2958] sm:$0xff]  ;;  %v1576_v24 = vld [vmem:[%s12184_s11 + $0x2980] sm:$0xff] }
 0x15b   : > { %1573 = vst [vmem:[%s12189_s12 + $0x14b0] sm:$0xff] %v1572_v22  ;;  %v1578_v25 = vld [vmem:[%s12184_s11 + $0x2988] sm:$0xff]  ;;  %1575 = vst [vmem:[%s12189_s12 + $0x14b8] sm:$0xff] %v1574_v23  ;;  %v1580_v26 = vld [vmem:[%s12184_s11 + $0x2990] sm:$0xff] }
 0x15c   : > { %1577 = vst [vmem:[%s12189_s12 + $0x14c0] sm:$0xff] %v1576_v24  ;;  %1579 = vst [vmem:[%s12189_s12 + $0x14c8] sm:$0xff] %v1578_v25  ;;  %v1582_v27 = vld [vmem:[%s12184_s11 + $0x2998] sm:$0xff]  ;;  %v1584_v28 = vld [vmem:[%s12184_s11 + $0x29c0] sm:$0xff] }
 0x15d   : > { %1581 = vst [vmem:[%s12189_s12 + $0x14d0] sm:$0xff] %v1580_v26  ;;  %1583 = vst [vmem:[%s12189_s12 + $0x14d8] sm:$0xff] %v1582_v27  ;;  %v1586_v29 = vld [vmem:[%s12184_s11 + $0x29c8] sm:$0xff]  ;;  %v1588_v30 = vld [vmem:[%s12184_s11 + $0x29d0] sm:$0xff] }
 0x15e   : > { %1585 = vst [vmem:[%s12189_s12 + $0x14e0] sm:$0xff] %v1584_v28  ;;  %v1590_v31 = vld [vmem:[%s12184_s11 + $0x29d8] sm:$0xff]  ;;  %1587 = vst [vmem:[%s12189_s12 + $0x14e8] sm:$0xff] %v1586_v29  ;;  %v1592_v32 = vld [vmem:[%s12184_s11 + $0x2a00] sm:$0xff] }
 0x15f   : > { %1589 = vst [vmem:[%s12189_s12 + $0x14f0] sm:$0xff] %v1588_v30  ;;  %1591 = vst [vmem:[%s12189_s12 + $0x14f8] sm:$0xff] %v1590_v31  ;;  %v1594_v33 = vld [vmem:[%s12184_s11 + $0x2a08] sm:$0xff]  ;;  %v1596_v34 = vld [vmem:[%s12184_s11 + $0x2a10] sm:$0xff] }
 0x160   : > { %1593 = vst [vmem:[%s12189_s12 + $0x1500] sm:$0xff] %v1592_v32  ;;  %1595 = vst [vmem:[%s12189_s12 + $0x1508] sm:$0xff] %v1594_v33  ;;  %v1598_v35 = vld [vmem:[%s12184_s11 + $0x2a18] sm:$0xff]  ;;  %v1600_v36 = vld [vmem:[%s12184_s11 + $0x2a40] sm:$0xff] }
 0x161   : > { %1597 = vst [vmem:[%s12189_s12 + $0x1510] sm:$0xff] %v1596_v34  ;;  %v1602_v37 = vld [vmem:[%s12184_s11 + $0x2a48] sm:$0xff]  ;;  %1599 = vst [vmem:[%s12189_s12 + $0x1518] sm:$0xff] %v1598_v35  ;;  %v1604_v38 = vld [vmem:[%s12184_s11 + $0x2a50] sm:$0xff] }
 0x162   : > { %1601 = vst [vmem:[%s12189_s12 + $0x1520] sm:$0xff] %v1600_v36  ;;  %1603 = vst [vmem:[%s12189_s12 + $0x1528] sm:$0xff] %v1602_v37  ;;  %v1606_v39 = vld [vmem:[%s12184_s11 + $0x2a58] sm:$0xff]  ;;  %v1608_v40 = vld [vmem:[%s12184_s11 + $0x2a80] sm:$0xff] }
 0x163   : > { %1605 = vst [vmem:[%s12189_s12 + $0x1530] sm:$0xff] %v1604_v38  ;;  %1607 = vst [vmem:[%s12189_s12 + $0x1538] sm:$0xff] %v1606_v39  ;;  %v1610_v41 = vld [vmem:[%s12184_s11 + $0x2a88] sm:$0xff]  ;;  %v1612_v42 = vld [vmem:[%s12184_s11 + $0x2a90] sm:$0xff] }
 0x164   : > { %1609 = vst [vmem:[%s12189_s12 + $0x1540] sm:$0xff] %v1608_v40  ;;  %v1614_v43 = vld [vmem:[%s12184_s11 + $0x2a98] sm:$0xff]  ;;  %1611 = vst [vmem:[%s12189_s12 + $0x1548] sm:$0xff] %v1610_v41  ;;  %v1616_v44 = vld [vmem:[%s12184_s11 + $0x2ac0] sm:$0xff] }
 0x165   : > { %1613 = vst [vmem:[%s12189_s12 + $0x1550] sm:$0xff] %v1612_v42  ;;  %1615 = vst [vmem:[%s12189_s12 + $0x1558] sm:$0xff] %v1614_v43  ;;  %v1618_v45 = vld [vmem:[%s12184_s11 + $0x2ac8] sm:$0xff]  ;;  %v1620_v46 = vld [vmem:[%s12184_s11 + $0x2ad0] sm:$0xff] }
 0x166   : > { %1617 = vst [vmem:[%s12189_s12 + $0x1560] sm:$0xff] %v1616_v44  ;;  %1619 = vst [vmem:[%s12189_s12 + $0x1568] sm:$0xff] %v1618_v45  ;;  %v1622_v47 = vld [vmem:[%s12184_s11 + $0x2ad8] sm:$0xff]  ;;  %v1624_v48 = vld [vmem:[%s12184_s11 + $0x2b00] sm:$0xff] }
 0x167   : > { %1621 = vst [vmem:[%s12189_s12 + $0x1570] sm:$0xff] %v1620_v46  ;;  %v1626_v49 = vld [vmem:[%s12184_s11 + $0x2b08] sm:$0xff]  ;;  %1623 = vst [vmem:[%s12189_s12 + $0x1578] sm:$0xff] %v1622_v47  ;;  %v1628_v50 = vld [vmem:[%s12184_s11 + $0x2b10] sm:$0xff] }
 0x168   : > { %1625 = vst [vmem:[%s12189_s12 + $0x1580] sm:$0xff] %v1624_v48  ;;  %1627 = vst [vmem:[%s12189_s12 + $0x1588] sm:$0xff] %v1626_v49  ;;  %v1630_v51 = vld [vmem:[%s12184_s11 + $0x2b18] sm:$0xff]  ;;  %v1632_v52 = vld [vmem:[%s12184_s11 + $0x2b40] sm:$0xff] }
 0x169   : > { %1629 = vst [vmem:[%s12189_s12 + $0x1590] sm:$0xff] %v1628_v50  ;;  %1631 = vst [vmem:[%s12189_s12 + $0x1598] sm:$0xff] %v1630_v51  ;;  %v1634_v53 = vld [vmem:[%s12184_s11 + $0x2b48] sm:$0xff]  ;;  %v1636_v54 = vld [vmem:[%s12184_s11 + $0x2b50] sm:$0xff] }
 0x16a   : > { %1633 = vst [vmem:[%s12189_s12 + $0x15a0] sm:$0xff] %v1632_v52  ;;  %v1638_v55 = vld [vmem:[%s12184_s11 + $0x2b58] sm:$0xff]  ;;  %1635 = vst [vmem:[%s12189_s12 + $0x15a8] sm:$0xff] %v1634_v53  ;;  %v1640_v56 = vld [vmem:[%s12184_s11 + $0x2b80] sm:$0xff] }
 0x16b   : > { %1637 = vst [vmem:[%s12189_s12 + $0x15b0] sm:$0xff] %v1636_v54  ;;  %1639 = vst [vmem:[%s12189_s12 + $0x15b8] sm:$0xff] %v1638_v55  ;;  %v1642_v57 = vld [vmem:[%s12184_s11 + $0x2b88] sm:$0xff]  ;;  %v1644_v58 = vld [vmem:[%s12184_s11 + $0x2b90] sm:$0xff] }
 0x16c   : > { %1641 = vst [vmem:[%s12189_s12 + $0x15c0] sm:$0xff] %v1640_v56  ;;  %1643 = vst [vmem:[%s12189_s12 + $0x15c8] sm:$0xff] %v1642_v57  ;;  %v1646_v59 = vld [vmem:[%s12184_s11 + $0x2b98] sm:$0xff]  ;;  %v1648_v60 = vld [vmem:[%s12184_s11 + $0x2bc0] sm:$0xff] }
 0x16d   : > { %1645 = vst [vmem:[%s12189_s12 + $0x15d0] sm:$0xff] %v1644_v58  ;;  %v1650_v61 = vld [vmem:[%s12184_s11 + $0x2bc8] sm:$0xff]  ;;  %1647 = vst [vmem:[%s12189_s12 + $0x15d8] sm:$0xff] %v1646_v59  ;;  %v1652_v62 = vld [vmem:[%s12184_s11 + $0x2bd0] sm:$0xff] }
 0x16e   : > { %1649 = vst [vmem:[%s12189_s12 + $0x15e0] sm:$0xff] %v1648_v60  ;;  %1651 = vst [vmem:[%s12189_s12 + $0x15e8] sm:$0xff] %v1650_v61  ;;  %v1654_v63 = vld [vmem:[%s12184_s11 + $0x2bd8] sm:$0xff]  ;;  %v1656_v0 = vld [vmem:[%s12184_s11 + $0x2c00] sm:$0xff] }
 0x16f   : > { %1653 = vst [vmem:[%s12189_s12 + $0x15f0] sm:$0xff] %v1652_v62  ;;  %1655 = vst [vmem:[%s12189_s12 + $0x15f8] sm:$0xff] %v1654_v63  ;;  %v1658_v1 = vld [vmem:[%s12184_s11 + $0x2c08] sm:$0xff]  ;;  %v1660_v2 = vld [vmem:[%s12184_s11 + $0x2c10] sm:$0xff] }
 0x170   : > { %1657 = vst [vmem:[%s12189_s12 + $0x1600] sm:$0xff] %v1656_v0  ;;  %v1662_v3 = vld [vmem:[%s12184_s11 + $0x2c18] sm:$0xff]  ;;  %1659 = vst [vmem:[%s12189_s12 + $0x1608] sm:$0xff] %v1658_v1  ;;  %v1664_v4 = vld [vmem:[%s12184_s11 + $0x2c40] sm:$0xff] }
 0x171   : > { %1661 = vst [vmem:[%s12189_s12 + $0x1610] sm:$0xff] %v1660_v2  ;;  %1663 = vst [vmem:[%s12189_s12 + $0x1618] sm:$0xff] %v1662_v3  ;;  %v1666_v5 = vld [vmem:[%s12184_s11 + $0x2c48] sm:$0xff]  ;;  %v1668_v6 = vld [vmem:[%s12184_s11 + $0x2c50] sm:$0xff] }
 0x172   : > { %1665 = vst [vmem:[%s12189_s12 + $0x1620] sm:$0xff] %v1664_v4  ;;  %1667 = vst [vmem:[%s12189_s12 + $0x1628] sm:$0xff] %v1666_v5  ;;  %v1670_v7 = vld [vmem:[%s12184_s11 + $0x2c58] sm:$0xff]  ;;  %v1672_v8 = vld [vmem:[%s12184_s11 + $0x2c80] sm:$0xff] }
 0x173   : > { %1669 = vst [vmem:[%s12189_s12 + $0x1630] sm:$0xff] %v1668_v6  ;;  %v1674_v9 = vld [vmem:[%s12184_s11 + $0x2c88] sm:$0xff]  ;;  %1671 = vst [vmem:[%s12189_s12 + $0x1638] sm:$0xff] %v1670_v7  ;;  %v1676_v10 = vld [vmem:[%s12184_s11 + $0x2c90] sm:$0xff] }
 0x174   : > { %1673 = vst [vmem:[%s12189_s12 + $0x1640] sm:$0xff] %v1672_v8  ;;  %1675 = vst [vmem:[%s12189_s12 + $0x1648] sm:$0xff] %v1674_v9  ;;  %v1678_v11 = vld [vmem:[%s12184_s11 + $0x2c98] sm:$0xff]  ;;  %v1680_v12 = vld [vmem:[%s12184_s11 + $0x2cc0] sm:$0xff] }
 0x175   : > { %1677 = vst [vmem:[%s12189_s12 + $0x1650] sm:$0xff] %v1676_v10  ;;  %1679 = vst [vmem:[%s12189_s12 + $0x1658] sm:$0xff] %v1678_v11  ;;  %v1682_v13 = vld [vmem:[%s12184_s11 + $0x2cc8] sm:$0xff]  ;;  %v1684_v14 = vld [vmem:[%s12184_s11 + $0x2cd0] sm:$0xff] }
 0x176   : > { %1681 = vst [vmem:[%s12189_s12 + $0x1660] sm:$0xff] %v1680_v12  ;;  %v1686_v15 = vld [vmem:[%s12184_s11 + $0x2cd8] sm:$0xff]  ;;  %1683 = vst [vmem:[%s12189_s12 + $0x1668] sm:$0xff] %v1682_v13  ;;  %v1688_v16 = vld [vmem:[%s12184_s11 + $0x2d00] sm:$0xff] }
 0x177   : > { %1685 = vst [vmem:[%s12189_s12 + $0x1670] sm:$0xff] %v1684_v14  ;;  %1687 = vst [vmem:[%s12189_s12 + $0x1678] sm:$0xff] %v1686_v15  ;;  %v1690_v17 = vld [vmem:[%s12184_s11 + $0x2d08] sm:$0xff]  ;;  %v1692_v18 = vld [vmem:[%s12184_s11 + $0x2d10] sm:$0xff] }
 0x178   : > { %1689 = vst [vmem:[%s12189_s12 + $0x1680] sm:$0xff] %v1688_v16  ;;  %1691 = vst [vmem:[%s12189_s12 + $0x1688] sm:$0xff] %v1690_v17  ;;  %v1694_v19 = vld [vmem:[%s12184_s11 + $0x2d18] sm:$0xff]  ;;  %v1696_v20 = vld [vmem:[%s12184_s11 + $0x2d40] sm:$0xff] }
 0x179   : > { %1693 = vst [vmem:[%s12189_s12 + $0x1690] sm:$0xff] %v1692_v18  ;;  %v1698_v21 = vld [vmem:[%s12184_s11 + $0x2d48] sm:$0xff]  ;;  %1695 = vst [vmem:[%s12189_s12 + $0x1698] sm:$0xff] %v1694_v19  ;;  %v1700_v22 = vld [vmem:[%s12184_s11 + $0x2d50] sm:$0xff] }
 0x17a   : > { %1697 = vst [vmem:[%s12189_s12 + $0x16a0] sm:$0xff] %v1696_v20  ;;  %1699 = vst [vmem:[%s12189_s12 + $0x16a8] sm:$0xff] %v1698_v21  ;;  %v1702_v23 = vld [vmem:[%s12184_s11 + $0x2d58] sm:$0xff]  ;;  %v1704_v24 = vld [vmem:[%s12184_s11 + $0x2d80] sm:$0xff] }
 0x17b   : > { %1701 = vst [vmem:[%s12189_s12 + $0x16b0] sm:$0xff] %v1700_v22  ;;  %1703 = vst [vmem:[%s12189_s12 + $0x16b8] sm:$0xff] %v1702_v23  ;;  %v1706_v25 = vld [vmem:[%s12184_s11 + $0x2d88] sm:$0xff]  ;;  %v1708_v26 = vld [vmem:[%s12184_s11 + $0x2d90] sm:$0xff] }
 0x17c   : > { %1705 = vst [vmem:[%s12189_s12 + $0x16c0] sm:$0xff] %v1704_v24  ;;  %v1710_v27 = vld [vmem:[%s12184_s11 + $0x2d98] sm:$0xff]  ;;  %1707 = vst [vmem:[%s12189_s12 + $0x16c8] sm:$0xff] %v1706_v25  ;;  %v1712_v28 = vld [vmem:[%s12184_s11 + $0x2dc0] sm:$0xff] }
 0x17d   : > { %1709 = vst [vmem:[%s12189_s12 + $0x16d0] sm:$0xff] %v1708_v26  ;;  %1711 = vst [vmem:[%s12189_s12 + $0x16d8] sm:$0xff] %v1710_v27  ;;  %v1714_v29 = vld [vmem:[%s12184_s11 + $0x2dc8] sm:$0xff]  ;;  %v1716_v30 = vld [vmem:[%s12184_s11 + $0x2dd0] sm:$0xff] }
 0x17e   : > { %1713 = vst [vmem:[%s12189_s12 + $0x16e0] sm:$0xff] %v1712_v28  ;;  %1715 = vst [vmem:[%s12189_s12 + $0x16e8] sm:$0xff] %v1714_v29  ;;  %v1718_v31 = vld [vmem:[%s12184_s11 + $0x2dd8] sm:$0xff]  ;;  %v1720_v32 = vld [vmem:[%s12184_s11 + $0x2e00] sm:$0xff] }
 0x17f   : > { %1717 = vst [vmem:[%s12189_s12 + $0x16f0] sm:$0xff] %v1716_v30  ;;  %v1722_v33 = vld [vmem:[%s12184_s11 + $0x2e08] sm:$0xff]  ;;  %1719 = vst [vmem:[%s12189_s12 + $0x16f8] sm:$0xff] %v1718_v31  ;;  %v1724_v34 = vld [vmem:[%s12184_s11 + $0x2e10] sm:$0xff] }
 0x180   : > { %1721 = vst [vmem:[%s12189_s12 + $0x1700] sm:$0xff] %v1720_v32  ;;  %1723 = vst [vmem:[%s12189_s12 + $0x1708] sm:$0xff] %v1722_v33  ;;  %v1726_v35 = vld [vmem:[%s12184_s11 + $0x2e18] sm:$0xff]  ;;  %v1728_v36 = vld [vmem:[%s12184_s11 + $0x2e40] sm:$0xff] }
 0x181   : > { %1725 = vst [vmem:[%s12189_s12 + $0x1710] sm:$0xff] %v1724_v34  ;;  %1727 = vst [vmem:[%s12189_s12 + $0x1718] sm:$0xff] %v1726_v35  ;;  %v1730_v37 = vld [vmem:[%s12184_s11 + $0x2e48] sm:$0xff]  ;;  %v1732_v38 = vld [vmem:[%s12184_s11 + $0x2e50] sm:$0xff] }
 0x182   : > { %1729 = vst [vmem:[%s12189_s12 + $0x1720] sm:$0xff] %v1728_v36  ;;  %v1734_v39 = vld [vmem:[%s12184_s11 + $0x2e58] sm:$0xff]  ;;  %1731 = vst [vmem:[%s12189_s12 + $0x1728] sm:$0xff] %v1730_v37  ;;  %v1736_v40 = vld [vmem:[%s12184_s11 + $0x2e80] sm:$0xff] }
 0x183   : > { %1733 = vst [vmem:[%s12189_s12 + $0x1730] sm:$0xff] %v1732_v38  ;;  %1735 = vst [vmem:[%s12189_s12 + $0x1738] sm:$0xff] %v1734_v39  ;;  %v1738_v41 = vld [vmem:[%s12184_s11 + $0x2e88] sm:$0xff]  ;;  %v1740_v42 = vld [vmem:[%s12184_s11 + $0x2e90] sm:$0xff] }
 0x184   : > { %1737 = vst [vmem:[%s12189_s12 + $0x1740] sm:$0xff] %v1736_v40  ;;  %1739 = vst [vmem:[%s12189_s12 + $0x1748] sm:$0xff] %v1738_v41  ;;  %v1742_v43 = vld [vmem:[%s12184_s11 + $0x2e98] sm:$0xff]  ;;  %v1744_v44 = vld [vmem:[%s12184_s11 + $0x2ec0] sm:$0xff] }
 0x185   : > { %1741 = vst [vmem:[%s12189_s12 + $0x1750] sm:$0xff] %v1740_v42  ;;  %v1746_v45 = vld [vmem:[%s12184_s11 + $0x2ec8] sm:$0xff]  ;;  %1743 = vst [vmem:[%s12189_s12 + $0x1758] sm:$0xff] %v1742_v43  ;;  %v1748_v46 = vld [vmem:[%s12184_s11 + $0x2ed0] sm:$0xff] }
 0x186   : > { %1745 = vst [vmem:[%s12189_s12 + $0x1760] sm:$0xff] %v1744_v44  ;;  %1747 = vst [vmem:[%s12189_s12 + $0x1768] sm:$0xff] %v1746_v45  ;;  %v1750_v47 = vld [vmem:[%s12184_s11 + $0x2ed8] sm:$0xff]  ;;  %v1752_v48 = vld [vmem:[%s12184_s11 + $0x2f00] sm:$0xff] }
 0x187   : > { %1749 = vst [vmem:[%s12189_s12 + $0x1770] sm:$0xff] %v1748_v46  ;;  %1751 = vst [vmem:[%s12189_s12 + $0x1778] sm:$0xff] %v1750_v47  ;;  %v1754_v49 = vld [vmem:[%s12184_s11 + $0x2f08] sm:$0xff]  ;;  %v1756_v50 = vld [vmem:[%s12184_s11 + $0x2f10] sm:$0xff] }
 0x188   : > { %1753 = vst [vmem:[%s12189_s12 + $0x1780] sm:$0xff] %v1752_v48  ;;  %v1758_v51 = vld [vmem:[%s12184_s11 + $0x2f18] sm:$0xff]  ;;  %1755 = vst [vmem:[%s12189_s12 + $0x1788] sm:$0xff] %v1754_v49  ;;  %v1760_v52 = vld [vmem:[%s12184_s11 + $0x2f40] sm:$0xff] }
 0x189   : > { %1757 = vst [vmem:[%s12189_s12 + $0x1790] sm:$0xff] %v1756_v50  ;;  %1759 = vst [vmem:[%s12189_s12 + $0x1798] sm:$0xff] %v1758_v51  ;;  %v1762_v53 = vld [vmem:[%s12184_s11 + $0x2f48] sm:$0xff]  ;;  %v1764_v54 = vld [vmem:[%s12184_s11 + $0x2f50] sm:$0xff] }
 0x18a   : > { %1761 = vst [vmem:[%s12189_s12 + $0x17a0] sm:$0xff] %v1760_v52  ;;  %1763 = vst [vmem:[%s12189_s12 + $0x17a8] sm:$0xff] %v1762_v53  ;;  %v1766_v55 = vld [vmem:[%s12184_s11 + $0x2f58] sm:$0xff]  ;;  %v1768_v56 = vld [vmem:[%s12184_s11 + $0x2f80] sm:$0xff] }
 0x18b   : > { %1765 = vst [vmem:[%s12189_s12 + $0x17b0] sm:$0xff] %v1764_v54  ;;  %v1770_v57 = vld [vmem:[%s12184_s11 + $0x2f88] sm:$0xff]  ;;  %1767 = vst [vmem:[%s12189_s12 + $0x17b8] sm:$0xff] %v1766_v55  ;;  %v1772_v58 = vld [vmem:[%s12184_s11 + $0x2f90] sm:$0xff] }
 0x18c   : > { %1769 = vst [vmem:[%s12189_s12 + $0x17c0] sm:$0xff] %v1768_v56  ;;  %1771 = vst [vmem:[%s12189_s12 + $0x17c8] sm:$0xff] %v1770_v57  ;;  %v1774_v59 = vld [vmem:[%s12184_s11 + $0x2f98] sm:$0xff]  ;;  %v1776_v60 = vld [vmem:[%s12184_s11 + $0x2fc0] sm:$0xff] }
 0x18d   : > { %1773 = vst [vmem:[%s12189_s12 + $0x17d0] sm:$0xff] %v1772_v58  ;;  %1775 = vst [vmem:[%s12189_s12 + $0x17d8] sm:$0xff] %v1774_v59  ;;  %v1778_v61 = vld [vmem:[%s12184_s11 + $0x2fc8] sm:$0xff]  ;;  %v1780_v62 = vld [vmem:[%s12184_s11 + $0x2fd0] sm:$0xff] }
 0x18e   : > { %1777 = vst [vmem:[%s12189_s12 + $0x17e0] sm:$0xff] %v1776_v60  ;;  %v1782_v63 = vld [vmem:[%s12184_s11 + $0x2fd8] sm:$0xff]  ;;  %1779 = vst [vmem:[%s12189_s12 + $0x17e8] sm:$0xff] %v1778_v61  ;;  %v1784_v0 = vld [vmem:[%s12184_s11 + $0x3000] sm:$0xff] }
 0x18f   : > { %1781 = vst [vmem:[%s12189_s12 + $0x17f0] sm:$0xff] %v1780_v62  ;;  %1783 = vst [vmem:[%s12189_s12 + $0x17f8] sm:$0xff] %v1782_v63  ;;  %v1786_v1 = vld [vmem:[%s12184_s11 + $0x3008] sm:$0xff]  ;;  %v1788_v2 = vld [vmem:[%s12184_s11 + $0x3010] sm:$0xff] }
 0x190   : > { %1785 = vst [vmem:[%s12189_s12 + $0x1800] sm:$0xff] %v1784_v0  ;;  %1787 = vst [vmem:[%s12189_s12 + $0x1808] sm:$0xff] %v1786_v1  ;;  %v1790_v3 = vld [vmem:[%s12184_s11 + $0x3018] sm:$0xff]  ;;  %v1792_v4 = vld [vmem:[%s12184_s11 + $0x3040] sm:$0xff] }
 0x191   : > { %1789 = vst [vmem:[%s12189_s12 + $0x1810] sm:$0xff] %v1788_v2  ;;  %v1794_v5 = vld [vmem:[%s12184_s11 + $0x3048] sm:$0xff]  ;;  %1791 = vst [vmem:[%s12189_s12 + $0x1818] sm:$0xff] %v1790_v3  ;;  %v1796_v6 = vld [vmem:[%s12184_s11 + $0x3050] sm:$0xff] }
 0x192   : > { %1793 = vst [vmem:[%s12189_s12 + $0x1820] sm:$0xff] %v1792_v4  ;;  %1795 = vst [vmem:[%s12189_s12 + $0x1828] sm:$0xff] %v1794_v5  ;;  %v1798_v7 = vld [vmem:[%s12184_s11 + $0x3058] sm:$0xff]  ;;  %v1800_v8 = vld [vmem:[%s12184_s11 + $0x3080] sm:$0xff] }
 0x193   : > { %1797 = vst [vmem:[%s12189_s12 + $0x1830] sm:$0xff] %v1796_v6  ;;  %1799 = vst [vmem:[%s12189_s12 + $0x1838] sm:$0xff] %v1798_v7  ;;  %v1802_v9 = vld [vmem:[%s12184_s11 + $0x3088] sm:$0xff]  ;;  %v1804_v10 = vld [vmem:[%s12184_s11 + $0x3090] sm:$0xff] }
 0x194   : > { %1801 = vst [vmem:[%s12189_s12 + $0x1840] sm:$0xff] %v1800_v8  ;;  %v1806_v11 = vld [vmem:[%s12184_s11 + $0x3098] sm:$0xff]  ;;  %1803 = vst [vmem:[%s12189_s12 + $0x1848] sm:$0xff] %v1802_v9  ;;  %v1808_v12 = vld [vmem:[%s12184_s11 + $0x30c0] sm:$0xff] }
 0x195   : > { %1805 = vst [vmem:[%s12189_s12 + $0x1850] sm:$0xff] %v1804_v10  ;;  %1807 = vst [vmem:[%s12189_s12 + $0x1858] sm:$0xff] %v1806_v11  ;;  %v1810_v13 = vld [vmem:[%s12184_s11 + $0x30c8] sm:$0xff]  ;;  %v1812_v14 = vld [vmem:[%s12184_s11 + $0x30d0] sm:$0xff] }
 0x196   : > { %1809 = vst [vmem:[%s12189_s12 + $0x1860] sm:$0xff] %v1808_v12  ;;  %1811 = vst [vmem:[%s12189_s12 + $0x1868] sm:$0xff] %v1810_v13  ;;  %v1814_v15 = vld [vmem:[%s12184_s11 + $0x30d8] sm:$0xff]  ;;  %v1816_v16 = vld [vmem:[%s12184_s11 + $0x3100] sm:$0xff] }
 0x197   : > { %1813 = vst [vmem:[%s12189_s12 + $0x1870] sm:$0xff] %v1812_v14  ;;  %v1818_v17 = vld [vmem:[%s12184_s11 + $0x3108] sm:$0xff]  ;;  %1815 = vst [vmem:[%s12189_s12 + $0x1878] sm:$0xff] %v1814_v15  ;;  %v1820_v18 = vld [vmem:[%s12184_s11 + $0x3110] sm:$0xff] }
 0x198   : > { %1817 = vst [vmem:[%s12189_s12 + $0x1880] sm:$0xff] %v1816_v16  ;;  %1819 = vst [vmem:[%s12189_s12 + $0x1888] sm:$0xff] %v1818_v17  ;;  %v1822_v19 = vld [vmem:[%s12184_s11 + $0x3118] sm:$0xff]  ;;  %v1824_v20 = vld [vmem:[%s12184_s11 + $0x3140] sm:$0xff] }
 0x199   : > { %1821 = vst [vmem:[%s12189_s12 + $0x1890] sm:$0xff] %v1820_v18  ;;  %1823 = vst [vmem:[%s12189_s12 + $0x1898] sm:$0xff] %v1822_v19  ;;  %v1826_v21 = vld [vmem:[%s12184_s11 + $0x3148] sm:$0xff]  ;;  %v1828_v22 = vld [vmem:[%s12184_s11 + $0x3150] sm:$0xff] }
 0x19a   : > { %1825 = vst [vmem:[%s12189_s12 + $0x18a0] sm:$0xff] %v1824_v20  ;;  %v1830_v23 = vld [vmem:[%s12184_s11 + $0x3158] sm:$0xff]  ;;  %1827 = vst [vmem:[%s12189_s12 + $0x18a8] sm:$0xff] %v1826_v21  ;;  %v1832_v24 = vld [vmem:[%s12184_s11 + $0x3180] sm:$0xff] }
 0x19b   : > { %1829 = vst [vmem:[%s12189_s12 + $0x18b0] sm:$0xff] %v1828_v22  ;;  %1831 = vst [vmem:[%s12189_s12 + $0x18b8] sm:$0xff] %v1830_v23  ;;  %v1834_v25 = vld [vmem:[%s12184_s11 + $0x3188] sm:$0xff]  ;;  %v1836_v26 = vld [vmem:[%s12184_s11 + $0x3190] sm:$0xff] }
 0x19c   : > { %1833 = vst [vmem:[%s12189_s12 + $0x18c0] sm:$0xff] %v1832_v24  ;;  %1835 = vst [vmem:[%s12189_s12 + $0x18c8] sm:$0xff] %v1834_v25  ;;  %v1838_v27 = vld [vmem:[%s12184_s11 + $0x3198] sm:$0xff]  ;;  %v1840_v28 = vld [vmem:[%s12184_s11 + $0x31c0] sm:$0xff] }
 0x19d   : > { %1837 = vst [vmem:[%s12189_s12 + $0x18d0] sm:$0xff] %v1836_v26  ;;  %v1842_v29 = vld [vmem:[%s12184_s11 + $0x31c8] sm:$0xff]  ;;  %1839 = vst [vmem:[%s12189_s12 + $0x18d8] sm:$0xff] %v1838_v27  ;;  %v1844_v30 = vld [vmem:[%s12184_s11 + $0x31d0] sm:$0xff] }
 0x19e   : > { %1841 = vst [vmem:[%s12189_s12 + $0x18e0] sm:$0xff] %v1840_v28  ;;  %1843 = vst [vmem:[%s12189_s12 + $0x18e8] sm:$0xff] %v1842_v29  ;;  %v1846_v31 = vld [vmem:[%s12184_s11 + $0x31d8] sm:$0xff]  ;;  %v1848_v32 = vld [vmem:[%s12184_s11 + $0x3200] sm:$0xff] }
 0x19f   : > { %1845 = vst [vmem:[%s12189_s12 + $0x18f0] sm:$0xff] %v1844_v30  ;;  %1847 = vst [vmem:[%s12189_s12 + $0x18f8] sm:$0xff] %v1846_v31  ;;  %v1850_v33 = vld [vmem:[%s12184_s11 + $0x3208] sm:$0xff]  ;;  %v1852_v34 = vld [vmem:[%s12184_s11 + $0x3210] sm:$0xff] }
 0x1a0   : > { %1849 = vst [vmem:[%s12189_s12 + $0x1900] sm:$0xff] %v1848_v32  ;;  %v1854_v35 = vld [vmem:[%s12184_s11 + $0x3218] sm:$0xff]  ;;  %1851 = vst [vmem:[%s12189_s12 + $0x1908] sm:$0xff] %v1850_v33  ;;  %v1856_v36 = vld [vmem:[%s12184_s11 + $0x3240] sm:$0xff] }
 0x1a1   : > { %1853 = vst [vmem:[%s12189_s12 + $0x1910] sm:$0xff] %v1852_v34  ;;  %1855 = vst [vmem:[%s12189_s12 + $0x1918] sm:$0xff] %v1854_v35  ;;  %v1858_v37 = vld [vmem:[%s12184_s11 + $0x3248] sm:$0xff]  ;;  %v1860_v38 = vld [vmem:[%s12184_s11 + $0x3250] sm:$0xff] }
 0x1a2   : > { %1857 = vst [vmem:[%s12189_s12 + $0x1920] sm:$0xff] %v1856_v36  ;;  %1859 = vst [vmem:[%s12189_s12 + $0x1928] sm:$0xff] %v1858_v37  ;;  %v1862_v39 = vld [vmem:[%s12184_s11 + $0x3258] sm:$0xff]  ;;  %v1864_v40 = vld [vmem:[%s12184_s11 + $0x3280] sm:$0xff] }
 0x1a3   : > { %1861 = vst [vmem:[%s12189_s12 + $0x1930] sm:$0xff] %v1860_v38  ;;  %v1866_v41 = vld [vmem:[%s12184_s11 + $0x3288] sm:$0xff]  ;;  %1863 = vst [vmem:[%s12189_s12 + $0x1938] sm:$0xff] %v1862_v39  ;;  %v1868_v42 = vld [vmem:[%s12184_s11 + $0x3290] sm:$0xff] }
 0x1a4   : > { %1865 = vst [vmem:[%s12189_s12 + $0x1940] sm:$0xff] %v1864_v40  ;;  %1867 = vst [vmem:[%s12189_s12 + $0x1948] sm:$0xff] %v1866_v41  ;;  %v1870_v43 = vld [vmem:[%s12184_s11 + $0x3298] sm:$0xff]  ;;  %v1872_v44 = vld [vmem:[%s12184_s11 + $0x32c0] sm:$0xff] }
 0x1a5   : > { %1869 = vst [vmem:[%s12189_s12 + $0x1950] sm:$0xff] %v1868_v42  ;;  %1871 = vst [vmem:[%s12189_s12 + $0x1958] sm:$0xff] %v1870_v43  ;;  %v1874_v45 = vld [vmem:[%s12184_s11 + $0x32c8] sm:$0xff]  ;;  %v1876_v46 = vld [vmem:[%s12184_s11 + $0x32d0] sm:$0xff] }
 0x1a6   : > { %1873 = vst [vmem:[%s12189_s12 + $0x1960] sm:$0xff] %v1872_v44  ;;  %v1878_v47 = vld [vmem:[%s12184_s11 + $0x32d8] sm:$0xff]  ;;  %1875 = vst [vmem:[%s12189_s12 + $0x1968] sm:$0xff] %v1874_v45  ;;  %v1880_v48 = vld [vmem:[%s12184_s11 + $0x3300] sm:$0xff] }
 0x1a7   : > { %1877 = vst [vmem:[%s12189_s12 + $0x1970] sm:$0xff] %v1876_v46  ;;  %1879 = vst [vmem:[%s12189_s12 + $0x1978] sm:$0xff] %v1878_v47  ;;  %v1882_v49 = vld [vmem:[%s12184_s11 + $0x3308] sm:$0xff]  ;;  %v1884_v50 = vld [vmem:[%s12184_s11 + $0x3310] sm:$0xff] }
 0x1a8   : > { %1881 = vst [vmem:[%s12189_s12 + $0x1980] sm:$0xff] %v1880_v48  ;;  %1883 = vst [vmem:[%s12189_s12 + $0x1988] sm:$0xff] %v1882_v49  ;;  %v1886_v51 = vld [vmem:[%s12184_s11 + $0x3318] sm:$0xff]  ;;  %v1888_v52 = vld [vmem:[%s12184_s11 + $0x3340] sm:$0xff] }
 0x1a9   : > { %1885 = vst [vmem:[%s12189_s12 + $0x1990] sm:$0xff] %v1884_v50  ;;  %v1890_v53 = vld [vmem:[%s12184_s11 + $0x3348] sm:$0xff]  ;;  %1887 = vst [vmem:[%s12189_s12 + $0x1998] sm:$0xff] %v1886_v51  ;;  %v1892_v54 = vld [vmem:[%s12184_s11 + $0x3350] sm:$0xff] }
 0x1aa   : > { %1889 = vst [vmem:[%s12189_s12 + $0x19a0] sm:$0xff] %v1888_v52  ;;  %1891 = vst [vmem:[%s12189_s12 + $0x19a8] sm:$0xff] %v1890_v53  ;;  %v1894_v55 = vld [vmem:[%s12184_s11 + $0x3358] sm:$0xff]  ;;  %v1896_v56 = vld [vmem:[%s12184_s11 + $0x3380] sm:$0xff] }
 0x1ab   : > { %1893 = vst [vmem:[%s12189_s12 + $0x19b0] sm:$0xff] %v1892_v54  ;;  %1895 = vst [vmem:[%s12189_s12 + $0x19b8] sm:$0xff] %v1894_v55  ;;  %v1898_v57 = vld [vmem:[%s12184_s11 + $0x3388] sm:$0xff]  ;;  %v1900_v58 = vld [vmem:[%s12184_s11 + $0x3390] sm:$0xff] }
 0x1ac   : > { %1897 = vst [vmem:[%s12189_s12 + $0x19c0] sm:$0xff] %v1896_v56  ;;  %v1902_v59 = vld [vmem:[%s12184_s11 + $0x3398] sm:$0xff]  ;;  %1899 = vst [vmem:[%s12189_s12 + $0x19c8] sm:$0xff] %v1898_v57  ;;  %v1904_v60 = vld [vmem:[%s12184_s11 + $0x33c0] sm:$0xff] }
 0x1ad   : > { %1901 = vst [vmem:[%s12189_s12 + $0x19d0] sm:$0xff] %v1900_v58  ;;  %1903 = vst [vmem:[%s12189_s12 + $0x19d8] sm:$0xff] %v1902_v59  ;;  %v1906_v61 = vld [vmem:[%s12184_s11 + $0x33c8] sm:$0xff]  ;;  %v1908_v62 = vld [vmem:[%s12184_s11 + $0x33d0] sm:$0xff] }
 0x1ae   : > { %1905 = vst [vmem:[%s12189_s12 + $0x19e0] sm:$0xff] %v1904_v60  ;;  %1907 = vst [vmem:[%s12189_s12 + $0x19e8] sm:$0xff] %v1906_v61  ;;  %v1910_v63 = vld [vmem:[%s12184_s11 + $0x33d8] sm:$0xff]  ;;  %v1912_v0 = vld [vmem:[%s12184_s11 + $0x3400] sm:$0xff] }
 0x1af   : > { %1909 = vst [vmem:[%s12189_s12 + $0x19f0] sm:$0xff] %v1908_v62  ;;  %v1914_v1 = vld [vmem:[%s12184_s11 + $0x3408] sm:$0xff]  ;;  %1911 = vst [vmem:[%s12189_s12 + $0x19f8] sm:$0xff] %v1910_v63  ;;  %v1916_v2 = vld [vmem:[%s12184_s11 + $0x3410] sm:$0xff] }
 0x1b0   : > { %1913 = vst [vmem:[%s12189_s12 + $0x1a00] sm:$0xff] %v1912_v0  ;;  %1915 = vst [vmem:[%s12189_s12 + $0x1a08] sm:$0xff] %v1914_v1  ;;  %v1918_v3 = vld [vmem:[%s12184_s11 + $0x3418] sm:$0xff]  ;;  %v1920_v4 = vld [vmem:[%s12184_s11 + $0x3440] sm:$0xff] }
 0x1b1   : > { %1917 = vst [vmem:[%s12189_s12 + $0x1a10] sm:$0xff] %v1916_v2  ;;  %1919 = vst [vmem:[%s12189_s12 + $0x1a18] sm:$0xff] %v1918_v3  ;;  %v1922_v5 = vld [vmem:[%s12184_s11 + $0x3448] sm:$0xff]  ;;  %v1924_v6 = vld [vmem:[%s12184_s11 + $0x3450] sm:$0xff] }
 0x1b2   : > { %1921 = vst [vmem:[%s12189_s12 + $0x1a20] sm:$0xff] %v1920_v4  ;;  %v1926_v7 = vld [vmem:[%s12184_s11 + $0x3458] sm:$0xff]  ;;  %1923 = vst [vmem:[%s12189_s12 + $0x1a28] sm:$0xff] %v1922_v5  ;;  %v1928_v8 = vld [vmem:[%s12184_s11 + $0x3480] sm:$0xff] }
 0x1b3   : > { %1925 = vst [vmem:[%s12189_s12 + $0x1a30] sm:$0xff] %v1924_v6  ;;  %1927 = vst [vmem:[%s12189_s12 + $0x1a38] sm:$0xff] %v1926_v7  ;;  %v1930_v9 = vld [vmem:[%s12184_s11 + $0x3488] sm:$0xff]  ;;  %v1932_v10 = vld [vmem:[%s12184_s11 + $0x3490] sm:$0xff] }
 0x1b4   : > { %1929 = vst [vmem:[%s12189_s12 + $0x1a40] sm:$0xff] %v1928_v8  ;;  %1931 = vst [vmem:[%s12189_s12 + $0x1a48] sm:$0xff] %v1930_v9  ;;  %v1934_v11 = vld [vmem:[%s12184_s11 + $0x3498] sm:$0xff]  ;;  %v1936_v12 = vld [vmem:[%s12184_s11 + $0x34c0] sm:$0xff] }
 0x1b5   : > { %1933 = vst [vmem:[%s12189_s12 + $0x1a50] sm:$0xff] %v1932_v10  ;;  %v1938_v13 = vld [vmem:[%s12184_s11 + $0x34c8] sm:$0xff]  ;;  %1935 = vst [vmem:[%s12189_s12 + $0x1a58] sm:$0xff] %v1934_v11  ;;  %v1940_v14 = vld [vmem:[%s12184_s11 + $0x34d0] sm:$0xff] }
 0x1b6   : > { %1937 = vst [vmem:[%s12189_s12 + $0x1a60] sm:$0xff] %v1936_v12  ;;  %1939 = vst [vmem:[%s12189_s12 + $0x1a68] sm:$0xff] %v1938_v13  ;;  %v1942_v15 = vld [vmem:[%s12184_s11 + $0x34d8] sm:$0xff]  ;;  %v1944_v16 = vld [vmem:[%s12184_s11 + $0x3500] sm:$0xff] }
 0x1b7   : > { %1941 = vst [vmem:[%s12189_s12 + $0x1a70] sm:$0xff] %v1940_v14  ;;  %1943 = vst [vmem:[%s12189_s12 + $0x1a78] sm:$0xff] %v1942_v15  ;;  %v1946_v17 = vld [vmem:[%s12184_s11 + $0x3508] sm:$0xff]  ;;  %v1948_v18 = vld [vmem:[%s12184_s11 + $0x3510] sm:$0xff] }
 0x1b8   : > { %1945 = vst [vmem:[%s12189_s12 + $0x1a80] sm:$0xff] %v1944_v16  ;;  %v1950_v19 = vld [vmem:[%s12184_s11 + $0x3518] sm:$0xff]  ;;  %1947 = vst [vmem:[%s12189_s12 + $0x1a88] sm:$0xff] %v1946_v17  ;;  %v1952_v20 = vld [vmem:[%s12184_s11 + $0x3540] sm:$0xff] }
 0x1b9   : > { %1949 = vst [vmem:[%s12189_s12 + $0x1a90] sm:$0xff] %v1948_v18  ;;  %1951 = vst [vmem:[%s12189_s12 + $0x1a98] sm:$0xff] %v1950_v19  ;;  %v1954_v21 = vld [vmem:[%s12184_s11 + $0x3548] sm:$0xff]  ;;  %v1956_v22 = vld [vmem:[%s12184_s11 + $0x3550] sm:$0xff] }
 0x1ba   : > { %1953 = vst [vmem:[%s12189_s12 + $0x1aa0] sm:$0xff] %v1952_v20  ;;  %1955 = vst [vmem:[%s12189_s12 + $0x1aa8] sm:$0xff] %v1954_v21  ;;  %v1958_v23 = vld [vmem:[%s12184_s11 + $0x3558] sm:$0xff]  ;;  %v1960_v24 = vld [vmem:[%s12184_s11 + $0x3580] sm:$0xff] }
 0x1bb   : > { %1957 = vst [vmem:[%s12189_s12 + $0x1ab0] sm:$0xff] %v1956_v22  ;;  %v1962_v25 = vld [vmem:[%s12184_s11 + $0x3588] sm:$0xff]  ;;  %1959 = vst [vmem:[%s12189_s12 + $0x1ab8] sm:$0xff] %v1958_v23  ;;  %v1964_v26 = vld [vmem:[%s12184_s11 + $0x3590] sm:$0xff] }
 0x1bc   : > { %1961 = vst [vmem:[%s12189_s12 + $0x1ac0] sm:$0xff] %v1960_v24  ;;  %1963 = vst [vmem:[%s12189_s12 + $0x1ac8] sm:$0xff] %v1962_v25  ;;  %v1966_v27 = vld [vmem:[%s12184_s11 + $0x3598] sm:$0xff]  ;;  %v1968_v28 = vld [vmem:[%s12184_s11 + $0x35c0] sm:$0xff] }
 0x1bd   : > { %1965 = vst [vmem:[%s12189_s12 + $0x1ad0] sm:$0xff] %v1964_v26  ;;  %1967 = vst [vmem:[%s12189_s12 + $0x1ad8] sm:$0xff] %v1966_v27  ;;  %v1970_v29 = vld [vmem:[%s12184_s11 + $0x35c8] sm:$0xff]  ;;  %v1972_v30 = vld [vmem:[%s12184_s11 + $0x35d0] sm:$0xff] }
 0x1be   : > { %1969 = vst [vmem:[%s12189_s12 + $0x1ae0] sm:$0xff] %v1968_v28  ;;  %v1974_v31 = vld [vmem:[%s12184_s11 + $0x35d8] sm:$0xff]  ;;  %1971 = vst [vmem:[%s12189_s12 + $0x1ae8] sm:$0xff] %v1970_v29  ;;  %v1976_v32 = vld [vmem:[%s12184_s11 + $0x3600] sm:$0xff] }
 0x1bf   : > { %1973 = vst [vmem:[%s12189_s12 + $0x1af0] sm:$0xff] %v1972_v30  ;;  %1975 = vst [vmem:[%s12189_s12 + $0x1af8] sm:$0xff] %v1974_v31  ;;  %v1978_v33 = vld [vmem:[%s12184_s11 + $0x3608] sm:$0xff]  ;;  %v1980_v34 = vld [vmem:[%s12184_s11 + $0x3610] sm:$0xff] }
 0x1c0   : > { %1977 = vst [vmem:[%s12189_s12 + $0x1b00] sm:$0xff] %v1976_v32  ;;  %1979 = vst [vmem:[%s12189_s12 + $0x1b08] sm:$0xff] %v1978_v33  ;;  %v1982_v35 = vld [vmem:[%s12184_s11 + $0x3618] sm:$0xff]  ;;  %v1984_v36 = vld [vmem:[%s12184_s11 + $0x3640] sm:$0xff] }
 0x1c1   : > { %1981 = vst [vmem:[%s12189_s12 + $0x1b10] sm:$0xff] %v1980_v34  ;;  %v1986_v37 = vld [vmem:[%s12184_s11 + $0x3648] sm:$0xff]  ;;  %1983 = vst [vmem:[%s12189_s12 + $0x1b18] sm:$0xff] %v1982_v35  ;;  %v1988_v38 = vld [vmem:[%s12184_s11 + $0x3650] sm:$0xff] }
 0x1c2   : > { %1985 = vst [vmem:[%s12189_s12 + $0x1b20] sm:$0xff] %v1984_v36  ;;  %1987 = vst [vmem:[%s12189_s12 + $0x1b28] sm:$0xff] %v1986_v37  ;;  %v1990_v39 = vld [vmem:[%s12184_s11 + $0x3658] sm:$0xff]  ;;  %v1992_v40 = vld [vmem:[%s12184_s11 + $0x3680] sm:$0xff] }
 0x1c3   : > { %1989 = vst [vmem:[%s12189_s12 + $0x1b30] sm:$0xff] %v1988_v38  ;;  %1991 = vst [vmem:[%s12189_s12 + $0x1b38] sm:$0xff] %v1990_v39  ;;  %v1994_v41 = vld [vmem:[%s12184_s11 + $0x3688] sm:$0xff]  ;;  %v1996_v42 = vld [vmem:[%s12184_s11 + $0x3690] sm:$0xff] }
 0x1c4   : > { %1993 = vst [vmem:[%s12189_s12 + $0x1b40] sm:$0xff] %v1992_v40  ;;  %v1998_v43 = vld [vmem:[%s12184_s11 + $0x3698] sm:$0xff]  ;;  %1995 = vst [vmem:[%s12189_s12 + $0x1b48] sm:$0xff] %v1994_v41  ;;  %v2000_v44 = vld [vmem:[%s12184_s11 + $0x36c0] sm:$0xff] }
 0x1c5   : > { %1997 = vst [vmem:[%s12189_s12 + $0x1b50] sm:$0xff] %v1996_v42  ;;  %1999 = vst [vmem:[%s12189_s12 + $0x1b58] sm:$0xff] %v1998_v43  ;;  %v2002_v45 = vld [vmem:[%s12184_s11 + $0x36c8] sm:$0xff]  ;;  %v2004_v46 = vld [vmem:[%s12184_s11 + $0x36d0] sm:$0xff] }
 0x1c6   : > { %2001 = vst [vmem:[%s12189_s12 + $0x1b60] sm:$0xff] %v2000_v44  ;;  %2003 = vst [vmem:[%s12189_s12 + $0x1b68] sm:$0xff] %v2002_v45  ;;  %v2006_v47 = vld [vmem:[%s12184_s11 + $0x36d8] sm:$0xff]  ;;  %v2008_v48 = vld [vmem:[%s12184_s11 + $0x3700] sm:$0xff] }
 0x1c7   : > { %2005 = vst [vmem:[%s12189_s12 + $0x1b70] sm:$0xff] %v2004_v46  ;;  %v2010_v49 = vld [vmem:[%s12184_s11 + $0x3708] sm:$0xff]  ;;  %2007 = vst [vmem:[%s12189_s12 + $0x1b78] sm:$0xff] %v2006_v47  ;;  %v2012_v50 = vld [vmem:[%s12184_s11 + $0x3710] sm:$0xff] }
 0x1c8   : > { %2009 = vst [vmem:[%s12189_s12 + $0x1b80] sm:$0xff] %v2008_v48  ;;  %2011 = vst [vmem:[%s12189_s12 + $0x1b88] sm:$0xff] %v2010_v49  ;;  %v2014_v51 = vld [vmem:[%s12184_s11 + $0x3718] sm:$0xff]  ;;  %v2016_v52 = vld [vmem:[%s12184_s11 + $0x3740] sm:$0xff] }
 0x1c9   : > { %2013 = vst [vmem:[%s12189_s12 + $0x1b90] sm:$0xff] %v2012_v50  ;;  %2015 = vst [vmem:[%s12189_s12 + $0x1b98] sm:$0xff] %v2014_v51  ;;  %v2018_v53 = vld [vmem:[%s12184_s11 + $0x3748] sm:$0xff]  ;;  %v2020_v54 = vld [vmem:[%s12184_s11 + $0x3750] sm:$0xff] }
 0x1ca   : > { %2017 = vst [vmem:[%s12189_s12 + $0x1ba0] sm:$0xff] %v2016_v52  ;;  %v2022_v55 = vld [vmem:[%s12184_s11 + $0x3758] sm:$0xff]  ;;  %2019 = vst [vmem:[%s12189_s12 + $0x1ba8] sm:$0xff] %v2018_v53  ;;  %v2024_v56 = vld [vmem:[%s12184_s11 + $0x3780] sm:$0xff] }
 0x1cb   : > { %2021 = vst [vmem:[%s12189_s12 + $0x1bb0] sm:$0xff] %v2020_v54  ;;  %2023 = vst [vmem:[%s12189_s12 + $0x1bb8] sm:$0xff] %v2022_v55  ;;  %v2026_v57 = vld [vmem:[%s12184_s11 + $0x3788] sm:$0xff]  ;;  %v2028_v58 = vld [vmem:[%s12184_s11 + $0x3790] sm:$0xff] }
 0x1cc   : > { %2025 = vst [vmem:[%s12189_s12 + $0x1bc0] sm:$0xff] %v2024_v56  ;;  %2027 = vst [vmem:[%s12189_s12 + $0x1bc8] sm:$0xff] %v2026_v57  ;;  %v2030_v59 = vld [vmem:[%s12184_s11 + $0x3798] sm:$0xff]  ;;  %v2032_v60 = vld [vmem:[%s12184_s11 + $0x37c0] sm:$0xff] }
 0x1cd   : > { %2029 = vst [vmem:[%s12189_s12 + $0x1bd0] sm:$0xff] %v2028_v58  ;;  %v2034_v61 = vld [vmem:[%s12184_s11 + $0x37c8] sm:$0xff]  ;;  %2031 = vst [vmem:[%s12189_s12 + $0x1bd8] sm:$0xff] %v2030_v59  ;;  %v2036_v62 = vld [vmem:[%s12184_s11 + $0x37d0] sm:$0xff] }
 0x1ce   : > { %2033 = vst [vmem:[%s12189_s12 + $0x1be0] sm:$0xff] %v2032_v60  ;;  %2035 = vst [vmem:[%s12189_s12 + $0x1be8] sm:$0xff] %v2034_v61  ;;  %v2038_v63 = vld [vmem:[%s12184_s11 + $0x37d8] sm:$0xff]  ;;  %v2040_v0 = vld [vmem:[%s12184_s11 + $0x3800] sm:$0xff] }
 0x1cf   : > { %2037 = vst [vmem:[%s12189_s12 + $0x1bf0] sm:$0xff] %v2036_v62  ;;  %2039 = vst [vmem:[%s12189_s12 + $0x1bf8] sm:$0xff] %v2038_v63  ;;  %v2042_v1 = vld [vmem:[%s12184_s11 + $0x3808] sm:$0xff]  ;;  %v2044_v2 = vld [vmem:[%s12184_s11 + $0x3810] sm:$0xff] }
 0x1d0   : > { %2041 = vst [vmem:[%s12189_s12 + $0x1c00] sm:$0xff] %v2040_v0  ;;  %v2046_v3 = vld [vmem:[%s12184_s11 + $0x3818] sm:$0xff]  ;;  %2043 = vst [vmem:[%s12189_s12 + $0x1c08] sm:$0xff] %v2042_v1  ;;  %v2048_v4 = vld [vmem:[%s12184_s11 + $0x3840] sm:$0xff] }
 0x1d1   : > { %2045 = vst [vmem:[%s12189_s12 + $0x1c10] sm:$0xff] %v2044_v2  ;;  %2047 = vst [vmem:[%s12189_s12 + $0x1c18] sm:$0xff] %v2046_v3  ;;  %v2050_v5 = vld [vmem:[%s12184_s11 + $0x3848] sm:$0xff]  ;;  %v2052_v6 = vld [vmem:[%s12184_s11 + $0x3850] sm:$0xff] }
 0x1d2   : > { %2049 = vst [vmem:[%s12189_s12 + $0x1c20] sm:$0xff] %v2048_v4  ;;  %2051 = vst [vmem:[%s12189_s12 + $0x1c28] sm:$0xff] %v2050_v5  ;;  %v2054_v7 = vld [vmem:[%s12184_s11 + $0x3858] sm:$0xff]  ;;  %v2056_v8 = vld [vmem:[%s12184_s11 + $0x3880] sm:$0xff] }
 0x1d3   : > { %2053 = vst [vmem:[%s12189_s12 + $0x1c30] sm:$0xff] %v2052_v6  ;;  %v2058_v9 = vld [vmem:[%s12184_s11 + $0x3888] sm:$0xff]  ;;  %2055 = vst [vmem:[%s12189_s12 + $0x1c38] sm:$0xff] %v2054_v7  ;;  %v2060_v10 = vld [vmem:[%s12184_s11 + $0x3890] sm:$0xff] }
 0x1d4   : > { %2057 = vst [vmem:[%s12189_s12 + $0x1c40] sm:$0xff] %v2056_v8  ;;  %2059 = vst [vmem:[%s12189_s12 + $0x1c48] sm:$0xff] %v2058_v9  ;;  %v2062_v11 = vld [vmem:[%s12184_s11 + $0x3898] sm:$0xff]  ;;  %v2064_v12 = vld [vmem:[%s12184_s11 + $0x38c0] sm:$0xff] }
 0x1d5   : > { %2061 = vst [vmem:[%s12189_s12 + $0x1c50] sm:$0xff] %v2060_v10  ;;  %2063 = vst [vmem:[%s12189_s12 + $0x1c58] sm:$0xff] %v2062_v11  ;;  %v2066_v13 = vld [vmem:[%s12184_s11 + $0x38c8] sm:$0xff]  ;;  %v2068_v14 = vld [vmem:[%s12184_s11 + $0x38d0] sm:$0xff] }
 0x1d6   : > { %2065 = vst [vmem:[%s12189_s12 + $0x1c60] sm:$0xff] %v2064_v12  ;;  %v2070_v15 = vld [vmem:[%s12184_s11 + $0x38d8] sm:$0xff]  ;;  %2067 = vst [vmem:[%s12189_s12 + $0x1c68] sm:$0xff] %v2066_v13  ;;  %v2072_v16 = vld [vmem:[%s12184_s11 + $0x3900] sm:$0xff] }
 0x1d7   : > { %2069 = vst [vmem:[%s12189_s12 + $0x1c70] sm:$0xff] %v2068_v14  ;;  %2071 = vst [vmem:[%s12189_s12 + $0x1c78] sm:$0xff] %v2070_v15  ;;  %v2074_v17 = vld [vmem:[%s12184_s11 + $0x3908] sm:$0xff]  ;;  %v2076_v18 = vld [vmem:[%s12184_s11 + $0x3910] sm:$0xff] }
 0x1d8   : > { %2073 = vst [vmem:[%s12189_s12 + $0x1c80] sm:$0xff] %v2072_v16  ;;  %2075 = vst [vmem:[%s12189_s12 + $0x1c88] sm:$0xff] %v2074_v17  ;;  %v2078_v19 = vld [vmem:[%s12184_s11 + $0x3918] sm:$0xff]  ;;  %v2080_v20 = vld [vmem:[%s12184_s11 + $0x3940] sm:$0xff] }
 0x1d9   : > { %2077 = vst [vmem:[%s12189_s12 + $0x1c90] sm:$0xff] %v2076_v18  ;;  %v2082_v21 = vld [vmem:[%s12184_s11 + $0x3948] sm:$0xff]  ;;  %2079 = vst [vmem:[%s12189_s12 + $0x1c98] sm:$0xff] %v2078_v19  ;;  %v2084_v22 = vld [vmem:[%s12184_s11 + $0x3950] sm:$0xff] }
 0x1da   : > { %2081 = vst [vmem:[%s12189_s12 + $0x1ca0] sm:$0xff] %v2080_v20  ;;  %2083 = vst [vmem:[%s12189_s12 + $0x1ca8] sm:$0xff] %v2082_v21  ;;  %v2086_v23 = vld [vmem:[%s12184_s11 + $0x3958] sm:$0xff]  ;;  %v2088_v24 = vld [vmem:[%s12184_s11 + $0x3980] sm:$0xff] }
 0x1db   : > { %2085 = vst [vmem:[%s12189_s12 + $0x1cb0] sm:$0xff] %v2084_v22  ;;  %2087 = vst [vmem:[%s12189_s12 + $0x1cb8] sm:$0xff] %v2086_v23  ;;  %v2090_v25 = vld [vmem:[%s12184_s11 + $0x3988] sm:$0xff]  ;;  %v2092_v26 = vld [vmem:[%s12184_s11 + $0x3990] sm:$0xff] }
 0x1dc   : > { %2089 = vst [vmem:[%s12189_s12 + $0x1cc0] sm:$0xff] %v2088_v24  ;;  %v2094_v27 = vld [vmem:[%s12184_s11 + $0x3998] sm:$0xff]  ;;  %2091 = vst [vmem:[%s12189_s12 + $0x1cc8] sm:$0xff] %v2090_v25  ;;  %v2096_v28 = vld [vmem:[%s12184_s11 + $0x39c0] sm:$0xff] }
 0x1dd   : > { %2093 = vst [vmem:[%s12189_s12 + $0x1cd0] sm:$0xff] %v2092_v26  ;;  %2095 = vst [vmem:[%s12189_s12 + $0x1cd8] sm:$0xff] %v2094_v27  ;;  %v2098_v29 = vld [vmem:[%s12184_s11 + $0x39c8] sm:$0xff]  ;;  %v2100_v30 = vld [vmem:[%s12184_s11 + $0x39d0] sm:$0xff] }
 0x1de   : > { %2097 = vst [vmem:[%s12189_s12 + $0x1ce0] sm:$0xff] %v2096_v28  ;;  %2099 = vst [vmem:[%s12189_s12 + $0x1ce8] sm:$0xff] %v2098_v29  ;;  %v2102_v31 = vld [vmem:[%s12184_s11 + $0x39d8] sm:$0xff]  ;;  %v2104_v32 = vld [vmem:[%s12184_s11 + $0x3a00] sm:$0xff] }
 0x1df   : > { %2101 = vst [vmem:[%s12189_s12 + $0x1cf0] sm:$0xff] %v2100_v30  ;;  %v2106_v33 = vld [vmem:[%s12184_s11 + $0x3a08] sm:$0xff]  ;;  %2103 = vst [vmem:[%s12189_s12 + $0x1cf8] sm:$0xff] %v2102_v31  ;;  %v2108_v34 = vld [vmem:[%s12184_s11 + $0x3a10] sm:$0xff] }
 0x1e0   : > { %2105 = vst [vmem:[%s12189_s12 + $0x1d00] sm:$0xff] %v2104_v32  ;;  %2107 = vst [vmem:[%s12189_s12 + $0x1d08] sm:$0xff] %v2106_v33  ;;  %v2110_v35 = vld [vmem:[%s12184_s11 + $0x3a18] sm:$0xff]  ;;  %v2112_v36 = vld [vmem:[%s12184_s11 + $0x3a40] sm:$0xff] }
 0x1e1   : > { %2109 = vst [vmem:[%s12189_s12 + $0x1d10] sm:$0xff] %v2108_v34  ;;  %2111 = vst [vmem:[%s12189_s12 + $0x1d18] sm:$0xff] %v2110_v35  ;;  %v2114_v37 = vld [vmem:[%s12184_s11 + $0x3a48] sm:$0xff]  ;;  %v2116_v38 = vld [vmem:[%s12184_s11 + $0x3a50] sm:$0xff] }
 0x1e2   : > { %2113 = vst [vmem:[%s12189_s12 + $0x1d20] sm:$0xff] %v2112_v36  ;;  %v2118_v39 = vld [vmem:[%s12184_s11 + $0x3a58] sm:$0xff]  ;;  %2115 = vst [vmem:[%s12189_s12 + $0x1d28] sm:$0xff] %v2114_v37  ;;  %v2120_v40 = vld [vmem:[%s12184_s11 + $0x3a80] sm:$0xff] }
 0x1e3   : > { %2117 = vst [vmem:[%s12189_s12 + $0x1d30] sm:$0xff] %v2116_v38  ;;  %2119 = vst [vmem:[%s12189_s12 + $0x1d38] sm:$0xff] %v2118_v39  ;;  %v2122_v41 = vld [vmem:[%s12184_s11 + $0x3a88] sm:$0xff]  ;;  %v2124_v42 = vld [vmem:[%s12184_s11 + $0x3a90] sm:$0xff] }
 0x1e4   : > { %2121 = vst [vmem:[%s12189_s12 + $0x1d40] sm:$0xff] %v2120_v40  ;;  %2123 = vst [vmem:[%s12189_s12 + $0x1d48] sm:$0xff] %v2122_v41  ;;  %v2126_v43 = vld [vmem:[%s12184_s11 + $0x3a98] sm:$0xff]  ;;  %v2128_v44 = vld [vmem:[%s12184_s11 + $0x3ac0] sm:$0xff] }
 0x1e5   : > { %2125 = vst [vmem:[%s12189_s12 + $0x1d50] sm:$0xff] %v2124_v42  ;;  %v2130_v45 = vld [vmem:[%s12184_s11 + $0x3ac8] sm:$0xff]  ;;  %2127 = vst [vmem:[%s12189_s12 + $0x1d58] sm:$0xff] %v2126_v43  ;;  %v2132_v46 = vld [vmem:[%s12184_s11 + $0x3ad0] sm:$0xff] }
 0x1e6   : > { %2129 = vst [vmem:[%s12189_s12 + $0x1d60] sm:$0xff] %v2128_v44  ;;  %2131 = vst [vmem:[%s12189_s12 + $0x1d68] sm:$0xff] %v2130_v45  ;;  %v2134_v47 = vld [vmem:[%s12184_s11 + $0x3ad8] sm:$0xff]  ;;  %v2136_v48 = vld [vmem:[%s12184_s11 + $0x3b00] sm:$0xff] }
 0x1e7   : > { %2133 = vst [vmem:[%s12189_s12 + $0x1d70] sm:$0xff] %v2132_v46  ;;  %2135 = vst [vmem:[%s12189_s12 + $0x1d78] sm:$0xff] %v2134_v47  ;;  %v2138_v49 = vld [vmem:[%s12184_s11 + $0x3b08] sm:$0xff]  ;;  %v2140_v50 = vld [vmem:[%s12184_s11 + $0x3b10] sm:$0xff] }
 0x1e8   : > { %2137 = vst [vmem:[%s12189_s12 + $0x1d80] sm:$0xff] %v2136_v48  ;;  %v2142_v51 = vld [vmem:[%s12184_s11 + $0x3b18] sm:$0xff]  ;;  %2139 = vst [vmem:[%s12189_s12 + $0x1d88] sm:$0xff] %v2138_v49  ;;  %v2144_v52 = vld [vmem:[%s12184_s11 + $0x3b40] sm:$0xff] }
 0x1e9   : > { %2141 = vst [vmem:[%s12189_s12 + $0x1d90] sm:$0xff] %v2140_v50  ;;  %2143 = vst [vmem:[%s12189_s12 + $0x1d98] sm:$0xff] %v2142_v51  ;;  %v2146_v53 = vld [vmem:[%s12184_s11 + $0x3b48] sm:$0xff]  ;;  %v2148_v54 = vld [vmem:[%s12184_s11 + $0x3b50] sm:$0xff] }
 0x1ea   : > { %2145 = vst [vmem:[%s12189_s12 + $0x1da0] sm:$0xff] %v2144_v52  ;;  %2147 = vst [vmem:[%s12189_s12 + $0x1da8] sm:$0xff] %v2146_v53  ;;  %v2150_v55 = vld [vmem:[%s12184_s11 + $0x3b58] sm:$0xff]  ;;  %v2152_v56 = vld [vmem:[%s12184_s11 + $0x3b80] sm:$0xff] }
 0x1eb   : > { %2149 = vst [vmem:[%s12189_s12 + $0x1db0] sm:$0xff] %v2148_v54  ;;  %v2154_v57 = vld [vmem:[%s12184_s11 + $0x3b88] sm:$0xff]  ;;  %2151 = vst [vmem:[%s12189_s12 + $0x1db8] sm:$0xff] %v2150_v55  ;;  %v2156_v58 = vld [vmem:[%s12184_s11 + $0x3b90] sm:$0xff] }
 0x1ec   : > { %2153 = vst [vmem:[%s12189_s12 + $0x1dc0] sm:$0xff] %v2152_v56  ;;  %2155 = vst [vmem:[%s12189_s12 + $0x1dc8] sm:$0xff] %v2154_v57  ;;  %v2158_v59 = vld [vmem:[%s12184_s11 + $0x3b98] sm:$0xff]  ;;  %v2160_v60 = vld [vmem:[%s12184_s11 + $0x3bc0] sm:$0xff] }
 0x1ed   : > { %2157 = vst [vmem:[%s12189_s12 + $0x1dd0] sm:$0xff] %v2156_v58  ;;  %2159 = vst [vmem:[%s12189_s12 + $0x1dd8] sm:$0xff] %v2158_v59  ;;  %v2162_v61 = vld [vmem:[%s12184_s11 + $0x3bc8] sm:$0xff]  ;;  %v2164_v62 = vld [vmem:[%s12184_s11 + $0x3bd0] sm:$0xff] }
 0x1ee   : > { %2161 = vst [vmem:[%s12189_s12 + $0x1de0] sm:$0xff] %v2160_v60  ;;  %v2166_v63 = vld [vmem:[%s12184_s11 + $0x3bd8] sm:$0xff]  ;;  %2163 = vst [vmem:[%s12189_s12 + $0x1de8] sm:$0xff] %v2162_v61  ;;  %v2168_v0 = vld [vmem:[%s12184_s11 + $0x3c00] sm:$0xff] }
 0x1ef   : > { %2165 = vst [vmem:[%s12189_s12 + $0x1df0] sm:$0xff] %v2164_v62  ;;  %2167 = vst [vmem:[%s12189_s12 + $0x1df8] sm:$0xff] %v2166_v63  ;;  %v2170_v1 = vld [vmem:[%s12184_s11 + $0x3c08] sm:$0xff]  ;;  %v2172_v2 = vld [vmem:[%s12184_s11 + $0x3c10] sm:$0xff] }
 0x1f0   : > { %2169 = vst [vmem:[%s12189_s12 + $0x1e00] sm:$0xff] %v2168_v0  ;;  %2171 = vst [vmem:[%s12189_s12 + $0x1e08] sm:$0xff] %v2170_v1  ;;  %v2174_v3 = vld [vmem:[%s12184_s11 + $0x3c18] sm:$0xff]  ;;  %v2176_v4 = vld [vmem:[%s12184_s11 + $0x3c40] sm:$0xff] }
 0x1f1   : > { %2173 = vst [vmem:[%s12189_s12 + $0x1e10] sm:$0xff] %v2172_v2  ;;  %v2178_v5 = vld [vmem:[%s12184_s11 + $0x3c48] sm:$0xff]  ;;  %2175 = vst [vmem:[%s12189_s12 + $0x1e18] sm:$0xff] %v2174_v3  ;;  %v2180_v6 = vld [vmem:[%s12184_s11 + $0x3c50] sm:$0xff] }
 0x1f2   : > { %2177 = vst [vmem:[%s12189_s12 + $0x1e20] sm:$0xff] %v2176_v4  ;;  %2179 = vst [vmem:[%s12189_s12 + $0x1e28] sm:$0xff] %v2178_v5  ;;  %v2182_v7 = vld [vmem:[%s12184_s11 + $0x3c58] sm:$0xff]  ;;  %v2184_v8 = vld [vmem:[%s12184_s11 + $0x3c80] sm:$0xff] }
 0x1f3   : > { %2181 = vst [vmem:[%s12189_s12 + $0x1e30] sm:$0xff] %v2180_v6  ;;  %2183 = vst [vmem:[%s12189_s12 + $0x1e38] sm:$0xff] %v2182_v7  ;;  %v2186_v9 = vld [vmem:[%s12184_s11 + $0x3c88] sm:$0xff]  ;;  %v2188_v10 = vld [vmem:[%s12184_s11 + $0x3c90] sm:$0xff] }
 0x1f4   : > { %2185 = vst [vmem:[%s12189_s12 + $0x1e40] sm:$0xff] %v2184_v8  ;;  %v2190_v11 = vld [vmem:[%s12184_s11 + $0x3c98] sm:$0xff]  ;;  %2187 = vst [vmem:[%s12189_s12 + $0x1e48] sm:$0xff] %v2186_v9  ;;  %v2192_v12 = vld [vmem:[%s12184_s11 + $0x3cc0] sm:$0xff] }
 0x1f5   : > { %2189 = vst [vmem:[%s12189_s12 + $0x1e50] sm:$0xff] %v2188_v10  ;;  %2191 = vst [vmem:[%s12189_s12 + $0x1e58] sm:$0xff] %v2190_v11  ;;  %v2194_v13 = vld [vmem:[%s12184_s11 + $0x3cc8] sm:$0xff]  ;;  %v2196_v14 = vld [vmem:[%s12184_s11 + $0x3cd0] sm:$0xff] }
 0x1f6   : > { %2193 = vst [vmem:[%s12189_s12 + $0x1e60] sm:$0xff] %v2192_v12  ;;  %2195 = vst [vmem:[%s12189_s12 + $0x1e68] sm:$0xff] %v2194_v13  ;;  %v2198_v15 = vld [vmem:[%s12184_s11 + $0x3cd8] sm:$0xff]  ;;  %v2200_v16 = vld [vmem:[%s12184_s11 + $0x3d00] sm:$0xff] }
 0x1f7   : > { %2197 = vst [vmem:[%s12189_s12 + $0x1e70] sm:$0xff] %v2196_v14  ;;  %v2202_v17 = vld [vmem:[%s12184_s11 + $0x3d08] sm:$0xff]  ;;  %2199 = vst [vmem:[%s12189_s12 + $0x1e78] sm:$0xff] %v2198_v15  ;;  %v2204_v18 = vld [vmem:[%s12184_s11 + $0x3d10] sm:$0xff] }
 0x1f8   : > { %2201 = vst [vmem:[%s12189_s12 + $0x1e80] sm:$0xff] %v2200_v16  ;;  %2203 = vst [vmem:[%s12189_s12 + $0x1e88] sm:$0xff] %v2202_v17  ;;  %v2206_v19 = vld [vmem:[%s12184_s11 + $0x3d18] sm:$0xff]  ;;  %v2208_v20 = vld [vmem:[%s12184_s11 + $0x3d40] sm:$0xff] }
 0x1f9   : > { %2205 = vst [vmem:[%s12189_s12 + $0x1e90] sm:$0xff] %v2204_v18  ;;  %2207 = vst [vmem:[%s12189_s12 + $0x1e98] sm:$0xff] %v2206_v19  ;;  %v2210_v21 = vld [vmem:[%s12184_s11 + $0x3d48] sm:$0xff]  ;;  %v2212_v22 = vld [vmem:[%s12184_s11 + $0x3d50] sm:$0xff] }
 0x1fa   : > { %2209 = vst [vmem:[%s12189_s12 + $0x1ea0] sm:$0xff] %v2208_v20  ;;  %v2214_v23 = vld [vmem:[%s12184_s11 + $0x3d58] sm:$0xff]  ;;  %2211 = vst [vmem:[%s12189_s12 + $0x1ea8] sm:$0xff] %v2210_v21  ;;  %v2216_v24 = vld [vmem:[%s12184_s11 + $0x3d80] sm:$0xff] }
 0x1fb   : > { %2213 = vst [vmem:[%s12189_s12 + $0x1eb0] sm:$0xff] %v2212_v22  ;;  %2215 = vst [vmem:[%s12189_s12 + $0x1eb8] sm:$0xff] %v2214_v23  ;;  %v2218_v25 = vld [vmem:[%s12184_s11 + $0x3d88] sm:$0xff]  ;;  %v2220_v26 = vld [vmem:[%s12184_s11 + $0x3d90] sm:$0xff] }
 0x1fc   : > { %2217 = vst [vmem:[%s12189_s12 + $0x1ec0] sm:$0xff] %v2216_v24  ;;  %2219 = vst [vmem:[%s12189_s12 + $0x1ec8] sm:$0xff] %v2218_v25  ;;  %v2222_v27 = vld [vmem:[%s12184_s11 + $0x3d98] sm:$0xff]  ;;  %v2224_v28 = vld [vmem:[%s12184_s11 + $0x3dc0] sm:$0xff] }
 0x1fd   : > { %2221 = vst [vmem:[%s12189_s12 + $0x1ed0] sm:$0xff] %v2220_v26  ;;  %v2226_v29 = vld [vmem:[%s12184_s11 + $0x3dc8] sm:$0xff]  ;;  %2223 = vst [vmem:[%s12189_s12 + $0x1ed8] sm:$0xff] %v2222_v27  ;;  %v2228_v30 = vld [vmem:[%s12184_s11 + $0x3dd0] sm:$0xff] }
 0x1fe   : > { %2225 = vst [vmem:[%s12189_s12 + $0x1ee0] sm:$0xff] %v2224_v28  ;;  %2227 = vst [vmem:[%s12189_s12 + $0x1ee8] sm:$0xff] %v2226_v29  ;;  %v2230_v31 = vld [vmem:[%s12184_s11 + $0x3dd8] sm:$0xff]  ;;  %v2232_v32 = vld [vmem:[%s12184_s11 + $0x3e00] sm:$0xff] }
 0x1ff   : > { %2229 = vst [vmem:[%s12189_s12 + $0x1ef0] sm:$0xff] %v2228_v30  ;;  %2231 = vst [vmem:[%s12189_s12 + $0x1ef8] sm:$0xff] %v2230_v31  ;;  %v2234_v33 = vld [vmem:[%s12184_s11 + $0x3e08] sm:$0xff]  ;;  %v2236_v34 = vld [vmem:[%s12184_s11 + $0x3e10] sm:$0xff] }
 0x200   : > { %2233 = vst [vmem:[%s12189_s12 + $0x1f00] sm:$0xff] %v2232_v32  ;;  %v2238_v35 = vld [vmem:[%s12184_s11 + $0x3e18] sm:$0xff]  ;;  %2235 = vst [vmem:[%s12189_s12 + $0x1f08] sm:$0xff] %v2234_v33  ;;  %v2240_v36 = vld [vmem:[%s12184_s11 + $0x3e40] sm:$0xff] }
 0x201   : > { %2237 = vst [vmem:[%s12189_s12 + $0x1f10] sm:$0xff] %v2236_v34  ;;  %2239 = vst [vmem:[%s12189_s12 + $0x1f18] sm:$0xff] %v2238_v35  ;;  %v2242_v37 = vld [vmem:[%s12184_s11 + $0x3e48] sm:$0xff]  ;;  %v2244_v38 = vld [vmem:[%s12184_s11 + $0x3e50] sm:$0xff] }
 0x202   : > { %2241 = vst [vmem:[%s12189_s12 + $0x1f20] sm:$0xff] %v2240_v36  ;;  %2243 = vst [vmem:[%s12189_s12 + $0x1f28] sm:$0xff] %v2242_v37  ;;  %v2246_v39 = vld [vmem:[%s12184_s11 + $0x3e58] sm:$0xff]  ;;  %v2248_v40 = vld [vmem:[%s12184_s11 + $0x3e80] sm:$0xff] }
 0x203   : > { %2245 = vst [vmem:[%s12189_s12 + $0x1f30] sm:$0xff] %v2244_v38  ;;  %v2250_v41 = vld [vmem:[%s12184_s11 + $0x3e88] sm:$0xff]  ;;  %2247 = vst [vmem:[%s12189_s12 + $0x1f38] sm:$0xff] %v2246_v39  ;;  %v2252_v42 = vld [vmem:[%s12184_s11 + $0x3e90] sm:$0xff] }
 0x204   : > { %2249 = vst [vmem:[%s12189_s12 + $0x1f40] sm:$0xff] %v2248_v40  ;;  %2251 = vst [vmem:[%s12189_s12 + $0x1f48] sm:$0xff] %v2250_v41  ;;  %v2254_v43 = vld [vmem:[%s12184_s11 + $0x3e98] sm:$0xff]  ;;  %v2256_v44 = vld [vmem:[%s12184_s11 + $0x3ec0] sm:$0xff] }
 0x205   : > { %2253 = vst [vmem:[%s12189_s12 + $0x1f50] sm:$0xff] %v2252_v42  ;;  %2255 = vst [vmem:[%s12189_s12 + $0x1f58] sm:$0xff] %v2254_v43  ;;  %v2258_v45 = vld [vmem:[%s12184_s11 + $0x3ec8] sm:$0xff]  ;;  %v2260_v46 = vld [vmem:[%s12184_s11 + $0x3ed0] sm:$0xff] }
 0x206   : > { %2257 = vst [vmem:[%s12189_s12 + $0x1f60] sm:$0xff] %v2256_v44  ;;  %v2262_v47 = vld [vmem:[%s12184_s11 + $0x3ed8] sm:$0xff]  ;;  %2259 = vst [vmem:[%s12189_s12 + $0x1f68] sm:$0xff] %v2258_v45  ;;  %v2264_v48 = vld [vmem:[%s12184_s11 + $0x3f00] sm:$0xff] }
 0x207   : > { %2261 = vst [vmem:[%s12189_s12 + $0x1f70] sm:$0xff] %v2260_v46  ;;  %2263 = vst [vmem:[%s12189_s12 + $0x1f78] sm:$0xff] %v2262_v47  ;;  %v2266_v49 = vld [vmem:[%s12184_s11 + $0x3f08] sm:$0xff]  ;;  %v2268_v50 = vld [vmem:[%s12184_s11 + $0x3f10] sm:$0xff] }
 0x208   : > { %2265 = vst [vmem:[%s12189_s12 + $0x1f80] sm:$0xff] %v2264_v48  ;;  %2267 = vst [vmem:[%s12189_s12 + $0x1f88] sm:$0xff] %v2266_v49  ;;  %v2270_v51 = vld [vmem:[%s12184_s11 + $0x3f18] sm:$0xff]  ;;  %v2272_v52 = vld [vmem:[%s12184_s11 + $0x3f40] sm:$0xff] }
 0x209   : > { %2269 = vst [vmem:[%s12189_s12 + $0x1f90] sm:$0xff] %v2268_v50  ;;  %v2274_v53 = vld [vmem:[%s12184_s11 + $0x3f48] sm:$0xff]  ;;  %2271 = vst [vmem:[%s12189_s12 + $0x1f98] sm:$0xff] %v2270_v51  ;;  %v2276_v54 = vld [vmem:[%s12184_s11 + $0x3f50] sm:$0xff] }
 0x20a   : > { %2273 = vst [vmem:[%s12189_s12 + $0x1fa0] sm:$0xff] %v2272_v52  ;;  %2275 = vst [vmem:[%s12189_s12 + $0x1fa8] sm:$0xff] %v2274_v53  ;;  %v2278_v55 = vld [vmem:[%s12184_s11 + $0x3f58] sm:$0xff]  ;;  %v2280_v56 = vld [vmem:[%s12184_s11 + $0x3f80] sm:$0xff] }
 0x20b   : > { %2277 = vst [vmem:[%s12189_s12 + $0x1fb0] sm:$0xff] %v2276_v54  ;;  %2279 = vst [vmem:[%s12189_s12 + $0x1fb8] sm:$0xff] %v2278_v55  ;;  %v2282_v57 = vld [vmem:[%s12184_s11 + $0x3f88] sm:$0xff]  ;;  %v2284_v58 = vld [vmem:[%s12184_s11 + $0x3f90] sm:$0xff] }
 0x20c   : > { %2281 = vst [vmem:[%s12189_s12 + $0x1fc0] sm:$0xff] %v2280_v56  ;;  %v2286_v59 = vld [vmem:[%s12184_s11 + $0x3f98] sm:$0xff]  ;;  %2283 = vst [vmem:[%s12189_s12 + $0x1fc8] sm:$0xff] %v2282_v57  ;;  %v2288_v60 = vld [vmem:[%s12184_s11 + $0x3fc0] sm:$0xff] }
 0x20d   : > { %2285 = vst [vmem:[%s12189_s12 + $0x1fd0] sm:$0xff] %v2284_v58  ;;  %2287 = vst [vmem:[%s12189_s12 + $0x1fd8] sm:$0xff] %v2286_v59  ;;  %v2290_v61 = vld [vmem:[%s12184_s11 + $0x3fc8] sm:$0xff]  ;;  %v2292_v62 = vld [vmem:[%s12184_s11 + $0x3fd0] sm:$0xff] }
 0x20e   : > { %2289 = vst [vmem:[%s12189_s12 + $0x1fe0] sm:$0xff] %v2288_v60  ;;  %2291 = vst [vmem:[%s12189_s12 + $0x1fe8] sm:$0xff] %v2290_v61  ;;  %v2294_v63 = vld [vmem:[%s12184_s11 + $0x3fd8] sm:$0xff] }
 0x20f   : > { %2293 = vst [vmem:[%s12189_s12 + $0x1ff0] sm:$0xff] %v2292_v62  ;;  %2295 = vst [vmem:[%s12189_s12 + $0x1ff8] sm:$0xff] %v2294_v63 }
 0x210 PF: > { %p10931_p6 = scmp.ge.s32.totalorder %s12103_s25, 1  ;;  %p2320_p7 = scmp.lt.s32.totalorder %s12103_s25, 3 }
 0x212   : > { %p2321_p8 = pnand %p10931_p6, %p2320_p7 }
 0x213   : > { %s2327_s28 = sand.u32 (!%p2321_p8), 1, %s12087_s21   ;;  %s10933_s21 = sshll.u32 (!%p2321_p8), %s12095_s23, 3 }
 0x214   : > { %2324 = sbr.rel (%p2321_p8) target bundleno = 2063 (0x80f), region = 63  ;;  %s10932_s12 = sshll.u32 (!%p2321_p8), %s2327_s28, 13 }
 0x215   : > { %s14445_s19 = scalar_lea.vmem (!%p2321_p8), [#allocation4], %s10932_s12  ;;  %p14859_p9 = scmp.lt.s32.totalorder (!%p2321_p8), %s10933_s21, 15 }
 0x216   : > { %p2381_p10 = scmp.lt.s32.totalorder (!%p2321_p8), %s12095_s23, 1 }
 0x219   : > { %v2439_v0 = vld [vmem:[%s15828_s1 + $0x188] sm:$0xff]  ;;  %v2441_v1 = vld [vmem:[%s15828_s1 + $0x198] sm:$0xff]  ;;  %v2438_v2 = vld [vmem:[%s15828_s1 + $0x180] sm:$0xff]  ;;  %vm2538_vm0 = vcmask 261120   ;;  %v12105_v17 = vmov 0.0   ;;  %s15842_s21 = smov (!%p14859_p9, %s10933_s21), 15 }
 0x21a   : > { %2566 = vmatprep.subr.mxu0 %v2439_v0  ;;  %2637 = vmatprep.subr.mxu1 %v2441_v1  ;;  %v2440_v3 = vld [vmem:[%s15828_s1 + $0x190] sm:$0xff]  ;;  %v2423_v4 = vld [vmem:[%s15828_s1 + $0x108] sm:$0xff]  ;;  %v2425_v5 = vld [vmem:[%s15828_s1 + $0x118] sm:$0xff]  ;;  %s14885_s16 = scalar_lea.vmem %s15831_s4, %s15842_s21  ;;  %s15122_s20 = scalar_lea.vmem %s15832_s5, %s15842_s21  ;;  %vm3198_vm1 = vcmask 7168  }
 0x21b   : > { %2567 = vmatpush1.msra.mxu0 %v2438_v2  ;;  %2638 = vmatpush1.msra.mxu1 %v2440_v3  ;;  %v2422_v6 = vld [vmem:[%s15828_s1 + $0x100] sm:$0xff]  ;;  %v2424_v7 = vld [vmem:[%s15828_s1 + $0x110] sm:$0xff]  ;;  %v2407_v8 = vld [vmem:[%s15828_s1 + $0x88] sm:$0xff]  ;;  %3199 = vst.msk [vmem:[#allocation3] sm:$0xff] %vm3198_vm1, %v12105_v17  ;;  %s15844_s23 = smov (!%p2381_p10, %s12095_s23), 1 }
 0x21c   : > { %2568 = vmatprep.subr.mxu0 %v2423_v4  ;;  %2639 = vmatprep.subr.mxu1 %v2425_v5  ;;  %v2409_v9 = vld [vmem:[%s15828_s1 + $0x98] sm:$0xff]  ;;  %v2406_v10 = vld [vmem:[%s15828_s1 + $0x80] sm:$0xff]  ;;  %v2408_v11 = vld [vmem:[%s15828_s1 + $0x90] sm:$0xff] }
 0x21d   : > { %2569 = vmatpush1.msra.mxu0 %v2422_v6  ;;  %2640 = vmatpush1.msra.mxu1 %v2424_v7  ;;  %v2391_v12 = vld [vmem:[%s15828_s1 + $0x8] sm:$0xff]  ;;  %v2393_v13 = vld [vmem:[%s15828_s1 + $0x18] sm:$0xff]  ;;  %v2390_v14 = vld [vmem:[%s15828_s1] sm:$0xff] }
 0x21e   : > { %2570 = vmatprep.subr.mxu0 %v2407_v8  ;;  %2641 = vmatprep.subr.mxu1 %v2409_v9  ;;  %v2392_v15 = vld [vmem:[%s15828_s1 + $0x10] sm:$0xff]  ;;  %v14289_v16 = vld [vmem:[%s15827_s0] sm:$0xff]  ;;  %v2443_v18 = vld [vmem:[%s15828_s1 + $0x1a8] sm:$0xff] }
 0x21f   : > { %2571 = vmatpush1.msra.mxu0 %v2406_v10  ;;  %2642 = vmatpush1.msra.mxu1 %v2408_v11  ;;  %v2445_v19 = vld [vmem:[%s15828_s1 + $0x1b8] sm:$0xff]  ;;  %v2442_v20 = vld [vmem:[%s15828_s1 + $0x1a0] sm:$0xff]  ;;  %v2444_v21 = vld [vmem:[%s15828_s1 + $0x1b0] sm:$0xff] }
 0x220   : > { %2572 = vmatprep.subr.mxu0 %v2391_v12  ;;  %2643 = vmatprep.subr.mxu1 %v2393_v13  ;;  %v2427_v22 = vld [vmem:[%s15828_s1 + $0x128] sm:$0xff]  ;;  %v2429_v23 = vld [vmem:[%s15828_s1 + $0x138] sm:$0xff]  ;;  %v2426_v24 = vld [vmem:[%s15828_s1 + $0x120] sm:$0xff] }
 0x221   : > { %2573 = vmatpush1.msra.mxu0 %v2390_v14  ;;  %2606 = vmatprep.mubr.f32.mxu0 %v12105_v17  ;;  %v2428_v25 = vld [vmem:[%s15828_s1 + $0x130] sm:$0xff]  ;;  %v2411_v26 = vld [vmem:[%s15828_s1 + $0xa8] sm:$0xff]  ;;  %v2413_v27 = vld [vmem:[%s15828_s1 + $0xb8] sm:$0xff] }
 0x222   : > { %2644 = vmatpush1.msra.mxu1 %v2392_v15  ;;  %2677 = vmatprep.mubr.f32.mxu1 %v12105_v17  ;;  %v2410_v28 = vld [vmem:[%s15828_s1 + $0xa0] sm:$0xff]  ;;  %v2412_v29 = vld [vmem:[%s15828_s1 + $0xb0] sm:$0xff]  ;;  %v2395_v30 = vld [vmem:[%s15828_s1 + $0x28] sm:$0xff] }
 0x223   : > { %10936 = vmatmul.mubr.msk.f32.vlgmr.msra.gmra.mxu0 %vm2538_vm0, %v14289_v16  ;;  %10937 = vmatmul.mubr.msk.f32.vlgmr.msra.gmra.mxu1 %vm2538_vm0, %v14289_v16  ;;  %v2394_v31 = vld [vmem:[%s15828_s1 + $0x20] sm:$0xff]  ;;  %v2397_v32 = vld [vmem:[%s15828_s1 + $0x38] sm:$0xff]  ;;  %v2396_v33 = vld [vmem:[%s15828_s1 + $0x30] sm:$0xff] }
 0x224   : > { %2708 = vmatprep.subr.mxu0 %v2443_v18  ;;  %2779 = vmatprep.subr.mxu1 %v2445_v19  ;;  %v2447_v34 = vld [vmem:[%s15828_s1 + $0x1c8] sm:$0xff]  ;;  %v2446_v35 = vld [vmem:[%s15828_s1 + $0x1c0] sm:$0xff]  ;;  %v2449_v36 = vld [vmem:[%s15828_s1 + $0x1d8] sm:$0xff] }
 0x225   : > { %2709 = vmatpush1.msra.mxu0 %v2442_v20  ;;  %2780 = vmatpush1.msra.mxu1 %v2444_v21  ;;  %v2431_v37 = vld [vmem:[%s15828_s1 + $0x148] sm:$0xff]  ;;  %v2448_v38 = vld [vmem:[%s15828_s1 + $0x1d0] sm:$0xff]  ;;  %v2430_v39 = vld [vmem:[%s15828_s1 + $0x140] sm:$0xff] }
 0x226   : > { %2710 = vmatprep.subr.mxu0 %v2427_v22  ;;  %2781 = vmatprep.subr.mxu1 %v2429_v23  ;;  %v2433_v40 = vld [vmem:[%s15828_s1 + $0x158] sm:$0xff]  ;;  %v2415_v41 = vld [vmem:[%s15828_s1 + $0xc8] sm:$0xff]  ;;  %v2432_v42 = vld [vmem:[%s15828_s1 + $0x150] sm:$0xff] }
 0x227   : > { %2711 = vmatpush1.msra.mxu0 %v2426_v24  ;;  %2782 = vmatpush1.msra.mxu1 %v2428_v25  ;;  %v2414_v43 = vld [vmem:[%s15828_s1 + $0xc0] sm:$0xff]  ;;  %v2417_v44 = vld [vmem:[%s15828_s1 + $0xd8] sm:$0xff]  ;;  %v2399_v45 = vld [vmem:[%s15828_s1 + $0x48] sm:$0xff] }
 0x228   : > { %2712 = vmatprep.subr.mxu0 %v2411_v26  ;;  %2783 = vmatprep.subr.mxu1 %v2413_v27  ;;  %v2416_v46 = vld [vmem:[%s15828_s1 + $0xd0] sm:$0xff]  ;;  %v2398_v47 = vld [vmem:[%s15828_s1 + $0x40] sm:$0xff]  ;;  %v2401_v48 = vld [vmem:[%s15828_s1 + $0x58] sm:$0xff] }
 0x229   : > { %2713 = vmatpush1.msra.mxu0 %v2410_v28  ;;  %2784 = vmatpush1.msra.mxu1 %v2412_v29  ;;  %v2400_v49 = vld [vmem:[%s15828_s1 + $0x50] sm:$0xff]  ;;  %v2451_v50 = vld [vmem:[%s15828_s1 + $0x1e8] sm:$0xff]  ;;  %v2450_v51 = vld [vmem:[%s15828_s1 + $0x1e0] sm:$0xff] }
 0x22a   : > { %2714 = vmatprep.subr.mxu0 %v2395_v30  ;;  %2748 = vmatprep.mubr.f32.mxu0 %v12105_v17  ;;  %v2453_v52 = vld [vmem:[%s15828_s1 + $0x1f8] sm:$0xff]  ;;  %v2435_v53 = vld [vmem:[%s15828_s1 + $0x168] sm:$0xff]  ;;  %v2452_v54 = vld [vmem:[%s15828_s1 + $0x1f0] sm:$0xff] }
 0x22b   : > { %2715 = vmatpush1.msra.mxu0 %v2394_v31  ;;  %2785 = vmatprep.subr.mxu1 %v2397_v32  ;;  %v2434_v55 = vld [vmem:[%s15828_s1 + $0x160] sm:$0xff]  ;;  %v2437_v56 = vld [vmem:[%s15828_s1 + $0x178] sm:$0xff]  ;;  %v2419_v57 = vld [vmem:[%s15828_s1 + $0xe8] sm:$0xff] }
 0x22c   : > { %10938 = vmatmul.mubr.msk.f32.vlgmr.msra.gmra.mxu0 %vm2538_vm0, %v14289_v16  ;;  %2786 = vmatpush1.msra.mxu1 %v2396_v33  ;;  %v2436_v58 = vld [vmem:[%s15828_s1 + $0x170] sm:$0xff]  ;;  %v2418_v59 = vld [vmem:[%s15828_s1 + $0xe0] sm:$0xff]  ;;  %v2421_v60 = vld [vmem:[%s15828_s1 + $0xf8] sm:$0xff] }
 0x22d   : > { %2819 = vmatprep.mubr.f32.mxu1 %v12105_v17  ;;  %2850 = vmatprep.subr.mxu0 %v2447_v34  ;;  %v2403_v61 = vld [vmem:[%s15828_s1 + $0x68] sm:$0xff]  ;;  %v2420_v62 = vld [vmem:[%s15828_s1 + $0xf0] sm:$0xff]  ;;  %v2402_v1 = vld [vmem:[%s15828_s1 + $0x60] sm:$0xff] }
 0x22e   : > { %10939 = vmatmul.mubr.msk.f32.vlgmr.msra.gmra.mxu1 %vm2538_vm0, %v14289_v16  ;;  %2851 = vmatpush1.msra.mxu0 %v2446_v35  ;;  %v3264_v63 = vld [vmem:[%s14445_s19 + $0x1c0] sm:$0xff]  ;;  %v2405_v4 = vld [vmem:[%s15828_s1 + $0x78] sm:$0xff]  ;;  %v2404_v5 = vld [vmem:[%s15828_s1 + $0x70] sm:$0xff] }
 0x22f   : > { %2921 = vmatprep.subr.mxu1 %v2449_v36  ;;  %2852 = vmatprep.subr.mxu0 %v2431_v37  ;;  %v3268_v0 = vld [vmem:[%s14445_s19 + $0x1e0] sm:$0xff] }
 0x230   : > { %2922 = vmatpush1.msra.mxu1 %v2448_v38  ;;  %2853 = vmatpush1.msra.mxu0 %v2430_v39  ;;  %v3392_v2 = vld [vmem:[%s14445_s19 + $0x5c0] sm:$0xff]  ;;  %v11025_v7 = vcombine.high %v3264_v63, %v3268_v0  ;;  %v11024_v12 = vcombine.low %v3264_v63, %v3268_v0 }
 0x231   : > { %2923 = vmatprep.subr.mxu1 %v2433_v40  ;;  %2854 = vmatprep.subr.mxu0 %v2415_v41  ;;  %v3396_v3 = vld [vmem:[%s14445_s19 + $0x5e0] sm:$0xff] }
 0x232   : > { %2924 = vmatpush1.msra.mxu1 %v2432_v42  ;;  %2855 = vmatpush1.msra.mxu0 %v2414_v43  ;;  %v3256_v6 = vld [vmem:[%s14445_s19 + $0x180] sm:$0xff]  ;;  %v11153_v11 = vcombine.high %v3392_v2, %v3396_v3  ;;  %v11152_v13 = vcombine.low %v3392_v2, %v3396_v3 }
 0x233   : > { %2925 = vmatprep.subr.mxu1 %v2417_v44  ;;  %2856 = vmatprep.subr.mxu0 %v2399_v45  ;;  %v3260_v8 = vld [vmem:[%s14445_s19 + $0x1a0] sm:$0xff] }
 0x234   : > { %2926 = vmatpush1.msra.mxu1 %v2416_v46  ;;  %2857 = vmatpush1.msra.mxu0 %v2398_v47  ;;  %v3384_v9 = vld [vmem:[%s14445_s19 + $0x580] sm:$0xff]  ;;  %v11017_v14 = vcombine.high %v3256_v6, %v3260_v8  ;;  %v11016_v22 = vcombine.low %v3256_v6, %v3260_v8 }
 0x235   : > { %2890 = vmatprep.mubr.f32.mxu0 %v12105_v17  ;;  %2927 = vmatprep.subr.mxu1 %v2401_v48  ;;  %v3388_v10 = vld [vmem:[%s14445_s19 + $0x5a0] sm:$0xff] }
 0x236   : > { %10940 = vmatmul.mubr.msk.f32.vlgmr.msra.gmra.mxu0 %vm2538_vm0, %v14289_v16  ;;  %2928 = vmatpush1.msra.mxu1 %v2400_v49  ;;  %v11145_v15 = vcombine.high %v3384_v9, %v3388_v10  ;;  %v3248_v18 = vld [vmem:[%s14445_s19 + $0x140] sm:$0xff]  ;;  %v11144_v23 = vcombine.low %v3384_v9, %v3388_v10 }
 0x237   : > { %2961 = vmatprep.mubr.f32.mxu1 %v12105_v17  ;;  %2992 = vmatprep.subr.mxu0 %v2451_v50  ;;  %v3252_v19 = vld [vmem:[%s14445_s19 + $0x160] sm:$0xff] }
 0x238   : > { %10941 = vmatmul.mubr.msk.f32.vlgmr.msra.gmra.mxu1 %vm2538_vm0, %v14289_v16  ;;  %2993 = vmatpush1.msra.mxu0 %v2450_v51  ;;  %v3376_v20 = vld [vmem:[%s14445_s19 + $0x540] sm:$0xff]  ;;  %v11009_v24 = vcombine.high %v3248_v18, %v3252_v19  ;;  %v11008_v30 = vcombine.low %v3248_v18, %v3252_v19 }
 0x239   : > { %3063 = vmatprep.subr.mxu1 %v2453_v52  ;;  %2994 = vmatprep.subr.mxu0 %v2435_v53  ;;  %v3380_v21 = vld [vmem:[%s14445_s19 + $0x560] sm:$0xff] }
 0x23a   : > { %3064 = vmatpush1.msra.mxu1 %v2452_v54  ;;  %2995 = vmatpush1.msra.mxu0 %v2434_v55  ;;  %v11137_v25 = vcombine.high %v3376_v20, %v3380_v21  ;;  %v3240_v26 = vld [vmem:[%s14445_s19 + $0x100] sm:$0xff] }
 0x23b   : > { %3065 = vmatprep.subr.mxu1 %v2437_v56  ;;  %2996 = vmatprep.subr.mxu0 %v2419_v57  ;;  %v3244_v27 = vld [vmem:[%s14445_s19 + $0x120] sm:$0xff] }
 0x23c   : > { %3066 = vmatpush1.msra.mxu1 %v2436_v58  ;;  %2997 = vmatpush1.msra.mxu0 %v2418_v59  ;;  %v3368_v28 = vld [vmem:[%s14445_s19 + $0x500] sm:$0xff]  ;;  %v11001_v31 = vcombine.high %v3240_v26, %v3244_v27  ;;  %v11000_v37 = vcombine.low %v3240_v26, %v3244_v27 }
 0x23d   : > { %3067 = vmatprep.subr.mxu1 %v2421_v60  ;;  %2998 = vmatprep.subr.mxu0 %v2403_v61  ;;  %v3372_v29 = vld [vmem:[%s14445_s19 + $0x520] sm:$0xff] }
 0x23e   : > { %3068 = vmatpush1.msra.mxu1 %v2420_v62  ;;  %2999 = vmatpush1.msra.mxu0 %v2402_v1  ;;  %v11129_v32 = vcombine.high %v3368_v28, %v3372_v29  ;;  %v3232_v33 = vld [vmem:[%s14445_s19 + $0xc0] sm:$0xff]  ;;  %v11128_v38 = vcombine.low %v3368_v28, %v3372_v29 }
 0x23f   : > { %3032 = vmatprep.mubr.f32.mxu0 %v12105_v17  ;;  %3069 = vmatprep.subr.mxu1 %v2405_v4  ;;  %v3236_v34 = vld [vmem:[%s14445_s19 + $0xe0] sm:$0xff] }
 0x240   : > { %10942 = vmatmul.mubr.msk.f32.vlgmr.msra.gmra.mxu0 %vm2538_vm0, %v14289_v16  ;;  %3070 = vmatpush1.msra.mxu1 %v2404_v5  ;;  %v3360_v35 = vld [vmem:[%s14445_s19 + $0x4c0] sm:$0xff]  ;;  %v10993_v39 = vcombine.high %v3232_v33, %v3236_v34  ;;  %v10992_v45 = vcombine.low %v3232_v33, %v3236_v34 }
 0x241   : > { %3103 = vmatprep.mubr.f32.mxu1 %v12105_v17  ;;  %9450 = vmatprep.subr.bf16.mxu0 %v11025_v7  ;;  %v3364_v36 = vld [vmem:[%s14445_s19 + $0x4e0] sm:$0xff] }
 0x242   : > { %9491 = vmatprep.subr.bf16.mxu1 %v11153_v11  ;;  %10943 = vmatmul.mubr.msk.f32.vlgmr.msra.gmra.mxu1 %vm2538_vm0, %v14289_v16  ;;  %v11136_v16 = vcombine.low %v3376_v20, %v3380_v21  ;;  %v11121_v40 = vcombine.high %v3360_v35, %v3364_v36  ;;  %v3224_v41 = vld [vmem:[%s14445_s19 + $0x80] sm:$0xff]  ;;  %v11120_v46 = vcombine.low %v3360_v35, %v3364_v36 }
 0x243   : > { %9451 = vmatpush1.bf16.msra.mxu0 %v11024_v12  ;;  %9492 = vmatpush1.bf16.msra.mxu1 %v11152_v13  ;;  %v3228_v42 = vld [vmem:[%s14445_s19 + $0xa0] sm:$0xff] }
 0x244   : > { %9452 = vmatprep.subr.bf16.mxu0 %v11017_v14  ;;  %9493 = vmatprep.subr.bf16.mxu1 %v11145_v15  ;;  %v3352_v43 = vld [vmem:[%s14445_s19 + $0x480] sm:$0xff]  ;;  %v10985_v47 = vcombine.high %v3224_v41, %v3228_v42  ;;  %v10984_v53 = vcombine.low %v3224_v41, %v3228_v42 }
 0x245   : > { %v3356_v44 = vld [vmem:[%s14445_s19 + $0x4a0] sm:$0xff] }
 0x246   : > { %v11113_v48 = vcombine.high %v3352_v43, %v3356_v44  ;;  %v3216_v49 = vld [vmem:[%s14445_s19 + $0x40] sm:$0xff]  ;;  %v11112_v54 = vcombine.low %v3352_v43, %v3356_v44 }
 0x247   : > { %9453 = vmatpush1.bf16.msra.mxu0 %v11016_v22  ;;  %9494 = vmatpush1.bf16.msra.mxu1 %v11144_v23  ;;  %v3220_v50 = vld [vmem:[%s14445_s19 + $0x60] sm:$0xff] }
 0x248   : > { %9454 = vmatprep.subr.bf16.mxu0 %v11009_v24  ;;  %9495 = vmatprep.subr.bf16.mxu1 %v11137_v25  ;;  %v3344_v51 = vld [vmem:[%s14445_s19 + $0x440] sm:$0xff]  ;;  %v10977_v55 = vcombine.high %v3216_v49, %v3220_v50  ;;  %v10976_v61 = vcombine.low %v3216_v49, %v3220_v50 }
 0x249   : > { %v3348_v52 = vld [vmem:[%s14445_s19 + $0x460] sm:$0xff] }
 0x24a   : > { %v11105_v56 = vcombine.high %v3344_v51, %v3348_v52  ;;  %v3208_v57 = vld [vmem:[%s14445_s19] sm:$0xff]  ;;  %v11104_v62 = vcombine.low %v3344_v51, %v3348_v52 }
 0x24b   : > { %9455 = vmatpush1.bf16.msra.mxu0 %v11008_v30  ;;  %9496 = vmatpush1.bf16.msra.mxu1 %v11136_v16  ;;  %v3212_v58 = vld [vmem:[%s14445_s19 + $0x20] sm:$0xff] }
 0x24c   : > { %9456 = vmatprep.subr.bf16.mxu0 %v11001_v31  ;;  %9497 = vmatprep.subr.bf16.mxu1 %v11129_v32  ;;  %v3336_v59 = vld [vmem:[%s14445_s19 + $0x400] sm:$0xff]  ;;  %v10969_v63 = vcombine.high %v3208_v57, %v3212_v58  ;;  %v10968_v5 = vcombine.low %v3208_v57, %v3212_v58 }
 0x24d   : > { %v3340_v60 = vld [vmem:[%s14445_s19 + $0x420] sm:$0xff] }
 0x24e   : > { %v11097_v0 = vcombine.high %v3336_v59, %v3340_v60  ;;  %v3328_v1 = vld [vmem:[%s14445_s19 + $0x3c0] sm:$0xff]  ;;  %v11096_v6 = vcombine.low %v3336_v59, %v3340_v60 }
 0x24f   : > { %9457 = vmatpush1.bf16.msra.mxu0 %v11000_v37  ;;  %9498 = vmatpush1.bf16.msra.mxu1 %v11128_v38  ;;  %v3332_v2 = vld [vmem:[%s14445_s19 + $0x3e0] sm:$0xff] }
 0x250   : > { %9458 = vmatprep.subr.bf16.mxu0 %v10993_v39  ;;  %9499 = vmatprep.subr.bf16.mxu1 %v11121_v40  ;;  %v3456_v3 = vld [vmem:[%s14445_s19 + $0x7c0] sm:$0xff]  ;;  %v11089_v7 = vcombine.high %v3328_v1, %v3332_v2  ;;  %v11088_v13 = vcombine.low %v3328_v1, %v3332_v2 }
 0x251   : > { %v3460_v4 = vld [vmem:[%s14445_s19 + $0x7e0] sm:$0xff] }
 0x252   : > { %v11217_v8 = vcombine.high %v3456_v3, %v3460_v4  ;;  %v3320_v9 = vld [vmem:[%s14445_s19 + $0x380] sm:$0xff]  ;;  %v11216_v14 = vcombine.low %v3456_v3, %v3460_v4 }
 0x253   : > { %9459 = vmatpush1.bf16.msra.mxu0 %v10992_v45  ;;  %9500 = vmatpush1.bf16.msra.mxu1 %v11120_v46  ;;  %v3324_v10 = vld [vmem:[%s14445_s19 + $0x3a0] sm:$0xff] }
 0x254   : > { %9460 = vmatprep.subr.bf16.mxu0 %v10985_v47  ;;  %9501 = vmatprep.subr.bf16.mxu1 %v11113_v48  ;;  %v3448_v11 = vld [vmem:[%s14445_s19 + $0x780] sm:$0xff]  ;;  %v11081_v15 = vcombine.high %v3320_v9, %v3324_v10  ;;  %v11080_v23 = vcombine.low %v3320_v9, %v3324_v10 }
 0x255   : > { %v3452_v12 = vld [vmem:[%s14445_s19 + $0x7a0] sm:$0xff] }
 0x256   : > { %v11209_v18 = vcombine.high %v3448_v11, %v3452_v12  ;;  %v3312_v19 = vld [vmem:[%s14445_s19 + $0x340] sm:$0xff]  ;;  %v11208_v24 = vcombine.low %v3448_v11, %v3452_v12  ;;  %v2458_v12 = vlaneseq }
 0x257   : > { %9461 = vmatpush1.bf16.msra.mxu0 %v10984_v53  ;;  %9502 = vmatpush1.bf16.msra.mxu1 %v11112_v54  ;;  %v3316_v20 = vld [vmem:[%s14445_s19 + $0x360] sm:$0xff] }
 0x258   : > { %9462 = vmatprep.subr.bf16.mxu0 %v10977_v55  ;;  %9503 = vmatprep.subr.bf16.mxu1 %v11105_v56  ;;  %v3440_v21 = vld [vmem:[%s14445_s19 + $0x740] sm:$0xff]  ;;  %v11073_v25 = vcombine.high %v3312_v19, %v3316_v20  ;;  %v11072_v16 = vcombine.low %v3312_v19, %v3316_v20 }
 0x259   : > { %v3444_v22 = vld [vmem:[%s14445_s19 + $0x760] sm:$0xff] }
 0x25a   : > { %v11201_v26 = vcombine.high %v3440_v21, %v3444_v22  ;;  %v3304_v27 = vld [vmem:[%s14445_s19 + $0x300] sm:$0xff]  ;;  %v11200_v31 = vcombine.low %v3440_v21, %v3444_v22 }
 0x25b   : > { %9463 = vmatpush1.bf16.msra.mxu0 %v10976_v61  ;;  %9504 = vmatpush1.bf16.msra.mxu1 %v11104_v62  ;;  %v3308_v28 = vld [vmem:[%s14445_s19 + $0x320] sm:$0xff] }
 0x25c   : > { %9464 = vmatprep.subr.bf16.mxu0 %v10969_v63  ;;  %9505 = vmatprep.subr.bf16.mxu1 %v11097_v0  ;;  %v3432_v29 = vld [vmem:[%s14445_s19 + $0x700] sm:$0xff]  ;;  %v11065_v33 = vcombine.high %v3304_v27, %v3308_v28  ;;  %v11064_v41 = vcombine.low %v3304_v27, %v3308_v28 }
 0x25d   : > { %v3436_v30 = vld [vmem:[%s14445_s19 + $0x720] sm:$0xff] }
 0x25e   : > { %v3296_v32 = vld [vmem:[%s14445_s19 + $0x2c0] sm:$0xff]  ;;  %v11193_v34 = vcombine.high %v3432_v29, %v3436_v30  ;;  %v11192_v43 = vcombine.low %v3432_v29, %v3436_v30 }
 0x25f   : > { %9465 = vmatpush1.bf16.msra.mxu0 %v10968_v5  ;;  %9506 = vmatpush1.bf16.msra.mxu1 %v11096_v6  ;;  %v3300_v35 = vld [vmem:[%s14445_s19 + $0x2e0] sm:$0xff] }
 0x260   : > { %9466 = vmatprep.subr.bf16.mxu0 %v11089_v7  ;;  %9507 = vmatprep.subr.bf16.mxu1 %v11217_v8  ;;  %v3424_v36 = vld [vmem:[%s14445_s19 + $0x6c0] sm:$0xff]  ;;  %v11057_v46 = vcombine.high %v3296_v32, %v3300_v35  ;;  %v11056_v52 = vcombine.low %v3296_v32, %v3300_v35 }
 0x261   : > { %v3428_v37 = vld [vmem:[%s14445_s19 + $0x6e0] sm:$0xff] }
 0x262   : > { %v14515_v38 = vld [vmem:[%s14445_s19 + $0x9c0] sm:$0xff]  ;;  %v11185_v47 = vcombine.high %v3424_v36, %v3428_v37  ;;  %v11184_v53 = vcombine.low %v3424_v36, %v3428_v37 }
 0x263   : > { %9467 = vmatpush2.bf16.msra.mxu0 %v11088_v13  ;;  %9508 = vmatpush2.bf16.msra.mxu1 %v11216_v14  ;;  %v14518_v39 = vld [vmem:[%s14445_s19 + $0x9e0] sm:$0xff]  ;;  %v14546_v13 = vshrl.u32 %v2458_v12, 7 }
 0x264   : > { %9468 = vmatprep.subr.bf16.mxu0 %v11081_v15  ;;  %9509 = vmatprep.subr.bf16.mxu1 %v11209_v18  ;;  %v14521_v40 = vld [vmem:[%s14445_s19 + $0xdc0] sm:$0xff]  ;;  %v11280_v44 = vcombine.low %v14515_v38, %v14518_v39  ;;  %v11281_v10 = vcombine.high %v14515_v38, %v14518_v39  ;;  %v14557_v18 = vld [vmem:[%s15829_s2] sm:$0xff] }
 0x265   : > { %v14524_v42 = vld [vmem:[%s14445_s19 + $0xde0] sm:$0xff]  ;;  %v14549_v14 = vsub.s32 0, %v14546_v13  ;;  %v14552_v15 = vsub.s32 2, %v14546_v13  ;;  %v14560_v19 = vsub.s32 1, %v14546_v13  ;;  %v14563_v20 = vsub.s32 3, %v14546_v13 }
 0x266   : > { %v11408_v45 = vcombine.low %v14521_v40, %v14524_v42  ;;  %v3288_v48 = vld [vmem:[%s14445_s19 + $0x280] sm:$0xff]  ;;  %v11409_v11 = vcombine.high %v14521_v40, %v14524_v42  ;;  %v14575_v35 = vsub.s32 5, %v14546_v13 }
 0x267   : > { %9469 = vmatpush2.bf16.msra.mxu0 %v11080_v23  ;;  %9510 = vmatpush2.bf16.msra.mxu1 %v11208_v24  ;;  %v3292_v49 = vld [vmem:[%s14445_s19 + $0x2a0] sm:$0xff]  ;;  %v2461_v21 = vrot.slane %v14557_v18, %v14549_v14  ;;  %v2469_v22 = vrot.slane %v14557_v18, %v14552_v15  ;;  %v2465_v23 = vrot.slane %v14557_v18, %v14560_v19 }
 0x268   : > { %9470 = vmatprep.subr.bf16.mxu0 %v11073_v25  ;;  %9511 = vmatprep.subr.bf16.mxu1 %v11201_v26  ;;  %v3416_v50 = vld [vmem:[%s14445_s19 + $0x680] sm:$0xff]  ;;  %v11049_v54 = vcombine.high %v3288_v48, %v3292_v49  ;;  %v11048_v60 = vcombine.low %v3288_v48, %v3292_v49  ;;  %v2473_v24 = vrot.slane %v14557_v18, %v14563_v20  ;;  %v14583_v48 = vsub.s32 7, %v14546_v13 }
 0x269   : > { %v3420_v51 = vld [vmem:[%s14445_s19 + $0x6a0] sm:$0xff] }
 0x26a   : > { %v11177_v55 = vcombine.high %v3416_v50, %v3420_v51  ;;  %v3280_v56 = vld [vmem:[%s14445_s19 + $0x240] sm:$0xff]  ;;  %v11176_v61 = vcombine.low %v3416_v50, %v3420_v51 }
 0x26b   : > { %9471 = vmatpush2.bf16.msra.mxu0 %v11072_v16  ;;  %9512 = vmatpush2.bf16.msra.mxu1 %v11200_v31  ;;  %v3284_v57 = vld [vmem:[%s14445_s19 + $0x260] sm:$0xff] }
 0x26c   : > { %9472 = vmatprep.subr.bf16.mxu0 %v11065_v33  ;;  %9513 = vmatprep.subr.bf16.mxu1 %v11193_v34  ;;  %v3408_v58 = vld [vmem:[%s14445_s19 + $0x640] sm:$0xff]  ;;  %v11041_v62 = vcombine.high %v3280_v56, %v3284_v57  ;;  %v11040_v4 = vcombine.low %v3280_v56, %v3284_v57 }
 0x26d   : > { %v3412_v59 = vld [vmem:[%s14445_s19 + $0x660] sm:$0xff] }
 0x26e   : > { %v11169_v63 = vcombine.high %v3408_v58, %v3412_v59  ;;  %v3272_v0 = vld [vmem:[%s14445_s19 + $0x200] sm:$0xff]  ;;  %v11168_v5 = vcombine.low %v3408_v58, %v3412_v59 }
 0x26f   : > { %9473 = vmatpush2.bf16.msra.mxu0 %v11064_v41  ;;  %9514 = vmatpush2.bf16.msra.mxu1 %v11192_v43  ;;  %v3276_v1 = vld [vmem:[%s14445_s19 + $0x220] sm:$0xff] }
 0x270   : > { %9474 = vmatprep.subr.bf16.mxu0 %v11057_v46  ;;  %9515 = vmatprep.subr.bf16.mxu1 %v11185_v47  ;;  %v3400_v2 = vld [vmem:[%s14445_s19 + $0x600] sm:$0xff]  ;;  %v11033_v6 = vcombine.high %v3272_v0, %v3276_v1  ;;  %v11032_v8 = vcombine.low %v3272_v0, %v3276_v1 }
 0x271   : > { %v3404_v3 = vld [vmem:[%s14445_s19 + $0x620] sm:$0xff] }
 0x272   : > { %v11161_v7 = vcombine.high %v3400_v2, %v3404_v3  ;;  %v11160_v9 = vcombine.low %v3400_v2, %v3404_v3  ;;  %v3512_v34 = vld [vmem:[%s14445_s19 + $0x980] sm:$0xff] }
 0x273   : > { %9475 = vmatpush2.bf16.msra.mxu0 %v11056_v52  ;;  %9516 = vmatpush2.bf16.msra.mxu1 %v11184_v53  ;;  %v3516_v41 = vld [vmem:[%s14445_s19 + $0x9a0] sm:$0xff] }
 0x274   : > { %9476 = vmatprep.subr.bf16.mxu0 %v11049_v54  ;;  %9517 = vmatprep.subr.bf16.mxu1 %v11177_v55  ;;  %v3640_v43 = vld [vmem:[%s14445_s19 + $0xd80] sm:$0xff]  ;;  %v11273_v52 = vcombine.high %v3512_v34, %v3516_v41  ;;  %v2481_v55 = vrot.slane %v14557_v18, %v14575_v35 }
 0x275   : > { %v3644_v46 = vld [vmem:[%s14445_s19 + $0xda0] sm:$0xff] }
 0x276   : > { %v11401_v53 = vcombine.high %v3640_v43, %v3644_v46  ;;  %v3504_v54 = vld [vmem:[%s14445_s19 + $0x940] sm:$0xff] }
 0x277   : > { %9477 = vmatpush2.bf16.msra.mxu0 %v11048_v60  ;;  %9518 = vmatpush2.bf16.msra.mxu1 %v11176_v61  ;;  %v3508_v56 = vld [vmem:[%s14445_s19 + $0x960] sm:$0xff]  ;;  %v2489_v60 = vrot.slane %v14557_v18, %v14583_v48  ;;  %v11272_v61 = vcombine.low %v3512_v34, %v3516_v41 }
 0x278   : > { %9478 = vmatprep.subr.bf16.mxu0 %v11041_v62  ;;  %9519 = vmatprep.subr.bf16.mxu1 %v11169_v63  ;;  %v3632_v57 = vld [vmem:[%s14445_s19 + $0xd40] sm:$0xff]  ;;  %v11400_v62 = vcombine.low %v3640_v43, %v3644_v46  ;;  %v11265_v1 = vcombine.high %v3504_v54, %v3508_v56 }
 0x279   : > { %v3636_v58 = vld [vmem:[%s14445_s19 + $0xd60] sm:$0xff] }
 0x27a   : > { %v11393_v2 = vcombine.high %v3632_v57, %v3636_v58  ;;  %v3496_v3 = vld [vmem:[%s14445_s19 + $0x900] sm:$0xff] }
 0x27b   : > { %9479 = vmatpush2.bf16.msra.mxu0 %v11040_v4  ;;  %9520 = vmatpush2.bf16.msra.mxu1 %v11168_v5  ;;  %v3500_v5 = vld [vmem:[%s14445_s19 + $0x920] sm:$0xff] }
 0x27c   : > { %9480 = vmatprep.subr.bf16.mxu0 %v11033_v6  ;;  %9521 = vmatprep.subr.bf16.mxu1 %v11161_v7  ;;  %v3624_v6 = vld [vmem:[%s14445_s19 + $0xd00] sm:$0xff]  ;;  %v11257_v7 = vcombine.high %v3496_v3, %v3500_v5 }
 0x27d   : > { %v3628_v38 = vld [vmem:[%s14445_s19 + $0xd20] sm:$0xff] }
 0x27e   : > { %v3492_v12 = vld [vmem:[%s14445_s19 + $0x8e0] sm:$0xff] }
 0x27f   : > { %9481 = vmatpush2.bf16.msra.mxu0 %v11032_v8  ;;  %9522 = vmatpush2.bf16.msra.mxu1 %v11160_v9  ;;  %v11385_v8 = vcombine.high %v3624_v6, %v3628_v38  ;;  %v3488_v9 = vld [vmem:[%s14445_s19 + $0x8c0] sm:$0xff] }
 0x280   : > { %9532 = vmatprep.subr.bf16.mxu0 %v11281_v10  ;;  %9573 = vmatprep.subr.bf16.mxu1 %v11409_v11  ;;  %v3600_v41 = vld [vmem:[%s14445_s19 + $0xc40] sm:$0xff] }
 0x281   : > { %v3604_v43 = vld [vmem:[%s14445_s19 + $0xc60] sm:$0xff] }
 0x2e3   : > { %v2608_v25 = vpop.f32.mrf.mxu0  ;;  %v2679_v26 = vpop.f32.mrf.mxu1 }
 0x2e4   : > { %v2609_v27 = vadd.f32 %v2608_v25, %v2461_v21  ;;  %v2680_v28 = vadd.f32 %v2679_v26, %v2469_v22  ;;  %v3616_v21 = vld [vmem:[%s14445_s19 + $0xcc0] sm:$0xff]  ;;  %v11384_v25 = vcombine.low %v3624_v6, %v3628_v38  ;;  %v11249_v26 = vcombine.high %v3488_v9, %v3492_v12 }
 0x2e5   : > { %v2610_v29 = vpop.f32.mrf.mxu0  ;;  %v2681_v30 = vpop.f32.mrf.mxu1  ;;  %v3620_v22 = vld [vmem:[%s14445_s19 + $0xce0] sm:$0xff] }
 0x2e6   : > { %v3112_v16 = vmax.f32 %v2680_v28, 0.0  ;;  %v2611_v31 = vadd.f32 %v2610_v29, %v2465_v23  ;;  %v2682_v32 = vadd.f32 %v2681_v30, %v2473_v24  ;;  %v3110_v33 = vmax.f32 %v2609_v27, 0.0  ;;  %v3480_v28 = vld [vmem:[%s14445_s19 + $0x880] sm:$0xff] }
 0x2e7   : > { %v11256_v24 = vcombine.low %v3496_v3, %v3500_v5  ;;  %v11377_v27 = vcombine.high %v3616_v21, %v3620_v22  ;;  %v3484_v29 = vld [vmem:[%s14445_s19 + $0x8a0] sm:$0xff] }
 0x2e8   : > { %v3111_v36 = vmax.f32 %v2611_v31, 0.0  ;;  %v3113_v37 = vmax.f32 %v2682_v32, 0.0  ;;  %v14580_v47 = vpack.c.bf16 %v3112_v16, %v3112_v16  ;;  %v14589_v51 = vpack.c.bf16 %v3110_v33, %v3110_v33  ;;  %v3608_v30 = vld [vmem:[%s14445_s19 + $0xc80] sm:$0xff] }
 0x2e9   : > { %v3612_v16 = vld [vmem:[%s14445_s19 + $0xca0] sm:$0xff]  ;;  %v11248_v31 = vcombine.low %v3488_v9, %v3492_v12  ;;  %v11376_v32 = vcombine.low %v3616_v21, %v3620_v22  ;;  %v11241_v33 = vcombine.high %v3480_v28, %v3484_v29  ;;  %v11240_v46 = vcombine.low %v3480_v28, %v3484_v29 }
 0x2ea   : > { %v14585_v49 = vpack.c.bf16 %v3111_v36, %v3111_v36  ;;  %v14587_v50 = vpack.c.bf16 %v3113_v37, %v3113_v37  ;;  %v11369_v34 = vcombine.high %v3608_v30, %v3612_v16  ;;  %v3472_v36 = vld [vmem:[%s14445_s19 + $0x840] sm:$0xff] }
 0x2eb   : > { %v3476_v37 = vld [vmem:[%s14445_s19 + $0x860] sm:$0xff] }
 0x2ec   : > { %9482 = vmatprep.mubr.bf16.mxu0 %v14585_v49  ;;  %9523 = vmatprep.mubr.bf16.mxu1 %v14587_v50  ;;  %v14599_v59 = vpop.f32.mrf.mxu0  ;;  %v3712_v3 = vld [vmem:[%s14445_s19 + $0xfc0] sm:$0xff] }
 0x2ed   : > { %9483 = vmatmul.mubr.bf16.vlgmr.msra.gmra.mxu0 %v14589_v51  ;;  %9524 = vmatmul.mubr.bf16.vlgmr.msra.gmra.mxu1 %v14580_v47  ;;  %v3568_v12 = vld [vmem:[%s14445_s19 + $0xb40] sm:$0xff] }
 0x2ee   : > { %9533 = vmatpush1.bf16.msra.mxu0 %v11280_v44  ;;  %9574 = vmatpush1.bf16.msra.mxu1 %v11408_v45  ;;  %v14611_v63 = vpop.f32.mrf.mxu1  ;;  %v2752_v0 = vpop.f32.mrf.mxu0  ;;  %v11264_v44 = vcombine.low %v3504_v54, %v3508_v56  ;;  %v11392_v45 = vcombine.low %v3632_v57, %v3636_v58  ;;  %v11361_v54 = vcombine.high %v3600_v41, %v3604_v43  ;;  %v3468_v56 = vld [vmem:[%s14445_s19 + $0x820] sm:$0xff] }
 0x2ef   : > { %9534 = vmatprep.subr.bf16.mxu0 %v11273_v52  ;;  %9575 = vmatprep.subr.bf16.mxu1 %v11401_v53  ;;  %v2753_v4 = vadd.f32 %v2752_v0, %v2481_v55  ;;  %v11368_v52 = vcombine.low %v3608_v30, %v3612_v16  ;;  %v11233_v53 = vcombine.high %v3472_v36, %v3476_v37  ;;  %v3464_v55 = vld [vmem:[%s14445_s19 + $0x800] sm:$0xff] }
 0x2f0   : > { %v2823_v39 = vpop.f32.mrf.mxu1  ;;  %v3592_v57 = vld [vmem:[%s14445_s19 + $0xc00] sm:$0xff]  ;;  %v11224_v5 = vcombine.low %v3464_v55, %v3468_v56 }
 0x2f1   : > { %v3115_v40 = vmax.f32 %v2753_v4, 0.0  ;;  %v2824_v42 = vadd.f32 %v2823_v39, %v2489_v60  ;;  %v3596_v58 = vld [vmem:[%s14445_s19 + $0xc20] sm:$0xff]  ;;  %v11232_v60 = vcombine.low %v3472_v36, %v3476_v37 }
 0x2f2   : > { %9535 = vmatpush1.bf16.msra.mxu0 %v11272_v61  ;;  %9576 = vmatpush1.bf16.msra.mxu1 %v11400_v62  ;;  %v11360_v61 = vcombine.low %v3600_v41, %v3604_v43  ;;  %v11225_v62 = vcombine.high %v3464_v55, %v3468_v56  ;;  %v11353_v0 = vcombine.high %v3592_v57, %v3596_v58  ;;  %v3716_v4 = vld [vmem:[%s14445_s19 + $0xfe0] sm:$0xff] }
 0x2f3   : > { %9536 = vmatprep.subr.bf16.mxu0 %v11265_v1  ;;  %9577 = vmatprep.subr.bf16.mxu1 %v11393_v2  ;;  %v14618_v10 = vpack.c.bf16 %v3115_v40, %v3115_v40  ;;  %v3117_v11 = vmax.f32 %v2824_v42, 0.0  ;;  %v3584_v1 = vld [vmem:[%s14445_s19 + $0xbc0] sm:$0xff]  ;;  %v11352_v6 = vcombine.low %v3592_v57, %v3596_v58  ;;  %v11473_v39 = vcombine.high %v3712_v3, %v3716_v4 }
 0x2f4   : > { %v3588_v2 = vld [vmem:[%s14445_s19 + $0xbe0] sm:$0xff] }
 0x2f5   : > { %v14623_v23 = vpack.c.bf16 %v3117_v11, %v3117_v11  ;;  %9564 = vmatprep.mubr.bf16.mxu0 %v14618_v10  ;;  %v11345_v38 = vcombine.high %v3584_v1, %v3588_v2  ;;  %v3576_v40 = vld [vmem:[%s14445_s19 + $0xb80] sm:$0xff] }
 0x2f6   : > { %9537 = vmatpush1.bf16.msra.mxu0 %v11264_v44  ;;  %9578 = vmatpush1.bf16.msra.mxu1 %v11392_v45  ;;  %v3580_v42 = vld [vmem:[%s14445_s19 + $0xba0] sm:$0xff] }
 0x2f7   : > { %9538 = vmatprep.subr.bf16.mxu0 %v11257_v7  ;;  %9579 = vmatprep.subr.bf16.mxu1 %v11385_v8  ;;  %v3704_v44 = vld [vmem:[%s14445_s19 + $0xf80] sm:$0xff]  ;;  %v11344_v7 = vcombine.low %v3584_v1, %v3588_v2  ;;  %v11472_v8 = vcombine.low %v3712_v3, %v3716_v4  ;;  %v11337_v9 = vcombine.high %v3576_v40, %v3580_v42  ;;  %v14667_v3 = vsub.s32 4, %v14546_v13 }
 0x2f8   : > { %9605 = vmatprep.mubr.bf16.mxu1 %v14623_v23  ;;  %v3708_v45 = vld [vmem:[%s14445_s19 + $0xfa0] sm:$0xff] }
 0x2f9   : > { %v11465_v11 = vcombine.high %v3704_v44, %v3708_v45  ;;  %v3572_v21 = vld [vmem:[%s14445_s19 + $0xb60] sm:$0xff] }
 0x2fa   : > { %9539 = vmatpush1.bf16.msra.mxu0 %v11256_v24  ;;  %9580 = vmatpush1.bf16.msra.mxu1 %v11384_v25  ;;  %v3696_v22 = vld [vmem:[%s14445_s19 + $0xf40] sm:$0xff]  ;;  %v11336_v25 = vcombine.low %v3576_v40, %v3580_v42  ;;  %v14680_v42 = vpop.f32.mrf.mxu0 }
 0x2fb   : > { %9540 = vmatprep.subr.bf16.mxu0 %v11249_v26  ;;  %9581 = vmatprep.subr.bf16.mxu1 %v11377_v27  ;;  %v3700_v24 = vld [vmem:[%s14445_s19 + $0xf60] sm:$0xff]  ;;  %v11464_v26 = vcombine.low %v3704_v44, %v3708_v45  ;;  %v11329_v27 = vcombine.high %v3568_v12, %v3572_v21 }
 0x2fc   : > { %v11457_v28 = vcombine.high %v3696_v22, %v3700_v24  ;;  %v3560_v29 = vld [vmem:[%s14445_s19 + $0xb00] sm:$0xff] }
 0x2fd   : > { %v3564_v30 = vld [vmem:[%s14445_s19 + $0xb20] sm:$0xff] }
 0x2fe   : > { %9541 = vmatpush1.bf16.msra.mxu0 %v11248_v31  ;;  %9582 = vmatpush1.bf16.msra.mxu1 %v11376_v32  ;;  %v3688_v16 = vld [vmem:[%s14445_s19 + $0xf00] sm:$0xff]  ;;  %v11328_v32 = vcombine.low %v3568_v12, %v3572_v21 }
 0x2ff   : > { %9542 = vmatprep.subr.bf16.mxu0 %v11241_v33  ;;  %9583 = vmatprep.subr.bf16.mxu1 %v11369_v34  ;;  %v3692_v31 = vld [vmem:[%s14445_s19 + $0xf20] sm:$0xff]  ;;  %v11456_v33 = vcombine.low %v3696_v22, %v3700_v24  ;;  %v11321_v34 = vcombine.high %v3560_v29, %v3564_v30 }
 0x300   : > { %v11449_v36 = vcombine.high %v3688_v16, %v3692_v31  ;;  %v3552_v37 = vld [vmem:[%s14445_s19 + $0xac0] sm:$0xff] }
 0x301   : > { %v3556_v41 = vld [vmem:[%s14445_s19 + $0xae0] sm:$0xff] }
 0x302   : > { %9543 = vmatpush1.bf16.msra.mxu0 %v11240_v46  ;;  %9584 = vmatpush1.bf16.msra.mxu1 %v11368_v52  ;;  %v3680_v43 = vld [vmem:[%s14445_s19 + $0xec0] sm:$0xff]  ;;  %v11320_v52 = vcombine.low %v3560_v29, %v3564_v30 }
 0x303   : > { %9544 = vmatprep.subr.bf16.mxu0 %v11233_v53  ;;  %9585 = vmatprep.subr.bf16.mxu1 %v11361_v54  ;;  %v3684_v46 = vld [vmem:[%s14445_s19 + $0xee0] sm:$0xff]  ;;  %v11448_v53 = vcombine.low %v3688_v16, %v3692_v31  ;;  %v11313_v54 = vcombine.high %v3552_v37, %v3556_v41 }
 0x304   : > { %v11441_v55 = vcombine.high %v3680_v43, %v3684_v46  ;;  %v3544_v56 = vld [vmem:[%s14445_s19 + $0xa80] sm:$0xff] }
 0x305   : > { %v3548_v57 = vld [vmem:[%s14445_s19 + $0xaa0] sm:$0xff] }
 0x306   : > { %9545 = vmatpush1.bf16.msra.mxu0 %v11232_v60  ;;  %9586 = vmatpush1.bf16.msra.mxu1 %v11360_v61  ;;  %v3672_v58 = vld [vmem:[%s14445_s19 + $0xe80] sm:$0xff]  ;;  %v14664_v61 = vsub.s32 6, %v14546_v13  ;;  %v11305_v1 = vcombine.high %v3544_v56, %v3548_v57  ;;  %v14682_v13 = vpop.f32.mrf.mxu1  ;;  %v11304_v44 = vcombine.low %v3544_v56, %v3548_v57 }
 0x307   : > { %9546 = vmatprep.subr.bf16.mxu0 %v11225_v62  ;;  %9587 = vmatprep.subr.bf16.mxu1 %v11353_v0  ;;  %v3676_v60 = vld [vmem:[%s14445_s19 + $0xea0] sm:$0xff]  ;;  %v11312_v62 = vcombine.low %v3552_v37, %v3556_v41  ;;  %v11440_v0 = vcombine.low %v3680_v43, %v3684_v46 }
 0x308   : > { %v11433_v2 = vcombine.high %v3672_v58, %v3676_v60  ;;  %v3536_v4 = vld [vmem:[%s14445_s19 + $0xa40] sm:$0xff]  ;;  %v11432_v45 = vcombine.low %v3672_v58, %v3676_v60 }
 0x309   : > { %v14678_v40 = vld [vmem:[%s15829_s2 + $0x8] sm:$0xff] }
 0x30a   : > { %9547 = vmatpush1.bf16.msra.mxu0 %v11224_v5  ;;  %9588 = vmatpush1.bf16.msra.mxu1 %v11352_v6  ;;  %v3540_v5 = vld [vmem:[%s14445_s19 + $0xa60] sm:$0xff]  ;;  %v2497_v24 = vrot.slane %v14678_v40, %v14560_v19 }
 0x30b   : > { %9548 = vmatprep.subr.bf16.mxu0 %v11345_v38  ;;  %9589 = vmatprep.subr.bf16.mxu1 %v11473_v39  ;;  %v3664_v6 = vld [vmem:[%s14445_s19 + $0xe40] sm:$0xff]  ;;  %v2485_v39 = vrot.slane %v14557_v18, %v14664_v61 }
 0x30c   : > { %v3668_v38 = vld [vmem:[%s14445_s19 + $0xe60] sm:$0xff] }
 0x30d   : > { %v3532_v12 = vld [vmem:[%s14445_s19 + $0xa20] sm:$0xff]  ;;  %v11424_v29 = vcombine.low %v3664_v6, %v3668_v38 }
 0x30e   : > { %9549 = vmatpush2.bf16.msra.mxu0 %v11344_v7  ;;  %9590 = vmatpush2.bf16.msra.mxu1 %v11472_v8  ;;  %v2477_v7 = vrot.slane %v14557_v18, %v14667_v3  ;;  %v11297_v8 = vcombine.high %v3536_v4, %v3540_v5  ;;  %v3656_v21 = vld [vmem:[%s14445_s19 + $0xe00] sm:$0xff]  ;;  %v2965_v18 = vpop.f32.mrf.mxu1 }
 0x30f   : > { %9550 = vmatprep.subr.bf16.mxu0 %v11337_v9  ;;  %9591 = vmatprep.subr.bf16.mxu1 %v11465_v11  ;;  %v11425_v9 = vcombine.high %v3664_v6, %v3668_v38  ;;  %v3528_v11 = vld [vmem:[%s14445_s19 + $0xa00] sm:$0xff] }
 0x310   : > { %v3660_v22 = vld [vmem:[%s14445_s19 + $0xe20] sm:$0xff]  ;;  %v2751_v30 = vadd.f32 %v14599_v59, %v2477_v7  ;;  %v11289_v16 = vcombine.high %v3528_v11, %v3532_v12  ;;  %v11288_v43 = vcombine.low %v3528_v11, %v3532_v12 }
 0x311   : > { %v11417_v31 = vcombine.high %v3656_v21, %v3660_v22  ;;  %v11416_v46 = vcombine.low %v3656_v21, %v3660_v22  ;;  %v3896_v56 = vld [vmem:[%s14445_s19 + $0x1580] sm:$0xff] }
 0x312   : > { %9551 = vmatpush2.bf16.msra.mxu0 %v11336_v25  ;;  %9592 = vmatpush2.bf16.msra.mxu1 %v11464_v26  ;;  %v2505_v25 = vrot.slane %v14678_v40, %v14563_v20  ;;  %v2822_v26 = vadd.f32 %v14611_v63, %v2485_v39  ;;  %v3114_v59 = vmax.f32 %v2751_v30, 0.0  ;;  %v3900_v57 = vld [vmem:[%s14445_s19 + $0x15a0] sm:$0xff] }
 0x313   : > { %9552 = vmatprep.subr.bf16.mxu0 %v11329_v27  ;;  %9593 = vmatprep.subr.bf16.mxu1 %v11457_v28  ;;  %v2894_v27 = vpop.f32.mrf.mxu0  ;;  %v11296_v28 = vcombine.low %v3536_v4, %v3540_v5  ;;  %v11657_v5 = vcombine.high %v3896_v56, %v3900_v57  ;;  %v3760_v6 = vld [vmem:[%s14445_s19 + $0x1140] sm:$0xff] }
 0x314   : > { %v2895_v63 = vadd.f32 %v2894_v27, %v2497_v24  ;;  %v2966_v37 = vadd.f32 %v2965_v18, %v2505_v25  ;;  %v3116_v41 = vmax.f32 %v2822_v26, 0.0  ;;  %v3764_v38 = vld [vmem:[%s14445_s19 + $0x1160] sm:$0xff] }
 0x315   : > { %v3888_v39 = vld [vmem:[%s14445_s19 + $0x1540] sm:$0xff]  ;;  %v11521_v11 = vcombine.high %v3760_v6, %v3764_v38  ;;  %v11520_v26 = vcombine.low %v3760_v6, %v3764_v38 }
 0x316   : > { %9553 = vmatpush2.bf16.msra.mxu0 %v11328_v32  ;;  %9594 = vmatpush2.bf16.msra.mxu1 %v11456_v33  ;;  %v3776_v32 = vld [vmem:[%s14445_s19 + $0x11c0] sm:$0xff]  ;;  %v3119_v58 = vmax.f32 %v2895_v63, 0.0  ;;  %v3121_v60 = vmax.f32 %v2966_v37, 0.0 }
 0x317   : > { %9554 = vmatprep.subr.bf16.mxu0 %v11321_v34  ;;  %9595 = vmatprep.subr.bf16.mxu1 %v11449_v36  ;;  %v3780_v33 = vld [vmem:[%s14445_s19 + $0x11e0] sm:$0xff] }
 0x318   : > { %v3904_v34 = vld [vmem:[%s14445_s19 + $0x15c0] sm:$0xff]  ;;  %v14714_v7 = vpack.c.bf16 %v3121_v60, %v3121_v60 }
 0x319   : > { %v3908_v36 = vld [vmem:[%s14445_s19 + $0x15e0] sm:$0xff] }
 0x31a   : > { %9555 = vmatpush2.bf16.msra.mxu0 %v11320_v52  ;;  %9596 = vmatpush2.bf16.msra.mxu1 %v11448_v53  ;;  %v11537_v52 = vcombine.high %v3776_v32, %v3780_v33  ;;  %v11665_v53 = vcombine.high %v3904_v34, %v3908_v36  ;;  %v3752_v21 = vld [vmem:[%s14445_s19 + $0x1100] sm:$0xff] }
 0x31b   : > { %9556 = vmatprep.subr.bf16.mxu0 %v11313_v54  ;;  %9597 = vmatprep.subr.bf16.mxu1 %v11441_v55  ;;  %v3768_v54 = vld [vmem:[%s14445_s19 + $0x1180] sm:$0xff] }
 0x31c   : > { %v3772_v55 = vld [vmem:[%s14445_s19 + $0x11a0] sm:$0xff] }
 0x31d   : > { %v11529_v4 = vcombine.high %v3768_v54, %v3772_v55  ;;  %v3756_v22 = vld [vmem:[%s14445_s19 + $0x1120] sm:$0xff] }
 0x31e   : > { %9557 = vmatpush2.bf16.msra.mxu0 %v11312_v62  ;;  %9598 = vmatpush2.bf16.msra.mxu1 %v11440_v0  ;;  %v14704_v62 = vpack.c.bf16 %v3116_v41, %v3116_v41  ;;  %v11536_v0 = vcombine.low %v3776_v32, %v3780_v33  ;;  %v3880_v24 = vld [vmem:[%s14445_s19 + $0x1500] sm:$0xff]  ;;  %v11513_v18 = vcombine.high %v3752_v21, %v3756_v22 }
 0x31f   : > { %9558 = vmatprep.subr.bf16.mxu0 %v11305_v1  ;;  %9599 = vmatprep.subr.bf16.mxu1 %v11433_v2  ;;  %v11664_v1 = vcombine.low %v3904_v34, %v3908_v36  ;;  %v14706_v2 = vpack.c.bf16 %v3114_v59, %v3114_v59  ;;  %v3884_v25 = vld [vmem:[%s14445_s19 + $0x1520] sm:$0xff]  ;;  %v11512_v32 = vcombine.low %v3752_v21, %v3756_v22 }
 0x320   : > { %v3748_v30 = vld [vmem:[%s14445_s19 + $0x10e0] sm:$0xff]  ;;  %v11640_v33 = vcombine.low %v3880_v24, %v3884_v25 }
 0x321   : > { %v3736_v63 = vld [vmem:[%s14445_s19 + $0x1080] sm:$0xff] }
 0x322   : > { %9559 = vmatpush2.bf16.msra.mxu0 %v11304_v44  ;;  %9600 = vmatpush2.bf16.msra.mxu1 %v11432_v45  ;;  %v3892_v44 = vld [vmem:[%s14445_s19 + $0x1560] sm:$0xff]  ;;  %v14712_v45 = vpack.c.bf16 %v3119_v58, %v3119_v58 }
 0x323   : > { %9560 = vmatprep.subr.bf16.mxu0 %v11297_v8  ;;  %9601 = vmatprep.subr.bf16.mxu1 %v11425_v9  ;;  %v11528_v8 = vcombine.low %v3768_v54, %v3772_v55  ;;  %v11656_v9 = vcombine.low %v3896_v56, %v3900_v57  ;;  %v11649_v12 = vcombine.high %v3888_v39, %v3892_v44  ;;  %v3740_v37 = vld [vmem:[%s14445_s19 + $0x10a0] sm:$0xff] }
 0x324   : > { %v11648_v27 = vcombine.low %v3888_v39, %v3892_v44  ;;  %v3864_v41 = vld [vmem:[%s14445_s19 + $0x1480] sm:$0xff]  ;;  %v11496_v58 = vcombine.low %v3736_v63, %v3740_v37 }
 0x325   : > { %v3728_v54 = vld [vmem:[%s14445_s19 + $0x1040] sm:$0xff] }
 0x326   : > { %9561 = vmatpush2.bf16.msra.mxu0 %v11296_v28  ;;  %9602 = vmatpush2.bf16.msra.mxu1 %v11424_v29  ;;  %v11641_v28 = vcombine.high %v3880_v24, %v3884_v25  ;;  %v3744_v29 = vld [vmem:[%s14445_s19 + $0x10c0] sm:$0xff] }
 0x327   : > { %9562 = vmatprep.subr.bf16.mxu0 %v11289_v16  ;;  %9603 = vmatprep.subr.bf16.mxu1 %v11417_v31  ;;  %v3872_v16 = vld [vmem:[%s14445_s19 + $0x14c0] sm:$0xff]  ;;  %v11505_v34 = vcombine.high %v3744_v29, %v3748_v30 }
 0x328   : > { %v3876_v31 = vld [vmem:[%s14445_s19 + $0x14e0] sm:$0xff] }
 0x329   : > { %v11633_v36 = vcombine.high %v3872_v16, %v3876_v31  ;;  %v11632_v59 = vcombine.low %v3872_v16, %v3876_v31  ;;  %v3732_v55 = vld [vmem:[%s14445_s19 + $0x1060] sm:$0xff] }
 0x32a   : > { %9563 = vmatpush2.bf16.msra.mxu0 %v11288_v43  ;;  %9604 = vmatpush2.bf16.msra.mxu1 %v11416_v46  ;;  %v3868_v43 = vld [vmem:[%s14445_s19 + $0x14a0] sm:$0xff]  ;;  %v11504_v46 = vcombine.low %v3744_v29, %v3748_v30  ;;  %v11488_v39 = vcombine.low %v3728_v54, %v3732_v55 }
 0x32b   : > { %9614 = vmatprep.subr.bf16.mxu0 %v11537_v52  ;;  %9655 = vmatprep.subr.bf16.mxu1 %v11665_v53  ;;  %v11497_v52 = vcombine.high %v3736_v63, %v3740_v37  ;;  %v11625_v53 = vcombine.high %v3864_v41, %v3868_v43  ;;  %v3856_v56 = vld [vmem:[%s14445_s19 + $0x1440] sm:$0xff]  ;;  %v11624_v60 = vcombine.low %v3864_v41, %v3868_v43 }
 0x32c   : > { %v3860_v57 = vld [vmem:[%s14445_s19 + $0x1460] sm:$0xff] }
 0x32d   : > { %9565 = vmatmul.mubr.bf16.vlgmr.msra.gmra.mxu0 %v14706_v2  ;;  %9606 = vmatmul.mubr.bf16.vlgmr.msra.gmra.mxu1 %v14704_v62  ;;  %v3848_v6 = vld [vmem:[%s14445_s19 + $0x1400] sm:$0xff]  ;;  %v11616_v44 = vcombine.low %v3856_v56, %v3860_v57 }
 0x32e   : > { %9615 = vmatpush1.bf16.msra.mxu0 %v11536_v0  ;;  %9656 = vmatpush1.bf16.msra.mxu1 %v11664_v1  ;;  %v11489_v0 = vcombine.high %v3728_v54, %v3732_v55  ;;  %v11617_v1 = vcombine.high %v3856_v56, %v3860_v57  ;;  %v3852_v38 = vld [vmem:[%s14445_s19 + $0x1420] sm:$0xff] }
 0x32f   : > { %9616 = vmatprep.subr.bf16.mxu0 %v11529_v4  ;;  %9657 = vmatprep.subr.bf16.mxu1 %v11657_v5  ;;  %v3720_v4 = vld [vmem:[%s14445_s19 + $0x1000] sm:$0xff]  ;;  %v11608_v25 = vcombine.low %v3848_v6, %v3852_v38 }
 0x330   : > { %9646 = vmatprep.mubr.bf16.mxu0 %v14712_v45  ;;  %9687 = vmatprep.mubr.bf16.mxu1 %v14714_v7  ;;  %v3724_v5 = vld [vmem:[%s14445_s19 + $0x1020] sm:$0xff] }
 0x331   : > { %v3968_v21 = vld [vmem:[%s14445_s19 + $0x17c0] sm:$0xff]  ;;  %v11480_v24 = vcombine.low %v3720_v4, %v3724_v5 }
 0x332   : > { %9617 = vmatpush1.bf16.msra.mxu0 %v11528_v8  ;;  %9658 = vmatpush1.bf16.msra.mxu1 %v11656_v9  ;;  %v11481_v8 = vcombine.high %v3720_v4, %v3724_v5  ;;  %v11609_v9 = vcombine.high %v3848_v6, %v3852_v38  ;;  %v3972_v22 = vld [vmem:[%s14445_s19 + $0x17e0] sm:$0xff] }
 0x333   : > { %9618 = vmatprep.subr.bf16.mxu0 %v11521_v11  ;;  %9659 = vmatprep.subr.bf16.mxu1 %v11649_v12  ;;  %v3840_v11 = vld [vmem:[%s14445_s19 + $0x13c0] sm:$0xff]  ;;  %v11728_v31 = vcombine.low %v3968_v21, %v3972_v22 }
 0x334   : > { %v3844_v12 = vld [vmem:[%s14445_s19 + $0x13e0] sm:$0xff] }
 0x335   : > { %v3960_v29 = vld [vmem:[%s14445_s19 + $0x1780] sm:$0xff]  ;;  %v11600_v16 = vcombine.low %v3840_v11, %v3844_v12 }
 0x336   : > { %9619 = vmatpush1.bf16.msra.mxu0 %v11520_v26  ;;  %9660 = vmatpush1.bf16.msra.mxu1 %v11648_v27  ;;  %v11601_v26 = vcombine.high %v3840_v11, %v3844_v12  ;;  %v11729_v27 = vcombine.high %v3968_v21, %v3972_v22  ;;  %v3964_v30 = vld [vmem:[%s14445_s19 + $0x17a0] sm:$0xff] }
 0x337   : > { %9620 = vmatprep.subr.bf16.mxu0 %v11513_v18  ;;  %9661 = vmatprep.subr.bf16.mxu1 %v11641_v28  ;;  %v3832_v18 = vld [vmem:[%s14445_s19 + $0x1380] sm:$0xff]  ;;  %v11720_v43 = vcombine.low %v3960_v29, %v3964_v30 }
 0x338   : > { %v3836_v28 = vld [vmem:[%s14445_s19 + $0x13a0] sm:$0xff] }
 0x339   : > { %v3952_v63 = vld [vmem:[%s14445_s19 + $0x1740] sm:$0xff]  ;;  %v11592_v41 = vcombine.low %v3832_v18, %v3836_v28 }
 0x33a   : > { %9621 = vmatpush1.bf16.msra.mxu0 %v11512_v32  ;;  %9662 = vmatpush1.bf16.msra.mxu1 %v11640_v33  ;;  %v11593_v32 = vcombine.high %v3832_v18, %v3836_v28  ;;  %v11721_v33 = vcombine.high %v3960_v29, %v3964_v30  ;;  %v3956_v37 = vld [vmem:[%s14445_s19 + $0x1760] sm:$0xff]  ;;  %v2501_v29 = vrot.slane %v14678_v40, %v14552_v15  ;;  %v14770_v30 = vpop.f32.mrf.mxu0 }
 0x33b   : > { %9622 = vmatprep.subr.bf16.mxu0 %v11505_v34  ;;  %9663 = vmatprep.subr.bf16.mxu1 %v11633_v36  ;;  %v3824_v34 = vld [vmem:[%s14445_s19 + $0x1340] sm:$0xff]  ;;  %v11712_v57 = vcombine.low %v3952_v63, %v3956_v37 }
 0x33c   : > { %v3828_v36 = vld [vmem:[%s14445_s19 + $0x1360] sm:$0xff] }
 0x33d   : > { %v3944_v54 = vld [vmem:[%s14445_s19 + $0x1700] sm:$0xff]  ;;  %v11584_v56 = vcombine.low %v3824_v34, %v3828_v36 }
 0x33e   : > { %9623 = vmatpush1.bf16.msra.mxu0 %v11504_v46  ;;  %9664 = vmatpush1.bf16.msra.mxu1 %v11632_v59  ;;  %v11585_v46 = vcombine.high %v3824_v34, %v3828_v36  ;;  %v11713_v59 = vcombine.high %v3952_v63, %v3956_v37  ;;  %v3948_v55 = vld [vmem:[%s14445_s19 + $0x1720] sm:$0xff] }
 0x33f   : > { %9624 = vmatprep.subr.bf16.mxu0 %v11497_v52  ;;  %9665 = vmatprep.subr.bf16.mxu1 %v11625_v53  ;;  %v3816_v52 = vld [vmem:[%s14445_s19 + $0x1300] sm:$0xff]  ;;  %v11704_v38 = vcombine.low %v3944_v54, %v3948_v55 }
 0x340   : > { %v3820_v53 = vld [vmem:[%s14445_s19 + $0x1320] sm:$0xff] }
 0x341   : > { %v3936_v4 = vld [vmem:[%s14445_s19 + $0x16c0] sm:$0xff]  ;;  %v11576_v6 = vcombine.low %v3816_v52, %v3820_v53 }
 0x342   : > { %9625 = vmatpush1.bf16.msra.mxu0 %v11496_v58  ;;  %9666 = vmatpush1.bf16.msra.mxu1 %v11624_v60  ;;  %v11577_v58 = vcombine.high %v3816_v52, %v3820_v53  ;;  %v11705_v60 = vcombine.high %v3944_v54, %v3948_v55  ;;  %v3940_v5 = vld [vmem:[%s14445_s19 + $0x16e0] sm:$0xff]  ;;  %v2964_v52 = vadd.f32 %v14682_v13, %v2501_v29  ;;  %v3036_v53 = vpop.f32.mrf.mxu0 }
 0x343   : > { %9626 = vmatprep.subr.bf16.mxu0 %v11489_v0  ;;  %9667 = vmatprep.subr.bf16.mxu1 %v11617_v1  ;;  %v3808_v0 = vld [vmem:[%s14445_s19 + $0x12c0] sm:$0xff]  ;;  %v11696_v22 = vcombine.low %v3936_v4, %v3940_v5 }
 0x344   : > { %v3812_v1 = vld [vmem:[%s14445_s19 + $0x12e0] sm:$0xff] }
 0x345   : > { %v3928_v11 = vld [vmem:[%s14445_s19 + $0x1680] sm:$0xff]  ;;  %v11568_v21 = vcombine.low %v3808_v0, %v3812_v1 }
 0x346   : > { %9627 = vmatpush1.bf16.msra.mxu0 %v11488_v39  ;;  %9668 = vmatpush1.bf16.msra.mxu1 %v11616_v44  ;;  %v11569_v39 = vcombine.high %v3808_v0, %v3812_v1  ;;  %v11697_v44 = vcombine.high %v3936_v4, %v3940_v5  ;;  %v3932_v12 = vld [vmem:[%s14445_s19 + $0x16a0] sm:$0xff] }
 0x347   : > { %9628 = vmatprep.subr.bf16.mxu0 %v11481_v8  ;;  %9669 = vmatprep.subr.bf16.mxu1 %v11609_v9  ;;  %v3800_v8 = vld [vmem:[%s14445_s19 + $0x1280] sm:$0xff] }
 0x348   : > { %v3804_v9 = vld [vmem:[%s14445_s19 + $0x12a0] sm:$0xff] }
 0x349   : > { %v3920_v18 = vld [vmem:[%s14445_s19 + $0x1640] sm:$0xff] }
 0x34a   : > { %9629 = vmatpush1.bf16.msra.mxu0 %v11480_v24  ;;  %9670 = vmatpush1.bf16.msra.mxu1 %v11608_v25  ;;  %v11561_v24 = vcombine.high %v3800_v8, %v3804_v9  ;;  %v11689_v25 = vcombine.high %v3928_v11, %v3932_v12  ;;  %v3924_v28 = vld [vmem:[%s14445_s19 + $0x1660] sm:$0xff] }
 0x34b   : > { %9630 = vmatprep.subr.bf16.mxu0 %v11601_v26  ;;  %9671 = vmatprep.subr.bf16.mxu1 %v11729_v27  ;;  %v3792_v26 = vld [vmem:[%s14445_s19 + $0x1240] sm:$0xff]  ;;  %v11681_v36 = vcombine.high %v3920_v18, %v3924_v28 }
 0x34c   : > { %v3796_v27 = vld [vmem:[%s14445_s19 + $0x1260] sm:$0xff] }
 0x34d   : > { %v11553_v34 = vcombine.high %v3792_v26, %v3796_v27  ;;  %v3784_v63 = vld [vmem:[%s14445_s19 + $0x1200] sm:$0xff]  ;;  %v11552_v55 = vcombine.low %v3792_v26, %v3796_v27 }
 0x34e   : > { %9631 = vmatpush2.bf16.msra.mxu0 %v11600_v16  ;;  %9672 = vmatpush2.bf16.msra.mxu1 %v11728_v31  ;;  %v14772_v16 = vpop.f32.mrf.mxu1  ;;  %v11560_v31 = vcombine.low %v3800_v8, %v3804_v9  ;;  %v3788_v37 = vld [vmem:[%s14445_s19 + $0x1220] sm:$0xff] }
 0x34f   : > { %9632 = vmatprep.subr.bf16.mxu0 %v11593_v32  ;;  %9673 = vmatprep.subr.bf16.mxu1 %v11721_v33  ;;  %v11688_v32 = vcombine.low %v3928_v11, %v3932_v12  ;;  %v2493_v33 = vrot.slane %v14678_v40, %v14549_v14  ;;  %v4032_v0 = vld [vmem:[%s14445_s19 + $0x19c0] sm:$0xff] }
 0x350   : > { %v3107_v54 = vpop.f32.mrf.mxu1  ;;  %v4036_v1 = vld [vmem:[%s14445_s19 + $0x19e0] sm:$0xff] }
 0x351   : > { %v4160_v4 = vld [vmem:[%s14445_s19 + $0x1dc0] sm:$0xff]  ;;  %v11793_v8 = vcombine.high %v4032_v0, %v4036_v1  ;;  %v11792_v27 = vcombine.low %v4032_v0, %v4036_v1 }
 0x352   : > { %9633 = vmatpush2.bf16.msra.mxu0 %v11592_v41  ;;  %9674 = vmatpush2.bf16.msra.mxu1 %v11720_v43  ;;  %v3912_v41 = vld [vmem:[%s14445_s19 + $0x1600] sm:$0xff] }
 0x353   : > { %9634 = vmatprep.subr.bf16.mxu0 %v11585_v46  ;;  %9675 = vmatprep.subr.bf16.mxu1 %v11713_v59  ;;  %v3916_v43 = vld [vmem:[%s14445_s19 + $0x1620] sm:$0xff]  ;;  %v2513_v46 = vrot.slane %v14678_v40, %v14575_v35  ;;  %v2521_v59 = vrot.slane %v14678_v40, %v14583_v48 }
 0x354   : > { %v4164_v5 = vld [vmem:[%s14445_s19 + $0x1de0] sm:$0xff] }
 0x355   : > { %v3108_v13 = vadd.f32 %v3107_v54, %v2521_v59  ;;  %v11921_v9 = vcombine.high %v4160_v4, %v4164_v5  ;;  %v4024_v11 = vld [vmem:[%s14445_s19 + $0x1980] sm:$0xff] }
 0x356   : > { %9635 = vmatpush2.bf16.msra.mxu0 %v11584_v56  ;;  %9676 = vmatpush2.bf16.msra.mxu1 %v11712_v57  ;;  %v11680_v56 = vcombine.low %v3920_v18, %v3924_v28  ;;  %v2893_v57 = vadd.f32 %v14680_v42, %v2493_v33  ;;  %v11920_v18 = vcombine.low %v4160_v4, %v4164_v5  ;;  %v4136_v54 = vld [vmem:[%s14445_s19 + $0x1d00] sm:$0xff] }
 0x357   : > { %9636 = vmatprep.subr.bf16.mxu0 %v11577_v58  ;;  %9677 = vmatprep.subr.bf16.mxu1 %v11705_v60  ;;  %v11545_v58 = vcombine.high %v3784_v63, %v3788_v37  ;;  %v11673_v60 = vcombine.high %v3912_v41, %v3916_v43  ;;  %v4000_v0 = vld [vmem:[%s14445_s19 + $0x18c0] sm:$0xff] }
 0x358   : > { %v3118_v42 = vmax.f32 %v2893_v57, 0.0  ;;  %v4004_v1 = vld [vmem:[%s14445_s19 + $0x18e0] sm:$0xff] }
 0x359   : > { %v4128_v4 = vld [vmem:[%s14445_s19 + $0x1cc0] sm:$0xff] }
 0x35a   : > { %9637 = vmatpush2.bf16.msra.mxu0 %v11576_v6  ;;  %9678 = vmatpush2.bf16.msra.mxu1 %v11704_v38  ;;  %v3037_v6 = vadd.f32 %v3036_v53, %v2513_v46  ;;  %v3120_v38 = vmax.f32 %v2964_v52, 0.0  ;;  %v14796_v28 = vpack.c.bf16 %v3118_v42, %v3118_v42  ;;  %v4008_v52 = vld [vmem:[%s14445_s19 + $0x1900] sm:$0xff] }
 0x35b   : > { %9638 = vmatprep.subr.bf16.mxu0 %v11569_v39  ;;  %9679 = vmatprep.subr.bf16.mxu1 %v11697_v44  ;;  %v11544_v39 = vcombine.low %v3784_v63, %v3788_v37  ;;  %v11672_v44 = vcombine.low %v3912_v41, %v3916_v43  ;;  %v4144_v63 = vld [vmem:[%s14445_s19 + $0x1d40] sm:$0xff] }
 0x35c   : > { %v3123_v12 = vmax.f32 %v3037_v6, 0.0  ;;  %v14794_v26 = vpack.c.bf16 %v3120_v38, %v3120_v38  ;;  %v4148_v37 = vld [vmem:[%s14445_s19 + $0x1d60] sm:$0xff]  ;;  %v11761_v38 = vcombine.high %v4000_v0, %v4004_v1 }
 0x35d   : > { %v11905_v59 = vcombine.high %v4144_v63, %v4148_v37  ;;  %v4012_v53 = vld [vmem:[%s14445_s19 + $0x1920] sm:$0xff]  ;;  %v11904_v57 = vcombine.low %v4144_v63, %v4148_v37 }
 0x35e   : > { %9639 = vmatpush2.bf16.msra.mxu0 %v11568_v21  ;;  %9680 = vmatpush2.bf16.msra.mxu1 %v11696_v22  ;;  %v3125_v21 = vmax.f32 %v3108_v13, 0.0  ;;  %v4028_v22 = vld [vmem:[%s14445_s19 + $0x19a0] sm:$0xff]  ;;  %v14799_v33 = vpack.c.bf16 %v3123_v12, %v3123_v12  ;;  %v11768_v6 = vcombine.low %v4008_v52, %v4012_v53 }
 0x35f   : > { %9640 = vmatprep.subr.bf16.mxu0 %v11561_v24  ;;  %9681 = vmatprep.subr.bf16.mxu1 %v11689_v25  ;;  %v4152_v24 = vld [vmem:[%s14445_s19 + $0x1d80] sm:$0xff]  ;;  %v11785_v29 = vcombine.high %v4024_v11, %v4028_v22  ;;  %v11784_v41 = vcombine.low %v4024_v11, %v4028_v22  ;;  %v11760_v11 = vcombine.low %v4000_v0, %v4004_v1 }
 0x360   : > { %v4156_v25 = vld [vmem:[%s14445_s19 + $0x1da0] sm:$0xff] }
 0x361   : > { %v11912_v43 = vcombine.low %v4152_v24, %v4156_v25  ;;  %v4132_v5 = vld [vmem:[%s14445_s19 + $0x1ce0] sm:$0xff] }
 0x362   : > { %9641 = vmatpush2.bf16.msra.mxu0 %v11560_v31  ;;  %9682 = vmatpush2.bf16.msra.mxu1 %v11688_v32  ;;  %v11913_v31 = vcombine.high %v4152_v24, %v4156_v25  ;;  %v4016_v32 = vld [vmem:[%s14445_s19 + $0x1940] sm:$0xff]  ;;  %v11888_v12 = vcombine.low %v4128_v4, %v4132_v5 }
 0x363   : > { %9642 = vmatprep.subr.bf16.mxu0 %v11553_v34  ;;  %9683 = vmatprep.subr.bf16.mxu1 %v11681_v36  ;;  %v14801_v34 = vpack.c.bf16 %v3125_v21, %v3125_v21  ;;  %v4020_v36 = vld [vmem:[%s14445_s19 + $0x1960] sm:$0xff] }
 0x364   : > { %v11777_v46 = vcombine.high %v4016_v32, %v4020_v36  ;;  %v3996_v42 = vld [vmem:[%s14445_s19 + $0x18a0] sm:$0xff] }
 0x365   : > { %v3984_v24 = vld [vmem:[%s14445_s19 + $0x1840] sm:$0xff] }
 0x366   : > { %9643 = vmatpush2.bf16.msra.mxu0 %v11552_v55  ;;  %9684 = vmatpush2.bf16.msra.mxu1 %v11680_v56  ;;  %v4140_v55 = vld [vmem:[%s14445_s19 + $0x1d20] sm:$0xff]  ;;  %v11776_v56 = vcombine.low %v4016_v32, %v4020_v36 }
 0x367   : > { %9644 = vmatprep.subr.bf16.mxu0 %v11545_v58  ;;  %9685 = vmatprep.subr.bf16.mxu1 %v11673_v60  ;;  %v11769_v58 = vcombine.high %v4008_v52, %v4012_v53  ;;  %v11897_v60 = vcombine.high %v4136_v54, %v4140_v55  ;;  %v11896_v13 = vcombine.low %v4136_v54, %v4140_v55  ;;  %v3988_v25 = vld [vmem:[%s14445_s19 + $0x1860] sm:$0xff] }
 0x368   : > { %v11745_v32 = vcombine.high %v3984_v24, %v3988_v25  ;;  %v3976_v63 = vld [vmem:[%s14445_s19 + $0x1800] sm:$0xff] }
 0x369   : > { %v3980_v37 = vld [vmem:[%s14445_s19 + $0x1820] sm:$0xff] }
 0x36a   : > { %9645 = vmatpush2.bf16.msra.mxu0 %v11544_v39  ;;  %9686 = vmatpush2.bf16.msra.mxu1 %v11672_v44  ;;  %v11889_v39 = vcombine.high %v4128_v4, %v4132_v5  ;;  %v3992_v44 = vld [vmem:[%s14445_s19 + $0x1880] sm:$0xff]  ;;  %v11737_v52 = vcombine.high %v3976_v63, %v3980_v37 }
 0x36b   : > { %9696 = vmatprep.subr.bf16.mxu0 %v11793_v8  ;;  %9737 = vmatprep.subr.bf16.mxu1 %v11921_v9  ;;  %v4120_v8 = vld [vmem:[%s14445_s19 + $0x1c80] sm:$0xff]  ;;  %v11753_v21 = vcombine.high %v3992_v44, %v3996_v42 }
 0x36c   : > { %v4124_v9 = vld [vmem:[%s14445_s19 + $0x1ca0] sm:$0xff] }
 0x36d   : > { %9647 = vmatmul.mubr.bf16.vlgmr.msra.gmra.mxu0 %v14796_v28  ;;  %9688 = vmatmul.mubr.bf16.vlgmr.msra.gmra.mxu1 %v14794_v26  ;;  %v11881_v22 = vcombine.high %v4120_v8, %v4124_v9  ;;  %v4096_v54 = vld [vmem:[%s14445_s19 + $0x1bc0] sm:$0xff] }
 0x36e   : > { %9697 = vmatpush1.bf16.msra.mxu0 %v11792_v27  ;;  %9738 = vmatpush1.bf16.msra.mxu1 %v11920_v18  ;;  %v4112_v27 = vld [vmem:[%s14445_s19 + $0x1c40] sm:$0xff] }
 0x36f   : > { %9698 = vmatprep.subr.bf16.mxu0 %v11785_v29  ;;  %9739 = vmatprep.subr.bf16.mxu1 %v11913_v31  ;;  %v4116_v18 = vld [vmem:[%s14445_s19 + $0x1c60] sm:$0xff]  ;;  %v11752_v29 = vcombine.low %v3992_v44, %v3996_v42  ;;  %v11880_v31 = vcombine.low %v4120_v8, %v4124_v9 }
 0x370   : > { %9728 = vmatprep.mubr.bf16.mxu0 %v14799_v33  ;;  %9769 = vmatprep.mubr.bf16.mxu1 %v14801_v34  ;;  %v11873_v36 = vcombine.high %v4112_v27, %v4116_v18  ;;  %v4100_v55 = vld [vmem:[%s14445_s19 + $0x1be0] sm:$0xff] }
 0x371   : > { %v11857_v0 = vcombine.high %v4096_v54, %v4100_v55  ;;  %v4088_v4 = vld [vmem:[%s14445_s19 + $0x1b80] sm:$0xff] }
 0x372   : > { %9699 = vmatpush1.bf16.msra.mxu0 %v11784_v41  ;;  %9740 = vmatpush1.bf16.msra.mxu1 %v11912_v43  ;;  %v4104_v41 = vld [vmem:[%s14445_s19 + $0x1c00] sm:$0xff] }
 0x373   : > { %9700 = vmatprep.subr.bf16.mxu0 %v11777_v46  ;;  %9741 = vmatprep.subr.bf16.mxu1 %v11905_v59  ;;  %v4108_v43 = vld [vmem:[%s14445_s19 + $0x1c20] sm:$0xff]  ;;  %v11744_v46 = vcombine.low %v3984_v24, %v3988_v25  ;;  %v11872_v59 = vcombine.low %v4112_v27, %v4116_v18 }
 0x374   : > { %v11865_v53 = vcombine.high %v4104_v41, %v4108_v43  ;;  %v4092_v5 = vld [vmem:[%s14445_s19 + $0x1ba0] sm:$0xff] }
 0x375   : > { %v11849_v44 = vcombine.high %v4088_v4, %v4092_v5  ;;  %v4080_v8 = vld [vmem:[%s14445_s19 + $0x1b40] sm:$0xff] }
 0x376   : > { %9701 = vmatpush1.bf16.msra.mxu0 %v11776_v56  ;;  %9742 = vmatpush1.bf16.msra.mxu1 %v11904_v57  ;;  %v4224_v56 = vld [vmem:[%s14445_s19 + $0x1fc0] sm:$0xff] }
 0x377   : > { %9702 = vmatprep.subr.bf16.mxu0 %v11769_v58  ;;  %9743 = vmatprep.subr.bf16.mxu1 %v11897_v60  ;;  %v4228_v57 = vld [vmem:[%s14445_s19 + $0x1fe0] sm:$0xff]  ;;  %v11736_v58 = vcombine.low %v3976_v63, %v3980_v37  ;;  %v11864_v60 = vcombine.low %v4104_v41, %v4108_v43 }
 0x378   : > { %v11985_v1 = vcombine.high %v4224_v56, %v4228_v57  ;;  %v4084_v9 = vld [vmem:[%s14445_s19 + $0x1b60] sm:$0xff] }
 0x379   : > { %v11841_v24 = vcombine.high %v4080_v8, %v4084_v9  ;;  %v4072_v27 = vld [vmem:[%s14445_s19 + $0x1b00] sm:$0xff] }
 0x37a   : > { %9703 = vmatpush1.bf16.msra.mxu0 %v11768_v6  ;;  %9744 = vmatpush1.bf16.msra.mxu1 %v11896_v13  ;;  %v4216_v6 = vld [vmem:[%s14445_s19 + $0x1f80] sm:$0xff] }
 0x37b   : > { %9704 = vmatprep.subr.bf16.mxu0 %v11761_v38  ;;  %9745 = vmatprep.subr.bf16.mxu1 %v11889_v39  ;;  %v4220_v13 = vld [vmem:[%s14445_s19 + $0x1fa0] sm:$0xff]  ;;  %v11856_v38 = vcombine.low %v4096_v54, %v4100_v55  ;;  %v11984_v39 = vcombine.low %v4224_v56, %v4228_v57 }
 0x37c   : > { %v11977_v42 = vcombine.high %v4216_v6, %v4220_v13  ;;  %v4076_v18 = vld [vmem:[%s14445_s19 + $0x1b20] sm:$0xff] }
 0x37d   : > { %v11833_v63 = vcombine.high %v4072_v27, %v4076_v18  ;;  %v4064_v41 = vld [vmem:[%s14445_s19 + $0x1ac0] sm:$0xff] }
 0x37e   : > { %9705 = vmatpush1.bf16.msra.mxu0 %v11760_v11  ;;  %9746 = vmatpush1.bf16.msra.mxu1 %v11888_v12  ;;  %v4208_v11 = vld [vmem:[%s14445_s19 + $0x1f40] sm:$0xff] }
 0x37f   : > { %9706 = vmatprep.subr.bf16.mxu0 %v11753_v21  ;;  %9747 = vmatprep.subr.bf16.mxu1 %v11881_v22  ;;  %v4212_v12 = vld [vmem:[%s14445_s19 + $0x1f60] sm:$0xff]  ;;  %v11848_v21 = vcombine.low %v4088_v4, %v4092_v5  ;;  %v11976_v22 = vcombine.low %v4216_v6, %v4220_v13 }
 0x380   : > { %v11969_v25 = vcombine.high %v4208_v11, %v4212_v12  ;;  %v4068_v43 = vld [vmem:[%s14445_s19 + $0x1ae0] sm:$0xff] }
 0x381   : > { %v11825_v54 = vcombine.high %v4064_v41, %v4068_v43  ;;  %v4056_v56 = vld [vmem:[%s14445_s19 + $0x1a80] sm:$0xff] }
 0x382   : > { %9707 = vmatpush1.bf16.msra.mxu0 %v11752_v29  ;;  %9748 = vmatpush1.bf16.msra.mxu1 %v11880_v31  ;;  %v4200_v29 = vld [vmem:[%s14445_s19 + $0x1f00] sm:$0xff] }
 0x383   : > { %9708 = vmatprep.subr.bf16.mxu0 %v11745_v32  ;;  %9749 = vmatprep.subr.bf16.mxu1 %v11873_v36  ;;  %v4204_v31 = vld [vmem:[%s14445_s19 + $0x1f20] sm:$0xff]  ;;  %v11840_v32 = vcombine.low %v4080_v8, %v4084_v9  ;;  %v11968_v36 = vcombine.low %v4208_v11, %v4212_v12  ;;  %v2517_v9 = vrot.slane %v14678_v40, %v14664_v61 }
 0x384   : > { %v11961_v37 = vcombine.high %v4200_v29, %v4204_v31  ;;  %v4060_v57 = vld [vmem:[%s14445_s19 + $0x1aa0] sm:$0xff] }
 0x385   : > { %v11817_v4 = vcombine.high %v4056_v56, %v4060_v57  ;;  %v4048_v6 = vld [vmem:[%s14445_s19 + $0x1a40] sm:$0xff] }
 0x386   : > { %9709 = vmatpush1.bf16.msra.mxu0 %v11744_v46  ;;  %9750 = vmatpush1.bf16.msra.mxu1 %v11872_v59  ;;  %v4192_v46 = vld [vmem:[%s14445_s19 + $0x1ec0] sm:$0xff] }
 0x387   : > { %9710 = vmatprep.subr.bf16.mxu0 %v11737_v52  ;;  %9751 = vmatprep.subr.bf16.mxu1 %v11865_v53  ;;  %v4196_v59 = vld [vmem:[%s14445_s19 + $0x1ee0] sm:$0xff]  ;;  %v11832_v52 = vcombine.low %v4072_v27, %v4076_v18  ;;  %v11960_v53 = vcombine.low %v4200_v29, %v4204_v31  ;;  %v3106_v29 = vadd.f32 %v14772_v16, %v2517_v9  ;;  %v3381_v9 = vld [vmem:[%s14445_s19 + $0x568] sm:$0xff] }
 0x388   : > { %v11953_v55 = vcombine.high %v4192_v46, %v4196_v59  ;;  %v4052_v13 = vld [vmem:[%s14445_s19 + $0x1a60] sm:$0xff] }
 0x389   : > { %v11809_v11 = vcombine.high %v4048_v6, %v4052_v13 }
 0x38a   : > { %9711 = vmatpush1.bf16.msra.mxu0 %v11736_v58  ;;  %9752 = vmatpush1.bf16.msra.mxu1 %v11864_v60  ;;  %v4184_v58 = vld [vmem:[%s14445_s19 + $0x1e80] sm:$0xff] }
 0x38b   : > { %9712 = vmatprep.subr.bf16.mxu0 %v11857_v0  ;;  %9753 = vmatprep.subr.bf16.mxu1 %v11985_v1  ;;  %v4188_v60 = vld [vmem:[%s14445_s19 + $0x1ea0] sm:$0xff]  ;;  %v11824_v0 = vcombine.low %v4064_v41, %v4068_v43  ;;  %v11952_v1 = vcombine.low %v4192_v46, %v4196_v59  ;;  %v3397_v41 = vld [vmem:[%s14445_s19 + $0x5e8] sm:$0xff]  ;;  %v3124_v46 = vmax.f32 %v3106_v29, 0.0 }
 0x38c   : > { %v11945_v5 = vcombine.high %v4184_v58, %v4188_v60  ;;  %v11944_v8 = vcombine.low %v4184_v58, %v4188_v60  ;;  %v3241_v29 = vld [vmem:[%s14445_s19 + $0x108] sm:$0xff] }
 0x38e   : > { %9713 = vmatpush2.bf16.msra.mxu0 %v11856_v38  ;;  %9754 = vmatpush2.bf16.msra.mxu1 %v11984_v39  ;;  %v4176_v38 = vld [vmem:[%s14445_s19 + $0x1e40] sm:$0xff] }
 0x38f   : > { %9714 = vmatprep.subr.bf16.mxu0 %v11849_v44  ;;  %9755 = vmatprep.subr.bf16.mxu1 %v11977_v42  ;;  %v4180_v39 = vld [vmem:[%s14445_s19 + $0x1e60] sm:$0xff]  ;;  %v2509_v44 = vrot.slane %v14678_v40, %v14667_v3  ;;  %v11816_v42 = vcombine.low %v4056_v56, %v4060_v57  ;;  %v11808_v40 = vcombine.low %v4048_v6, %v4052_v13  ;;  %v3385_v56 = vld [vmem:[%s14445_s19 + $0x588] sm:$0xff] }
 0x390   : > { %v11937_v12 = vcombine.high %v4176_v38, %v4180_v39  ;;  %v11936_v18 = vcombine.low %v4176_v38, %v4180_v39  ;;  %v3389_v57 = vld [vmem:[%s14445_s19 + $0x5a8] sm:$0xff] }
 0x391   : > { %v3035_v27 = vadd.f32 %v14770_v30, %v2509_v44  ;;  %v11147_v13 = vcombine.high %v3385_v56, %v3389_v57  ;;  %v3249_v38 = vld [vmem:[%s14445_s19 + $0x148] sm:$0xff] }
 0x392   : > { %9715 = vmatpush2.bf16.msra.mxu0 %v11848_v21  ;;  %9756 = vmatpush2.bf16.msra.mxu1 %v11976_v22  ;;  %v4040_v21 = vld [vmem:[%s14445_s19 + $0x1a00] sm:$0xff]  ;;  %v3253_v39 = vld [vmem:[%s14445_s19 + $0x168] sm:$0xff] }
 0x393   : > { %9716 = vmatprep.subr.bf16.mxu0 %v11841_v24  ;;  %9757 = vmatprep.subr.bf16.mxu1 %v11969_v25  ;;  %v4044_v22 = vld [vmem:[%s14445_s19 + $0x1a20] sm:$0xff]  ;;  %v3122_v43 = vmax.f32 %v3035_v27, 0.0 }
 0x394   : > { %v4168_v24 = vld [vmem:[%s14445_s19 + $0x1e00] sm:$0xff]  ;;  %v11801_v31 = vcombine.high %v4040_v21, %v4044_v22  ;;  %v11800_v30 = vcombine.low %v4040_v21, %v4044_v22 }
 0x395   : > { %v4172_v25 = vld [vmem:[%s14445_s19 + $0x1e20] sm:$0xff] }
 0x396   : > { %9717 = vmatpush2.bf16.msra.mxu0 %v11840_v32  ;;  %9758 = vmatpush2.bf16.msra.mxu1 %v11968_v36  ;;  %v11929_v32 = vcombine.high %v4168_v24, %v4172_v25  ;;  %v3265_v36 = vld [vmem:[%s14445_s19 + $0x1c8] sm:$0xff]  ;;  %v11928_v16 = vcombine.low %v4168_v24, %v4172_v25  ;;  %v11146_v24 = vcombine.low %v3385_v56, %v3389_v57 }
 0x397   : > { %9718 = vmatprep.subr.bf16.mxu0 %v11833_v63  ;;  %9759 = vmatprep.subr.bf16.mxu1 %v11961_v37  ;;  %v3269_v63 = vld [vmem:[%s14445_s19 + $0x1e8] sm:$0xff]  ;;  %v11011_v25 = vcombine.high %v3249_v38, %v3253_v39 }
 0x398   : > { %v3393_v37 = vld [vmem:[%s14445_s19 + $0x5c8] sm:$0xff]  ;;  %v11027_v59 = vcombine.high %v3265_v36, %v3269_v63  ;;  %v11026_v58 = vcombine.low %v3265_v36, %v3269_v63 }
 0x399   : > { %v3369_v63 = vld [vmem:[%s14445_s19 + $0x508] sm:$0xff] }
 0x39a   : > { %9719 = vmatpush2.bf16.msra.mxu0 %v11832_v52  ;;  %9760 = vmatpush2.bf16.msra.mxu1 %v11960_v53  ;;  %v11155_v52 = vcombine.high %v3393_v37, %v3397_v41  ;;  %v4232_v53 = vld [vmem:[%s14885_s16] sm:$0xff]  ;;  %v3365_v56 = vld [vmem:[%s14445_s19 + $0x4e8] sm:$0xff] }
 0x39b   : > { %9720 = vmatprep.subr.bf16.mxu0 %v11825_v54  ;;  %9761 = vmatprep.subr.bf16.mxu1 %v11953_v55  ;;  %v3257_v54 = vld [vmem:[%s14445_s19 + $0x188] sm:$0xff]  ;;  %v4237_v60 = vrot.slane %v4232_v53, %v14549_v14 }
 0x39c   : > { %v3261_v55 = vld [vmem:[%s14445_s19 + $0x1a8] sm:$0xff] }
 0x39d   : > { %v11019_v6 = vcombine.high %v3257_v54, %v3261_v55 }
 0x39e   : > { %9721 = vmatpush2.bf16.msra.mxu0 %v11824_v0  ;;  %9762 = vmatpush2.bf16.msra.mxu1 %v11952_v1  ;;  %v14893_v0 = vpack.c.bf16 %v3122_v43, %v3122_v43  ;;  %v14895_v1 = vpack.c.bf16 %v3124_v46, %v3124_v46 }
 0x39f   : > { %9722 = vmatprep.subr.bf16.mxu0 %v11817_v4  ;;  %9763 = vmatprep.subr.bf16.mxu1 %v11945_v5  ;;  %v11154_v4 = vcombine.low %v3393_v37, %v3397_v41  ;;  %v4241_v5 = vrot.slane %v4232_v53, %v14560_v19  ;;  %v3373_v37 = vld [vmem:[%s14445_s19 + $0x528] sm:$0xff] }
 0x3a0   : > { %v3233_v53 = vld [vmem:[%s14445_s19 + $0xc8] sm:$0xff] }
 0x3a2   : > { %9723 = vmatpush2.bf16.msra.mxu0 %v11816_v42  ;;  %9764 = vmatpush2.bf16.msra.mxu1 %v11944_v8  ;;  %v3377_v8 = vld [vmem:[%s14445_s19 + $0x548] sm:$0xff] }
 0x3a3   : > { %9724 = vmatprep.subr.bf16.mxu0 %v11809_v11  ;;  %9765 = vmatprep.subr.bf16.mxu1 %v11937_v12  ;;  %v11018_v12 = vcombine.low %v3257_v54, %v3261_v55  ;;  %v11138_v46 = vcombine.low %v3377_v8, %v3381_v9  ;;  %v3237_v54 = vld [vmem:[%s14445_s19 + $0xe8] sm:$0xff] }
 0x3a4   : > { %v3361_v55 = vld [vmem:[%s14445_s19 + $0x4c8] sm:$0xff] }
 0x3a6   : > { %9725 = vmatpush2.bf16.msra.mxu0 %v11808_v40  ;;  %9766 = vmatpush2.bf16.msra.mxu1 %v11936_v18  ;;  %v11139_v18 = vcombine.high %v3377_v8, %v3381_v9  ;;  %v3217_v9 = vld [vmem:[%s14445_s19 + $0x48] sm:$0xff] }
 0x3a7   : > { %9726 = vmatprep.subr.bf16.mxu0 %v11801_v31  ;;  %9767 = vmatprep.subr.bf16.mxu1 %v11929_v32  ;;  %v3245_v31 = vld [vmem:[%s14445_s19 + $0x128] sm:$0xff] }
 0x3a8   : > { %v11002_v57 = vcombine.low %v3241_v29, %v3245_v31 }
 0x3aa   : > { %9727 = vmatpush2.bf16.msra.mxu0 %v11800_v30  ;;  %9768 = vmatpush2.bf16.msra.mxu1 %v11928_v16  ;;  %v11010_v30 = vcombine.low %v3249_v38, %v3253_v39  ;;  %v3357_v38 = vld [vmem:[%s14445_s19 + $0x4a8] sm:$0xff]  ;;  %v10994_v39 = vcombine.low %v3233_v53, %v3237_v54 }
 0x3ab   : > { %9778 = vmatprep.subr.bf16.mxu0 %v11027_v59  ;;  %9819 = vmatprep.subr.bf16.mxu1 %v11155_v52  ;;  %v11003_v59 = vcombine.high %v3241_v29, %v3245_v31  ;;  %v11131_v52 = vcombine.high %v3369_v63, %v3373_v37  ;;  %v3213_v29 = vld [vmem:[%s14445_s19 + $0x28] sm:$0xff] }
 0x3ac   : > { %v3337_v31 = vld [vmem:[%s14445_s19 + $0x408] sm:$0xff] }
 0x3ad   : > { %9729 = vmatmul.mubr.bf16.vlgmr.msra.gmra.mxu0 %v14893_v0  ;;  %9770 = vmatmul.mubr.bf16.vlgmr.msra.gmra.mxu1 %v14895_v1  ;;  %v9484_v44 = vpop.f32.mrf.mxu0  ;;  %v9525_v42 = vpop.f32.mrf.mxu1 }
 0x3ae   : > { %v9485_v11 = vadd.f32 %v9484_v44, %v4237_v60  ;;  %9779 = vmatpush1.bf16.msra.mxu0 %v11026_v58  ;;  %9810 = vmatprep.mubr.bf16.mxu0 %v14585_v49  ;;  %v11130_v58 = vcombine.low %v3369_v63, %v3373_v37  ;;  %v10995_v60 = vcombine.high %v3233_v53, %v3237_v54 }
 0x3af   : > { %9820 = vmatpush1.bf16.msra.mxu1 %v11154_v4  ;;  %9851 = vmatprep.mubr.bf16.mxu1 %v14587_v50  ;;  %v9486_v21 = vpop.f32.mrf.mxu0  ;;  %v9527_v22 = vpop.f32.mrf.mxu1  ;;  %v11123_v4 = vcombine.high %v3361_v55, %v3365_v56  ;;  %v11122_v44 = vcombine.low %v3361_v55, %v3365_v56  ;;  %v3321_v56 = vld [vmem:[%s14445_s19 + $0x388] sm:$0xff] }
 0x3b0   : > { %v14906_v27 = vadd.f32 %v9525_v42, %v9485_v11  ;;  %v9487_v40 = vadd.f32 %v9486_v21, %v4241_v5  ;;  %9780 = vmatprep.subr.bf16.mxu0 %v11019_v6  ;;  %9821 = vmatprep.subr.bf16.mxu1 %v11147_v13  ;;  %v3225_v5 = vld [vmem:[%s14445_s19 + $0x88] sm:$0xff] }
 0x3b1   : > { %v9488_v32 = vpop.f32.mrf.mxu0  ;;  %v9529_v36 = vpop.f32.mrf.mxu1  ;;  %v3229_v6 = vld [vmem:[%s14445_s19 + $0xa8] sm:$0xff] }
 0x3b2   : > { %v14912_v41 = vadd.f32 %v9527_v22, %v9487_v40  ;;  %9781 = vmatpush1.bf16.msra.mxu0 %v11018_v12  ;;  %v3353_v13 = vld [vmem:[%s14445_s19 + $0x488] sm:$0xff]  ;;  %v10987_v42 = vcombine.high %v3225_v5, %v3229_v6  ;;  %v10986_v22 = vcombine.low %v3225_v5, %v3229_v6 }
 0x3b3   : > { %9822 = vmatpush1.bf16.msra.mxu1 %v11146_v24  ;;  %v9489_v16 = vpop.f32.mrf.mxu0  ;;  %v9530_v43 = vpop.f32.mrf.mxu1  ;;  %9782 = vmatprep.subr.bf16.mxu0 %v11011_v25  ;;  %v11115_v8 = vcombine.high %v3353_v13, %v3357_v38  ;;  %v3221_v11 = vld [vmem:[%s14445_s19 + $0x68] sm:$0xff]  ;;  %v11114_v24 = vcombine.low %v3353_v13, %v3357_v38 }
 0x3b4   : > { %9823 = vmatprep.subr.bf16.mxu1 %v11139_v18  ;;  %v3345_v12 = vld [vmem:[%s14445_s19 + $0x448] sm:$0xff]  ;;  %v10979_v25 = vcombine.high %v3217_v9, %v3221_v11  ;;  %v10978_v36 = vcombine.low %v3217_v9, %v3221_v11 }
 0x3b5   : > { %v3349_v21 = vld [vmem:[%s14445_s19 + $0x468] sm:$0xff] }
 0x3b6   : > { %9783 = vmatpush1.bf16.msra.mxu0 %v11010_v30  ;;  %v11107_v40 = vcombine.high %v3345_v12, %v3349_v21  ;;  %v3209_v18 = vld [vmem:[%s14445_s19 + $0x8] sm:$0xff]  ;;  %v11106_v63 = vcombine.low %v3345_v12, %v3349_v21 }
 0x3b7   : > { %9824 = vmatpush1.bf16.msra.mxu1 %v11138_v46  ;;  %9784 = vmatprep.subr.bf16.mxu0 %v11003_v59  ;;  %v3341_v32 = vld [vmem:[%s14445_s19 + $0x428] sm:$0xff]  ;;  %v10971_v37 = vcombine.high %v3209_v18, %v3213_v29 }
 0x3b8   : > { %9825 = vmatprep.subr.bf16.mxu1 %v11131_v52  ;;  %v11099_v30 = vcombine.high %v3337_v31, %v3341_v32  ;;  %v3329_v16 = vld [vmem:[%s14445_s19 + $0x3c8] sm:$0xff]  ;;  %v10970_v52 = vcombine.low %v3209_v18, %v3213_v29  ;;  %v11098_v53 = vcombine.low %v3337_v31, %v3341_v32 }
 0x3b9   : > { %v3333_v43 = vld [vmem:[%s14445_s19 + $0x3e8] sm:$0xff] }
 0x3ba   : > { %9785 = vmatpush1.bf16.msra.mxu0 %v11002_v57  ;;  %v3457_v46 = vld [vmem:[%s14445_s19 + $0x7c8] sm:$0xff]  ;;  %v11091_v54 = vcombine.high %v3329_v16, %v3333_v43 }
 0x3bb   : > { %9826 = vmatpush1.bf16.msra.mxu1 %v11130_v58  ;;  %9786 = vmatprep.subr.bf16.mxu0 %v10995_v60  ;;  %v3461_v59 = vld [vmem:[%s14445_s19 + $0x7e8] sm:$0xff] }
 0x3bc   : > { %9827 = vmatprep.subr.bf16.mxu1 %v11123_v4  ;;  %v11219_v55 = vcombine.high %v3457_v46, %v3461_v59  ;;  %v3325_v57 = vld [vmem:[%s14445_s19 + $0x3a8] sm:$0xff]  ;;  %v11090_v4 = vcombine.low %v3329_v16, %v3333_v43  ;;  %v11218_v5 = vcombine.low %v3457_v46, %v3461_v59 }
 0x3bd   : > { %v3449_v58 = vld [vmem:[%s14445_s19 + $0x788] sm:$0xff]  ;;  %v11083_v6 = vcombine.high %v3321_v56, %v3325_v57 }
 0x3be   : > { %9787 = vmatpush1.bf16.msra.mxu0 %v10994_v39  ;;  %v3453_v60 = vld [vmem:[%s14445_s19 + $0x7a8] sm:$0xff] }
 0x3bf   : > { %9828 = vmatpush1.bf16.msra.mxu1 %v11122_v44  ;;  %9788 = vmatprep.subr.bf16.mxu0 %v10987_v42  ;;  %v11211_v13 = vcombine.high %v3449_v58, %v3453_v60  ;;  %v3313_v38 = vld [vmem:[%s14445_s19 + $0x348] sm:$0xff]  ;;  %v11210_v9 = vcombine.low %v3449_v58, %v3453_v60 }
 0x3c0   : > { %9829 = vmatprep.subr.bf16.mxu1 %v11115_v8  ;;  %v3317_v39 = vld [vmem:[%s14445_s19 + $0x368] sm:$0xff]  ;;  %v11082_v8 = vcombine.low %v3321_v56, %v3325_v57 }
 0x3c1   : > { %v3441_v44 = vld [vmem:[%s14445_s19 + $0x748] sm:$0xff]  ;;  %v11075_v11 = vcombine.high %v3313_v38, %v3317_v39 }
 0x3c2   : > { %9789 = vmatpush1.bf16.msra.mxu0 %v10986_v22  ;;  %v3445_v42 = vld [vmem:[%s14445_s19 + $0x768] sm:$0xff] }
 0x3c3   : > { %9830 = vmatpush1.bf16.msra.mxu1 %v11114_v24  ;;  %9790 = vmatprep.subr.bf16.mxu0 %v10979_v25  ;;  %v11203_v12 = vcombine.high %v3441_v44, %v3445_v42  ;;  %v3305_v21 = vld [vmem:[%s14445_s19 + $0x308] sm:$0xff]  ;;  %v11202_v18 = vcombine.low %v3441_v44, %v3445_v42 }
 0x3c4   : > { %9831 = vmatprep.subr.bf16.mxu1 %v11107_v40  ;;  %v3309_v22 = vld [vmem:[%s14445_s19 + $0x328] sm:$0xff]  ;;  %v11074_v40 = vcombine.low %v3313_v38, %v3317_v39 }
 0x3c5   : > { %v3433_v24 = vld [vmem:[%s14445_s19 + $0x708] sm:$0xff]  ;;  %v11067_v29 = vcombine.high %v3305_v21, %v3309_v22 }
 0x3c6   : > { %9791 = vmatpush1.bf16.msra.mxu0 %v10978_v36  ;;  %v3437_v25 = vld [vmem:[%s14445_s19 + $0x728] sm:$0xff] }
 0x3c7   : > { %9832 = vmatpush1.bf16.msra.mxu1 %v11106_v63  ;;  %9792 = vmatprep.subr.bf16.mxu0 %v10971_v37  ;;  %v11195_v31 = vcombine.high %v3433_v24, %v3437_v25  ;;  %v3297_v32 = vld [vmem:[%s14445_s19 + $0x2c8] sm:$0xff]  ;;  %v11194_v16 = vcombine.low %v3433_v24, %v3437_v25 }
 0x3c8   : > { %9833 = vmatprep.subr.bf16.mxu1 %v11099_v30  ;;  %v3301_v36 = vld [vmem:[%s14445_s19 + $0x2e8] sm:$0xff]  ;;  %v11066_v30 = vcombine.low %v3305_v21, %v3309_v22 }
 0x3c9   : > { %v3425_v63 = vld [vmem:[%s14445_s19 + $0x6c8] sm:$0xff]  ;;  %v11059_v43 = vcombine.high %v3297_v32, %v3301_v36 }
 0x3ca   : > { %9793 = vmatpush1.bf16.msra.mxu0 %v10970_v52  ;;  %v3429_v37 = vld [vmem:[%s14445_s19 + $0x6e8] sm:$0xff] }
 0x3cb   : > { %9834 = vmatpush1.bf16.msra.mxu1 %v11098_v53  ;;  %9794 = vmatprep.subr.bf16.mxu0 %v11091_v54  ;;  %v11187_v46 = vcombine.high %v3425_v63, %v3429_v37  ;;  %v3289_v59 = vld [vmem:[%s14445_s19 + $0x288] sm:$0xff]  ;;  %v11186_v56 = vcombine.low %v3425_v63, %v3429_v37 }
 0x3cc   : > { %9835 = vmatprep.subr.bf16.mxu1 %v11219_v55  ;;  %v3293_v52 = vld [vmem:[%s14445_s19 + $0x2a8] sm:$0xff]  ;;  %v11058_v55 = vcombine.low %v3297_v32, %v3301_v36 }
 0x3cd   : > { %v3417_v53 = vld [vmem:[%s14445_s19 + $0x688] sm:$0xff]  ;;  %v11051_v57 = vcombine.high %v3289_v59, %v3293_v52 }
 0x3ce   : > { %9795 = vmatpush2.bf16.msra.mxu0 %v11090_v4  ;;  %v3421_v54 = vld [vmem:[%s14445_s19 + $0x6a8] sm:$0xff] }
 0x3cf   : > { %9836 = vmatpush2.bf16.msra.mxu1 %v11218_v5  ;;  %9796 = vmatprep.subr.bf16.mxu0 %v11083_v6  ;;  %v11179_v58 = vcombine.high %v3417_v53, %v3421_v54  ;;  %v3281_v60 = vld [vmem:[%s14445_s19 + $0x248] sm:$0xff]  ;;  %v11178_v38 = vcombine.low %v3417_v53, %v3421_v54 }
 0x3d0   : > { %9837 = vmatprep.subr.bf16.mxu1 %v11211_v13  ;;  %v3285_v4 = vld [vmem:[%s14445_s19 + $0x268] sm:$0xff]  ;;  %v11050_v13 = vcombine.low %v3289_v59, %v3293_v52 }
 0x3d1   : > { %v3409_v5 = vld [vmem:[%s14445_s19 + $0x648] sm:$0xff]  ;;  %v11043_v39 = vcombine.high %v3281_v60, %v3285_v4 }
 0x3d2   : > { %9797 = vmatpush2.bf16.msra.mxu0 %v11082_v8  ;;  %v3413_v6 = vld [vmem:[%s14445_s19 + $0x668] sm:$0xff] }
 0x3d3   : > { %9838 = vmatpush2.bf16.msra.mxu1 %v11210_v9  ;;  %9798 = vmatprep.subr.bf16.mxu0 %v11075_v11  ;;  %v11171_v44 = vcombine.high %v3409_v5, %v3413_v6  ;;  %v3273_v42 = vld [vmem:[%s14445_s19 + $0x208] sm:$0xff]  ;;  %v11170_v21 = vcombine.low %v3409_v5, %v3413_v6 }
 0x3d4   : > { %9839 = vmatprep.subr.bf16.mxu1 %v11203_v12  ;;  %v3277_v8 = vld [vmem:[%s14445_s19 + $0x228] sm:$0xff]  ;;  %v11042_v12 = vcombine.low %v3281_v60, %v3285_v4 }
 0x3d5   : > { %v3401_v9 = vld [vmem:[%s14445_s19 + $0x608] sm:$0xff]  ;;  %v11035_v22 = vcombine.high %v3273_v42, %v3277_v8 }
 0x3d6   : > { %9799 = vmatpush2.bf16.msra.mxu0 %v11074_v40  ;;  %v3405_v11 = vld [vmem:[%s14445_s19 + $0x628] sm:$0xff] }
 0x3d7   : > { %9840 = vmatpush2.bf16.msra.mxu1 %v11202_v18  ;;  %9800 = vmatprep.subr.bf16.mxu0 %v11067_v29  ;;  %v11163_v24 = vcombine.high %v3401_v9, %v3405_v11  ;;  %v3521_v25 = vld [vmem:[%s14445_s19 + $0x9c8] sm:$0xff]  ;;  %v11162_v32 = vcombine.low %v3401_v9, %v3405_v11 }
 0x3d8   : > { %9841 = vmatprep.subr.bf16.mxu1 %v11195_v31  ;;  %v3525_v40 = vld [vmem:[%s14445_s19 + $0x9e8] sm:$0xff]  ;;  %v11034_v31 = vcombine.low %v3273_v42, %v3277_v8 }
 0x3d9   : > { %v3649_v18 = vld [vmem:[%s14445_s19 + $0xdc8] sm:$0xff]  ;;  %v11283_v36 = vcombine.high %v3521_v25, %v3525_v40 }
 0x3da   : > { %9801 = vmatpush2.bf16.msra.mxu0 %v11066_v30  ;;  %v3653_v29 = vld [vmem:[%s14445_s19 + $0xde8] sm:$0xff] }
 0x3db   : > { %9842 = vmatpush2.bf16.msra.mxu1 %v11194_v16  ;;  %9802 = vmatprep.subr.bf16.mxu0 %v11059_v43  ;;  %v11411_v63 = vcombine.high %v3649_v18, %v3653_v29  ;;  %v3513_v37 = vld [vmem:[%s14445_s19 + $0x988] sm:$0xff]  ;;  %v11282_v16 = vcombine.low %v3521_v25, %v3525_v40  ;;  %v11410_v59 = vcombine.low %v3649_v18, %v3653_v29 }
 0x3dc   : > { %9843 = vmatprep.subr.bf16.mxu1 %v11187_v46  ;;  %v3517_v30 = vld [vmem:[%s14445_s19 + $0x9a8] sm:$0xff] }
 0x3dd   : > { %v3641_v43 = vld [vmem:[%s14445_s19 + $0xd88] sm:$0xff]  ;;  %v11275_v52 = vcombine.high %v3513_v37, %v3517_v30  ;;  %v11274_v5 = vcombine.low %v3513_v37, %v3517_v30 }
 0x3de   : > { %9803 = vmatpush2.bf16.msra.mxu0 %v11058_v55  ;;  %v3645_v46 = vld [vmem:[%s14445_s19 + $0xda8] sm:$0xff] }
 0x3df   : > { %9844 = vmatpush2.bf16.msra.mxu1 %v11186_v56  ;;  %9804 = vmatprep.subr.bf16.mxu0 %v11051_v57  ;;  %v3505_v53 = vld [vmem:[%s14445_s19 + $0x948] sm:$0xff]  ;;  %v11403_v57 = vcombine.high %v3641_v43, %v3645_v46 }
 0x3e0   : > { %9845 = vmatprep.subr.bf16.mxu1 %v11179_v58  ;;  %v3509_v54 = vld [vmem:[%s14445_s19 + $0x968] sm:$0xff] }
 0x3e1   : > { %v3633_v58 = vld [vmem:[%s14445_s19 + $0xd48] sm:$0xff]  ;;  %v11266_v25 = vcombine.low %v3505_v53, %v3509_v54 }
 0x3e2   : > { %9805 = vmatpush2.bf16.msra.mxu0 %v11050_v13  ;;  %v3637_v60 = vld [vmem:[%s14445_s19 + $0xd68] sm:$0xff] }
 0x3e3   : > { %9846 = vmatpush2.bf16.msra.mxu1 %v11178_v38  ;;  %9806 = vmatprep.subr.bf16.mxu0 %v11043_v39  ;;  %v11402_v38 = vcombine.low %v3641_v43, %v3645_v46  ;;  %v11267_v39 = vcombine.high %v3505_v53, %v3509_v54  ;;  %v11395_v42 = vcombine.high %v3633_v58, %v3637_v60  ;;  %v3497_v8 = vld [vmem:[%s14445_s19 + $0x908] sm:$0xff] }
 0x3e4   : > { %9847 = vmatprep.subr.bf16.mxu1 %v11171_v44  ;;  %v3501_v9 = vld [vmem:[%s14445_s19 + $0x928] sm:$0xff]  ;;  %v11394_v18 = vcombine.low %v3633_v58, %v3637_v60 }
 0x3e5   : > { %v11259_v29 = vcombine.high %v3497_v8, %v3501_v9  ;;  %v3621_v37 = vld [vmem:[%s14445_s19 + $0xce8] sm:$0xff]  ;;  %v11258_v30 = vcombine.low %v3497_v8, %v3501_v9 }
 0x3e6   : > { %9807 = vmatpush2.bf16.msra.mxu0 %v11042_v12  ;;  %v3609_v53 = vld [vmem:[%s14445_s19 + $0xc88] sm:$0xff] }
 0x3e7   : > { %9848 = vmatpush2.bf16.msra.mxu1 %v11170_v21  ;;  %9808 = vmatprep.subr.bf16.mxu0 %v11035_v22  ;;  %v3625_v21 = vld [vmem:[%s14445_s19 + $0xd08] sm:$0xff] }
 0x3e8   : > { %9849 = vmatprep.subr.bf16.mxu1 %v11163_v24  ;;  %v3629_v22 = vld [vmem:[%s14445_s19 + $0xd28] sm:$0xff] }
 0x3e9   : > { %v3613_v54 = vld [vmem:[%s14445_s19 + $0xca8] sm:$0xff] }
 0x3ea   : > { %9809 = vmatpush2.bf16.msra.mxu0 %v11034_v31  ;;  %v11387_v31 = vcombine.high %v3625_v21, %v3629_v22  ;;  %v11371_v58 = vcombine.high %v3609_v53, %v3613_v54  ;;  %v3473_v60 = vld [vmem:[%s14445_s19 + $0x848] sm:$0xff] }
 0x3eb   : > { %9850 = vmatpush2.bf16.msra.mxu1 %v11162_v32  ;;  %9860 = vmatprep.subr.bf16.mxu0 %v11283_v36  ;;  %v3489_v32 = vld [vmem:[%s14445_s19 + $0x8c8] sm:$0xff] }
 0x3ec   : > { %9901 = vmatprep.subr.bf16.mxu1 %v11411_v63  ;;  %v3493_v36 = vld [vmem:[%s14445_s19 + $0x8e8] sm:$0xff] }
 0x3ed   : > { %v9566_v55 = vpop.f32.mrf.mxu0  ;;  %v9607_v56 = vpop.f32.mrf.mxu1  ;;  %9811 = vmatmul.mubr.bf16.vlgmr.msra.gmra.mxu0 %v14589_v51  ;;  %v3617_v63 = vld [vmem:[%s14445_s19 + $0xcc8] sm:$0xff]  ;;  %v11251_v43 = vcombine.high %v3489_v32, %v3493_v36 }
 0x3ee   : > { %v9567_v4 = vadd.f32 %v9566_v55, %v14906_v27  ;;  %9852 = vmatmul.mubr.bf16.vlgmr.msra.gmra.mxu1 %v14580_v47  ;;  %9861 = vmatpush1.bf16.msra.mxu0 %v11282_v16  ;;  %v11386_v16 = vcombine.low %v3625_v21, %v3629_v22  ;;  %v11379_v46 = vcombine.high %v3617_v63, %v3621_v37  ;;  %v3469_v8 = vld [vmem:[%s14445_s19 + $0x828] sm:$0xff] }
 0x3ef   : > { %9892 = vmatprep.mubr.bf16.mxu0 %v14618_v10  ;;  %9902 = vmatpush1.bf16.msra.mxu1 %v11410_v59  ;;  %v9568_v6 = vpop.f32.mrf.mxu0  ;;  %v9609_v13 = vpop.f32.mrf.mxu1  ;;  %v3481_v59 = vld [vmem:[%s14445_s19 + $0x888] sm:$0xff]  ;;  %v11250_v55 = vcombine.low %v3489_v32, %v3493_v36 }
 0x3f0   : > { %v14978_v44 = vadd.f32 %v9607_v56, %v9567_v4  ;;  %9933 = vmatprep.mubr.bf16.mxu1 %v14623_v23  ;;  %v9569_v27 = vadd.f32 %v9568_v6, %v14912_v41  ;;  %9862 = vmatprep.subr.bf16.mxu0 %v11275_v52  ;;  %v3485_v52 = vld [vmem:[%s14445_s19 + $0x8a8] sm:$0xff]  ;;  %v11378_v56 = vcombine.low %v3617_v63, %v3621_v37 }
 0x3f1   : > { %v9570_v11 = vpop.f32.mrf.mxu0  ;;  %v9611_v12 = vpop.f32.mrf.mxu1  ;;  %9903 = vmatprep.subr.bf16.mxu1 %v11403_v57  ;;  %v11243_v57 = vcombine.high %v3481_v59, %v3485_v52  ;;  %v3477_v4 = vld [vmem:[%s14445_s19 + $0x868] sm:$0xff] }
 0x3f2   : > { %v14986_v24 = vadd.f32 %v9609_v13, %v9569_v27  ;;  %9863 = vmatpush1.bf16.msra.mxu0 %v11274_v5  ;;  %v3601_v5 = vld [vmem:[%s14445_s19 + $0xc48] sm:$0xff]  ;;  %v11242_v13 = vcombine.low %v3481_v59, %v3485_v52  ;;  %v11234_v12 = vcombine.low %v3473_v60, %v3477_v4 }
 0x3f3   : > { %9904 = vmatpush1.bf16.msra.mxu1 %v11402_v38  ;;  %v9571_v40 = vpop.f32.mrf.mxu0  ;;  %v9612_v41 = vpop.f32.mrf.mxu1  ;;  %9864 = vmatprep.subr.bf16.mxu0 %v11267_v39  ;;  %v3605_v6 = vld [vmem:[%s14445_s19 + $0xc68] sm:$0xff]  ;;  %v11370_v38 = vcombine.low %v3609_v53, %v3613_v54  ;;  %v11235_v39 = vcombine.high %v3473_v60, %v3477_v4 }
 0x3f4   : > { %9905 = vmatprep.subr.bf16.mxu1 %v11395_v42  ;;  %v11363_v27 = vcombine.high %v3601_v5, %v3605_v6  ;;  %v3465_v42 = vld [vmem:[%s14445_s19 + $0x808] sm:$0xff]  ;;  %v11362_v21 = vcombine.low %v3601_v5, %v3605_v6 }
 0x3f5   : > { %v3593_v9 = vld [vmem:[%s14445_s19 + $0xc08] sm:$0xff]  ;;  %v11227_v22 = vcombine.high %v3465_v42, %v3469_v8 }
 0x3f6   : > { %9865 = vmatpush1.bf16.msra.mxu0 %v11266_v25  ;;  %v3597_v11 = vld [vmem:[%s14445_s19 + $0xc28] sm:$0xff] }
 0x3f7   : > { %9906 = vmatpush1.bf16.msra.mxu1 %v11394_v18  ;;  %9866 = vmatprep.subr.bf16.mxu0 %v11259_v29  ;;  %v11355_v25 = vcombine.high %v3593_v9, %v3597_v11  ;;  %v3585_v40 = vld [vmem:[%s14445_s19 + $0xbc8] sm:$0xff]  ;;  %v11354_v32 = vcombine.low %v3593_v9, %v3597_v11 }
 0x3f8   : > { %9907 = vmatprep.subr.bf16.mxu1 %v11387_v31  ;;  %v3589_v41 = vld [vmem:[%s14445_s19 + $0xbe8] sm:$0xff]  ;;  %v11226_v31 = vcombine.low %v3465_v42, %v3469_v8 }
 0x3f9   : > { %v3713_v18 = vld [vmem:[%s14445_s19 + $0xfc8] sm:$0xff]  ;;  %v11347_v36 = vcombine.high %v3585_v40, %v3589_v41 }
 0x3fa   : > { %9867 = vmatpush1.bf16.msra.mxu0 %v11258_v30  ;;  %v3717_v29 = vld [vmem:[%s14445_s19 + $0xfe8] sm:$0xff] }
 0x3fb   : > { %9908 = vmatpush1.bf16.msra.mxu1 %v11386_v16  ;;  %9868 = vmatprep.subr.bf16.mxu0 %v11251_v43  ;;  %v11475_v63 = vcombine.high %v3713_v18, %v3717_v29  ;;  %v3577_v37 = vld [vmem:[%s14445_s19 + $0xb88] sm:$0xff]  ;;  %v11474_v59 = vcombine.low %v3713_v18, %v3717_v29 }
 0x3fc   : > { %9909 = vmatprep.subr.bf16.mxu1 %v11379_v46  ;;  %v3581_v30 = vld [vmem:[%s14445_s19 + $0xba8] sm:$0xff]  ;;  %v11346_v46 = vcombine.low %v3585_v40, %v3589_v41 }
 0x3fd   : > { %v3705_v16 = vld [vmem:[%s14445_s19 + $0xf88] sm:$0xff]  ;;  %v11339_v52 = vcombine.high %v3577_v37, %v3581_v30 }
 0x3fe   : > { %9869 = vmatpush1.bf16.msra.mxu0 %v11250_v55  ;;  %v3709_v43 = vld [vmem:[%s14445_s19 + $0xfa8] sm:$0xff] }
 0x3ff   : > { %9910 = vmatpush1.bf16.msra.mxu1 %v11378_v56  ;;  %9870 = vmatprep.subr.bf16.mxu0 %v11243_v57  ;;  %v11467_v53 = vcombine.high %v3705_v16, %v3709_v43  ;;  %v3569_v54 = vld [vmem:[%s14445_s19 + $0xb48] sm:$0xff]  ;;  %v11466_v60 = vcombine.low %v3705_v16, %v3709_v43 }
 0x400   : > { %9911 = vmatprep.subr.bf16.mxu1 %v11371_v58  ;;  %v3573_v55 = vld [vmem:[%s14445_s19 + $0xb68] sm:$0xff]  ;;  %v11338_v58 = vcombine.low %v3577_v37, %v3581_v30 }
 0x401   : > { %v3697_v56 = vld [vmem:[%s14445_s19 + $0xf48] sm:$0xff]  ;;  %v11331_v4 = vcombine.high %v3569_v54, %v3573_v55 }
 0x402   : > { %9871 = vmatpush1.bf16.msra.mxu0 %v11242_v13  ;;  %v3701_v57 = vld [vmem:[%s14445_s19 + $0xf68] sm:$0xff] }
 0x403   : > { %9912 = vmatpush1.bf16.msra.mxu1 %v11370_v38  ;;  %9872 = vmatprep.subr.bf16.mxu0 %v11235_v39  ;;  %v11459_v5 = vcombine.high %v3697_v56, %v3701_v57  ;;  %v3561_v6 = vld [vmem:[%s14445_s19 + $0xb08] sm:$0xff]  ;;  %v11458_v42 = vcombine.low %v3697_v56, %v3701_v57 }
 0x404   : > { %9913 = vmatprep.subr.bf16.mxu1 %v11363_v27  ;;  %v3565_v13 = vld [vmem:[%s14445_s19 + $0xb28] sm:$0xff]  ;;  %v11330_v27 = vcombine.low %v3569_v54, %v3573_v55 }
 0x405   : > { %v3689_v38 = vld [vmem:[%s14445_s19 + $0xf08] sm:$0xff]  ;;  %v11323_v8 = vcombine.high %v3561_v6, %v3565_v13 }
 0x406   : > { %9873 = vmatpush1.bf16.msra.mxu0 %v11234_v12  ;;  %v3693_v39 = vld [vmem:[%s14445_s19 + $0xf28] sm:$0xff] }
 0x407   : > { %9914 = vmatpush1.bf16.msra.mxu1 %v11362_v21  ;;  %9874 = vmatprep.subr.bf16.mxu0 %v11227_v22  ;;  %v11451_v9 = vcombine.high %v3689_v38, %v3693_v39  ;;  %v3553_v11 = vld [vmem:[%s14445_s19 + $0xac8] sm:$0xff]  ;;  %v11450_v40 = vcombine.low %v3689_v38, %v3693_v39 }
 0x408   : > { %9915 = vmatprep.subr.bf16.mxu1 %v11355_v25  ;;  %v3557_v12 = vld [vmem:[%s14445_s19 + $0xae8] sm:$0xff]  ;;  %v11322_v25 = vcombine.low %v3561_v6, %v3565_v13 }
 0x409   : > { %v3681_v21 = vld [vmem:[%s14445_s19 + $0xec8] sm:$0xff]  ;;  %v11315_v41 = vcombine.high %v3553_v11, %v3557_v12 }
 0x40a   : > { %9875 = vmatpush1.bf16.msra.mxu0 %v11226_v31  ;;  %v3685_v22 = vld [vmem:[%s14445_s19 + $0xee8] sm:$0xff] }
 0x40b   : > { %9916 = vmatpush1.bf16.msra.mxu1 %v11354_v32  ;;  %9876 = vmatprep.subr.bf16.mxu0 %v11347_v36  ;;  %v11443_v18 = vcombine.high %v3681_v21, %v3685_v22  ;;  %v3545_v29 = vld [vmem:[%s14445_s19 + $0xa88] sm:$0xff]  ;;  %v11442_v37 = vcombine.low %v3681_v21, %v3685_v22 }
 0x40c   : > { %9917 = vmatprep.subr.bf16.mxu1 %v11475_v63  ;;  %v3549_v31 = vld [vmem:[%s14445_s19 + $0xaa8] sm:$0xff]  ;;  %v11314_v63 = vcombine.low %v3553_v11, %v3557_v12 }
 0x40d   : > { %v3673_v32 = vld [vmem:[%s14445_s19 + $0xe88] sm:$0xff]  ;;  %v11307_v30 = vcombine.high %v3545_v29, %v3549_v31 }
 0x40e   : > { %9877 = vmatpush2.bf16.msra.mxu0 %v11346_v46  ;;  %v3677_v36 = vld [vmem:[%s14445_s19 + $0xea8] sm:$0xff] }
 0x40f   : > { %9918 = vmatpush2.bf16.msra.mxu1 %v11474_v59  ;;  %9878 = vmatprep.subr.bf16.mxu0 %v11339_v52  ;;  %v11435_v16 = vcombine.high %v3673_v32, %v3677_v36  ;;  %v3537_v43 = vld [vmem:[%s14445_s19 + $0xa48] sm:$0xff]  ;;  %v11434_v54 = vcombine.low %v3673_v32, %v3677_v36 }
 0x410   : > { %9919 = vmatprep.subr.bf16.mxu1 %v11467_v53  ;;  %v3541_v46 = vld [vmem:[%s14445_s19 + $0xa68] sm:$0xff]  ;;  %v11306_v53 = vcombine.low %v3545_v29, %v3549_v31 }
 0x411   : > { %v3665_v59 = vld [vmem:[%s14445_s19 + $0xe48] sm:$0xff]  ;;  %v11299_v55 = vcombine.high %v3537_v43, %v3541_v46 }
 0x412   : > { %9879 = vmatpush2.bf16.msra.mxu0 %v11338_v58  ;;  %v3669_v52 = vld [vmem:[%s14445_s19 + $0xe68] sm:$0xff] }
 0x413   : > { %9920 = vmatpush2.bf16.msra.mxu1 %v11466_v60  ;;  %9880 = vmatprep.subr.bf16.mxu0 %v11331_v4  ;;  %v11427_v56 = vcombine.high %v3665_v59, %v3669_v52  ;;  %v3529_v57 = vld [vmem:[%s14445_s19 + $0xa08] sm:$0xff]  ;;  %v11426_v6 = vcombine.low %v3665_v59, %v3669_v52 }
 0x414   : > { %9921 = vmatprep.subr.bf16.mxu1 %v11459_v5  ;;  %v3533_v58 = vld [vmem:[%s14445_s19 + $0xa28] sm:$0xff]  ;;  %v11298_v5 = vcombine.low %v3537_v43, %v3541_v46 }
 0x415   : > { %v3657_v60 = vld [vmem:[%s14445_s19 + $0xe08] sm:$0xff]  ;;  %v11291_v13 = vcombine.high %v3529_v57, %v3533_v58 }
 0x416   : > { %9881 = vmatpush2.bf16.msra.mxu0 %v11330_v27  ;;  %v3661_v4 = vld [vmem:[%s14445_s19 + $0xe28] sm:$0xff] }
 0x417   : > { %9922 = vmatpush2.bf16.msra.mxu1 %v11458_v42  ;;  %9882 = vmatprep.subr.bf16.mxu0 %v11323_v8  ;;  %v11419_v38 = vcombine.high %v3657_v60, %v3661_v4  ;;  %v3777_v39 = vld [vmem:[%s14445_s19 + $0x11c8] sm:$0xff]  ;;  %v11418_v11 = vcombine.low %v3657_v60, %v3661_v4 }
 0x418   : > { %9923 = vmatprep.subr.bf16.mxu1 %v11451_v9  ;;  %v3781_v27 = vld [vmem:[%s14445_s19 + $0x11e8] sm:$0xff]  ;;  %v11290_v9 = vcombine.low %v3529_v57, %v3533_v58 }
 0x419   : > { %v3905_v42 = vld [vmem:[%s14445_s19 + $0x15c8] sm:$0xff]  ;;  %v11539_v12 = vcombine.high %v3777_v39, %v3781_v27 }
 0x41a   : > { %9883 = vmatpush2.bf16.msra.mxu0 %v11322_v25  ;;  %v3909_v8 = vld [vmem:[%s14445_s19 + $0x15e8] sm:$0xff] }
 0x41b   : > { %9924 = vmatpush2.bf16.msra.mxu1 %v11450_v40  ;;  %9884 = vmatprep.subr.bf16.mxu0 %v11315_v41  ;;  %v11667_v21 = vcombine.high %v3905_v42, %v3909_v8  ;;  %v3769_v22 = vld [vmem:[%s14445_s19 + $0x1188] sm:$0xff]  ;;  %v11538_v40 = vcombine.low %v3777_v39, %v3781_v27  ;;  %v11666_v29 = vcombine.low %v3905_v42, %v3909_v8 }
 0x41c   : > { %9925 = vmatprep.subr.bf16.mxu1 %v11443_v18  ;;  %v3773_v25 = vld [vmem:[%s14445_s19 + $0x11a8] sm:$0xff] }
 0x41d   : > { %v3897_v41 = vld [vmem:[%s14445_s19 + $0x1588] sm:$0xff]  ;;  %v11531_v31 = vcombine.high %v3769_v22, %v3773_v25  ;;  %v11530_v59 = vcombine.low %v3769_v22, %v3773_v25 }
 0x41e   : > { %9885 = vmatpush2.bf16.msra.mxu0 %v11314_v63  ;;  %v3901_v18 = vld [vmem:[%s14445_s19 + $0x15a8] sm:$0xff] }
 0x41f   : > { %9926 = vmatpush2.bf16.msra.mxu1 %v11442_v37  ;;  %9886 = vmatprep.subr.bf16.mxu0 %v11307_v30  ;;  %v3761_v32 = vld [vmem:[%s14445_s19 + $0x1148] sm:$0xff]  ;;  %v11659_v30 = vcombine.high %v3897_v41, %v3901_v18 }
 0x420   : > { %9927 = vmatprep.subr.bf16.mxu1 %v11435_v16  ;;  %v3765_v36 = vld [vmem:[%s14445_s19 + $0x1168] sm:$0xff] }
 0x421   : > { %v3889_v16 = vld [vmem:[%s14445_s19 + $0x1548] sm:$0xff]  ;;  %v11522_v39 = vcombine.low %v3761_v32, %v3765_v36 }
 0x422   : > { %9887 = vmatpush2.bf16.msra.mxu0 %v11306_v53  ;;  %v3893_v43 = vld [vmem:[%s14445_s19 + $0x1568] sm:$0xff] }
 0x423   : > { %9928 = vmatpush2.bf16.msra.mxu1 %v11434_v54  ;;  %9888 = vmatprep.subr.bf16.mxu0 %v11299_v55  ;;  %v11658_v54 = vcombine.low %v3897_v41, %v3901_v18  ;;  %v11523_v55 = vcombine.high %v3761_v32, %v3765_v36  ;;  %v11651_v57 = vcombine.high %v3889_v16, %v3893_v43  ;;  %v3753_v58 = vld [vmem:[%s14445_s19 + $0x1108] sm:$0xff] }
 0x424   : > { %9929 = vmatprep.subr.bf16.mxu1 %v11427_v56  ;;  %v3757_v60 = vld [vmem:[%s14445_s19 + $0x1128] sm:$0xff]  ;;  %v11650_v42 = vcombine.low %v3889_v16, %v3893_v43 }
 0x425   : > { %v11515_v8 = vcombine.high %v3753_v58, %v3757_v60  ;;  %v3877_v22 = vld [vmem:[%s14445_s19 + $0x14e8] sm:$0xff]  ;;  %v11514_v25 = vcombine.low %v3753_v58, %v3757_v60 }
 0x426   : > { %9889 = vmatpush2.bf16.msra.mxu0 %v11298_v5  ;;  %v3865_v32 = vld [vmem:[%s14445_s19 + $0x1488] sm:$0xff] }
 0x427   : > { %9930 = vmatpush2.bf16.msra.mxu1 %v11426_v6  ;;  %9890 = vmatprep.subr.bf16.mxu0 %v11291_v13  ;;  %v3881_v6 = vld [vmem:[%s14445_s19 + $0x1508] sm:$0xff] }
 0x428   : > { %9931 = vmatprep.subr.bf16.mxu1 %v11419_v38  ;;  %v3885_v13 = vld [vmem:[%s14445_s19 + $0x1528] sm:$0xff] }
 0x429   : > { %v3869_v36 = vld [vmem:[%s14445_s19 + $0x14a8] sm:$0xff] }
 0x42a   : > { %9891 = vmatpush2.bf16.msra.mxu0 %v11290_v9  ;;  %v11643_v9 = vcombine.high %v3881_v6, %v3885_v13  ;;  %v11627_v16 = vcombine.high %v3865_v32, %v3869_v36  ;;  %v3729_v43 = vld [vmem:[%s14445_s19 + $0x1048] sm:$0xff] }
 0x42b   : > { %9932 = vmatpush2.bf16.msra.mxu1 %v11418_v11  ;;  %9942 = vmatprep.subr.bf16.mxu0 %v11539_v12  ;;  %v3745_v11 = vld [vmem:[%s14445_s19 + $0x10c8] sm:$0xff] }
 0x42c   : > { %9983 = vmatprep.subr.bf16.mxu1 %v11667_v21  ;;  %v3749_v12 = vld [vmem:[%s14445_s19 + $0x10e8] sm:$0xff] }
 0x42d   : > { %v9648_v63 = vpop.f32.mrf.mxu0  ;;  %v9689_v37 = vpop.f32.mrf.mxu1  ;;  %9893 = vmatmul.mubr.bf16.vlgmr.msra.gmra.mxu0 %v14706_v2  ;;  %v3873_v21 = vld [vmem:[%s14445_s19 + $0x14c8] sm:$0xff]  ;;  %v11507_v41 = vcombine.high %v3745_v11, %v3749_v12 }
 0x42e   : > { %v9649_v46 = vadd.f32 %v9648_v63, %v14978_v44  ;;  %9934 = vmatmul.mubr.bf16.vlgmr.msra.gmra.mxu1 %v14704_v62  ;;  %9943 = vmatpush1.bf16.msra.mxu0 %v11538_v40  ;;  %v11642_v40 = vcombine.low %v3881_v6, %v3885_v13  ;;  %v11635_v18 = vcombine.high %v3873_v21, %v3877_v22  ;;  %v3725_v58 = vld [vmem:[%s14445_s19 + $0x1028] sm:$0xff] }
 0x42f   : > { %9974 = vmatprep.mubr.bf16.mxu0 %v14712_v45  ;;  %9984 = vmatpush1.bf16.msra.mxu1 %v11666_v29  ;;  %v9650_v52 = vpop.f32.mrf.mxu0  ;;  %v9691_v53 = vpop.f32.mrf.mxu1  ;;  %v3737_v29 = vld [vmem:[%s14445_s19 + $0x1088] sm:$0xff]  ;;  %v11506_v63 = vcombine.low %v3745_v11, %v3749_v12 }
 0x430   : > { %v15052_v56 = vadd.f32 %v9689_v37, %v9649_v46  ;;  %10015 = vmatprep.mubr.bf16.mxu1 %v14714_v7  ;;  %v9651_v44 = vadd.f32 %v9650_v52, %v14986_v24  ;;  %9944 = vmatprep.subr.bf16.mxu0 %v11531_v31  ;;  %v3741_v31 = vld [vmem:[%s14445_s19 + $0x10a8] sm:$0xff]  ;;  %v11634_v37 = vcombine.low %v3873_v21, %v3877_v22 }
 0x431   : > { %v9652_v4 = vpop.f32.mrf.mxu0  ;;  %v9693_v5 = vpop.f32.mrf.mxu1  ;;  %9985 = vmatprep.subr.bf16.mxu1 %v11659_v30  ;;  %v11499_v30 = vcombine.high %v3737_v29, %v3741_v31  ;;  %v3733_v46 = vld [vmem:[%s14445_s19 + $0x1068] sm:$0xff] }
 0x432   : > { %v15060_v38 = vadd.f32 %v9691_v53, %v9651_v44  ;;  %9945 = vmatpush1.bf16.msra.mxu0 %v11530_v59  ;;  %v3857_v59 = vld [vmem:[%s14445_s19 + $0x1448] sm:$0xff]  ;;  %v11498_v53 = vcombine.low %v3737_v29, %v3741_v31  ;;  %v11490_v5 = vcombine.low %v3729_v43, %v3733_v46 }
 0x433   : > { %9986 = vmatpush1.bf16.msra.mxu1 %v11658_v54  ;;  %v9653_v27 = vpop.f32.mrf.mxu0  ;;  %v9694_v24 = vpop.f32.mrf.mxu1  ;;  %9946 = vmatprep.subr.bf16.mxu0 %v11523_v55  ;;  %v3861_v52 = vld [vmem:[%s14445_s19 + $0x1468] sm:$0xff]  ;;  %v11626_v54 = vcombine.low %v3865_v32, %v3869_v36  ;;  %v11491_v55 = vcombine.high %v3729_v43, %v3733_v46 }
 0x434   : > { %9987 = vmatprep.subr.bf16.mxu1 %v11651_v57  ;;  %v11619_v44 = vcombine.high %v3857_v59, %v3861_v52  ;;  %v3721_v57 = vld [vmem:[%s14445_s19 + $0x1008] sm:$0xff]  ;;  %v11618_v6 = vcombine.low %v3857_v59, %v3861_v52 }
 0x435   : > { %v3849_v60 = vld [vmem:[%s14445_s19 + $0x1408] sm:$0xff]  ;;  %v11483_v13 = vcombine.high %v3721_v57, %v3725_v58 }
 0x436   : > { %9947 = vmatpush1.bf16.msra.mxu0 %v11522_v39  ;;  %v3853_v4 = vld [vmem:[%s14445_s19 + $0x1428] sm:$0xff] }
 0x437   : > { %9988 = vmatpush1.bf16.msra.mxu1 %v11650_v42  ;;  %9948 = vmatprep.subr.bf16.mxu0 %v11515_v8  ;;  %v11611_v39 = vcombine.high %v3849_v60, %v3853_v4  ;;  %v3841_v27 = vld [vmem:[%s14445_s19 + $0x13c8] sm:$0xff]  ;;  %v11610_v11 = vcombine.low %v3849_v60, %v3853_v4 }
 0x438   : > { %9989 = vmatprep.subr.bf16.mxu1 %v11643_v9  ;;  %v3845_v24 = vld [vmem:[%s14445_s19 + $0x13e8] sm:$0xff]  ;;  %v11482_v9 = vcombine.low %v3721_v57, %v3725_v58 }
 0x439   : > { %v3969_v42 = vld [vmem:[%s14445_s19 + $0x17c8] sm:$0xff]  ;;  %v11603_v12 = vcombine.high %v3841_v27, %v3845_v24 }
 0x43a   : > { %9949 = vmatpush1.bf16.msra.mxu0 %v11514_v25  ;;  %v3973_v8 = vld [vmem:[%s14445_s19 + $0x17e8] sm:$0xff] }
 0x43b   : > { %9990 = vmatpush1.bf16.msra.mxu1 %v11642_v40  ;;  %9950 = vmatprep.subr.bf16.mxu0 %v11507_v41  ;;  %v11731_v21 = vcombine.high %v3969_v42, %v3973_v8  ;;  %v3833_v22 = vld [vmem:[%s14445_s19 + $0x1388] sm:$0xff]  ;;  %v11730_v29 = vcombine.low %v3969_v42, %v3973_v8 }
 0x43c   : > { %9991 = vmatprep.subr.bf16.mxu1 %v11635_v18  ;;  %v3837_v25 = vld [vmem:[%s14445_s19 + $0x13a8] sm:$0xff]  ;;  %v11602_v18 = vcombine.low %v3841_v27, %v3845_v24 }
 0x43d   : > { %v3961_v40 = vld [vmem:[%s14445_s19 + $0x1788] sm:$0xff]  ;;  %v11595_v31 = vcombine.high %v3833_v22, %v3837_v25 }
 0x43e   : > { %9951 = vmatpush1.bf16.msra.mxu0 %v11506_v63  ;;  %v3965_v41 = vld [vmem:[%s14445_s19 + $0x17a8] sm:$0xff] }
 0x43f   : > { %9992 = vmatpush1.bf16.msra.mxu1 %v11634_v37  ;;  %9952 = vmatprep.subr.bf16.mxu0 %v11499_v30  ;;  %v11723_v32 = vcombine.high %v3961_v40, %v3965_v41  ;;  %v3825_v36 = vld [vmem:[%s14445_s19 + $0x1348] sm:$0xff]  ;;  %v11722_v43 = vcombine.low %v3961_v40, %v3965_v41 }
 0x440   : > { %9993 = vmatprep.subr.bf16.mxu1 %v11627_v16  ;;  %v3829_v63 = vld [vmem:[%s14445_s19 + $0x1368] sm:$0xff]  ;;  %v11594_v16 = vcombine.low %v3833_v22, %v3837_v25 }
 0x441   : > { %v3953_v37 = vld [vmem:[%s14445_s19 + $0x1748] sm:$0xff]  ;;  %v11587_v46 = vcombine.high %v3825_v36, %v3829_v63 }
 0x442   : > { %9953 = vmatpush1.bf16.msra.mxu0 %v11498_v53  ;;  %v3957_v30 = vld [vmem:[%s14445_s19 + $0x1768] sm:$0xff] }
 0x443   : > { %9994 = vmatpush1.bf16.msra.mxu1 %v11626_v54  ;;  %9954 = vmatprep.subr.bf16.mxu0 %v11491_v55  ;;  %v11715_v59 = vcombine.high %v3953_v37, %v3957_v30  ;;  %v3817_v52 = vld [vmem:[%s14445_s19 + $0x1308] sm:$0xff]  ;;  %v11714_v57 = vcombine.low %v3953_v37, %v3957_v30 }
 0x444   : > { %9995 = vmatprep.subr.bf16.mxu1 %v11619_v44  ;;  %v3821_v53 = vld [vmem:[%s14445_s19 + $0x1328] sm:$0xff]  ;;  %v11586_v44 = vcombine.low %v3825_v36, %v3829_v63 }
 0x445   : > { %v3945_v54 = vld [vmem:[%s14445_s19 + $0x1708] sm:$0xff]  ;;  %v11579_v58 = vcombine.high %v3817_v52, %v3821_v53 }
 0x446   : > { %9955 = vmatpush1.bf16.msra.mxu0 %v11490_v5  ;;  %v3949_v55 = vld [vmem:[%s14445_s19 + $0x1728] sm:$0xff] }
 0x447   : > { %9996 = vmatpush1.bf16.msra.mxu1 %v11618_v6  ;;  %9956 = vmatprep.subr.bf16.mxu0 %v11483_v13  ;;  %v11707_v60 = vcombine.high %v3945_v54, %v3949_v55  ;;  %v3809_v4 = vld [vmem:[%s14445_s19 + $0x12c8] sm:$0xff]  ;;  %v11706_v27 = vcombine.low %v3945_v54, %v3949_v55 }
 0x448   : > { %9997 = vmatprep.subr.bf16.mxu1 %v11611_v39  ;;  %v3813_v5 = vld [vmem:[%s14445_s19 + $0x12e8] sm:$0xff]  ;;  %v11578_v39 = vcombine.low %v3817_v52, %v3821_v53 }
 0x449   : > { %v3937_v6 = vld [vmem:[%s14445_s19 + $0x16c8] sm:$0xff]  ;;  %v11571_v24 = vcombine.high %v3809_v4, %v3813_v5 }
 0x44a   : > { %9957 = vmatpush1.bf16.msra.mxu0 %v11482_v9  ;;  %v3941_v13 = vld [vmem:[%s14445_s19 + $0x16e8] sm:$0xff] }
 0x44b   : > { %9998 = vmatpush1.bf16.msra.mxu1 %v11610_v11  ;;  %9958 = vmatprep.subr.bf16.mxu0 %v11603_v12  ;;  %v11699_v42 = vcombine.high %v3937_v6, %v3941_v13  ;;  %v3801_v8 = vld [vmem:[%s14445_s19 + $0x1288] sm:$0xff]  ;;  %v11698_v22 = vcombine.low %v3937_v6, %v3941_v13 }
 0x44c   : > { %9999 = vmatprep.subr.bf16.mxu1 %v11731_v21  ;;  %v3805_v9 = vld [vmem:[%s14445_s19 + $0x12a8] sm:$0xff]  ;;  %v11570_v21 = vcombine.low %v3809_v4, %v3813_v5 }
 0x44d   : > { %v3929_v11 = vld [vmem:[%s14445_s19 + $0x1688] sm:$0xff]  ;;  %v11563_v25 = vcombine.high %v3801_v8, %v3805_v9 }
 0x44e   : > { %9959 = vmatpush2.bf16.msra.mxu0 %v11602_v18  ;;  %v3933_v12 = vld [vmem:[%s14445_s19 + $0x16a8] sm:$0xff] }
 0x44f   : > { %10000 = vmatpush2.bf16.msra.mxu1 %v11730_v29  ;;  %9960 = vmatprep.subr.bf16.mxu0 %v11595_v31  ;;  %v11691_v40 = vcombine.high %v3929_v11, %v3933_v12  ;;  %v3793_v41 = vld [vmem:[%s14445_s19 + $0x1248] sm:$0xff]  ;;  %v11690_v36 = vcombine.low %v3929_v11, %v3933_v12 }
 0x450   : > { %10001 = vmatprep.subr.bf16.mxu1 %v11723_v32  ;;  %v3797_v18 = vld [vmem:[%s14445_s19 + $0x1268] sm:$0xff]  ;;  %v11562_v32 = vcombine.low %v3801_v8, %v3805_v9 }
 0x451   : > { %v3921_v29 = vld [vmem:[%s14445_s19 + $0x1648] sm:$0xff]  ;;  %v11555_v63 = vcombine.high %v3793_v41, %v3797_v18 }
 0x452   : > { %9961 = vmatpush2.bf16.msra.mxu0 %v11594_v16  ;;  %v3925_v31 = vld [vmem:[%s14445_s19 + $0x1668] sm:$0xff] }
 0x453   : > { %10002 = vmatpush2.bf16.msra.mxu1 %v11722_v43  ;;  %9962 = vmatprep.subr.bf16.mxu0 %v11587_v46  ;;  %v11683_v37 = vcombine.high %v3921_v29, %v3925_v31  ;;  %v3785_v30 = vld [vmem:[%s14445_s19 + $0x1208] sm:$0xff]  ;;  %v11682_v52 = vcombine.low %v3921_v29, %v3925_v31  ;;  %v10771_v29 = vld [vmem:[%s15122_s20] sm:$0xff] }
 0x454   : > { %10003 = vmatprep.subr.bf16.mxu1 %v11715_v59  ;;  %v3789_v16 = vld [vmem:[%s14445_s19 + $0x1228] sm:$0xff]  ;;  %v11554_v59 = vcombine.low %v3793_v41, %v3797_v18 }
 0x455   : > { %v3913_v43 = vld [vmem:[%s14445_s19 + $0x1608] sm:$0xff]  ;;  %v11547_v53 = vcombine.high %v3785_v30, %v3789_v16 }
 0x456   : > { %9963 = vmatpush2.bf16.msra.mxu0 %v11586_v44  ;;  %v3917_v46 = vld [vmem:[%s14445_s19 + $0x1628] sm:$0xff] }
 0x457   : > { %10004 = vmatpush2.bf16.msra.mxu1 %v11714_v57  ;;  %9964 = vmatprep.subr.bf16.mxu0 %v11579_v58  ;;  %v11675_v54 = vcombine.high %v3913_v43, %v3917_v46  ;;  %v4033_v55 = vld [vmem:[%s14445_s19 + $0x19c8] sm:$0xff]  ;;  %v11674_v4 = vcombine.low %v3913_v43, %v3917_v46 }
 0x458   : > { %10005 = vmatprep.subr.bf16.mxu1 %v11707_v60  ;;  %v4037_v44 = vld [vmem:[%s14445_s19 + $0x19e8] sm:$0xff]  ;;  %v11546_v60 = vcombine.low %v3785_v30, %v3789_v16 }
 0x459   : > { %v4161_v57 = vld [vmem:[%s14445_s19 + $0x1dc8] sm:$0xff]  ;;  %v11795_v5 = vcombine.high %v4033_v55, %v4037_v44 }
 0x45a   : > { %9965 = vmatpush2.bf16.msra.mxu0 %v11578_v39  ;;  %v4165_v58 = vld [vmem:[%s14445_s19 + $0x1de8] sm:$0xff] }
 0x45b   : > { %10006 = vmatpush2.bf16.msra.mxu1 %v11706_v27  ;;  %9966 = vmatprep.subr.bf16.mxu0 %v11571_v24  ;;  %v11923_v6 = vcombine.high %v4161_v57, %v4165_v58  ;;  %v4025_v13 = vld [vmem:[%s14445_s19 + $0x1988] sm:$0xff]  ;;  %v11794_v27 = vcombine.low %v4033_v55, %v4037_v44  ;;  %v11922_v8 = vcombine.low %v4161_v57, %v4165_v58 }
 0x45c   : > { %10007 = vmatprep.subr.bf16.mxu1 %v11699_v42  ;;  %v4029_v39 = vld [vmem:[%s14445_s19 + $0x19a8] sm:$0xff]  ;;  %v10780_v58 = vrot.slane %v10771_v29, %v14560_v19 }
 0x45d   : > { %v4153_v24 = vld [vmem:[%s14445_s19 + $0x1d88] sm:$0xff]  ;;  %v11787_v9 = vcombine.high %v4025_v13, %v4029_v39  ;;  %v11786_v31 = vcombine.low %v4025_v13, %v4029_v39 }
 0x45e   : > { %9967 = vmatpush2.bf16.msra.mxu0 %v11570_v21  ;;  %v4157_v42 = vld [vmem:[%s14445_s19 + $0x1da8] sm:$0xff] }
 0x45f   : > { %10008 = vmatpush2.bf16.msra.mxu1 %v11698_v22  ;;  %9968 = vmatprep.subr.bf16.mxu0 %v11563_v25  ;;  %v4017_v11 = vld [vmem:[%s14445_s19 + $0x1948] sm:$0xff]  ;;  %v11915_v25 = vcombine.high %v4153_v24, %v4157_v42 }
 0x460   : > { %10009 = vmatprep.subr.bf16.mxu1 %v11691_v40  ;;  %v4021_v12 = vld [vmem:[%s14445_s19 + $0x1968] sm:$0xff] }
 0x461   : > { %v4145_v40 = vld [vmem:[%s14445_s19 + $0x1d48] sm:$0xff] }
 0x462   : > { %9969 = vmatpush2.bf16.msra.mxu0 %v11562_v32  ;;  %v4149_v41 = vld [vmem:[%s14445_s19 + $0x1d68] sm:$0xff] }
 0x463   : > { %10010 = vmatpush2.bf16.msra.mxu1 %v11690_v36  ;;  %9970 = vmatprep.subr.bf16.mxu0 %v11555_v63  ;;  %v11914_v63 = vcombine.low %v4153_v24, %v4157_v42  ;;  %v11907_v16 = vcombine.high %v4145_v40, %v4149_v41  ;;  %v4009_v43 = vld [vmem:[%s14445_s19 + $0x1908] sm:$0xff] }
 0x464   : > { %10011 = vmatprep.subr.bf16.mxu1 %v11683_v37  ;;  %v11779_v37 = vcombine.high %v4017_v11, %v4021_v12  ;;  %v4013_v46 = vld [vmem:[%s14445_s19 + $0x1928] sm:$0xff] }
 0x465   : > { %v4141_v55 = vld [vmem:[%s14445_s19 + $0x1d28] sm:$0xff] }
 0x466   : > { %9971 = vmatpush2.bf16.msra.mxu0 %v11554_v59  ;;  %v10776_v59 = vrot.slane %v10771_v29, %v14549_v14  ;;  %v11906_v14 = vcombine.low %v4145_v40, %v4149_v41  ;;  %v4001_v39 = vld [vmem:[%s14445_s19 + $0x18c8] sm:$0xff] }
 0x467   : > { %10012 = vmatpush2.bf16.msra.mxu1 %v11682_v52  ;;  %9972 = vmatprep.subr.bf16.mxu0 %v11547_v53  ;;  %v4129_v24 = vld [vmem:[%s14445_s19 + $0x1cc8] sm:$0xff] }
 0x468   : > { %10013 = vmatprep.subr.bf16.mxu1 %v11675_v54  ;;  %v4137_v54 = vld [vmem:[%s14445_s19 + $0x1d08] sm:$0xff] }
 0x469   : > { %v11899_v13 = vcombine.high %v4137_v54, %v4141_v55  ;;  %v4133_v42 = vld [vmem:[%s14445_s19 + $0x1ce8] sm:$0xff] }
 0x46a   : > { %9973 = vmatpush2.bf16.msra.mxu0 %v11546_v60  ;;  %v3997_v40 = vld [vmem:[%s14445_s19 + $0x18a8] sm:$0xff] }
 0x46b   : > { %10014 = vmatpush2.bf16.msra.mxu1 %v11674_v4  ;;  %10024 = vmatprep.subr.bf16.mxu0 %v11795_v5  ;;  %v11771_v5 = vcombine.high %v4009_v43, %v4013_v46  ;;  %v4121_v41 = vld [vmem:[%s14445_s19 + $0x1c88] sm:$0xff] }
 0x46c   : > { %10065 = vmatprep.subr.bf16.mxu1 %v11923_v6 }
 0x46d   : > { %v9730_v21 = vpop.f32.mrf.mxu0  ;;  %v9771_v22 = vpop.f32.mrf.mxu1  ;;  %9975 = vmatmul.mubr.bf16.vlgmr.msra.gmra.mxu0 %v14796_v28 }
 0x46e   : > { %v9731_v18 = vadd.f32 %v9730_v21, %v15052_v56  ;;  %10016 = vmatmul.mubr.bf16.vlgmr.msra.gmra.mxu1 %v14794_v26  ;;  %10025 = vmatpush1.bf16.msra.mxu0 %v11794_v27  ;;  %v4005_v27 = vld [vmem:[%s14445_s19 + $0x18e8] sm:$0xff] }
 0x46f   : > { %10056 = vmatprep.mubr.bf16.mxu0 %v14799_v33  ;;  %10066 = vmatpush1.bf16.msra.mxu1 %v11922_v8  ;;  %v9732_v32 = vpop.f32.mrf.mxu0  ;;  %v9773_v36 = vpop.f32.mrf.mxu1  ;;  %v11762_v29 = vcombine.low %v4001_v39, %v4005_v27 }
 0x470   : > { %v9772_v30 = vadd.f32 %v9771_v22, %v9731_v18  ;;  %10097 = vmatprep.mubr.bf16.mxu1 %v14801_v34  ;;  %v9733_v56 = vadd.f32 %v9732_v32, %v15060_v38  ;;  %10026 = vmatprep.subr.bf16.mxu0 %v11787_v9  ;;  %v11778_v38 = vcombine.low %v4017_v11, %v4021_v12  ;;  %v4125_v18 = vld [vmem:[%s14445_s19 + $0x1ca8] sm:$0xff] }
 0x471   : > { %v9734_v52 = vpop.f32.mrf.mxu0  ;;  %v9775_v53 = vpop.f32.mrf.mxu1  ;;  %10067 = vmatprep.subr.bf16.mxu1 %v11915_v25  ;;  %v11770_v9 = vcombine.low %v4009_v43, %v4013_v46  ;;  %v11898_v11 = vcombine.low %v4137_v54, %v4141_v55  ;;  %v11763_v12 = vcombine.high %v4001_v39, %v4005_v27  ;;  %v11891_v22 = vcombine.high %v4129_v24, %v4133_v42  ;;  %v3993_v25 = vld [vmem:[%s14445_s19 + $0x1888] sm:$0xff] }
 0x472   : > { %v10762_v44 = vmax.f32 %v9772_v30, 0.0  ;;  %v9774_v57 = vadd.f32 %v9773_v36, %v9733_v56  ;;  %10027 = vmatpush1.bf16.msra.mxu0 %v11786_v31  ;;  %v11890_v31 = vcombine.low %v4129_v24, %v4133_v42  ;;  %v11755_v32 = vcombine.high %v3993_v25, %v3997_v40  ;;  %v4113_v30 = vld [vmem:[%s14445_s19 + $0x1c48] sm:$0xff] }
 0x473   : > { %10068 = vmatpush1.bf16.msra.mxu1 %v11914_v63  ;;  %v9735_v60 = vpop.f32.mrf.mxu0  ;;  %v9776_v4 = vpop.f32.mrf.mxu1  ;;  %10028 = vmatprep.subr.bf16.mxu0 %v11779_v37  ;;  %v11883_v36 = vcombine.high %v4121_v41, %v4125_v18  ;;  %v3985_v63 = vld [vmem:[%s14445_s19 + $0x1848] sm:$0xff]  ;;  %v11882_v43 = vcombine.low %v4121_v41, %v4125_v18 }
 0x474   : > { %v10763_v6 = vmax.f32 %v9774_v57, 0.0  ;;  %10069 = vmatprep.subr.bf16.mxu1 %v11907_v16  ;;  %v10813_v19 = vmul.f32 %v10776_v59, %v10762_v44  ;;  %v3989_v37 = vld [vmem:[%s14445_s19 + $0x1868] sm:$0xff]  ;;  %v11754_v16 = vcombine.low %v3993_v25, %v3997_v40 }
 0x475   : > { %v4117_v56 = vld [vmem:[%s14445_s19 + $0x1c68] sm:$0xff]  ;;  %v11747_v46 = vcombine.high %v3985_v63, %v3989_v37  ;;  %v11746_v44 = vcombine.low %v3985_v63, %v3989_v37 }
 0x476   : > { %v10814_v8 = vmul.f32 %v10780_v58, %v10763_v6  ;;  %10029 = vmatpush1.bf16.msra.mxu0 %v11778_v38  ;;  %v11875_v59 = vcombine.high %v4113_v30, %v4117_v56  ;;  %v3977_v52 = vld [vmem:[%s14445_s19 + $0x1808] sm:$0xff]  ;;  %v11874_v57 = vcombine.low %v4113_v30, %v4117_v56 }
 0x477   : > { %10070 = vmatpush1.bf16.msra.mxu1 %v11906_v14  ;;  %10030 = vmatprep.subr.bf16.mxu0 %v11771_v5  ;;  %v3981_v53 = vld [vmem:[%s14445_s19 + $0x1828] sm:$0xff] }
 0x478   : > { %v15145_v21 = vadd.f32 %v10814_v8, %v10813_v19  ;;  %10071 = vmatprep.subr.bf16.mxu1 %v11899_v13  ;;  %v4105_v54 = vld [vmem:[%s14445_s19 + $0x1c08] sm:$0xff]  ;;  %v11739_v58 = vcombine.high %v3977_v52, %v3981_v53  ;;  %v11738_v6 = vcombine.low %v3977_v52, %v3981_v53 }
 0x479   : > { %v4109_v55 = vld [vmem:[%s14445_s19 + $0x1c28] sm:$0xff] }
 0x47a   : > { %10031 = vmatpush1.bf16.msra.mxu0 %v11770_v9  ;;  %v11867_v38 = vcombine.high %v4105_v54, %v4109_v55  ;;  %v4097_v60 = vld [vmem:[%s14445_s19 + $0x1bc8] sm:$0xff]  ;;  %v11866_v13 = vcombine.low %v4105_v54, %v4109_v55 }
 0x47b   : > { %10072 = vmatpush1.bf16.msra.mxu1 %v11898_v11  ;;  %10032 = vmatprep.subr.bf16.mxu0 %v11763_v12  ;;  %v4101_v4 = vld [vmem:[%s14445_s19 + $0x1be8] sm:$0xff] }
 0x47c   : > { %10073 = vmatprep.subr.bf16.mxu1 %v11891_v22  ;;  %v4225_v14 = vld [vmem:[%s14445_s19 + $0x1fc8] sm:$0xff]  ;;  %v11859_v39 = vcombine.high %v4097_v60, %v4101_v4  ;;  %v11858_v9 = vcombine.low %v4097_v60, %v4101_v4 }
 0x47d   : > { %v4229_v5 = vld [vmem:[%s14445_s19 + $0x1fe8] sm:$0xff] }
 0x47e   : > { %10033 = vmatpush1.bf16.msra.mxu0 %v11762_v29  ;;  %v11987_v27 = vcombine.high %v4225_v14, %v4229_v5  ;;  %v4089_v24 = vld [vmem:[%s14445_s19 + $0x1b88] sm:$0xff]  ;;  %v11986_v11 = vcombine.low %v4225_v14, %v4229_v5 }
 0x47f   : > { %10074 = vmatpush1.bf16.msra.mxu1 %v11890_v31  ;;  %10034 = vmatprep.subr.bf16.mxu0 %v11755_v32  ;;  %v4093_v42 = vld [vmem:[%s14445_s19 + $0x1ba8] sm:$0xff] }
 0x480   : > { %10075 = vmatprep.subr.bf16.mxu1 %v11883_v36  ;;  %v4217_v19 = vld [vmem:[%s14445_s19 + $0x1f88] sm:$0xff]  ;;  %v11851_v12 = vcombine.high %v4089_v24, %v4093_v42  ;;  %v11850_v29 = vcombine.low %v4089_v24, %v4093_v42 }
 0x481   : > { %v4221_v8 = vld [vmem:[%s14445_s19 + $0x1fa8] sm:$0xff] }
 0x482   : > { %10035 = vmatpush1.bf16.msra.mxu0 %v11754_v16  ;;  %v11979_v22 = vcombine.high %v4217_v19, %v4221_v8  ;;  %v4081_v25 = vld [vmem:[%s14445_s19 + $0x1b48] sm:$0xff]  ;;  %v11978_v31 = vcombine.low %v4217_v19, %v4221_v8 }
 0x483   : > { %10076 = vmatpush1.bf16.msra.mxu1 %v11882_v43  ;;  %10036 = vmatprep.subr.bf16.mxu0 %v11747_v46  ;;  %v4085_v40 = vld [vmem:[%s14445_s19 + $0x1b68] sm:$0xff] }
 0x484   : > { %10077 = vmatprep.subr.bf16.mxu1 %v11875_v59  ;;  %v4209_v41 = vld [vmem:[%s14445_s19 + $0x1f48] sm:$0xff]  ;;  %v11843_v32 = vcombine.high %v4081_v25, %v4085_v40  ;;  %v11842_v16 = vcombine.low %v4081_v25, %v4085_v40 }
 0x485   : > { %v4213_v18 = vld [vmem:[%s14445_s19 + $0x1f68] sm:$0xff] }
 0x486   : > { %10037 = vmatpush1.bf16.msra.mxu0 %v11746_v44  ;;  %v11971_v36 = vcombine.high %v4209_v41, %v4213_v18  ;;  %v4073_v63 = vld [vmem:[%s14445_s19 + $0x1b08] sm:$0xff]  ;;  %v11970_v43 = vcombine.low %v4209_v41, %v4213_v18 }
 0x487   : > { %10078 = vmatpush1.bf16.msra.mxu1 %v11874_v57  ;;  %10038 = vmatprep.subr.bf16.mxu0 %v11739_v58  ;;  %v4077_v37 = vld [vmem:[%s14445_s19 + $0x1b28] sm:$0xff] }
 0x488   : > { %10079 = vmatprep.subr.bf16.mxu1 %v11867_v38  ;;  %v4201_v30 = vld [vmem:[%s14445_s19 + $0x1f08] sm:$0xff]  ;;  %v11835_v46 = vcombine.high %v4073_v63, %v4077_v37  ;;  %v11834_v44 = vcombine.low %v4073_v63, %v4077_v37  ;;  %v3266_v63 = vld [vmem:[%s14445_s19 + $0x1d0] sm:$0xff] }
 0x489   : > { %v4205_v56 = vld [vmem:[%s14445_s19 + $0x1f28] sm:$0xff]  ;;  %v3270_v37 = vld [vmem:[%s14445_s19 + $0x1f0] sm:$0xff] }
 0x48a   : > { %10039 = vmatpush1.bf16.msra.mxu0 %v11738_v6  ;;  %v11963_v59 = vcombine.high %v4201_v30, %v4205_v56  ;;  %v4065_v52 = vld [vmem:[%s14445_s19 + $0x1ac8] sm:$0xff]  ;;  %v11962_v57 = vcombine.low %v4201_v30, %v4205_v56  ;;  %v3394_v30 = vld [vmem:[%s14445_s19 + $0x5d0] sm:$0xff] }
 0x48b   : > { %10080 = vmatpush1.bf16.msra.mxu1 %v11866_v13  ;;  %10040 = vmatprep.subr.bf16.mxu0 %v11859_v39  ;;  %v4069_v53 = vld [vmem:[%s14445_s19 + $0x1ae8] sm:$0xff]  ;;  %v3398_v56 = vld [vmem:[%s14445_s19 + $0x5f0] sm:$0xff] }
 0x48c   : > { %10081 = vmatprep.subr.bf16.mxu1 %v11987_v27  ;;  %v4193_v54 = vld [vmem:[%s14445_s19 + $0x1ec8] sm:$0xff]  ;;  %v11827_v58 = vcombine.high %v4065_v52, %v4069_v53  ;;  %v11826_v6 = vcombine.low %v4065_v52, %v4069_v53  ;;  %v3258_v52 = vld [vmem:[%s14445_s19 + $0x190] sm:$0xff] }
 0x48d   : > { %v4197_v55 = vld [vmem:[%s14445_s19 + $0x1ee8] sm:$0xff]  ;;  %v3262_v53 = vld [vmem:[%s14445_s19 + $0x1b0] sm:$0xff] }
 0x48e   : > { %10041 = vmatpush2.bf16.msra.mxu0 %v11858_v9  ;;  %v11955_v38 = vcombine.high %v4193_v54, %v4197_v55  ;;  %v4057_v60 = vld [vmem:[%s14445_s19 + $0x1a88] sm:$0xff]  ;;  %v11954_v13 = vcombine.low %v4193_v54, %v4197_v55  ;;  %v12060_v54 = vld [vmem:[%s14885_s16] sm:$0xff] }
 0x48f   : > { %10082 = vmatpush2.bf16.msra.mxu1 %v11986_v11  ;;  %10042 = vmatprep.subr.bf16.mxu0 %v11851_v12  ;;  %v4061_v4 = vld [vmem:[%s14445_s19 + $0x1aa8] sm:$0xff]  ;;  %v4245_v55 = vrot.slane %v12060_v54, %v14552_v15 }
 0x490   : > { %10083 = vmatprep.subr.bf16.mxu1 %v11979_v22  ;;  %v4185_v14 = vld [vmem:[%s14445_s19 + $0x1e88] sm:$0xff]  ;;  %v11819_v39 = vcombine.high %v4057_v60, %v4061_v4  ;;  %v11818_v9 = vcombine.low %v4057_v60, %v4061_v4  ;;  %v4249_v60 = vrot.slane %v12060_v54, %v14563_v20  ;;  %v11021_v4 = vcombine.high %v3258_v52, %v3262_v53  ;;  %v3366_v54 = vld [vmem:[%s14445_s19 + $0x4f0] sm:$0xff] }
 0x491   : > { %v4189_v5 = vld [vmem:[%s14445_s19 + $0x1ea8] sm:$0xff] }
 0x492   : > { %10043 = vmatpush2.bf16.msra.mxu0 %v11850_v29  ;;  %v11947_v27 = vcombine.high %v4185_v14, %v4189_v5  ;;  %v4049_v24 = vld [vmem:[%s14445_s19 + $0x1a48] sm:$0xff]  ;;  %v11946_v11 = vcombine.low %v4185_v14, %v4189_v5  ;;  %v3250_v14 = vld [vmem:[%s14445_s19 + $0x150] sm:$0xff] }
 0x493   : > { %10084 = vmatpush2.bf16.msra.mxu1 %v11978_v31  ;;  %10044 = vmatprep.subr.bf16.mxu0 %v11843_v32  ;;  %v4053_v42 = vld [vmem:[%s14445_s19 + $0x1a68] sm:$0xff]  ;;  %v3254_v5 = vld [vmem:[%s14445_s19 + $0x170] sm:$0xff] }
 0x494   : > { %10085 = vmatprep.subr.bf16.mxu1 %v11971_v36  ;;  %v4177_v19 = vld [vmem:[%s14445_s19 + $0x1e48] sm:$0xff]  ;;  %v11811_v12 = vcombine.high %v4049_v24, %v4053_v42  ;;  %v11810_v29 = vcombine.low %v4049_v24, %v4053_v42 }
 0x495   : > { %v4181_v8 = vld [vmem:[%s14445_s19 + $0x1e68] sm:$0xff] }
 0x496   : > { %10045 = vmatpush2.bf16.msra.mxu0 %v11842_v16  ;;  %v11939_v22 = vcombine.high %v4177_v19, %v4181_v8  ;;  %v4041_v25 = vld [vmem:[%s14445_s19 + $0x1a08] sm:$0xff]  ;;  %v11938_v31 = vcombine.low %v4177_v19, %v4181_v8  ;;  %v11020_v19 = vcombine.low %v3258_v52, %v3262_v53  ;;  %v3238_v52 = vld [vmem:[%s14445_s19 + $0xf0] sm:$0xff] }
 0x497   : > { %10086 = vmatpush2.bf16.msra.mxu1 %v11970_v43  ;;  %10046 = vmatprep.subr.bf16.mxu0 %v11835_v46  ;;  %v4045_v40 = vld [vmem:[%s14445_s19 + $0x1a28] sm:$0xff]  ;;  %v11029_v46 = vcombine.high %v3266_v63, %v3270_v37  ;;  %v3362_v53 = vld [vmem:[%s14445_s19 + $0x4d0] sm:$0xff] }
 0x498   : > { %10087 = vmatprep.subr.bf16.mxu1 %v11963_v59  ;;  %v4169_v41 = vld [vmem:[%s14445_s19 + $0x1e08] sm:$0xff]  ;;  %v11803_v32 = vcombine.high %v4041_v25, %v4045_v40  ;;  %v11802_v16 = vcombine.low %v4041_v25, %v4045_v40  ;;  %v11157_v59 = vcombine.high %v3394_v30, %v3398_v56 }
 0x499   : > { %v4173_v18 = vld [vmem:[%s14445_s19 + $0x1e28] sm:$0xff] }
 0x49a   : > { %10047 = vmatpush2.bf16.msra.mxu0 %v11834_v44  ;;  %v11931_v36 = vcombine.high %v4169_v41, %v4173_v18  ;;  %v11930_v43 = vcombine.low %v4169_v41, %v4173_v18  ;;  %v11028_v44 = vcombine.low %v3266_v63, %v3270_v37  ;;  %v3242_v41 = vld [vmem:[%s14445_s19 + $0x110] sm:$0xff]  ;;  %v11012_v37 = vcombine.low %v3250_v14, %v3254_v5 }
 0x49b   : > { %10088 = vmatpush2.bf16.msra.mxu1 %v11962_v57  ;;  %10048 = vmatprep.subr.bf16.mxu0 %v11827_v58  ;;  %v3386_v57 = vld [vmem:[%s14445_s19 + $0x590] sm:$0xff] }
 0x49c   : > { %10089 = vmatprep.subr.bf16.mxu1 %v11955_v38  ;;  %v3390_v58 = vld [vmem:[%s14445_s19 + $0x5b0] sm:$0xff]  ;;  %v11156_v38 = vcombine.low %v3394_v30, %v3398_v56 }
 0x49d   : > { %v3246_v18 = vld [vmem:[%s14445_s19 + $0x130] sm:$0xff] }
 0x49e   : > { %10049 = vmatpush2.bf16.msra.mxu0 %v11826_v6 }
 0x49f   : > { %10090 = vmatpush2.bf16.msra.mxu1 %v11954_v13  ;;  %10050 = vmatprep.subr.bf16.mxu0 %v11819_v39  ;;  %v11149_v13 = vcombine.high %v3386_v57, %v3390_v58  ;;  %v3378_v39 = vld [vmem:[%s14445_s19 + $0x550] sm:$0xff] }
 0x4a0   : > { %10091 = vmatprep.subr.bf16.mxu1 %v11947_v27  ;;  %v3382_v27 = vld [vmem:[%s14445_s19 + $0x570] sm:$0xff] }
 0x4a1   : > { %v11141_v40 = vcombine.high %v3378_v39, %v3382_v27  ;;  %v11140_v56 = vcombine.low %v3378_v39, %v3382_v27  ;;  %v3218_v27 = vld [vmem:[%s14445_s19 + $0x50] sm:$0xff] }
 0x4a2   : > { %10051 = vmatpush2.bf16.msra.mxu0 %v11818_v9  ;;  %v11148_v9 = vcombine.low %v3386_v57, %v3390_v58  ;;  %v11125_v58 = vcombine.high %v3362_v53, %v3366_v54 }
 0x4a3   : > { %10092 = vmatpush2.bf16.msra.mxu1 %v11946_v11  ;;  %10052 = vmatprep.subr.bf16.mxu0 %v11811_v12  ;;  %v11013_v11 = vcombine.high %v3250_v14, %v3254_v5  ;;  %v3358_v14 = vld [vmem:[%s14445_s19 + $0x4b0] sm:$0xff] }
 0x4a4   : > { %10093 = vmatprep.subr.bf16.mxu1 %v11939_v22 }
 0x4a6   : > { %10053 = vmatpush2.bf16.msra.mxu0 %v11810_v29 }
 0x4a7   : > { %10094 = vmatpush2.bf16.msra.mxu1 %v11938_v31  ;;  %10054 = vmatprep.subr.bf16.mxu0 %v11803_v32  ;;  %v3370_v31 = vld [vmem:[%s14445_s19 + $0x510] sm:$0xff] }
 0x4a8   : > { %10095 = vmatprep.subr.bf16.mxu1 %v11931_v36  ;;  %v3374_v32 = vld [vmem:[%s14445_s19 + $0x530] sm:$0xff] }
 0x4aa   : > { %10055 = vmatpush2.bf16.msra.mxu0 %v11802_v16  ;;  %v11005_v16 = vcombine.high %v3242_v41, %v3246_v18 }
 0x4ab   : > { %10096 = vmatpush2.bf16.msra.mxu1 %v11930_v43  ;;  %10106 = vmatprep.subr.bf16.mxu0 %v11029_v46  ;;  %v11133_v46 = vcombine.high %v3370_v31, %v3374_v32 }
 0x4ac   : > { %10147 = vmatprep.subr.bf16.mxu1 %v11157_v59  ;;  %v3234_v59 = vld [vmem:[%s14445_s19 + $0xd0] sm:$0xff] }
 0x4ad   : > { %v9812_v6 = vpop.f32.mrf.mxu0  ;;  %10057 = vmatmul.mubr.bf16.vlgmr.msra.gmra.mxu0 %v14893_v0  ;;  %v10997_v57 = vcombine.high %v3234_v59, %v3238_v52  ;;  %v10996_v5 = vcombine.low %v3234_v59, %v3238_v52 }
 0x4ae   : > { %v9813_v24 = vadd.f32 %v9812_v6, %v4245_v55  ;;  %v9853_v42 = vpop.f32.mrf.mxu1  ;;  %10098 = vmatmul.mubr.bf16.vlgmr.msra.gmra.mxu1 %v14895_v1  ;;  %10107 = vmatpush1.bf16.msra.mxu0 %v11028_v44  ;;  %v11004_v55 = vcombine.low %v3242_v41, %v3246_v18  ;;  %v11132_v44 = vcombine.low %v3370_v31, %v3374_v32  ;;  %v3338_v41 = vld [vmem:[%s14445_s19 + $0x410] sm:$0xff] }
 0x4af   : > { %10138 = vmatprep.mubr.bf16.mxu0 %v14585_v49  ;;  %10148 = vmatpush1.bf16.msra.mxu1 %v11156_v38  ;;  %v9814_v8 = vpop.f32.mrf.mxu0  ;;  %v3226_v38 = vld [vmem:[%s14445_s19 + $0x90] sm:$0xff]  ;;  %v11124_v6 = vcombine.low %v3362_v53, %v3366_v54 }
 0x4b0   : > { %v15209_v12 = vadd.f32 %v9853_v42, %v9813_v24  ;;  %10179 = vmatprep.mubr.bf16.mxu1 %v14587_v50  ;;  %v9815_v22 = vadd.f32 %v9814_v8, %v4249_v60  ;;  %v9855_v25 = vpop.f32.mrf.mxu1  ;;  %10108 = vmatprep.subr.bf16.mxu0 %v11021_v4  ;;  %v3230_v60 = vld [vmem:[%s14445_s19 + $0xb0] sm:$0xff] }
 0x4b1   : > { %v9816_v29 = vpop.f32.mrf.mxu0  ;;  %10149 = vmatprep.subr.bf16.mxu1 %v11149_v13  ;;  %v3354_v4 = vld [vmem:[%s14445_s19 + $0x490] sm:$0xff]  ;;  %v10989_v13 = vcombine.high %v3226_v38, %v3230_v60  ;;  %v10988_v8 = vcombine.low %v3226_v38, %v3230_v60 }
 0x4b2   : > { %v15216_v36 = vadd.f32 %v9855_v25, %v9815_v22  ;;  %v9857_v63 = vpop.f32.mrf.mxu1  ;;  %10109 = vmatpush1.bf16.msra.mxu0 %v11020_v19  ;;  %v11117_v39 = vcombine.high %v3354_v4, %v3358_v14  ;;  %v3222_v24 = vld [vmem:[%s14445_s19 + $0x70] sm:$0xff] }
 0x4b3   : > { %10150 = vmatpush1.bf16.msra.mxu1 %v11148_v9  ;;  %v9817_v30 = vpop.f32.mrf.mxu0  ;;  %10110 = vmatprep.subr.bf16.mxu0 %v11013_v11  ;;  %v3346_v42 = vld [vmem:[%s14445_s19 + $0x450] sm:$0xff]  ;;  %v11116_v9 = vcombine.low %v3354_v4, %v3358_v14  ;;  %v10981_v11 = vcombine.high %v3218_v27, %v3222_v24  ;;  %v10980_v29 = vcombine.low %v3218_v27, %v3222_v24 }
 0x4b4   : > { %v9858_v43 = vpop.f32.mrf.mxu1  ;;  %10151 = vmatprep.subr.bf16.mxu1 %v11141_v40  ;;  %v3350_v19 = vld [vmem:[%s14445_s19 + $0x470] sm:$0xff] }
 0x4b5   : > { %v11109_v22 = vcombine.high %v3346_v42, %v3350_v19  ;;  %v3210_v25 = vld [vmem:[%s14445_s19 + $0x10] sm:$0xff]  ;;  %v11108_v31 = vcombine.low %v3346_v42, %v3350_v19 }
 0x4b6   : > { %10111 = vmatpush1.bf16.msra.mxu0 %v11012_v37  ;;  %v3214_v40 = vld [vmem:[%s14445_s19 + $0x30] sm:$0xff] }
 0x4b7   : > { %10152 = vmatpush1.bf16.msra.mxu1 %v11140_v56  ;;  %10112 = vmatprep.subr.bf16.mxu0 %v11005_v16  ;;  %v3342_v18 = vld [vmem:[%s14445_s19 + $0x430] sm:$0xff]  ;;  %v10973_v32 = vcombine.high %v3210_v25, %v3214_v40  ;;  %v10972_v43 = vcombine.low %v3210_v25, %v3214_v40 }
 0x4b8   : > { %10153 = vmatprep.subr.bf16.mxu1 %v11133_v46  ;;  %v11101_v63 = vcombine.high %v3338_v41, %v3342_v18  ;;  %v3330_v37 = vld [vmem:[%s14445_s19 + $0x3d0] sm:$0xff]  ;;  %v11100_v46 = vcombine.low %v3338_v41, %v3342_v18 }
 0x4b9   : > { %v3334_v30 = vld [vmem:[%s14445_s19 + $0x3f0] sm:$0xff] }
 0x4ba   : > { %10113 = vmatpush1.bf16.msra.mxu0 %v11004_v55  ;;  %v3458_v56 = vld [vmem:[%s14445_s19 + $0x7d0] sm:$0xff]  ;;  %v11093_v59 = vcombine.high %v3330_v37, %v3334_v30 }
 0x4bb   : > { %10154 = vmatpush1.bf16.msra.mxu1 %v11132_v44  ;;  %10114 = vmatprep.subr.bf16.mxu0 %v10997_v57  ;;  %v3462_v16 = vld [vmem:[%s14445_s19 + $0x7f0] sm:$0xff]  ;;  %v11092_v57 = vcombine.low %v3330_v37, %v3334_v30 }
 0x4bc   : > { %10155 = vmatprep.subr.bf16.mxu1 %v11125_v58  ;;  %v11221_v52 = vcombine.high %v3458_v56, %v3462_v16  ;;  %v3322_v53 = vld [vmem:[%s14445_s19 + $0x390] sm:$0xff]  ;;  %v11220_v58 = vcombine.low %v3458_v56, %v3462_v16 }
 0x4bd   : > { %v3326_v54 = vld [vmem:[%s14445_s19 + $0x3b0] sm:$0xff] }
 0x4be   : > { %10115 = vmatpush1.bf16.msra.mxu0 %v10996_v5  ;;  %v3450_v55 = vld [vmem:[%s14445_s19 + $0x790] sm:$0xff]  ;;  %v11085_v38 = vcombine.high %v3322_v53, %v3326_v54 }
 0x4bf   : > { %10156 = vmatpush1.bf16.msra.mxu1 %v11124_v6  ;;  %10116 = vmatprep.subr.bf16.mxu0 %v10989_v13  ;;  %v3454_v44 = vld [vmem:[%s14445_s19 + $0x7b0] sm:$0xff]  ;;  %v11084_v13 = vcombine.low %v3322_v53, %v3326_v54 }
 0x4c0   : > { %10157 = vmatprep.subr.bf16.mxu1 %v11117_v39  ;;  %v11213_v60 = vcombine.high %v3450_v55, %v3454_v44  ;;  %v3314_v4 = vld [vmem:[%s14445_s19 + $0x350] sm:$0xff]  ;;  %v11212_v39 = vcombine.low %v3450_v55, %v3454_v44 }
 0x4c1   : > { %v3318_v14 = vld [vmem:[%s14445_s19 + $0x370] sm:$0xff] }
 0x4c2   : > { %10117 = vmatpush1.bf16.msra.mxu0 %v10988_v8  ;;  %v3442_v5 = vld [vmem:[%s14445_s19 + $0x750] sm:$0xff]  ;;  %v11077_v27 = vcombine.high %v3314_v4, %v3318_v14 }
 0x4c3   : > { %10158 = vmatpush1.bf16.msra.mxu1 %v11116_v9  ;;  %10118 = vmatprep.subr.bf16.mxu0 %v10981_v11  ;;  %v3446_v6 = vld [vmem:[%s14445_s19 + $0x770] sm:$0xff]  ;;  %v11076_v11 = vcombine.low %v3314_v4, %v3318_v14 }
 0x4c4   : > { %10159 = vmatprep.subr.bf16.mxu1 %v11109_v22  ;;  %v11205_v24 = vcombine.high %v3442_v5, %v3446_v6  ;;  %v3306_v42 = vld [vmem:[%s14445_s19 + $0x310] sm:$0xff]  ;;  %v11204_v22 = vcombine.low %v3442_v5, %v3446_v6 }
 0x4c5   : > { %v3310_v19 = vld [vmem:[%s14445_s19 + $0x330] sm:$0xff] }
 0x4c6   : > { %10119 = vmatpush1.bf16.msra.mxu0 %v10980_v29  ;;  %v3434_v8 = vld [vmem:[%s14445_s19 + $0x710] sm:$0xff]  ;;  %v11069_v25 = vcombine.high %v3306_v42, %v3310_v19 }
 0x4c7   : > { %10160 = vmatpush1.bf16.msra.mxu1 %v11108_v31  ;;  %10120 = vmatprep.subr.bf16.mxu0 %v10973_v32  ;;  %v3438_v9 = vld [vmem:[%s14445_s19 + $0x730] sm:$0xff]  ;;  %v11068_v32 = vcombine.low %v3306_v42, %v3310_v19 }
 0x4c8   : > { %10161 = vmatprep.subr.bf16.mxu1 %v11101_v63  ;;  %v11197_v40 = vcombine.high %v3434_v8, %v3438_v9  ;;  %v3298_v41 = vld [vmem:[%s14445_s19 + $0x2d0] sm:$0xff]  ;;  %v11196_v63 = vcombine.low %v3434_v8, %v3438_v9 }
 0x4c9   : > { %v3302_v18 = vld [vmem:[%s14445_s19 + $0x2f0] sm:$0xff] }
 0x4ca   : > { %10121 = vmatpush1.bf16.msra.mxu0 %v10972_v43  ;;  %v3426_v29 = vld [vmem:[%s14445_s19 + $0x6d0] sm:$0xff]  ;;  %v11061_v37 = vcombine.high %v3298_v41, %v3302_v18 }
 0x4cb   : > { %10162 = vmatpush1.bf16.msra.mxu1 %v11100_v46  ;;  %10122 = vmatprep.subr.bf16.mxu0 %v11093_v59  ;;  %v3430_v31 = vld [vmem:[%s14445_s19 + $0x6f0] sm:$0xff]  ;;  %v11060_v59 = vcombine.low %v3298_v41, %v3302_v18 }
 0x4cc   : > { %10163 = vmatprep.subr.bf16.mxu1 %v11221_v52  ;;  %v11189_v30 = vcombine.high %v3426_v29, %v3430_v31  ;;  %v3290_v56 = vld [vmem:[%s14445_s19 + $0x290] sm:$0xff]  ;;  %v11188_v52 = vcombine.low %v3426_v29, %v3430_v31 }
 0x4cd   : > { %v3294_v16 = vld [vmem:[%s14445_s19 + $0x2b0] sm:$0xff] }
 0x4ce   : > { %10123 = vmatpush2.bf16.msra.mxu0 %v11092_v57  ;;  %v3418_v43 = vld [vmem:[%s14445_s19 + $0x690] sm:$0xff]  ;;  %v11053_v53 = vcombine.high %v3290_v56, %v3294_v16 }
 0x4cf   : > { %10164 = vmatpush2.bf16.msra.mxu1 %v11220_v58  ;;  %10124 = vmatprep.subr.bf16.mxu0 %v11085_v38  ;;  %v3422_v46 = vld [vmem:[%s14445_s19 + $0x6b0] sm:$0xff]  ;;  %v11052_v38 = vcombine.low %v3290_v56, %v3294_v16 }
 0x4d0   : > { %10165 = vmatprep.subr.bf16.mxu1 %v11213_v60  ;;  %v11181_v54 = vcombine.high %v3418_v43, %v3422_v46  ;;  %v3282_v55 = vld [vmem:[%s14445_s19 + $0x250] sm:$0xff]  ;;  %v11180_v60 = vcombine.low %v3418_v43, %v3422_v46 }
 0x4d1   : > { %v3286_v44 = vld [vmem:[%s14445_s19 + $0x270] sm:$0xff] }
 0x4d2   : > { %10125 = vmatpush2.bf16.msra.mxu0 %v11084_v13  ;;  %v3410_v57 = vld [vmem:[%s14445_s19 + $0x650] sm:$0xff]  ;;  %v11045_v4 = vcombine.high %v3282_v55, %v3286_v44 }
 0x4d3   : > { %10166 = vmatpush2.bf16.msra.mxu1 %v11212_v39  ;;  %10126 = vmatprep.subr.bf16.mxu0 %v11077_v27  ;;  %v3414_v58 = vld [vmem:[%s14445_s19 + $0x670] sm:$0xff]  ;;  %v11044_v27 = vcombine.low %v3282_v55, %v3286_v44 }
 0x4d4   : > { %10167 = vmatprep.subr.bf16.mxu1 %v11205_v24  ;;  %v11173_v14 = vcombine.high %v3410_v57, %v3414_v58  ;;  %v3274_v5 = vld [vmem:[%s14445_s19 + $0x210] sm:$0xff]  ;;  %v11172_v24 = vcombine.low %v3410_v57, %v3414_v58 }
 0x4d5   : > { %v3278_v6 = vld [vmem:[%s14445_s19 + $0x230] sm:$0xff] }
 0x4d6   : > { %10127 = vmatpush2.bf16.msra.mxu0 %v11076_v11  ;;  %v3402_v13 = vld [vmem:[%s14445_s19 + $0x610] sm:$0xff]  ;;  %v11037_v42 = vcombine.high %v3274_v5, %v3278_v6 }
 0x4d7   : > { %10168 = vmatpush2.bf16.msra.mxu1 %v11204_v22  ;;  %10128 = vmatprep.subr.bf16.mxu0 %v11069_v25  ;;  %v3406_v39 = vld [vmem:[%s14445_s19 + $0x630] sm:$0xff]  ;;  %v11036_v25 = vcombine.low %v3274_v5, %v3278_v6 }
 0x4d8   : > { %10169 = vmatprep.subr.bf16.mxu1 %v11197_v40  ;;  %v11165_v19 = vcombine.high %v3402_v13, %v3406_v39  ;;  %v3522_v8 = vld [vmem:[%s14445_s19 + $0x9d0] sm:$0xff]  ;;  %v11164_v40 = vcombine.low %v3402_v13, %v3406_v39 }
 0x4d9   : > { %v3526_v9 = vld [vmem:[%s14445_s19 + $0x9f0] sm:$0xff] }
 0x4da   : > { %10129 = vmatpush2.bf16.msra.mxu0 %v11068_v32  ;;  %v3650_v11 = vld [vmem:[%s14445_s19 + $0xdd0] sm:$0xff]  ;;  %v11285_v41 = vcombine.high %v3522_v8, %v3526_v9  ;;  %v11284_v32 = vcombine.low %v3522_v8, %v3526_v9 }
 0x4db   : > { %10170 = vmatpush2.bf16.msra.mxu1 %v11196_v63  ;;  %10130 = vmatprep.subr.bf16.mxu0 %v11061_v37  ;;  %v3654_v22 = vld [vmem:[%s14445_s19 + $0xdf0] sm:$0xff] }
 0x4dc   : > { %10171 = vmatprep.subr.bf16.mxu1 %v11189_v30  ;;  %v11413_v18 = vcombine.high %v3650_v11, %v3654_v22  ;;  %v3514_v29 = vld [vmem:[%s14445_s19 + $0x990] sm:$0xff]  ;;  %v11412_v30 = vcombine.low %v3650_v11, %v3654_v22 }
 0x4dd   : > { %v3518_v31 = vld [vmem:[%s14445_s19 + $0x9b0] sm:$0xff] }
 0x4de   : > { %10131 = vmatpush2.bf16.msra.mxu0 %v11060_v59  ;;  %v3642_v63 = vld [vmem:[%s14445_s19 + $0xd90] sm:$0xff]  ;;  %v11277_v56 = vcombine.high %v3514_v29, %v3518_v31  ;;  %v11276_v44 = vcombine.low %v3514_v29, %v3518_v31 }
 0x4df   : > { %10172 = vmatpush2.bf16.msra.mxu1 %v11188_v52  ;;  %10132 = vmatprep.subr.bf16.mxu0 %v11053_v53  ;;  %v3646_v37 = vld [vmem:[%s14445_s19 + $0xdb0] sm:$0xff] }
 0x4e0   : > { %10173 = vmatprep.subr.bf16.mxu1 %v11181_v54  ;;  %v3506_v16 = vld [vmem:[%s14445_s19 + $0x950] sm:$0xff]  ;;  %v11405_v59 = vcombine.high %v3642_v63, %v3646_v37  ;;  %v11404_v58 = vcombine.low %v3642_v63, %v3646_v37 }
 0x4e1   : > { %v3510_v43 = vld [vmem:[%s14445_s19 + $0x970] sm:$0xff] }
 0x4e2   : > { %10133 = vmatpush2.bf16.msra.mxu0 %v11052_v38  ;;  %v3634_v52 = vld [vmem:[%s14445_s19 + $0xd50] sm:$0xff]  ;;  %v11269_v38 = vcombine.high %v3506_v16, %v3510_v43 }
 0x4e3   : > { %10174 = vmatpush2.bf16.msra.mxu1 %v11180_v60  ;;  %10134 = vmatprep.subr.bf16.mxu0 %v11045_v4  ;;  %v3638_v53 = vld [vmem:[%s14445_s19 + $0xd70] sm:$0xff] }
 0x4e4   : > { %10175 = vmatprep.subr.bf16.mxu1 %v11173_v14  ;;  %v11397_v14 = vcombine.high %v3634_v52, %v3638_v53  ;;  %v3498_v5 = vld [vmem:[%s14445_s19 + $0x910] sm:$0xff]  ;;  %v11396_v8 = vcombine.low %v3634_v52, %v3638_v53 }
 0x4e5   : > { %v3502_v6 = vld [vmem:[%s14445_s19 + $0x930] sm:$0xff] }
 0x4e6   : > { %10135 = vmatpush2.bf16.msra.mxu0 %v11044_v27  ;;  %v3626_v39 = vld [vmem:[%s14445_s19 + $0xd10] sm:$0xff]  ;;  %v11261_v9 = vcombine.high %v3498_v5, %v3502_v6  ;;  %v11260_v29 = vcombine.low %v3498_v5, %v3502_v6 }
 0x4e7   : > { %10176 = vmatpush2.bf16.msra.mxu1 %v11172_v24  ;;  %10136 = vmatprep.subr.bf16.mxu0 %v11037_v42  ;;  %v3630_v27 = vld [vmem:[%s14445_s19 + $0xd30] sm:$0xff] }
 0x4e8   : > { %10177 = vmatprep.subr.bf16.mxu1 %v11165_v19  ;;  %v11268_v19 = vcombine.low %v3506_v16, %v3510_v43  ;;  %v11389_v22 = vcombine.high %v3626_v39, %v3630_v27  ;;  %v11388_v31 = vcombine.low %v3626_v39, %v3630_v27  ;;  %v3482_v37 = vld [vmem:[%s14445_s19 + $0x890] sm:$0xff] }
 0x4e9   : > { %v3614_v16 = vld [vmem:[%s14445_s19 + $0xcb0] sm:$0xff] }
 0x4ea   : > { %10137 = vmatpush2.bf16.msra.mxu0 %v11036_v25  ;;  %v3490_v25 = vld [vmem:[%s14445_s19 + $0x8d0] sm:$0xff] }
 0x4eb   : > { %10178 = vmatpush2.bf16.msra.mxu1 %v11164_v40  ;;  %10188 = vmatprep.subr.bf16.mxu0 %v11285_v41  ;;  %v3494_v40 = vld [vmem:[%s14445_s19 + $0x8f0] sm:$0xff] }
 0x4ec   : > { %10229 = vmatprep.subr.bf16.mxu1 %v11413_v18  ;;  %v3618_v41 = vld [vmem:[%s14445_s19 + $0xcd0] sm:$0xff]  ;;  %v11252_v43 = vcombine.low %v3490_v25, %v3494_v40 }
 0x4ed   : > { %v9894_v46 = vpop.f32.mrf.mxu0  ;;  %10139 = vmatmul.mubr.bf16.vlgmr.msra.gmra.mxu0 %v14589_v51  ;;  %v3622_v18 = vld [vmem:[%s14445_s19 + $0xcf0] sm:$0xff] }
 0x4ee   : > { %v9895_v54 = vadd.f32 %v9894_v46, %v15209_v12  ;;  %v9935_v55 = vpop.f32.mrf.mxu1  ;;  %10180 = vmatmul.mubr.bf16.vlgmr.msra.gmra.mxu1 %v14580_v47  ;;  %10189 = vmatpush1.bf16.msra.mxu0 %v11284_v32  ;;  %v11253_v32 = vcombine.high %v3490_v25, %v3494_v40  ;;  %v11381_v63 = vcombine.high %v3618_v41, %v3622_v18  ;;  %v3474_v53 = vld [vmem:[%s14445_s19 + $0x850] sm:$0xff] }
 0x4ef   : > { %10220 = vmatprep.mubr.bf16.mxu0 %v14618_v10  ;;  %10230 = vmatpush1.bf16.msra.mxu1 %v11412_v30  ;;  %v9896_v57 = vpop.f32.mrf.mxu0  ;;  %v3486_v30 = vld [vmem:[%s14445_s19 + $0x8b0] sm:$0xff]  ;;  %v11380_v46 = vcombine.low %v3618_v41, %v3622_v18 }
 0x4f0   : > { %v15282_v60 = vadd.f32 %v9935_v55, %v9895_v54  ;;  %10261 = vmatprep.mubr.bf16.mxu1 %v14623_v23  ;;  %v9897_v12 = vadd.f32 %v9896_v57, %v15216_v36  ;;  %v9937_v4 = vpop.f32.mrf.mxu1  ;;  %10190 = vmatprep.subr.bf16.mxu0 %v11277_v56  ;;  %v3610_v56 = vld [vmem:[%s14445_s19 + $0xc90] sm:$0xff]  ;;  %v11244_v57 = vcombine.low %v3482_v37, %v3486_v30 }
 0x4f1   : > { %v9898_v13 = vpop.f32.mrf.mxu0  ;;  %10231 = vmatprep.subr.bf16.mxu1 %v11405_v59  ;;  %v11245_v59 = vcombine.high %v3482_v37, %v3486_v30  ;;  %v11373_v52 = vcombine.high %v3610_v56, %v3614_v16  ;;  %v3478_v54 = vld [vmem:[%s14445_s19 + $0x870] sm:$0xff] }
 0x4f2   : > { %v15290_v24 = vadd.f32 %v9937_v4, %v9897_v12  ;;  %v9939_v42 = vpop.f32.mrf.mxu1  ;;  %10191 = vmatpush1.bf16.msra.mxu0 %v11276_v44  ;;  %v3602_v55 = vld [vmem:[%s14445_s19 + $0xc50] sm:$0xff]  ;;  %v11236_v13 = vcombine.low %v3474_v53, %v3478_v54 }
 0x4f3   : > { %10232 = vmatpush1.bf16.msra.mxu1 %v11404_v58  ;;  %v9899_v36 = vpop.f32.mrf.mxu0  ;;  %10192 = vmatprep.subr.bf16.mxu0 %v11269_v38  ;;  %v3606_v44 = vld [vmem:[%s14445_s19 + $0xc70] sm:$0xff]  ;;  %v11372_v58 = vcombine.low %v3610_v56, %v3614_v16  ;;  %v11237_v38 = vcombine.high %v3474_v53, %v3478_v54 }
 0x4f4   : > { %v9940_v11 = vpop.f32.mrf.mxu1  ;;  %10233 = vmatprep.subr.bf16.mxu1 %v11397_v14  ;;  %v11365_v12 = vcombine.high %v3602_v55, %v3606_v44  ;;  %v3466_v4 = vld [vmem:[%s14445_s19 + $0x810] sm:$0xff]  ;;  %v11364_v39 = vcombine.low %v3602_v55, %v3606_v44 }
 0x4f5   : > { %v3470_v14 = vld [vmem:[%s14445_s19 + $0x830] sm:$0xff] }
 0x4f6   : > { %10193 = vmatpush1.bf16.msra.mxu0 %v11268_v19  ;;  %v3594_v5 = vld [vmem:[%s14445_s19 + $0xc10] sm:$0xff]  ;;  %v11229_v27 = vcombine.high %v3466_v4, %v3470_v14  ;;  %v11228_v11 = vcombine.low %v3466_v4, %v3470_v14 }
 0x4f7   : > { %10234 = vmatpush1.bf16.msra.mxu1 %v11396_v8  ;;  %10194 = vmatprep.subr.bf16.mxu0 %v11261_v9  ;;  %v3598_v6 = vld [vmem:[%s14445_s19 + $0xc30] sm:$0xff] }
 0x4f8   : > { %10235 = vmatprep.subr.bf16.mxu1 %v11389_v22  ;;  %v11357_v42 = vcombine.high %v3594_v5, %v3598_v6  ;;  %v3586_v19 = vld [vmem:[%s14445_s19 + $0xbd0] sm:$0xff]  ;;  %v11356_v22 = vcombine.low %v3594_v5, %v3598_v6 }
 0x4f9   : > { %v3590_v36 = vld [vmem:[%s14445_s19 + $0xbf0] sm:$0xff] }
 0x4fa   : > { %10195 = vmatpush1.bf16.msra.mxu0 %v11260_v29  ;;  %v3714_v8 = vld [vmem:[%s14445_s19 + $0xfd0] sm:$0xff]  ;;  %v11349_v25 = vcombine.high %v3586_v19, %v3590_v36 }
 0x4fb   : > { %10236 = vmatpush1.bf16.msra.mxu1 %v11388_v31  ;;  %10196 = vmatprep.subr.bf16.mxu0 %v11253_v32  ;;  %v3718_v9 = vld [vmem:[%s14445_s19 + $0xff0] sm:$0xff]  ;;  %v11348_v32 = vcombine.low %v3586_v19, %v3590_v36 }
 0x4fc   : > { %10237 = vmatprep.subr.bf16.mxu1 %v11381_v63  ;;  %v11477_v40 = vcombine.high %v3714_v8, %v3718_v9  ;;  %v3578_v41 = vld [vmem:[%s14445_s19 + $0xb90] sm:$0xff]  ;;  %v11476_v63 = vcombine.low %v3714_v8, %v3718_v9 }
 0x4fd   : > { %v3582_v18 = vld [vmem:[%s14445_s19 + $0xbb0] sm:$0xff] }
 0x4fe   : > { %10197 = vmatpush1.bf16.msra.mxu0 %v11252_v43  ;;  %v3706_v29 = vld [vmem:[%s14445_s19 + $0xf90] sm:$0xff]  ;;  %v11341_v37 = vcombine.high %v3578_v41, %v3582_v18 }
 0x4ff   : > { %10238 = vmatpush1.bf16.msra.mxu1 %v11380_v46  ;;  %10198 = vmatprep.subr.bf16.mxu0 %v11245_v59  ;;  %v3710_v31 = vld [vmem:[%s14445_s19 + $0xfb0] sm:$0xff]  ;;  %v11340_v59 = vcombine.low %v3578_v41, %v3582_v18 }
 0x500   : > { %10239 = vmatprep.subr.bf16.mxu1 %v11373_v52  ;;  %v11469_v30 = vcombine.high %v3706_v29, %v3710_v31  ;;  %v3570_v56 = vld [vmem:[%s14445_s19 + $0xb50] sm:$0xff]  ;;  %v11468_v52 = vcombine.low %v3706_v29, %v3710_v31 }
 0x501   : > { %v3574_v16 = vld [vmem:[%s14445_s19 + $0xb70] sm:$0xff] }
 0x502   : > { %10199 = vmatpush1.bf16.msra.mxu0 %v11244_v57  ;;  %v3698_v43 = vld [vmem:[%s14445_s19 + $0xf50] sm:$0xff]  ;;  %v11333_v53 = vcombine.high %v3570_v56, %v3574_v16 }
 0x503   : > { %10240 = vmatpush1.bf16.msra.mxu1 %v11372_v58  ;;  %10200 = vmatprep.subr.bf16.mxu0 %v11237_v38  ;;  %v3702_v46 = vld [vmem:[%s14445_s19 + $0xf70] sm:$0xff]  ;;  %v11332_v38 = vcombine.low %v3570_v56, %v3574_v16 }
 0x504   : > { %10241 = vmatprep.subr.bf16.mxu1 %v11365_v12  ;;  %v11461_v54 = vcombine.high %v3698_v43, %v3702_v46  ;;  %v3562_v55 = vld [vmem:[%s14445_s19 + $0xb10] sm:$0xff]  ;;  %v11460_v12 = vcombine.low %v3698_v43, %v3702_v46 }
 0x505   : > { %v3566_v44 = vld [vmem:[%s14445_s19 + $0xb30] sm:$0xff] }
 0x506   : > { %10201 = vmatpush1.bf16.msra.mxu0 %v11236_v13  ;;  %v3690_v57 = vld [vmem:[%s14445_s19 + $0xf10] sm:$0xff]  ;;  %v11325_v4 = vcombine.high %v3562_v55, %v3566_v44 }
 0x507   : > { %10242 = vmatpush1.bf16.msra.mxu1 %v11364_v39  ;;  %10202 = vmatprep.subr.bf16.mxu0 %v11229_v27  ;;  %v3694_v58 = vld [vmem:[%s14445_s19 + $0xf30] sm:$0xff]  ;;  %v11324_v27 = vcombine.low %v3562_v55, %v3566_v44 }
 0x508   : > { %10243 = vmatprep.subr.bf16.mxu1 %v11357_v42  ;;  %v11453_v14 = vcombine.high %v3690_v57, %v3694_v58  ;;  %v3554_v5 = vld [vmem:[%s14445_s19 + $0xad0] sm:$0xff]  ;;  %v11452_v42 = vcombine.low %v3690_v57, %v3694_v58 }
 0x509   : > { %v3558_v6 = vld [vmem:[%s14445_s19 + $0xaf0] sm:$0xff] }
 0x50a   : > { %10203 = vmatpush1.bf16.msra.mxu0 %v11228_v11  ;;  %v3682_v13 = vld [vmem:[%s14445_s19 + $0xed0] sm:$0xff]  ;;  %v11317_v19 = vcombine.high %v3554_v5, %v3558_v6 }
 0x50b   : > { %10244 = vmatpush1.bf16.msra.mxu1 %v11356_v22  ;;  %10204 = vmatprep.subr.bf16.mxu0 %v11349_v25  ;;  %v3686_v39 = vld [vmem:[%s14445_s19 + $0xef0] sm:$0xff]  ;;  %v11316_v25 = vcombine.low %v3554_v5, %v3558_v6 }
 0x50c   : > { %10245 = vmatprep.subr.bf16.mxu1 %v11477_v40  ;;  %v11445_v36 = vcombine.high %v3682_v13, %v3686_v39  ;;  %v3546_v8 = vld [vmem:[%s14445_s19 + $0xa90] sm:$0xff]  ;;  %v11444_v40 = vcombine.low %v3682_v13, %v3686_v39 }
 0x50d   : > { %v3550_v9 = vld [vmem:[%s14445_s19 + $0xab0] sm:$0xff] }
 0x50e   : > { %10205 = vmatpush2.bf16.msra.mxu0 %v11348_v32  ;;  %v3674_v11 = vld [vmem:[%s14445_s19 + $0xe90] sm:$0xff]  ;;  %v11309_v41 = vcombine.high %v3546_v8, %v3550_v9 }
 0x50f   : > { %10246 = vmatpush2.bf16.msra.mxu1 %v11476_v63  ;;  %10206 = vmatprep.subr.bf16.mxu0 %v11341_v37  ;;  %v3678_v22 = vld [vmem:[%s14445_s19 + $0xeb0] sm:$0xff]  ;;  %v11308_v37 = vcombine.low %v3546_v8, %v3550_v9 }
 0x510   : > { %10247 = vmatprep.subr.bf16.mxu1 %v11469_v30  ;;  %v11437_v18 = vcombine.high %v3674_v11, %v3678_v22  ;;  %v3538_v29 = vld [vmem:[%s14445_s19 + $0xa50] sm:$0xff]  ;;  %v11436_v30 = vcombine.low %v3674_v11, %v3678_v22 }
 0x511   : > { %v3542_v31 = vld [vmem:[%s14445_s19 + $0xa70] sm:$0xff] }
 0x512   : > { %10207 = vmatpush2.bf16.msra.mxu0 %v11340_v59  ;;  %v3666_v32 = vld [vmem:[%s14445_s19 + $0xe50] sm:$0xff]  ;;  %v11301_v56 = vcombine.high %v3538_v29, %v3542_v31 }
 0x513   : > { %10248 = vmatpush2.bf16.msra.mxu1 %v11468_v52  ;;  %10208 = vmatprep.subr.bf16.mxu0 %v11333_v53  ;;  %v3670_v63 = vld [vmem:[%s14445_s19 + $0xe70] sm:$0xff]  ;;  %v11300_v53 = vcombine.low %v3538_v29, %v3542_v31 }
 0x514   : > { %10249 = vmatprep.subr.bf16.mxu1 %v11461_v54  ;;  %v11429_v16 = vcombine.high %v3666_v32, %v3670_v63  ;;  %v3530_v43 = vld [vmem:[%s14445_s19 + $0xa10] sm:$0xff]  ;;  %v11428_v54 = vcombine.low %v3666_v32, %v3670_v63 }
 0x515   : > { %v3534_v46 = vld [vmem:[%s14445_s19 + $0xa30] sm:$0xff] }
 0x516   : > { %10209 = vmatpush2.bf16.msra.mxu0 %v11332_v38  ;;  %v3658_v59 = vld [vmem:[%s14445_s19 + $0xe10] sm:$0xff]  ;;  %v11293_v55 = vcombine.high %v3530_v43, %v3534_v46 }
 0x517   : > { %10250 = vmatpush2.bf16.msra.mxu1 %v11460_v12  ;;  %10210 = vmatprep.subr.bf16.mxu0 %v11325_v4  ;;  %v3662_v52 = vld [vmem:[%s14445_s19 + $0xe30] sm:$0xff]  ;;  %v11292_v4 = vcombine.low %v3530_v43, %v3534_v46 }
 0x518   : > { %10251 = vmatprep.subr.bf16.mxu1 %v11453_v14  ;;  %v11421_v44 = vcombine.high %v3658_v59, %v3662_v52  ;;  %v3778_v57 = vld [vmem:[%s14445_s19 + $0x11d0] sm:$0xff]  ;;  %v11420_v14 = vcombine.low %v3658_v59, %v3662_v52 }
 0x519   : > { %v3782_v58 = vld [vmem:[%s14445_s19 + $0x11f0] sm:$0xff] }
 0x51a   : > { %10211 = vmatpush2.bf16.msra.mxu0 %v11324_v27  ;;  %v3906_v38 = vld [vmem:[%s14445_s19 + $0x15d0] sm:$0xff]  ;;  %v11541_v5 = vcombine.high %v3778_v57, %v3782_v58  ;;  %v11540_v27 = vcombine.low %v3778_v57, %v3782_v58 }
 0x51b   : > { %10252 = vmatpush2.bf16.msra.mxu1 %v11452_v42  ;;  %10212 = vmatprep.subr.bf16.mxu0 %v11317_v19  ;;  %v3910_v12 = vld [vmem:[%s14445_s19 + $0x15f0] sm:$0xff] }
 0x51c   : > { %10253 = vmatprep.subr.bf16.mxu1 %v11445_v36  ;;  %v11669_v6 = vcombine.high %v3906_v38, %v3910_v12  ;;  %v3770_v13 = vld [vmem:[%s14445_s19 + $0x1190] sm:$0xff]  ;;  %v11668_v36 = vcombine.low %v3906_v38, %v3910_v12 }
 0x51d   : > { %v3774_v39 = vld [vmem:[%s14445_s19 + $0x11b0] sm:$0xff] }
 0x51e   : > { %10213 = vmatpush2.bf16.msra.mxu0 %v11316_v25  ;;  %v3898_v42 = vld [vmem:[%s14445_s19 + $0x1590] sm:$0xff]  ;;  %v11533_v8 = vcombine.high %v3770_v13, %v3774_v39  ;;  %v11532_v31 = vcombine.low %v3770_v13, %v3774_v39 }
 0x51f   : > { %10254 = vmatpush2.bf16.msra.mxu1 %v11444_v40  ;;  %10214 = vmatprep.subr.bf16.mxu0 %v11309_v41  ;;  %v3902_v19 = vld [vmem:[%s14445_s19 + $0x15b0] sm:$0xff] }
 0x520   : > { %10255 = vmatprep.subr.bf16.mxu1 %v11437_v18  ;;  %v3762_v9 = vld [vmem:[%s14445_s19 + $0x1150] sm:$0xff]  ;;  %v11661_v25 = vcombine.high %v3898_v42, %v3902_v19  ;;  %v11660_v63 = vcombine.low %v3898_v42, %v3902_v19 }
 0x521   : > { %v3766_v11 = vld [vmem:[%s14445_s19 + $0x1170] sm:$0xff] }
 0x522   : > { %10215 = vmatpush2.bf16.msra.mxu0 %v11308_v37  ;;  %v3890_v40 = vld [vmem:[%s14445_s19 + $0x1550] sm:$0xff]  ;;  %v11525_v37 = vcombine.high %v3762_v9, %v3766_v11 }
 0x523   : > { %10256 = vmatpush2.bf16.msra.mxu1 %v11436_v30  ;;  %10216 = vmatprep.subr.bf16.mxu0 %v11301_v56  ;;  %v3894_v41 = vld [vmem:[%s14445_s19 + $0x1570] sm:$0xff] }
 0x524   : > { %10257 = vmatprep.subr.bf16.mxu1 %v11429_v16  ;;  %v11653_v16 = vcombine.high %v3890_v40, %v3894_v41  ;;  %v3754_v43 = vld [vmem:[%s14445_s19 + $0x1110] sm:$0xff]  ;;  %v11652_v57 = vcombine.low %v3890_v40, %v3894_v41 }
 0x525   : > { %v3758_v46 = vld [vmem:[%s14445_s19 + $0x1130] sm:$0xff] }
 0x526   : > { %10217 = vmatpush2.bf16.msra.mxu0 %v11300_v53  ;;  %v3882_v52 = vld [vmem:[%s14445_s19 + $0x1510] sm:$0xff]  ;;  %v11517_v58 = vcombine.high %v3754_v43, %v3758_v46  ;;  %v11516_v13 = vcombine.low %v3754_v43, %v3758_v46 }
 0x527   : > { %10258 = vmatpush2.bf16.msra.mxu1 %v11428_v54  ;;  %10218 = vmatprep.subr.bf16.mxu0 %v11293_v55  ;;  %v3886_v53 = vld [vmem:[%s14445_s19 + $0x1530] sm:$0xff] }
 0x528   : > { %10259 = vmatprep.subr.bf16.mxu1 %v11421_v44  ;;  %v11524_v44 = vcombine.low %v3762_v9, %v3766_v11  ;;  %v11645_v12 = vcombine.high %v3882_v52, %v3886_v53  ;;  %v11644_v39 = vcombine.low %v3882_v52, %v3886_v53  ;;  %v3738_v19 = vld [vmem:[%s14445_s19 + $0x1090] sm:$0xff] }
 0x529   : > { %v3870_v9 = vld [vmem:[%s14445_s19 + $0x14b0] sm:$0xff] }
 0x52a   : > { %10219 = vmatpush2.bf16.msra.mxu0 %v11292_v4  ;;  %v3746_v4 = vld [vmem:[%s14445_s19 + $0x10d0] sm:$0xff] }
 0x52b   : > { %10260 = vmatpush2.bf16.msra.mxu1 %v11420_v14  ;;  %10270 = vmatprep.subr.bf16.mxu0 %v11541_v5  ;;  %v3750_v14 = vld [vmem:[%s14445_s19 + $0x10f0] sm:$0xff] }
 0x52c   : > { %10311 = vmatprep.subr.bf16.mxu1 %v11669_v6  ;;  %v3874_v5 = vld [vmem:[%s14445_s19 + $0x14d0] sm:$0xff]  ;;  %v11508_v11 = vcombine.low %v3746_v4, %v3750_v14 }
 0x52d   : > { %v9976_v22 = vpop.f32.mrf.mxu0  ;;  %10221 = vmatmul.mubr.bf16.vlgmr.msra.gmra.mxu0 %v14706_v2  ;;  %v3878_v6 = vld [vmem:[%s14445_s19 + $0x14f0] sm:$0xff] }
 0x52e   : > { %v9977_v18 = vadd.f32 %v9976_v22, %v15282_v60  ;;  %v10017_v29 = vpop.f32.mrf.mxu1  ;;  %10262 = vmatmul.mubr.bf16.vlgmr.msra.gmra.mxu1 %v14704_v62  ;;  %10271 = vmatpush1.bf16.msra.mxu0 %v11540_v27  ;;  %v11509_v27 = vcombine.high %v3746_v4, %v3750_v14  ;;  %v11637_v42 = vcombine.high %v3874_v5, %v3878_v6  ;;  %v3730_v41 = vld [vmem:[%s14445_s19 + $0x1050] sm:$0xff] }
 0x52f   : > { %10302 = vmatprep.mubr.bf16.mxu0 %v14712_v45  ;;  %10312 = vmatpush1.bf16.msra.mxu1 %v11668_v36  ;;  %v9978_v32 = vpop.f32.mrf.mxu0  ;;  %v3742_v36 = vld [vmem:[%s14445_s19 + $0x10b0] sm:$0xff]  ;;  %v11636_v22 = vcombine.low %v3874_v5, %v3878_v6 }
 0x530   : > { %v15356_v30 = vadd.f32 %v10017_v29, %v9977_v18  ;;  %10343 = vmatprep.mubr.bf16.mxu1 %v14714_v7  ;;  %v9979_v60 = vadd.f32 %v9978_v32, %v15290_v24  ;;  %v10019_v56 = vpop.f32.mrf.mxu1  ;;  %10272 = vmatprep.subr.bf16.mxu0 %v11533_v8  ;;  %v3866_v8 = vld [vmem:[%s14445_s19 + $0x1490] sm:$0xff]  ;;  %v11500_v32 = vcombine.low %v3738_v19, %v3742_v36 }
 0x531   : > { %v9980_v59 = vpop.f32.mrf.mxu0  ;;  %10313 = vmatprep.subr.bf16.mxu1 %v11661_v25  ;;  %v11501_v25 = vcombine.high %v3738_v19, %v3742_v36  ;;  %v11629_v40 = vcombine.high %v3866_v8, %v3870_v9  ;;  %v3734_v18 = vld [vmem:[%s14445_s19 + $0x1070] sm:$0xff] }
 0x532   : > { %v15364_v54 = vadd.f32 %v10019_v56, %v9979_v60  ;;  %v10021_v55 = vpop.f32.mrf.mxu1  ;;  %10273 = vmatpush1.bf16.msra.mxu0 %v11532_v31  ;;  %v3858_v29 = vld [vmem:[%s14445_s19 + $0x1450] sm:$0xff]  ;;  %v11492_v59 = vcombine.low %v3730_v41, %v3734_v18 }
 0x533   : > { %10314 = vmatpush1.bf16.msra.mxu1 %v11660_v63  ;;  %v9981_v24 = vpop.f32.mrf.mxu0  ;;  %10274 = vmatprep.subr.bf16.mxu0 %v11525_v37  ;;  %v3862_v31 = vld [vmem:[%s14445_s19 + $0x1470] sm:$0xff]  ;;  %v11628_v63 = vcombine.low %v3866_v8, %v3870_v9  ;;  %v11493_v37 = vcombine.high %v3730_v41, %v3734_v18 }
 0x534   : > { %v10022_v38 = vpop.f32.mrf.mxu1  ;;  %10315 = vmatprep.subr.bf16.mxu1 %v11653_v16  ;;  %v11621_v60 = vcombine.high %v3858_v29, %v3862_v31  ;;  %v3722_v56 = vld [vmem:[%s14445_s19 + $0x1010] sm:$0xff]  ;;  %v11620_v52 = vcombine.low %v3858_v29, %v3862_v31 }
 0x535   : > { %v3726_v16 = vld [vmem:[%s14445_s19 + $0x1030] sm:$0xff] }
 0x536   : > { %10275 = vmatpush1.bf16.msra.mxu0 %v11524_v44  ;;  %v3850_v43 = vld [vmem:[%s14445_s19 + $0x1410] sm:$0xff]  ;;  %v11485_v53 = vcombine.high %v3722_v56, %v3726_v16  ;;  %v11484_v38 = vcombine.low %v3722_v56, %v3726_v16 }
 0x537   : > { %10316 = vmatpush1.bf16.msra.mxu1 %v11652_v57  ;;  %10276 = vmatprep.subr.bf16.mxu0 %v11517_v58  ;;  %v3854_v46 = vld [vmem:[%s14445_s19 + $0x1430] sm:$0xff] }
 0x538   : > { %10317 = vmatprep.subr.bf16.mxu1 %v11645_v12  ;;  %v11613_v55 = vcombine.high %v3850_v43, %v3854_v46  ;;  %v3842_v44 = vld [vmem:[%s14445_s19 + $0x13d0] sm:$0xff]  ;;  %v11612_v12 = vcombine.low %v3850_v43, %v3854_v46 }
 0x539   : > { %v3846_v24 = vld [vmem:[%s14445_s19 + $0x13f0] sm:$0xff] }
 0x53a   : > { %10277 = vmatpush1.bf16.msra.mxu0 %v11516_v13  ;;  %v3970_v57 = vld [vmem:[%s14445_s19 + $0x17d0] sm:$0xff]  ;;  %v11605_v4 = vcombine.high %v3842_v44, %v3846_v24 }
 0x53b   : > { %10318 = vmatpush1.bf16.msra.mxu1 %v11644_v39  ;;  %10278 = vmatprep.subr.bf16.mxu0 %v11509_v27  ;;  %v3974_v58 = vld [vmem:[%s14445_s19 + $0x17f0] sm:$0xff]  ;;  %v11604_v27 = vcombine.low %v3842_v44, %v3846_v24 }
 0x53c   : > { %10319 = vmatprep.subr.bf16.mxu1 %v11637_v42  ;;  %v11733_v14 = vcombine.high %v3970_v57, %v3974_v58  ;;  %v3834_v5 = vld [vmem:[%s14445_s19 + $0x1390] sm:$0xff]  ;;  %v11732_v42 = vcombine.low %v3970_v57, %v3974_v58 }
 0x53d   : > { %v3838_v6 = vld [vmem:[%s14445_s19 + $0x13b0] sm:$0xff] }
 0x53e   : > { %10279 = vmatpush1.bf16.msra.mxu0 %v11508_v11  ;;  %v3962_v13 = vld [vmem:[%s14445_s19 + $0x1790] sm:$0xff]  ;;  %v11597_v19 = vcombine.high %v3834_v5, %v3838_v6 }
 0x53f   : > { %10320 = vmatpush1.bf16.msra.mxu1 %v11636_v22  ;;  %10280 = vmatprep.subr.bf16.mxu0 %v11501_v25  ;;  %v3966_v39 = vld [vmem:[%s14445_s19 + $0x17b0] sm:$0xff]  ;;  %v11596_v25 = vcombine.low %v3834_v5, %v3838_v6 }
 0x540   : > { %10321 = vmatprep.subr.bf16.mxu1 %v11629_v40  ;;  %v11725_v36 = vcombine.high %v3962_v13, %v3966_v39  ;;  %v3826_v8 = vld [vmem:[%s14445_s19 + $0x1350] sm:$0xff]  ;;  %v11724_v40 = vcombine.low %v3962_v13, %v3966_v39 }
 0x541   : > { %v3830_v9 = vld [vmem:[%s14445_s19 + $0x1370] sm:$0xff] }
 0x542   : > { %10281 = vmatpush1.bf16.msra.mxu0 %v11500_v32  ;;  %v3954_v11 = vld [vmem:[%s14445_s19 + $0x1750] sm:$0xff]  ;;  %v11589_v41 = vcombine.high %v3826_v8, %v3830_v9 }
 0x543   : > { %10322 = vmatpush1.bf16.msra.mxu1 %v11628_v63  ;;  %10282 = vmatprep.subr.bf16.mxu0 %v11493_v37  ;;  %v3958_v22 = vld [vmem:[%s14445_s19 + $0x1770] sm:$0xff]  ;;  %v11588_v37 = vcombine.low %v3826_v8, %v3830_v9 }
 0x544   : > { %10323 = vmatprep.subr.bf16.mxu1 %v11621_v60  ;;  %v11717_v18 = vcombine.high %v3954_v11, %v3958_v22  ;;  %v3818_v29 = vld [vmem:[%s14445_s19 + $0x1310] sm:$0xff]  ;;  %v11716_v60 = vcombine.low %v3954_v11, %v3958_v22 }
 0x545   : > { %v3822_v31 = vld [vmem:[%s14445_s19 + $0x1330] sm:$0xff] }
 0x546   : > { %10283 = vmatpush1.bf16.msra.mxu0 %v11492_v59  ;;  %v3946_v32 = vld [vmem:[%s14445_s19 + $0x1710] sm:$0xff]  ;;  %v11581_v56 = vcombine.high %v3818_v29, %v3822_v31 }
 0x547   : > { %10324 = vmatpush1.bf16.msra.mxu1 %v11620_v52  ;;  %10284 = vmatprep.subr.bf16.mxu0 %v11485_v53  ;;  %v3950_v63 = vld [vmem:[%s14445_s19 + $0x1730] sm:$0xff]  ;;  %v11580_v53 = vcombine.low %v3818_v29, %v3822_v31 }
 0x548   : > { %10325 = vmatprep.subr.bf16.mxu1 %v11613_v55  ;;  %v11709_v16 = vcombine.high %v3946_v32, %v3950_v63  ;;  %v3810_v43 = vld [vmem:[%s14445_s19 + $0x12d0] sm:$0xff]  ;;  %v11708_v55 = vcombine.low %v3946_v32, %v3950_v63 }
 0x549   : > { %v3814_v46 = vld [vmem:[%s14445_s19 + $0x12f0] sm:$0xff] }
 0x54a   : > { %10285 = vmatpush1.bf16.msra.mxu0 %v11484_v38  ;;  %v3938_v59 = vld [vmem:[%s14445_s19 + $0x16d0] sm:$0xff]  ;;  %v11573_v44 = vcombine.high %v3810_v43, %v3814_v46 }
 0x54b   : > { %10326 = vmatpush1.bf16.msra.mxu1 %v11612_v12  ;;  %10286 = vmatprep.subr.bf16.mxu0 %v11605_v4  ;;  %v3942_v52 = vld [vmem:[%s14445_s19 + $0x16f0] sm:$0xff]  ;;  %v11572_v4 = vcombine.low %v3810_v43, %v3814_v46 }
 0x54c   : > { %10327 = vmatprep.subr.bf16.mxu1 %v11733_v14  ;;  %v11701_v24 = vcombine.high %v3938_v59, %v3942_v52  ;;  %v3802_v57 = vld [vmem:[%s14445_s19 + $0x1290] sm:$0xff]  ;;  %v11700_v14 = vcombine.low %v3938_v59, %v3942_v52 }
 0x54d   : > { %v3806_v58 = vld [vmem:[%s14445_s19 + $0x12b0] sm:$0xff] }
 0x54e   : > { %10287 = vmatpush2.bf16.msra.mxu0 %v11604_v27  ;;  %v3930_v38 = vld [vmem:[%s14445_s19 + $0x1690] sm:$0xff]  ;;  %v11565_v5 = vcombine.high %v3802_v57, %v3806_v58 }
 0x54f   : > { %10328 = vmatpush2.bf16.msra.mxu1 %v11732_v42  ;;  %10288 = vmatprep.subr.bf16.mxu0 %v11597_v19  ;;  %v3934_v12 = vld [vmem:[%s14445_s19 + $0x16b0] sm:$0xff]  ;;  %v11564_v19 = vcombine.low %v3802_v57, %v3806_v58 }
 0x550   : > { %10329 = vmatprep.subr.bf16.mxu1 %v11725_v36  ;;  %v11693_v6 = vcombine.high %v3930_v38, %v3934_v12  ;;  %v3794_v13 = vld [vmem:[%s14445_s19 + $0x1250] sm:$0xff]  ;;  %v11692_v36 = vcombine.low %v3930_v38, %v3934_v12 }
 0x551   : > { %v3798_v39 = vld [vmem:[%s14445_s19 + $0x1270] sm:$0xff] }
 0x552   : > { %10289 = vmatpush2.bf16.msra.mxu0 %v11596_v25  ;;  %v3922_v27 = vld [vmem:[%s14445_s19 + $0x1650] sm:$0xff]  ;;  %v11557_v8 = vcombine.high %v3794_v13, %v3798_v39 }
 0x553   : > { %10330 = vmatpush2.bf16.msra.mxu1 %v11724_v40  ;;  %10290 = vmatprep.subr.bf16.mxu0 %v11589_v41  ;;  %v3926_v42 = vld [vmem:[%s14445_s19 + $0x1670] sm:$0xff]  ;;  %v11556_v41 = vcombine.low %v3794_v13, %v3798_v39 }
 0x554   : > { %10331 = vmatprep.subr.bf16.mxu1 %v11717_v18  ;;  %v11685_v9 = vcombine.high %v3922_v27, %v3926_v42  ;;  %v3786_v11 = vld [vmem:[%s14445_s19 + $0x1210] sm:$0xff]  ;;  %v11684_v18 = vcombine.low %v3922_v27, %v3926_v42  ;;  %v12061_v27 = vld [vmem:[%s15122_s20] sm:$0xff] }
 0x555   : > { %v3790_v22 = vld [vmem:[%s14445_s19 + $0x1230] sm:$0xff]  ;;  %v10784_v42 = vrot.slane %v12061_v27, %v14552_v15 }
 0x556   : > { %10291 = vmatpush2.bf16.msra.mxu0 %v11588_v37  ;;  %v3914_v25 = vld [vmem:[%s14445_s19 + $0x1610] sm:$0xff]  ;;  %v11549_v29 = vcombine.high %v3786_v11, %v3790_v22 }
 0x557   : > { %10332 = vmatpush2.bf16.msra.mxu1 %v11716_v60  ;;  %10292 = vmatprep.subr.bf16.mxu0 %v11581_v56  ;;  %v3918_v40 = vld [vmem:[%s14445_s19 + $0x1630] sm:$0xff]  ;;  %v11548_v56 = vcombine.low %v3786_v11, %v3790_v22 }
 0x558   : > { %10333 = vmatprep.subr.bf16.mxu1 %v11709_v16  ;;  %v11677_v31 = vcombine.high %v3914_v25, %v3918_v40  ;;  %v4034_v32 = vld [vmem:[%s14445_s19 + $0x19d0] sm:$0xff]  ;;  %v11676_v16 = vcombine.low %v3914_v25, %v3918_v40 }
 0x559   : > { %v4038_v63 = vld [vmem:[%s14445_s19 + $0x19f0] sm:$0xff] }
 0x55a   : > { %10293 = vmatpush2.bf16.msra.mxu0 %v11580_v53  ;;  %v4162_v37 = vld [vmem:[%s14445_s19 + $0x1dd0] sm:$0xff]  ;;  %v11797_v43 = vcombine.high %v4034_v32, %v4038_v63  ;;  %v11796_v53 = vcombine.low %v4034_v32, %v4038_v63  ;;  %v10788_v32 = vrot.slane %v12061_v27, %v14563_v20 }
 0x55b   : > { %10334 = vmatpush2.bf16.msra.mxu1 %v11708_v55  ;;  %10294 = vmatprep.subr.bf16.mxu0 %v11573_v44  ;;  %v4166_v60 = vld [vmem:[%s14445_s19 + $0x1df0] sm:$0xff] }
 0x55c   : > { %10335 = vmatprep.subr.bf16.mxu1 %v11701_v24  ;;  %v11925_v46 = vcombine.high %v4162_v37, %v4166_v60  ;;  %v4026_v59 = vld [vmem:[%s14445_s19 + $0x1990] sm:$0xff]  ;;  %v11924_v24 = vcombine.low %v4162_v37, %v4166_v60 }
 0x55d   : > { %v4030_v52 = vld [vmem:[%s14445_s19 + $0x19b0] sm:$0xff] }
 0x55e   : > { %10295 = vmatpush2.bf16.msra.mxu0 %v11572_v4  ;;  %v4154_v55 = vld [vmem:[%s14445_s19 + $0x1d90] sm:$0xff]  ;;  %v11789_v57 = vcombine.high %v4026_v59, %v4030_v52  ;;  %v11788_v39 = vcombine.low %v4026_v59, %v4030_v52 }
 0x55f   : > { %10336 = vmatpush2.bf16.msra.mxu1 %v11700_v14  ;;  %10296 = vmatprep.subr.bf16.mxu0 %v11565_v5  ;;  %v4158_v44 = vld [vmem:[%s14445_s19 + $0x1db0] sm:$0xff] }
 0x560   : > { %10337 = vmatprep.subr.bf16.mxu1 %v11693_v6  ;;  %v4018_v58 = vld [vmem:[%s14445_s19 + $0x1950] sm:$0xff]  ;;  %v11917_v4 = vcombine.high %v4154_v55, %v4158_v44 }
 0x561   : > { %v4022_v38 = vld [vmem:[%s14445_s19 + $0x1970] sm:$0xff] }
 0x562   : > { %10297 = vmatpush2.bf16.msra.mxu0 %v11564_v19  ;;  %v4146_v14 = vld [vmem:[%s14445_s19 + $0x1d50] sm:$0xff] }
 0x563   : > { %10338 = vmatpush2.bf16.msra.mxu1 %v11692_v36  ;;  %10298 = vmatprep.subr.bf16.mxu0 %v11557_v8  ;;  %v4150_v5 = vld [vmem:[%s14445_s19 + $0x1d70] sm:$0xff]  ;;  %v11916_v36 = vcombine.low %v4154_v55, %v4158_v44  ;;  %v11781_v8 = vcombine.high %v4018_v58, %v4022_v38 }
 0x564   : > { %10339 = vmatprep.subr.bf16.mxu1 %v11685_v9  ;;  %v11909_v22 = vcombine.high %v4146_v14, %v4150_v5  ;;  %v4010_v25 = vld [vmem:[%s14445_s19 + $0x1910] sm:$0xff]  ;;  %v11908_v60 = vcombine.low %v4146_v14, %v4150_v5 }
 0x565   : > { %v4014_v40 = vld [vmem:[%s14445_s19 + $0x1930] sm:$0xff] }
 0x566   : > { %10299 = vmatpush2.bf16.msra.mxu0 %v11556_v41  ;;  %v4138_v15 = vld [vmem:[%s14445_s19 + $0x1d10] sm:$0xff] }
 0x567   : > { %10340 = vmatpush2.bf16.msra.mxu1 %v11684_v18  ;;  %10300 = vmatprep.subr.bf16.mxu0 %v11549_v29  ;;  %v4142_v18 = vld [vmem:[%s14445_s19 + $0x1d30] sm:$0xff] }
 0x568   : > { %10341 = vmatprep.subr.bf16.mxu1 %v11677_v31  ;;  %v11901_v59 = vcombine.high %v4138_v15, %v4142_v18  ;;  %v4002_v52 = vld [vmem:[%s14445_s19 + $0x18d0] sm:$0xff] }
 0x569   : > { %v4130_v20 = vld [vmem:[%s14445_s19 + $0x1cd0] sm:$0xff] }
 0x56a   : > { %10301 = vmatpush2.bf16.msra.mxu0 %v11548_v56  ;;  %v11773_v56 = vcombine.high %v4010_v25, %v4014_v40  ;;  %v4134_v55 = vld [vmem:[%s14445_s19 + $0x1cf0] sm:$0xff] }
 0x56b   : > { %10342 = vmatpush2.bf16.msra.mxu1 %v11676_v16  ;;  %10352 = vmatprep.subr.bf16.mxu0 %v11797_v43  ;;  %v3994_v14 = vld [vmem:[%s14445_s19 + $0x1890] sm:$0xff] }
 0x56c   : > { %10393 = vmatprep.subr.bf16.mxu1 %v11925_v46  ;;  %v3998_v5 = vld [vmem:[%s14445_s19 + $0x18b0] sm:$0xff] }
 0x56d   : > { %v10058_v12 = vpop.f32.mrf.mxu0  ;;  %10303 = vmatmul.mubr.bf16.vlgmr.msra.gmra.mxu0 %v14796_v28  ;;  %v11757_v27 = vcombine.high %v3994_v14, %v3998_v5 }
 0x56e   : > { %v10059_v6 = vadd.f32 %v10058_v12, %v15356_v30  ;;  %v10099_v13 = vpop.f32.mrf.mxu1  ;;  %10344 = vmatmul.mubr.bf16.vlgmr.msra.gmra.mxu1 %v14794_v26  ;;  %10353 = vmatpush1.bf16.msra.mxu0 %v11796_v53  ;;  %v4006_v53 = vld [vmem:[%s14445_s19 + $0x18f0] sm:$0xff] }
 0x56f   : > { %10384 = vmatprep.mubr.bf16.mxu0 %v14799_v33  ;;  %10394 = vmatpush1.bf16.msra.mxu1 %v11924_v24  ;;  %v10060_v19 = vpop.f32.mrf.mxu0 }
 0x570   : > { %v10100_v9 = vadd.f32 %v10099_v13, %v10059_v6  ;;  %10425 = vmatprep.mubr.bf16.mxu1 %v14801_v34  ;;  %v10061_v30 = vadd.f32 %v10060_v19, %v15364_v54  ;;  %v10101_v11 = vpop.f32.mrf.mxu1  ;;  %10354 = vmatprep.subr.bf16.mxu0 %v11789_v57  ;;  %v11780_v54 = vcombine.low %v4018_v58, %v4022_v38  ;;  %v4122_v6 = vld [vmem:[%s14445_s19 + $0x1c90] sm:$0xff] }
 0x571   : > { %v10062_v41 = vpop.f32.mrf.mxu0  ;;  %10395 = vmatprep.subr.bf16.mxu1 %v11917_v4  ;;  %v11772_v57 = vcombine.low %v4010_v25, %v4014_v40  ;;  %v11900_v58 = vcombine.low %v4138_v15, %v4142_v18  ;;  %v11765_v38 = vcombine.high %v4002_v52, %v4006_v53  ;;  %v11893_v4 = vcombine.high %v4130_v20, %v4134_v55  ;;  %v4126_v13 = vld [vmem:[%s14445_s19 + $0x1cb0] sm:$0xff] }
 0x572   : > { %v10764_v29 = vmax.f32 %v10100_v9, 0.0  ;;  %v10102_v31 = vadd.f32 %v10101_v11, %v10061_v30  ;;  %v10103_v63 = vpop.f32.mrf.mxu1  ;;  %10355 = vmatpush1.bf16.msra.mxu0 %v11788_v39  ;;  %v11892_v39 = vcombine.low %v4130_v20, %v4134_v55  ;;  %v3986_v19 = vld [vmem:[%s14445_s19 + $0x1850] sm:$0xff]  ;;  %v11756_v30 = vcombine.low %v3994_v14, %v3998_v5 }
 0x573   : > { %10396 = vmatpush1.bf16.msra.mxu1 %v11916_v36  ;;  %v10063_v37 = vpop.f32.mrf.mxu0  ;;  %10356 = vmatprep.subr.bf16.mxu0 %v11781_v8  ;;  %v3990_v36 = vld [vmem:[%s14445_s19 + $0x1870] sm:$0xff]  ;;  %v11884_v11 = vcombine.low %v4122_v6, %v4126_v13 }
 0x574   : > { %v10815_v16 = vmul.f32 %v10784_v42, %v10764_v29  ;;  %v10765_v43 = vmax.f32 %v10102_v31, 0.0  ;;  %v10104_v46 = vpop.f32.mrf.mxu1  ;;  %10397 = vmatprep.subr.bf16.mxu1 %v11909_v22  ;;  %v11885_v42 = vcombine.high %v4122_v6, %v4126_v13  ;;  %v4114_v8 = vld [vmem:[%s14445_s19 + $0x1c50] sm:$0xff]  ;;  %v11749_v22 = vcombine.high %v3986_v19, %v3990_v36 }
 0x575   : > { %v4118_v9 = vld [vmem:[%s14445_s19 + $0x1c70] sm:$0xff]  ;;  %v11748_v29 = vcombine.low %v3986_v19, %v3990_v36 }
 0x576   : > { %v10822_v44 = vadd.f32 %v15145_v21, %v10815_v16  ;;  %v10816_v24 = vmul.f32 %v10788_v32, %v10765_v43  ;;  %10357 = vmatpush1.bf16.msra.mxu0 %v11780_v54  ;;  %v11764_v21 = vcombine.low %v4002_v52, %v4006_v53  ;;  %v11877_v25 = vcombine.high %v4114_v8, %v4118_v9  ;;  %v3978_v40 = vld [vmem:[%s14445_s19 + $0x1810] sm:$0xff] }
 0x577   : > { %10398 = vmatpush1.bf16.msra.mxu1 %v11908_v60  ;;  %10358 = vmatprep.subr.bf16.mxu0 %v11773_v56  ;;  %v3982_v41 = vld [vmem:[%s14445_s19 + $0x1830] sm:$0xff]  ;;  %v11876_v31 = vcombine.low %v4114_v8, %v4118_v9 }
 0x578   : > { %v15444_v12 = vadd.f32 %v10822_v44, %v10816_v24  ;;  %10399 = vmatprep.subr.bf16.mxu1 %v11901_v59  ;;  %v4106_v15 = vld [vmem:[%s14445_s19 + $0x1c10] sm:$0xff]  ;;  %v11741_v32 = vcombine.high %v3978_v40, %v3982_v41  ;;  %v11740_v16 = vcombine.low %v3978_v40, %v3982_v41 }
 0x579   : > { %v4110_v18 = vld [vmem:[%s14445_s19 + $0x1c30] sm:$0xff] }
 0x57a   : > { %10359 = vmatpush1.bf16.msra.mxu0 %v11772_v57  ;;  %v11869_v63 = vcombine.high %v4106_v15, %v4110_v18  ;;  %v4098_v54 = vld [vmem:[%s14445_s19 + $0x1bd0] sm:$0xff]  ;;  %v11868_v43 = vcombine.low %v4106_v15, %v4110_v18 }
 0x57b   : > { %10400 = vmatpush1.bf16.msra.mxu1 %v11900_v58  ;;  %10360 = vmatprep.subr.bf16.mxu0 %v11765_v38  ;;  %v4102_v37 = vld [vmem:[%s14445_s19 + $0x1bf0] sm:$0xff] }
 0x57c   : > { %10401 = vmatprep.subr.bf16.mxu1 %v11893_v4  ;;  %v4226_v60 = vld [vmem:[%s14445_s19 + $0x1fd0] sm:$0xff]  ;;  %v11861_v46 = vcombine.high %v4098_v54, %v4102_v37  ;;  %v11860_v44 = vcombine.low %v4098_v54, %v4102_v37 }
 0x57d   : > { %v4230_v56 = vld [vmem:[%s14445_s19 + $0x1ff0] sm:$0xff] }
 0x57e   : > { %10361 = vmatpush1.bf16.msra.mxu0 %v11764_v21  ;;  %v11989_v59 = vcombine.high %v4226_v60, %v4230_v56  ;;  %v4090_v52 = vld [vmem:[%s14445_s19 + $0x1b90] sm:$0xff]  ;;  %v11988_v24 = vcombine.low %v4226_v60, %v4230_v56 }
 0x57f   : > { %10402 = vmatpush1.bf16.msra.mxu1 %v11892_v39  ;;  %10362 = vmatprep.subr.bf16.mxu0 %v11757_v27  ;;  %v4094_v53 = vld [vmem:[%s14445_s19 + $0x1bb0] sm:$0xff] }
 0x580   : > { %10403 = vmatprep.subr.bf16.mxu1 %v11885_v42  ;;  %v4218_v20 = vld [vmem:[%s14445_s19 + $0x1f90] sm:$0xff]  ;;  %v11853_v57 = vcombine.high %v4090_v52, %v4094_v53  ;;  %v11852_v6 = vcombine.low %v4090_v52, %v4094_v53 }
 0x581   : > { %v4222_v55 = vld [vmem:[%s14445_s19 + $0x1fb0] sm:$0xff] }
 0x582   : > { %10363 = vmatpush1.bf16.msra.mxu0 %v11756_v30  ;;  %v11981_v58 = vcombine.high %v4218_v20, %v4222_v55  ;;  %v4082_v38 = vld [vmem:[%s14445_s19 + $0x1b50] sm:$0xff]  ;;  %v11980_v13 = vcombine.low %v4218_v20, %v4222_v55 }
 0x583   : > { %10404 = vmatpush1.bf16.msra.mxu1 %v11884_v11  ;;  %10364 = vmatprep.subr.bf16.mxu0 %v11749_v22  ;;  %v4086_v4 = vld [vmem:[%s14445_s19 + $0x1b70] sm:$0xff] }
 0x584   : > { %10405 = vmatprep.subr.bf16.mxu1 %v11877_v25  ;;  %v4210_v14 = vld [vmem:[%s14445_s19 + $0x1f50] sm:$0xff]  ;;  %v11845_v21 = vcombine.high %v4082_v38, %v4086_v4  ;;  %v11844_v8 = vcombine.low %v4082_v38, %v4086_v4 }
 0x585   : > { %v4214_v5 = vld [vmem:[%s14445_s19 + $0x1f70] sm:$0xff] }
 0x586   : > { %10365 = vmatpush1.bf16.msra.mxu0 %v11748_v29  ;;  %v11973_v39 = vcombine.high %v4210_v14, %v4214_v5  ;;  %v4074_v27 = vld [vmem:[%s14445_s19 + $0x1b10] sm:$0xff]  ;;  %v11972_v9 = vcombine.low %v4210_v14, %v4214_v5 }
 0x587   : > { %10406 = vmatpush1.bf16.msra.mxu1 %v11876_v31  ;;  %10366 = vmatprep.subr.bf16.mxu0 %v11741_v32  ;;  %v4078_v42 = vld [vmem:[%s14445_s19 + $0x1b30] sm:$0xff] }
 0x588   : > { %10407 = vmatprep.subr.bf16.mxu1 %v11869_v63  ;;  %v4202_v19 = vld [vmem:[%s14445_s19 + $0x1f10] sm:$0xff]  ;;  %v11837_v30 = vcombine.high %v4074_v27, %v4078_v42  ;;  %v11836_v15 = vcombine.low %v4074_v27, %v4078_v42  ;;  %v3395_v27 = vld [vmem:[%s14445_s19 + $0x5d8] sm:$0xff] }
 0x589   : > { %v4206_v36 = vld [vmem:[%s14445_s19 + $0x1f30] sm:$0xff]  ;;  %v3399_v42 = vld [vmem:[%s14445_s19 + $0x5f8] sm:$0xff] }
 0x58a   : > { %10367 = vmatpush1.bf16.msra.mxu0 %v11740_v16  ;;  %v11965_v11 = vcombine.high %v4202_v19, %v4206_v36  ;;  %v4066_v22 = vld [vmem:[%s14445_s19 + $0x1ad0] sm:$0xff]  ;;  %v11964_v18 = vcombine.low %v4202_v19, %v4206_v36 }
 0x58b   : > { %10408 = vmatpush1.bf16.msra.mxu1 %v11868_v43  ;;  %10368 = vmatprep.subr.bf16.mxu0 %v11861_v46  ;;  %v4070_v25 = vld [vmem:[%s14445_s19 + $0x1af0] sm:$0xff] }
 0x58c   : > { %10409 = vmatprep.subr.bf16.mxu1 %v11989_v59  ;;  %v4194_v40 = vld [vmem:[%s14445_s19 + $0x1ed0] sm:$0xff]  ;;  %v11829_v29 = vcombine.high %v4066_v22, %v4070_v25  ;;  %v11828_v60 = vcombine.low %v4066_v22, %v4070_v25  ;;  %v12062_v22 = vld [vmem:[%s14885_s16] sm:$0xff] }
 0x58d   : > { %v4198_v41 = vld [vmem:[%s14445_s19 + $0x1ef0] sm:$0xff]  ;;  %v4253_v25 = vrot.slane %v12062_v22, %v14667_v3 }
 0x58e   : > { %10369 = vmatpush2.bf16.msra.mxu0 %v11860_v44  ;;  %v11957_v31 = vcombine.high %v4194_v40, %v4198_v41  ;;  %v4058_v32 = vld [vmem:[%s14445_s19 + $0x1a90] sm:$0xff]  ;;  %v11956_v56 = vcombine.low %v4194_v40, %v4198_v41  ;;  %v3387_v41 = vld [vmem:[%s14445_s19 + $0x598] sm:$0xff] }
 0x58f   : > { %10410 = vmatpush2.bf16.msra.mxu1 %v11988_v24  ;;  %10370 = vmatprep.subr.bf16.mxu0 %v11853_v57  ;;  %v4062_v63 = vld [vmem:[%s14445_s19 + $0x1ab0] sm:$0xff] }
 0x590   : > { %10411 = vmatprep.subr.bf16.mxu1 %v11981_v58  ;;  %v4186_v54 = vld [vmem:[%s14445_s19 + $0x1e90] sm:$0xff]  ;;  %v11821_v16 = vcombine.high %v4058_v32, %v4062_v63  ;;  %v11820_v20 = vcombine.low %v4058_v32, %v4062_v63  ;;  %v3251_v32 = vld [vmem:[%s14445_s19 + $0x158] sm:$0xff] }
 0x591   : > { %v4190_v37 = vld [vmem:[%s14445_s19 + $0x1eb0] sm:$0xff]  ;;  %v3255_v63 = vld [vmem:[%s14445_s19 + $0x178] sm:$0xff] }
 0x592   : > { %10371 = vmatpush2.bf16.msra.mxu0 %v11852_v6  ;;  %v11949_v43 = vcombine.high %v4186_v54, %v4190_v37  ;;  %v4050_v46 = vld [vmem:[%s14445_s19 + $0x1a50] sm:$0xff]  ;;  %v11948_v55 = vcombine.low %v4186_v54, %v4190_v37 }
 0x593   : > { %10412 = vmatpush2.bf16.msra.mxu1 %v11980_v13  ;;  %10372 = vmatprep.subr.bf16.mxu0 %v11845_v21  ;;  %v4054_v59 = vld [vmem:[%s14445_s19 + $0x1a70] sm:$0xff]  ;;  %v3267_v21 = vld [vmem:[%s14445_s19 + $0x1d8] sm:$0xff] }
 0x594   : > { %10413 = vmatprep.subr.bf16.mxu1 %v11973_v39  ;;  %v4178_v52 = vld [vmem:[%s14445_s19 + $0x1e50] sm:$0xff]  ;;  %v11813_v44 = vcombine.high %v4050_v46, %v4054_v59  ;;  %v11812_v14 = vcombine.low %v4050_v46, %v4054_v59  ;;  %v3271_v39 = vld [vmem:[%s14445_s19 + $0x1f8] sm:$0xff] }
 0x595   : > { %v4182_v53 = vld [vmem:[%s14445_s19 + $0x1e70] sm:$0xff]  ;;  %v11030_v40 = vcombine.low %v3267_v21, %v3271_v39 }
 0x596   : > { %10373 = vmatpush2.bf16.msra.mxu0 %v11844_v8  ;;  %v11941_v24 = vcombine.high %v4178_v52, %v4182_v53  ;;  %v4042_v57 = vld [vmem:[%s14445_s19 + $0x1a10] sm:$0xff]  ;;  %v11940_v5 = vcombine.low %v4178_v52, %v4182_v53  ;;  %v11031_v8 = vcombine.high %v3267_v21, %v3271_v39  ;;  %v11015_v53 = vcombine.high %v3251_v32, %v3255_v63 }
 0x597   : > { %10414 = vmatpush2.bf16.msra.mxu1 %v11972_v9  ;;  %10374 = vmatprep.subr.bf16.mxu0 %v11837_v30  ;;  %v4046_v58 = vld [vmem:[%s14445_s19 + $0x1a30] sm:$0xff]  ;;  %v11159_v9 = vcombine.high %v3395_v27, %v3399_v42  ;;  %v3259_v30 = vld [vmem:[%s14445_s19 + $0x198] sm:$0xff] }
 0x598   : > { %10415 = vmatprep.subr.bf16.mxu1 %v11965_v11  ;;  %v4170_v38 = vld [vmem:[%s14445_s19 + $0x1e10] sm:$0xff]  ;;  %v11805_v6 = vcombine.high %v4042_v57, %v4046_v58  ;;  %v11804_v19 = vcombine.low %v4042_v57, %v4046_v58  ;;  %v3263_v11 = vld [vmem:[%s14445_s19 + $0x1b8] sm:$0xff] }
 0x599   : > { %v4174_v4 = vld [vmem:[%s14445_s19 + $0x1e30] sm:$0xff]  ;;  %v11022_v46 = vcombine.low %v3259_v30, %v3263_v11  ;;  %v3243_v57 = vld [vmem:[%s14445_s19 + $0x118] sm:$0xff] }
 0x59a   : > { %10375 = vmatpush2.bf16.msra.mxu0 %v11836_v15  ;;  %v11933_v13 = vcombine.high %v4170_v38, %v4174_v4  ;;  %v11932_v36 = vcombine.low %v4170_v38, %v4174_v4  ;;  %v3391_v15 = vld [vmem:[%s14445_s19 + $0x5b8] sm:$0xff] }
 0x59b   : > { %10416 = vmatpush2.bf16.msra.mxu1 %v11964_v18  ;;  %10376 = vmatprep.subr.bf16.mxu0 %v11829_v29  ;;  %v11158_v18 = vcombine.low %v3395_v27, %v3399_v42  ;;  %v4257_v29 = vrot.slane %v12062_v22, %v14575_v35  ;;  %v11151_v37 = vcombine.high %v3387_v41, %v3391_v15  ;;  %v3247_v58 = vld [vmem:[%s14445_s19 + $0x138] sm:$0xff] }
 0x59c   : > { %10417 = vmatprep.subr.bf16.mxu1 %v11957_v31  ;;  %v11023_v31 = vcombine.high %v3259_v30, %v3263_v11  ;;  %v11150_v52 = vcombine.low %v3387_v41, %v3391_v15  ;;  %v3375_v4 = vld [vmem:[%s14445_s19 + $0x538] sm:$0xff]  ;;  %v11007_v21 = vcombine.high %v3243_v57, %v3247_v58 }
 0x59d   : > { %v3235_v42 = vld [vmem:[%s14445_s19 + $0xd8] sm:$0xff] }
 0x59e   : > { %10377 = vmatpush2.bf16.msra.mxu0 %v11828_v60  ;;  %v3379_v60 = vld [vmem:[%s14445_s19 + $0x558] sm:$0xff] }
 0x59f   : > { %10418 = vmatpush2.bf16.msra.mxu1 %v11956_v56  ;;  %10378 = vmatprep.subr.bf16.mxu0 %v11821_v16  ;;  %v3383_v56 = vld [vmem:[%s14445_s19 + $0x578] sm:$0xff] }
 0x5a0   : > { %10419 = vmatprep.subr.bf16.mxu1 %v11949_v43  ;;  %v3355_v41 = vld [vmem:[%s14445_s19 + $0x498] sm:$0xff] }
 0x5a1   : > { %v3359_v15 = vld [vmem:[%s14445_s19 + $0x4b8] sm:$0xff] }
 0x5a2   : > { %10379 = vmatpush2.bf16.msra.mxu0 %v11820_v20 }
 0x5a3   : > { %10420 = vmatpush2.bf16.msra.mxu1 %v11948_v55  ;;  %10380 = vmatprep.subr.bf16.mxu0 %v11813_v44 }
 0x5a4   : > { %10421 = vmatprep.subr.bf16.mxu1 %v11941_v24  ;;  %v11143_v24 = vcombine.high %v3379_v60, %v3383_v56 }
 0x5a6   : > { %10381 = vmatpush2.bf16.msra.mxu0 %v11812_v14 }
 0x5a7   : > { %10422 = vmatpush2.bf16.msra.mxu1 %v11940_v5  ;;  %10382 = vmatprep.subr.bf16.mxu0 %v11805_v6  ;;  %v11014_v6 = vcombine.low %v3251_v32, %v3255_v63  ;;  %v11119_v32 = vcombine.high %v3355_v41, %v3359_v15  ;;  %v3219_v63 = vld [vmem:[%s14445_s19 + $0x58] sm:$0xff] }
 0x5a8   : > { %10423 = vmatprep.subr.bf16.mxu1 %v11933_v13  ;;  %v11142_v13 = vcombine.low %v3379_v60, %v3383_v56  ;;  %v3351_v60 = vld [vmem:[%s14445_s19 + $0x478] sm:$0xff] }
 0x5aa   : > { %10383 = vmatpush2.bf16.msra.mxu0 %v11804_v19  ;;  %v3239_v19 = vld [vmem:[%s14445_s19 + $0xf8] sm:$0xff] }
 0x5ab   : > { %10424 = vmatpush2.bf16.msra.mxu1 %v11932_v36  ;;  %10434 = vmatprep.subr.bf16.mxu0 %v11031_v8  ;;  %v3363_v36 = vld [vmem:[%s14445_s19 + $0x4d8] sm:$0xff]  ;;  %v10999_v11 = vcombine.high %v3235_v42, %v3239_v19 }
 0x5ac   : > { %10475 = vmatprep.subr.bf16.mxu1 %v11159_v9  ;;  %v3367_v8 = vld [vmem:[%s14445_s19 + $0x4f8] sm:$0xff]  ;;  %v11006_v9 = vcombine.low %v3243_v57, %v3247_v58 }
 0x5ad   : > { %v10140_v54 = vpop.f32.mrf.mxu0  ;;  %10385 = vmatmul.mubr.bf16.vlgmr.msra.gmra.mxu0 %v14893_v0  ;;  %v11127_v22 = vcombine.high %v3363_v36, %v3367_v8 }
 0x5ae   : > { %v10141_v16 = vadd.f32 %v10140_v54, %v4253_v25  ;;  %v10181_v43 = vpop.f32.mrf.mxu1  ;;  %10426 = vmatmul.mubr.bf16.vlgmr.msra.gmra.mxu1 %v14895_v1  ;;  %10435 = vmatpush1.bf16.msra.mxu0 %v11030_v40  ;;  %v3227_v25 = vld [vmem:[%s14445_s19 + $0x98] sm:$0xff] }
 0x5af   : > { %10466 = vmatprep.mubr.bf16.mxu0 %v14585_v49  ;;  %10476 = vmatpush1.bf16.msra.mxu1 %v11158_v18  ;;  %v10142_v59 = vpop.f32.mrf.mxu0  ;;  %v3371_v49 = vld [vmem:[%s14445_s19 + $0x518] sm:$0xff]  ;;  %v10998_v18 = vcombine.low %v3235_v42, %v3239_v19 }
 0x5b0   : > { %v15508_v20 = vadd.f32 %v10181_v43, %v10141_v16  ;;  %10507 = vmatprep.mubr.bf16.mxu1 %v14587_v50  ;;  %v10143_v55 = vadd.f32 %v10142_v59, %v4257_v29  ;;  %v10183_v44 = vpop.f32.mrf.mxu1  ;;  %10436 = vmatprep.subr.bf16.mxu0 %v11023_v31  ;;  %v11135_v27 = vcombine.high %v3371_v49, %v3375_v4  ;;  %v3231_v40 = vld [vmem:[%s14445_s19 + $0xb8] sm:$0xff] }
 0x5b1   : > { %v10144_v38 = vpop.f32.mrf.mxu0  ;;  %10477 = vmatprep.subr.bf16.mxu1 %v11151_v37  ;;  %v11134_v30 = vcombine.low %v3371_v49, %v3375_v4  ;;  %v11126_v29 = vcombine.low %v3363_v36, %v3367_v8  ;;  %v10991_v31 = vcombine.high %v3227_v25, %v3231_v40  ;;  %v3223_v54 = vld [vmem:[%s14445_s19 + $0x78] sm:$0xff]  ;;  %v10990_v56 = vcombine.low %v3227_v25, %v3231_v40 }
 0x5b2   : > { %v15515_v14 = vadd.f32 %v10183_v44, %v10143_v55  ;;  %v10185_v5 = vpop.f32.mrf.mxu1  ;;  %10437 = vmatpush1.bf16.msra.mxu0 %v11022_v46  ;;  %v3347_v37 = vld [vmem:[%s14445_s19 + $0x458] sm:$0xff]  ;;  %v11118_v16 = vcombine.low %v3355_v41, %v3359_v15  ;;  %v10983_v43 = vcombine.high %v3219_v63, %v3223_v54  ;;  %v10982_v44 = vcombine.low %v3219_v63, %v3223_v54 }
 0x5b3   : > { %10478 = vmatpush1.bf16.msra.mxu1 %v11150_v52  ;;  %v10145_v50 = vpop.f32.mrf.mxu0  ;;  %10438 = vmatprep.subr.bf16.mxu0 %v11015_v53  ;;  %v11111_v46 = vcombine.high %v3347_v37, %v3351_v60  ;;  %v3211_v59 = vld [vmem:[%s14445_s19 + $0x18] sm:$0xff] }
 0x5b4   : > { %v10186_v39 = vpop.f32.mrf.mxu1  ;;  %10479 = vmatprep.subr.bf16.mxu1 %v11143_v24  ;;  %v3215_v52 = vld [vmem:[%s14445_s19 + $0x38] sm:$0xff]  ;;  %v11110_v24 = vcombine.low %v3347_v37, %v3351_v60 }
 0x5b5   : > { %v3339_v53 = vld [vmem:[%s14445_s19 + $0x418] sm:$0xff]  ;;  %v10975_v57 = vcombine.high %v3211_v59, %v3215_v52 }
 0x5b6   : > { %10439 = vmatpush1.bf16.msra.mxu0 %v11014_v6  ;;  %v3343_v55 = vld [vmem:[%s14445_s19 + $0x438] sm:$0xff]  ;;  %v10974_v6 = vcombine.low %v3211_v59, %v3215_v52 }
 0x5b7   : > { %10480 = vmatpush1.bf16.msra.mxu1 %v11142_v13  ;;  %10440 = vmatprep.subr.bf16.mxu0 %v11007_v21  ;;  %v11103_v58 = vcombine.high %v3339_v53, %v3343_v55  ;;  %v3331_v38 = vld [vmem:[%s14445_s19 + $0x3d8] sm:$0xff]  ;;  %v11102_v50 = vcombine.low %v3339_v53, %v3343_v55 }
 0x5b8   : > { %10481 = vmatprep.subr.bf16.mxu1 %v11135_v27  ;;  %v3335_v49 = vld [vmem:[%s14445_s19 + $0x3f8] sm:$0xff] }
 0x5b9   : > { %v3459_v4 = vld [vmem:[%s14445_s19 + $0x7d8] sm:$0xff]  ;;  %v11095_v13 = vcombine.high %v3331_v38, %v3335_v49  ;;  %v11094_v36 = vcombine.low %v3331_v38, %v3335_v49 }
 0x5ba   : > { %10441 = vmatpush1.bf16.msra.mxu0 %v11006_v9  ;;  %v3463_v5 = vld [vmem:[%s14445_s19 + $0x7f8] sm:$0xff] }
 0x5bb   : > { %10482 = vmatpush1.bf16.msra.mxu1 %v11134_v30  ;;  %10442 = vmatprep.subr.bf16.mxu0 %v10999_v11  ;;  %v11223_v21 = vcombine.high %v3459_v4, %v3463_v5  ;;  %v3323_v39 = vld [vmem:[%s14445_s19 + $0x398] sm:$0xff]  ;;  %v11222_v8 = vcombine.low %v3459_v4, %v3463_v5 }
 0x5bc   : > { %10483 = vmatprep.subr.bf16.mxu1 %v11127_v22  ;;  %v3327_v27 = vld [vmem:[%s14445_s19 + $0x3b8] sm:$0xff] }
 0x5bd   : > { %v3451_v42 = vld [vmem:[%s14445_s19 + $0x798] sm:$0xff]  ;;  %v11087_v9 = vcombine.high %v3323_v39, %v3327_v27  ;;  %v11086_v41 = vcombine.low %v3323_v39, %v3327_v27 }
 0x5be   : > { %10443 = vmatpush1.bf16.msra.mxu0 %v10998_v18  ;;  %v3455_v19 = vld [vmem:[%s14445_s19 + $0x7b8] sm:$0xff] }
 0x5bf   : > { %10484 = vmatpush1.bf16.msra.mxu1 %v11126_v29  ;;  %10444 = vmatprep.subr.bf16.mxu0 %v10991_v31  ;;  %v11215_v30 = vcombine.high %v3451_v42, %v3455_v19  ;;  %v3315_v11 = vld [vmem:[%s14445_s19 + $0x358] sm:$0xff]  ;;  %v11214_v15 = vcombine.low %v3451_v42, %v3455_v19 }
 0x5c0   : > { %10485 = vmatprep.subr.bf16.mxu1 %v11119_v32  ;;  %v3319_v22 = vld [vmem:[%s14445_s19 + $0x378] sm:$0xff] }
 0x5c1   : > { %v3443_v25 = vld [vmem:[%s14445_s19 + $0x758] sm:$0xff]  ;;  %v11079_v18 = vcombine.high %v3315_v11, %v3319_v22  ;;  %v11078_v37 = vcombine.low %v3315_v11, %v3319_v22 }
 0x5c2   : > { %10445 = vmatpush1.bf16.msra.mxu0 %v10990_v56  ;;  %v3447_v40 = vld [vmem:[%s14445_s19 + $0x778] sm:$0xff] }
 0x5c3   : > { %10486 = vmatpush1.bf16.msra.mxu1 %v11118_v16  ;;  %10446 = vmatprep.subr.bf16.mxu0 %v10983_v43  ;;  %v11207_v29 = vcombine.high %v3443_v25, %v3447_v40  ;;  %v3307_v31 = vld [vmem:[%s14445_s19 + $0x318] sm:$0xff]  ;;  %v11206_v60 = vcombine.low %v3443_v25, %v3447_v40 }
 0x5c4   : > { %10487 = vmatprep.subr.bf16.mxu1 %v11111_v46  ;;  %v3311_v32 = vld [vmem:[%s14445_s19 + $0x338] sm:$0xff] }
 0x5c5   : > { %v3435_v63 = vld [vmem:[%s14445_s19 + $0x718] sm:$0xff]  ;;  %v11071_v56 = vcombine.high %v3307_v31, %v3311_v32  ;;  %v11070_v53 = vcombine.low %v3307_v31, %v3311_v32 }
 0x5c6   : > { %10447 = vmatpush1.bf16.msra.mxu0 %v10982_v44  ;;  %v3439_v54 = vld [vmem:[%s14445_s19 + $0x738] sm:$0xff] }
 0x5c7   : > { %10488 = vmatpush1.bf16.msra.mxu1 %v11110_v24  ;;  %10448 = vmatprep.subr.bf16.mxu0 %v10975_v57  ;;  %v11199_v16 = vcombine.high %v3435_v63, %v3439_v54  ;;  %v3299_v43 = vld [vmem:[%s14445_s19 + $0x2d8] sm:$0xff]  ;;  %v11198_v55 = vcombine.low %v3435_v63, %v3439_v54 }
 0x5c8   : > { %10489 = vmatprep.subr.bf16.mxu1 %v11103_v58  ;;  %v3303_v46 = vld [vmem:[%s14445_s19 + $0x2f8] sm:$0xff] }
 0x5c9   : > { %v3427_v59 = vld [vmem:[%s14445_s19 + $0x6d8] sm:$0xff]  ;;  %v11063_v44 = vcombine.high %v3299_v43, %v3303_v46  ;;  %v11062_v4 = vcombine.low %v3299_v43, %v3303_v46 }
 0x5ca   : > { %10449 = vmatpush1.bf16.msra.mxu0 %v10974_v6  ;;  %v3431_v52 = vld [vmem:[%s14445_s19 + $0x6f8] sm:$0xff] }
 0x5cb   : > { %10490 = vmatpush1.bf16.msra.mxu1 %v11102_v50  ;;  %10450 = vmatprep.subr.bf16.mxu0 %v11095_v13  ;;  %v11191_v24 = vcombine.high %v3427_v59, %v3431_v52  ;;  %v3291_v57 = vld [vmem:[%s14445_s19 + $0x298] sm:$0xff]  ;;  %v11190_v5 = vcombine.low %v3427_v59, %v3431_v52 }
 0x5cc   : > { %10491 = vmatprep.subr.bf16.mxu1 %v11223_v21  ;;  %v3295_v58 = vld [vmem:[%s14445_s19 + $0x2b8] sm:$0xff] }
 0x5cd   : > { %v3419_v38 = vld [vmem:[%s14445_s19 + $0x698] sm:$0xff]  ;;  %v11055_v6 = vcombine.high %v3291_v57, %v3295_v58  ;;  %v11054_v42 = vcombine.low %v3291_v57, %v3295_v58 }
 0x5ce   : > { %10451 = vmatpush2.bf16.msra.mxu0 %v11094_v36  ;;  %v3423_v49 = vld [vmem:[%s14445_s19 + $0x6b8] sm:$0xff] }
 0x5cf   : > { %10492 = vmatpush2.bf16.msra.mxu1 %v11222_v8  ;;  %10452 = vmatprep.subr.bf16.mxu0 %v11087_v9  ;;  %v11183_v50 = vcombine.high %v3419_v38, %v3423_v49  ;;  %v3283_v13 = vld [vmem:[%s14445_s19 + $0x258] sm:$0xff]  ;;  %v11182_v19 = vcombine.low %v3419_v38, %v3423_v49 }
 0x5d0   : > { %10493 = vmatprep.subr.bf16.mxu1 %v11215_v30  ;;  %v3287_v21 = vld [vmem:[%s14445_s19 + $0x278] sm:$0xff] }
 0x5d1   : > { %v3411_v39 = vld [vmem:[%s14445_s19 + $0x658] sm:$0xff]  ;;  %v11047_v36 = vcombine.high %v3283_v13, %v3287_v21  ;;  %v11046_v25 = vcombine.low %v3283_v13, %v3287_v21 }
 0x5d2   : > { %10453 = vmatpush2.bf16.msra.mxu0 %v11086_v41  ;;  %v3415_v27 = vld [vmem:[%s14445_s19 + $0x678] sm:$0xff] }
 0x5d3   : > { %10494 = vmatpush2.bf16.msra.mxu1 %v11214_v15  ;;  %10454 = vmatprep.subr.bf16.mxu0 %v11079_v18  ;;  %v11175_v8 = vcombine.high %v3411_v39, %v3415_v27  ;;  %v3275_v9 = vld [vmem:[%s14445_s19 + $0x218] sm:$0xff]  ;;  %v11174_v40 = vcombine.low %v3411_v39, %v3415_v27 }
 0x5d4   : > { %10495 = vmatprep.subr.bf16.mxu1 %v11207_v29  ;;  %v3279_v30 = vld [vmem:[%s14445_s19 + $0x238] sm:$0xff] }
 0x5d5   : > { %v3403_v11 = vld [vmem:[%s14445_s19 + $0x618] sm:$0xff]  ;;  %v11039_v41 = vcombine.high %v3275_v9, %v3279_v30  ;;  %v11038_v63 = vcombine.low %v3275_v9, %v3279_v30 }
 0x5d6   : > { %10455 = vmatpush2.bf16.msra.mxu0 %v11078_v37  ;;  %v3407_v22 = vld [vmem:[%s14445_s19 + $0x638] sm:$0xff] }
 0x5d7   : > { %10496 = vmatpush2.bf16.msra.mxu1 %v11206_v60  ;;  %10456 = vmatprep.subr.bf16.mxu0 %v11071_v56  ;;  %v11167_v15 = vcombine.high %v3403_v11, %v3407_v22  ;;  %v3523_v18 = vld [vmem:[%s14445_s19 + $0x9d8] sm:$0xff]  ;;  %v11166_v54 = vcombine.low %v3403_v11, %v3407_v22 }
 0x5d8   : > { %10497 = vmatprep.subr.bf16.mxu1 %v11199_v16  ;;  %v3527_v29 = vld [vmem:[%s14445_s19 + $0x9f8] sm:$0xff] }
 0x5d9   : > { %v3651_v31 = vld [vmem:[%s14445_s19 + $0xdd8] sm:$0xff]  ;;  %v11287_v37 = vcombine.high %v3523_v18, %v3527_v29  ;;  %v11286_v43 = vcombine.low %v3523_v18, %v3527_v29 }
 0x5da   : > { %10457 = vmatpush2.bf16.msra.mxu0 %v11070_v53  ;;  %v3655_v32 = vld [vmem:[%s14445_s19 + $0xdf8] sm:$0xff] }
 0x5db   : > { %10498 = vmatpush2.bf16.msra.mxu1 %v11198_v55  ;;  %10458 = vmatprep.subr.bf16.mxu0 %v11063_v44  ;;  %v11415_v60 = vcombine.high %v3651_v31, %v3655_v32  ;;  %v3515_v56 = vld [vmem:[%s14445_s19 + $0x998] sm:$0xff]  ;;  %v11414_v52 = vcombine.low %v3651_v31, %v3655_v32 }
 0x5dc   : > { %10499 = vmatprep.subr.bf16.mxu1 %v11191_v24  ;;  %v3519_v16 = vld [vmem:[%s14445_s19 + $0x9b8] sm:$0xff] }
 0x5dd   : > { %v3643_v46 = vld [vmem:[%s14445_s19 + $0xd98] sm:$0xff]  ;;  %v11279_v53 = vcombine.high %v3515_v56, %v3519_v16 }
 0x5de   : > { %10459 = vmatpush2.bf16.msra.mxu0 %v11062_v4  ;;  %v3647_v59 = vld [vmem:[%s14445_s19 + $0xdb8] sm:$0xff] }
 0x5df   : > { %10500 = vmatpush2.bf16.msra.mxu1 %v11190_v5  ;;  %10460 = vmatprep.subr.bf16.mxu0 %v11055_v6  ;;  %v3507_v55 = vld [vmem:[%s14445_s19 + $0x958] sm:$0xff]  ;;  %v11407_v57 = vcombine.high %v3643_v46, %v3647_v59  ;;  %v11278_v5 = vcombine.low %v3515_v56, %v3519_v16 }
 0x5e0   : > { %10501 = vmatprep.subr.bf16.mxu1 %v11183_v50  ;;  %v3511_v44 = vld [vmem:[%s14445_s19 + $0x978] sm:$0xff]  ;;  %v11406_v50 = vcombine.low %v3643_v46, %v3647_v59 }
 0x5e1   : > { %v3635_v58 = vld [vmem:[%s14445_s19 + $0xd58] sm:$0xff] }
 0x5e2   : > { %10461 = vmatpush2.bf16.msra.mxu0 %v11054_v42  ;;  %v3639_v38 = vld [vmem:[%s14445_s19 + $0xd78] sm:$0xff] }
 0x5e3   : > { %10502 = vmatpush2.bf16.msra.mxu1 %v11182_v19  ;;  %10462 = vmatprep.subr.bf16.mxu0 %v11047_v36  ;;  %v11399_v39 = vcombine.high %v3635_v58, %v3639_v38  ;;  %v3503_v27 = vld [vmem:[%s14445_s19 + $0x938] sm:$0xff]  ;;  %v11398_v9 = vcombine.low %v3635_v58, %v3639_v38 }
 0x5e4   : > { %10503 = vmatprep.subr.bf16.mxu1 %v11175_v8  ;;  %v3631_v19 = vld [vmem:[%s14445_s19 + $0xd38] sm:$0xff] }
 0x5e5   : > { %v3475_v59 = vld [vmem:[%s14445_s19 + $0x858] sm:$0xff] }
 0x5e6   : > { %10463 = vmatpush2.bf16.msra.mxu0 %v11046_v25  ;;  %v3491_v25 = vld [vmem:[%s14445_s19 + $0x8d8] sm:$0xff] }
 0x5e7   : > { %10504 = vmatpush2.bf16.msra.mxu1 %v11174_v40  ;;  %10464 = vmatprep.subr.bf16.mxu0 %v11039_v41  ;;  %v3495_v40 = vld [vmem:[%s14445_s19 + $0x8f8] sm:$0xff] }
 0x5e8   : > { %10505 = vmatprep.subr.bf16.mxu1 %v11167_v15  ;;  %v3619_v41 = vld [vmem:[%s14445_s19 + $0xcd8] sm:$0xff]  ;;  %v11255_v31 = vcombine.high %v3491_v25, %v3495_v40  ;;  %v11254_v56 = vcombine.low %v3491_v25, %v3495_v40 }
 0x5e9   : > { %v3623_v15 = vld [vmem:[%s14445_s19 + $0xcf8] sm:$0xff] }
 0x5ea   : > { %10465 = vmatpush2.bf16.msra.mxu0 %v11038_v63  ;;  %v11383_v32 = vcombine.high %v3619_v41, %v3623_v15  ;;  %v3483_v63 = vld [vmem:[%s14445_s19 + $0x898] sm:$0xff]  ;;  %v11382_v16 = vcombine.low %v3619_v41, %v3623_v15 }
 0x5eb   : > { %10506 = vmatpush2.bf16.msra.mxu1 %v11166_v54  ;;  %10516 = vmatprep.subr.bf16.mxu0 %v11287_v37  ;;  %v3487_v54 = vld [vmem:[%s14445_s19 + $0x8b8] sm:$0xff] }
 0x5ec   : > { %10557 = vmatprep.subr.bf16.mxu1 %v11415_v60  ;;  %v3611_v37 = vld [vmem:[%s14445_s19 + $0xc98] sm:$0xff] }
 0x5ed   : > { %v10222_v24 = vpop.f32.mrf.mxu0  ;;  %10467 = vmatmul.mubr.bf16.vlgmr.msra.gmra.mxu0 %v14589_v51  ;;  %v11271_v51 = vcombine.high %v3507_v55, %v3511_v44  ;;  %v3615_v60 = vld [vmem:[%s14445_s19 + $0xcb8] sm:$0xff] }
 0x5ee   : > { %v10223_v49 = vadd.f32 %v10222_v24, %v15508_v20  ;;  %v10263_v4 = vpop.f32.mrf.mxu1  ;;  %10508 = vmatmul.mubr.bf16.vlgmr.msra.gmra.mxu1 %v14580_v47  ;;  %10517 = vmatpush1.bf16.msra.mxu0 %v11286_v43  ;;  %v3499_v47 = vld [vmem:[%s14445_s19 + $0x918] sm:$0xff]  ;;  %v11247_v43 = vcombine.high %v3483_v63, %v3487_v54  ;;  %v11375_v46 = vcombine.high %v3611_v37, %v3615_v60 }
 0x5ef   : > { %10548 = vmatprep.mubr.bf16.mxu0 %v14618_v10  ;;  %10558 = vmatpush1.bf16.msra.mxu1 %v11414_v52  ;;  %v10224_v6 = vpop.f32.mrf.mxu0  ;;  %v3627_v10 = vld [vmem:[%s14445_s19 + $0xd18] sm:$0xff]  ;;  %v11263_v30 = vcombine.high %v3499_v47, %v3503_v27  ;;  %v11262_v18 = vcombine.low %v3499_v47, %v3503_v27  ;;  %v11374_v24 = vcombine.low %v3611_v37, %v3615_v60 }
 0x5f0   : > { %v15581_v13 = vadd.f32 %v10263_v4, %v10223_v49  ;;  %10589 = vmatprep.mubr.bf16.mxu1 %v14623_v23  ;;  %v10225_v20 = vadd.f32 %v10224_v6, %v15515_v14  ;;  %v10265_v21 = vpop.f32.mrf.mxu1  ;;  %10518 = vmatprep.subr.bf16.mxu0 %v11279_v53  ;;  %v11270_v23 = vcombine.low %v3507_v55, %v3511_v44  ;;  %v3479_v52 = vld [vmem:[%s14445_s19 + $0x878] sm:$0xff] }
 0x5f1   : > { %v10226_v42 = vpop.f32.mrf.mxu0  ;;  %10559 = vmatprep.subr.bf16.mxu1 %v11407_v57  ;;  %v11391_v22 = vcombine.high %v3627_v10, %v3631_v19  ;;  %v11390_v29 = vcombine.low %v3627_v10, %v3631_v19  ;;  %v3603_v53 = vld [vmem:[%s14445_s19 + $0xc58] sm:$0xff]  ;;  %v11246_v44 = vcombine.low %v3483_v63, %v3487_v54  ;;  %v11239_v57 = vcombine.high %v3475_v59, %v3479_v52 }
 0x5f2   : > { %v15589_v36 = vadd.f32 %v10265_v21, %v10225_v20  ;;  %v10267_v8 = vpop.f32.mrf.mxu1  ;;  %10519 = vmatpush1.bf16.msra.mxu0 %v11278_v5  ;;  %v3607_v55 = vld [vmem:[%s14445_s19 + $0xc78] sm:$0xff]  ;;  %v11238_v6 = vcombine.low %v3475_v59, %v3479_v52 }
 0x5f3   : > { %10560 = vmatpush1.bf16.msra.mxu1 %v11406_v50  ;;  %v10227_v14 = vpop.f32.mrf.mxu0  ;;  %10520 = vmatprep.subr.bf16.mxu0 %v11271_v51  ;;  %v11367_v58 = vcombine.high %v3603_v53, %v3607_v55  ;;  %v3467_v38 = vld [vmem:[%s14445_s19 + $0x818] sm:$0xff]  ;;  %v11366_v50 = vcombine.low %v3603_v53, %v3607_v55 }
 0x5f4   : > { %v10268_v11 = vpop.f32.mrf.mxu1  ;;  %10561 = vmatprep.subr.bf16.mxu1 %v11399_v39  ;;  %v3471_v49 = vld [vmem:[%s14445_s19 + $0x838] sm:$0xff] }
 0x5f5   : > { %v3595_v4 = vld [vmem:[%s14445_s19 + $0xc18] sm:$0xff]  ;;  %v11231_v51 = vcombine.high %v3467_v38, %v3471_v49  ;;  %v11230_v42 = vcombine.low %v3467_v38, %v3471_v49 }
 0x5f6   : > { %10521 = vmatpush1.bf16.msra.mxu0 %v11270_v23  ;;  %v3599_v5 = vld [vmem:[%s14445_s19 + $0xc38] sm:$0xff] }
 0x5f7   : > { %10562 = vmatpush1.bf16.msra.mxu1 %v11398_v9  ;;  %10522 = vmatprep.subr.bf16.mxu0 %v11263_v30  ;;  %v11359_v20 = vcombine.high %v3595_v4, %v3599_v5  ;;  %v3587_v21 = vld [vmem:[%s14445_s19 + $0xbd8] sm:$0xff]  ;;  %v11358_v10 = vcombine.low %v3595_v4, %v3599_v5 }
 0x5f8   : > { %10563 = vmatprep.subr.bf16.mxu1 %v11391_v22  ;;  %v3591_v39 = vld [vmem:[%s14445_s19 + $0xbf8] sm:$0xff] }
 0x5f9   : > { %v3715_v47 = vld [vmem:[%s14445_s19 + $0xfd8] sm:$0xff]  ;;  %v11351_v19 = vcombine.high %v3587_v21, %v3591_v39  ;;  %v11350_v11 = vcombine.low %v3587_v21, %v3591_v39 }
 0x5fa   : > { %10523 = vmatpush1.bf16.msra.mxu0 %v11262_v18  ;;  %v3719_v27 = vld [vmem:[%s14445_s19 + $0xff8] sm:$0xff] }
 0x5fb   : > { %10564 = vmatpush1.bf16.msra.mxu1 %v11390_v29  ;;  %10524 = vmatprep.subr.bf16.mxu0 %v11255_v31  ;;  %v11479_v8 = vcombine.high %v3715_v47, %v3719_v27  ;;  %v3579_v23 = vld [vmem:[%s14445_s19 + $0xb98] sm:$0xff]  ;;  %v11478_v22 = vcombine.low %v3715_v47, %v3719_v27 }
 0x5fc   : > { %10565 = vmatprep.subr.bf16.mxu1 %v11383_v32  ;;  %v3583_v14 = vld [vmem:[%s14445_s19 + $0xbb8] sm:$0xff] }
 0x5fd   : > { %v3707_v9 = vld [vmem:[%s14445_s19 + $0xf98] sm:$0xff]  ;;  %v11343_v25 = vcombine.high %v3579_v23, %v3583_v14  ;;  %v11342_v31 = vcombine.low %v3579_v23, %v3583_v14 }
 0x5fe   : > { %10525 = vmatpush1.bf16.msra.mxu0 %v11254_v56  ;;  %v3711_v30 = vld [vmem:[%s14445_s19 + $0xfb8] sm:$0xff] }
 0x5ff   : > { %10566 = vmatpush1.bf16.msra.mxu1 %v11382_v16  ;;  %10526 = vmatprep.subr.bf16.mxu0 %v11247_v43  ;;  %v11471_v40 = vcombine.high %v3707_v9, %v3711_v30  ;;  %v3571_v41 = vld [vmem:[%s14445_s19 + $0xb58] sm:$0xff]  ;;  %v11470_v32 = vcombine.low %v3707_v9, %v3711_v30 }
 0x600   : > { %10567 = vmatprep.subr.bf16.mxu1 %v11375_v46  ;;  %v3575_v15 = vld [vmem:[%s14445_s19 + $0xb78] sm:$0xff] }
 0x601   : > { %v3699_v18 = vld [vmem:[%s14445_s19 + $0xf58] sm:$0xff]  ;;  %v11335_v63 = vcombine.high %v3571_v41, %v3575_v15  ;;  %v11334_v43 = vcombine.low %v3571_v41, %v3575_v15 }
 0x602   : > { %10527 = vmatpush1.bf16.msra.mxu0 %v11246_v44  ;;  %v3703_v29 = vld [vmem:[%s14445_s19 + $0xf78] sm:$0xff] }
 0x603   : > { %10568 = vmatpush1.bf16.msra.mxu1 %v11374_v24  ;;  %10528 = vmatprep.subr.bf16.mxu0 %v11239_v57  ;;  %v11463_v54 = vcombine.high %v3699_v18, %v3703_v29  ;;  %v3563_v37 = vld [vmem:[%s14445_s19 + $0xb18] sm:$0xff]  ;;  %v11462_v46 = vcombine.low %v3699_v18, %v3703_v29 }
 0x604   : > { %10569 = vmatprep.subr.bf16.mxu1 %v11367_v58  ;;  %v3567_v60 = vld [vmem:[%s14445_s19 + $0xb38] sm:$0xff] }
 0x605   : > { %v3691_v56 = vld [vmem:[%s14445_s19 + $0xf18] sm:$0xff]  ;;  %v11327_v59 = vcombine.high %v3563_v37, %v3567_v60  ;;  %v11326_v57 = vcombine.low %v3563_v37, %v3567_v60 }
 0x606   : > { %10529 = vmatpush1.bf16.msra.mxu0 %v11238_v6  ;;  %v3695_v16 = vld [vmem:[%s14445_s19 + $0xf38] sm:$0xff] }
 0x607   : > { %10570 = vmatpush1.bf16.msra.mxu1 %v11366_v50  ;;  %10530 = vmatprep.subr.bf16.mxu0 %v11231_v51  ;;  %v11455_v52 = vcombine.high %v3691_v56, %v3695_v16  ;;  %v3555_v53 = vld [vmem:[%s14445_s19 + $0xad8] sm:$0xff]  ;;  %v11454_v58 = vcombine.low %v3691_v56, %v3695_v16 }
 0x608   : > { %10571 = vmatprep.subr.bf16.mxu1 %v11359_v20  ;;  %v3559_v55 = vld [vmem:[%s14445_s19 + $0xaf8] sm:$0xff] }
 0x609   : > { %v3683_v44 = vld [vmem:[%s14445_s19 + $0xed8] sm:$0xff]  ;;  %v11319_v38 = vcombine.high %v3555_v53, %v3559_v55  ;;  %v11318_v51 = vcombine.low %v3555_v53, %v3559_v55 }
 0x60a   : > { %10531 = vmatpush1.bf16.msra.mxu0 %v11230_v42  ;;  %v3687_v24 = vld [vmem:[%s14445_s19 + $0xef8] sm:$0xff] }
 0x60b   : > { %10572 = vmatpush1.bf16.msra.mxu1 %v11358_v10  ;;  %10532 = vmatprep.subr.bf16.mxu0 %v11351_v19  ;;  %v11447_v49 = vcombine.high %v3683_v44, %v3687_v24  ;;  %v3547_v4 = vld [vmem:[%s14445_s19 + $0xa98] sm:$0xff]  ;;  %v11446_v20 = vcombine.low %v3683_v44, %v3687_v24 }
 0x60c   : > { %10573 = vmatprep.subr.bf16.mxu1 %v11479_v8  ;;  %v3551_v5 = vld [vmem:[%s14445_s19 + $0xab8] sm:$0xff] }
 0x60d   : > { %v3675_v6 = vld [vmem:[%s14445_s19 + $0xe98] sm:$0xff]  ;;  %v11311_v21 = vcombine.high %v3547_v4, %v3551_v5  ;;  %v11310_v19 = vcombine.low %v3547_v4, %v3551_v5 }
 0x60e   : > { %10533 = vmatpush2.bf16.msra.mxu0 %v11350_v11  ;;  %v3679_v50 = vld [vmem:[%s14445_s19 + $0xeb8] sm:$0xff] }
 0x60f   : > { %10574 = vmatpush2.bf16.msra.mxu1 %v11478_v22  ;;  %10534 = vmatprep.subr.bf16.mxu0 %v11343_v25  ;;  %v11439_v39 = vcombine.high %v3675_v6, %v3679_v50  ;;  %v3539_v47 = vld [vmem:[%s14445_s19 + $0xa58] sm:$0xff]  ;;  %v11438_v8 = vcombine.low %v3675_v6, %v3679_v50 }
 0x610   : > { %10575 = vmatprep.subr.bf16.mxu1 %v11471_v40  ;;  %v3543_v27 = vld [vmem:[%s14445_s19 + $0xa78] sm:$0xff] }
 0x611   : > { %v3667_v42 = vld [vmem:[%s14445_s19 + $0xe58] sm:$0xff]  ;;  %v11303_v23 = vcombine.high %v3539_v47, %v3543_v27  ;;  %v11302_v25 = vcombine.low %v3539_v47, %v3543_v27 }
 0x612   : > { %10535 = vmatpush2.bf16.msra.mxu0 %v11342_v31  ;;  %v3671_v10 = vld [vmem:[%s14445_s19 + $0xe78] sm:$0xff] }
 0x613   : > { %10576 = vmatpush2.bf16.msra.mxu1 %v11470_v32  ;;  %10536 = vmatprep.subr.bf16.mxu0 %v11335_v63  ;;  %v11431_v14 = vcombine.high %v3667_v42, %v3671_v10  ;;  %v3531_v9 = vld [vmem:[%s14445_s19 + $0xa18] sm:$0xff]  ;;  %v11430_v40 = vcombine.low %v3667_v42, %v3671_v10 }
 0x614   : > { %10577 = vmatprep.subr.bf16.mxu1 %v11463_v54  ;;  %v3535_v30 = vld [vmem:[%s14445_s19 + $0xa38] sm:$0xff] }
 0x615   : > { %v3659_v11 = vld [vmem:[%s14445_s19 + $0xe18] sm:$0xff]  ;;  %v11295_v41 = vcombine.high %v3531_v9, %v3535_v30  ;;  %v11294_v63 = vcombine.low %v3531_v9, %v3535_v30 }
 0x616   : > { %10537 = vmatpush2.bf16.msra.mxu0 %v11334_v43  ;;  %v3663_v22 = vld [vmem:[%s14445_s19 + $0xe38] sm:$0xff] }
 0x617   : > { %10578 = vmatpush2.bf16.msra.mxu1 %v11462_v46  ;;  %10538 = vmatprep.subr.bf16.mxu0 %v11327_v59  ;;  %v11423_v15 = vcombine.high %v3659_v11, %v3663_v22  ;;  %v3779_v18 = vld [vmem:[%s14445_s19 + $0x11d8] sm:$0xff]  ;;  %v11422_v54 = vcombine.low %v3659_v11, %v3663_v22 }
 0x618   : > { %10579 = vmatprep.subr.bf16.mxu1 %v11455_v52  ;;  %v3783_v29 = vld [vmem:[%s14445_s19 + $0x11f8] sm:$0xff] }
 0x619   : > { %v3907_v31 = vld [vmem:[%s14445_s19 + $0x15d8] sm:$0xff]  ;;  %v11543_v37 = vcombine.high %v3779_v18, %v3783_v29  ;;  %v11542_v43 = vcombine.low %v3779_v18, %v3783_v29 }
 0x61a   : > { %10539 = vmatpush2.bf16.msra.mxu0 %v11326_v57  ;;  %v3911_v32 = vld [vmem:[%s14445_s19 + $0x15f8] sm:$0xff] }
 0x61b   : > { %10580 = vmatpush2.bf16.msra.mxu1 %v11454_v58  ;;  %10540 = vmatprep.subr.bf16.mxu0 %v11319_v38  ;;  %v11671_v60 = vcombine.high %v3907_v31, %v3911_v32  ;;  %v3771_v56 = vld [vmem:[%s14445_s19 + $0x1198] sm:$0xff]  ;;  %v11670_v52 = vcombine.low %v3907_v31, %v3911_v32 }
 0x61c   : > { %10581 = vmatprep.subr.bf16.mxu1 %v11447_v49  ;;  %v3775_v16 = vld [vmem:[%s14445_s19 + $0x11b8] sm:$0xff] }
 0x61d   : > { %v3899_v46 = vld [vmem:[%s14445_s19 + $0x1598] sm:$0xff]  ;;  %v11535_v53 = vcombine.high %v3771_v56, %v3775_v16  ;;  %v11534_v5 = vcombine.low %v3771_v56, %v3775_v16 }
 0x61e   : > { %10541 = vmatpush2.bf16.msra.mxu0 %v11318_v51  ;;  %v3903_v59 = vld [vmem:[%s14445_s19 + $0x15b8] sm:$0xff] }
 0x61f   : > { %10582 = vmatpush2.bf16.msra.mxu1 %v11446_v20  ;;  %10542 = vmatprep.subr.bf16.mxu0 %v11311_v21  ;;  %v3763_v55 = vld [vmem:[%s14445_s19 + $0x1158] sm:$0xff]  ;;  %v11663_v57 = vcombine.high %v3899_v46, %v3903_v59  ;;  %v11662_v50 = vcombine.low %v3899_v46, %v3903_v59 }
 0x620   : > { %10583 = vmatprep.subr.bf16.mxu1 %v11439_v39  ;;  %v3767_v44 = vld [vmem:[%s14445_s19 + $0x1178] sm:$0xff] }
 0x621   : > { %v3891_v58 = vld [vmem:[%s14445_s19 + $0x1558] sm:$0xff] }
 0x622   : > { %10543 = vmatpush2.bf16.msra.mxu0 %v11310_v19  ;;  %v3895_v38 = vld [vmem:[%s14445_s19 + $0x1578] sm:$0xff] }
 0x623   : > { %10584 = vmatpush2.bf16.msra.mxu1 %v11438_v8  ;;  %10544 = vmatprep.subr.bf16.mxu0 %v11303_v23  ;;  %v11655_v21 = vcombine.high %v3891_v58, %v3895_v38  ;;  %v3759_v39 = vld [vmem:[%s14445_s19 + $0x1138] sm:$0xff]  ;;  %v11654_v19 = vcombine.low %v3891_v58, %v3895_v38 }
 0x624   : > { %10585 = vmatprep.subr.bf16.mxu1 %v11431_v14  ;;  %v3887_v27 = vld [vmem:[%s14445_s19 + $0x1538] sm:$0xff] }
 0x625   : > { %v3747_v9 = vld [vmem:[%s14445_s19 + $0x10d8] sm:$0xff] }
 0x626   : > { %10545 = vmatpush2.bf16.msra.mxu0 %v11302_v25  ;;  %v3751_v30 = vld [vmem:[%s14445_s19 + $0x10f8] sm:$0xff] }
 0x627   : > { %10586 = vmatpush2.bf16.msra.mxu1 %v11430_v40  ;;  %10546 = vmatprep.subr.bf16.mxu0 %v11295_v41  ;;  %v3875_v11 = vld [vmem:[%s14445_s19 + $0x14d8] sm:$0xff]  ;;  %v11511_v41 = vcombine.high %v3747_v9, %v3751_v30 }
 0x628   : > { %10587 = vmatprep.subr.bf16.mxu1 %v11423_v15  ;;  %v3879_v22 = vld [vmem:[%s14445_s19 + $0x14f8] sm:$0xff] }
 0x629   : > { %v11639_v15 = vcombine.high %v3875_v11, %v3879_v22  ;;  %v3739_v18 = vld [vmem:[%s14445_s19 + $0x1098] sm:$0xff] }
 0x62a   : > { %10547 = vmatpush2.bf16.msra.mxu0 %v11294_v63  ;;  %v3743_v29 = vld [vmem:[%s14445_s19 + $0x10b8] sm:$0xff]  ;;  %v11510_v63 = vcombine.low %v3747_v9, %v3751_v30 }
 0x62b   : > { %10588 = vmatpush2.bf16.msra.mxu1 %v11422_v54  ;;  %10598 = vmatprep.subr.bf16.mxu0 %v11543_v37  ;;  %v3867_v31 = vld [vmem:[%s14445_s19 + $0x1498] sm:$0xff]  ;;  %v11638_v54 = vcombine.low %v3875_v11, %v3879_v22  ;;  %v11503_v37 = vcombine.high %v3739_v18, %v3743_v29  ;;  %v11502_v59 = vcombine.low %v3739_v18, %v3743_v29 }
 0x62c   : > { %10639 = vmatprep.subr.bf16.mxu1 %v11671_v60  ;;  %v3871_v32 = vld [vmem:[%s14445_s19 + $0x14b8] sm:$0xff] }
 0x62d   : > { %v10304_v24 = vpop.f32.mrf.mxu0  ;;  %10549 = vmatmul.mubr.bf16.vlgmr.msra.gmra.mxu0 %v14706_v2  ;;  %v11527_v2 = vcombine.high %v3763_v55, %v3767_v44  ;;  %v11631_v60 = vcombine.high %v3867_v31, %v3871_v32  ;;  %v3731_v56 = vld [vmem:[%s14445_s19 + $0x1058] sm:$0xff] }
 0x62e   : > { %v10305_v49 = vadd.f32 %v10304_v24, %v15581_v13  ;;  %v10345_v4 = vpop.f32.mrf.mxu1  ;;  %10590 = vmatmul.mubr.bf16.vlgmr.msra.gmra.mxu1 %v14704_v62  ;;  %10599 = vmatpush1.bf16.msra.mxu0 %v11542_v43  ;;  %v3755_v62 = vld [vmem:[%s14445_s19 + $0x1118] sm:$0xff] }
 0x62f   : > { %10630 = vmatprep.mubr.bf16.mxu0 %v14712_v45  ;;  %10640 = vmatpush1.bf16.msra.mxu1 %v11670_v52  ;;  %v10306_v6 = vpop.f32.mrf.mxu0  ;;  %v3883_v45 = vld [vmem:[%s14445_s19 + $0x1518] sm:$0xff]  ;;  %v11519_v8 = vcombine.high %v3755_v62, %v3759_v39  ;;  %v11518_v25 = vcombine.low %v3755_v62, %v3759_v39  ;;  %v11630_v52 = vcombine.low %v3867_v31, %v3871_v32 }
 0x630   : > { %v15655_v51 = vadd.f32 %v10345_v4, %v10305_v49  ;;  %10671 = vmatprep.mubr.bf16.mxu1 %v14714_v7  ;;  %v10307_v13 = vadd.f32 %v10306_v6, %v15589_v36  ;;  %v10347_v20 = vpop.f32.mrf.mxu1  ;;  %10600 = vmatprep.subr.bf16.mxu0 %v11535_v53  ;;  %v11526_v7 = vcombine.low %v3763_v55, %v3767_v44  ;;  %v3735_v16 = vld [vmem:[%s14445_s19 + $0x1078] sm:$0xff] }
 0x631   : > { %v10308_v47 = vpop.f32.mrf.mxu0  ;;  %10641 = vmatprep.subr.bf16.mxu1 %v11663_v57  ;;  %v11647_v14 = vcombine.high %v3883_v45, %v3887_v27  ;;  %v11646_v40 = vcombine.low %v3883_v45, %v3887_v27  ;;  %v3859_v43 = vld [vmem:[%s14445_s19 + $0x1458] sm:$0xff]  ;;  %v11495_v53 = vcombine.high %v3731_v56, %v3735_v16  ;;  %v11494_v38 = vcombine.low %v3731_v56, %v3735_v16 }
 0x632   : > { %v15663_v42 = vadd.f32 %v10347_v20, %v10307_v13  ;;  %v10349_v10 = vpop.f32.mrf.mxu1  ;;  %10601 = vmatpush1.bf16.msra.mxu0 %v11534_v5  ;;  %v3863_v46 = vld [vmem:[%s14445_s19 + $0x1478] sm:$0xff] }
 0x633   : > { %10642 = vmatpush1.bf16.msra.mxu1 %v11662_v50  ;;  %v10309_v36 = vpop.f32.mrf.mxu0  ;;  %10602 = vmatprep.subr.bf16.mxu0 %v11527_v2  ;;  %v11623_v55 = vcombine.high %v3859_v43, %v3863_v46  ;;  %v3723_v44 = vld [vmem:[%s14445_s19 + $0x1018] sm:$0xff]  ;;  %v11622_v49 = vcombine.low %v3859_v43, %v3863_v46 }
 0x634   : > { %v10350_v23 = vpop.f32.mrf.mxu1  ;;  %10643 = vmatprep.subr.bf16.mxu1 %v11655_v21  ;;  %v3727_v24 = vld [vmem:[%s14445_s19 + $0x1038] sm:$0xff] }
 0x635   : > { %v3851_v57 = vld [vmem:[%s14445_s19 + $0x1418] sm:$0xff]  ;;  %v11487_v4 = vcombine.high %v3723_v44, %v3727_v24  ;;  %v11486_v20 = vcombine.low %v3723_v44, %v3727_v24 }
 0x636   : > { %10603 = vmatpush1.bf16.msra.mxu0 %v11526_v7  ;;  %v3855_v58 = vld [vmem:[%s14445_s19 + $0x1438] sm:$0xff] }
 0x637   : > { %10644 = vmatpush1.bf16.msra.mxu1 %v11654_v19  ;;  %10604 = vmatprep.subr.bf16.mxu0 %v11519_v8  ;;  %v11615_v5 = vcombine.high %v3851_v57, %v3855_v58  ;;  %v3843_v6 = vld [vmem:[%s14445_s19 + $0x13d8] sm:$0xff]  ;;  %v11614_v21 = vcombine.low %v3851_v57, %v3855_v58 }
 0x638   : > { %10645 = vmatprep.subr.bf16.mxu1 %v11647_v14  ;;  %v3847_v50 = vld [vmem:[%s14445_s19 + $0x13f8] sm:$0xff] }
 0x639   : > { %v3971_v2 = vld [vmem:[%s14445_s19 + $0x17d8] sm:$0xff]  ;;  %v11607_v62 = vcombine.high %v3843_v6, %v3847_v50  ;;  %v11606_v7 = vcombine.low %v3843_v6, %v3847_v50 }
 0x63a   : > { %10605 = vmatpush1.bf16.msra.mxu0 %v11518_v25  ;;  %v3975_v13 = vld [vmem:[%s14445_s19 + $0x17f8] sm:$0xff] }
 0x63b   : > { %10646 = vmatpush1.bf16.msra.mxu1 %v11646_v40  ;;  %10606 = vmatprep.subr.bf16.mxu0 %v11511_v41  ;;  %v11735_v39 = vcombine.high %v3971_v2, %v3975_v13  ;;  %v3835_v47 = vld [vmem:[%s14445_s19 + $0x1398] sm:$0xff]  ;;  %v11734_v36 = vcombine.low %v3971_v2, %v3975_v13 }
 0x63c   : > { %10647 = vmatprep.subr.bf16.mxu1 %v11639_v15  ;;  %v3839_v45 = vld [vmem:[%s14445_s19 + $0x13b8] sm:$0xff] }
 0x63d   : > { %v3963_v27 = vld [vmem:[%s14445_s19 + $0x1798] sm:$0xff]  ;;  %v11599_v19 = vcombine.high %v3835_v47, %v3839_v45  ;;  %v11598_v11 = vcombine.low %v3835_v47, %v3839_v45 }
 0x63e   : > { %10607 = vmatpush1.bf16.msra.mxu0 %v11510_v63  ;;  %v3967_v10 = vld [vmem:[%s14445_s19 + $0x17b8] sm:$0xff] }
 0x63f   : > { %10648 = vmatpush1.bf16.msra.mxu1 %v11638_v54  ;;  %10608 = vmatprep.subr.bf16.mxu0 %v11503_v37  ;;  %v11727_v8 = vcombine.high %v3963_v27, %v3967_v10  ;;  %v3827_v23 = vld [vmem:[%s14445_s19 + $0x1358] sm:$0xff]  ;;  %v11726_v22 = vcombine.low %v3963_v27, %v3967_v10 }
 0x640   : > { %10649 = vmatprep.subr.bf16.mxu1 %v11631_v60  ;;  %v3831_v14 = vld [vmem:[%s14445_s19 + $0x1378] sm:$0xff] }
 0x641   : > { %v3955_v9 = vld [vmem:[%s14445_s19 + $0x1758] sm:$0xff]  ;;  %v11591_v25 = vcombine.high %v3827_v23, %v3831_v14  ;;  %v11590_v31 = vcombine.low %v3827_v23, %v3831_v14 }
 0x642   : > { %10609 = vmatpush1.bf16.msra.mxu0 %v11502_v59  ;;  %v3959_v30 = vld [vmem:[%s14445_s19 + $0x1778] sm:$0xff] }
 0x643   : > { %10650 = vmatpush1.bf16.msra.mxu1 %v11630_v52  ;;  %10610 = vmatprep.subr.bf16.mxu0 %v11495_v53  ;;  %v11719_v40 = vcombine.high %v3955_v9, %v3959_v30  ;;  %v3819_v41 = vld [vmem:[%s14445_s19 + $0x1318] sm:$0xff]  ;;  %v11718_v32 = vcombine.low %v3955_v9, %v3959_v30 }
 0x644   : > { %10651 = vmatprep.subr.bf16.mxu1 %v11623_v55  ;;  %v3823_v15 = vld [vmem:[%s14445_s19 + $0x1338] sm:$0xff] }
 0x645   : > { %v3947_v18 = vld [vmem:[%s14445_s19 + $0x1718] sm:$0xff]  ;;  %v11583_v63 = vcombine.high %v3819_v41, %v3823_v15  ;;  %v11582_v43 = vcombine.low %v3819_v41, %v3823_v15 }
 0x646   : > { %10611 = vmatpush1.bf16.msra.mxu0 %v11494_v38  ;;  %v3951_v29 = vld [vmem:[%s14445_s19 + $0x1738] sm:$0xff] }
 0x647   : > { %10652 = vmatpush1.bf16.msra.mxu1 %v11622_v49  ;;  %10612 = vmatprep.subr.bf16.mxu0 %v11487_v4  ;;  %v11711_v54 = vcombine.high %v3947_v18, %v3951_v29  ;;  %v3811_v37 = vld [vmem:[%s14445_s19 + $0x12d8] sm:$0xff]  ;;  %v11710_v46 = vcombine.low %v3947_v18, %v3951_v29 }
 0x648   : > { %10653 = vmatprep.subr.bf16.mxu1 %v11615_v5  ;;  %v3815_v60 = vld [vmem:[%s14445_s19 + $0x12f8] sm:$0xff] }
 0x649   : > { %v3939_v56 = vld [vmem:[%s14445_s19 + $0x16d8] sm:$0xff]  ;;  %v11575_v59 = vcombine.high %v3811_v37, %v3815_v60  ;;  %v11574_v57 = vcombine.low %v3811_v37, %v3815_v60 }
 0x64a   : > { %10613 = vmatpush1.bf16.msra.mxu0 %v11486_v20  ;;  %v3943_v16 = vld [vmem:[%s14445_s19 + $0x16f8] sm:$0xff] }
 0x64b   : > { %10654 = vmatpush1.bf16.msra.mxu1 %v11614_v21  ;;  %10614 = vmatprep.subr.bf16.mxu0 %v11607_v62  ;;  %v11703_v52 = vcombine.high %v3939_v56, %v3943_v16  ;;  %v3803_v53 = vld [vmem:[%s14445_s19 + $0x1298] sm:$0xff]  ;;  %v11702_v58 = vcombine.low %v3939_v56, %v3943_v16 }
 0x64c   : > { %10655 = vmatprep.subr.bf16.mxu1 %v11735_v39  ;;  %v3807_v55 = vld [vmem:[%s14445_s19 + $0x12b8] sm:$0xff] }
 0x64d   : > { %v3931_v44 = vld [vmem:[%s14445_s19 + $0x1698] sm:$0xff]  ;;  %v11567_v38 = vcombine.high %v3803_v53, %v3807_v55  ;;  %v11566_v2 = vcombine.low %v3803_v53, %v3807_v55 }
 0x64e   : > { %10615 = vmatpush2.bf16.msra.mxu0 %v11606_v7  ;;  %v3935_v24 = vld [vmem:[%s14445_s19 + $0x16b8] sm:$0xff] }
 0x64f   : > { %10656 = vmatpush2.bf16.msra.mxu1 %v11734_v36  ;;  %10616 = vmatprep.subr.bf16.mxu0 %v11599_v19  ;;  %v11695_v49 = vcombine.high %v3931_v44, %v3935_v24  ;;  %v3795_v4 = vld [vmem:[%s14445_s19 + $0x1258] sm:$0xff]  ;;  %v11694_v13 = vcombine.low %v3931_v44, %v3935_v24 }
 0x650   : > { %10657 = vmatprep.subr.bf16.mxu1 %v11727_v8  ;;  %v3799_v5 = vld [vmem:[%s14445_s19 + $0x1278] sm:$0xff] }
 0x651   : > { %v3923_v6 = vld [vmem:[%s14445_s19 + $0x1658] sm:$0xff]  ;;  %v11559_v20 = vcombine.high %v3795_v4, %v3799_v5  ;;  %v11558_v27 = vcombine.low %v3795_v4, %v3799_v5 }
 0x652   : > { %10617 = vmatpush2.bf16.msra.mxu0 %v11598_v11  ;;  %v3927_v50 = vld [vmem:[%s14445_s19 + $0x1678] sm:$0xff] }
 0x653   : > { %10658 = vmatpush2.bf16.msra.mxu1 %v11726_v22  ;;  %10618 = vmatprep.subr.bf16.mxu0 %v11591_v25  ;;  %v11687_v21 = vcombine.high %v3923_v6, %v3927_v50  ;;  %v3787_v62 = vld [vmem:[%s14445_s19 + $0x1218] sm:$0xff]  ;;  %v11686_v10 = vcombine.low %v3923_v6, %v3927_v50 }
 0x654   : > { %10659 = vmatprep.subr.bf16.mxu1 %v11719_v40  ;;  %v3791_v39 = vld [vmem:[%s14445_s19 + $0x1238] sm:$0xff] }
 0x655   : > { %v3915_v47 = vld [vmem:[%s14445_s19 + $0x1618] sm:$0xff]  ;;  %v11551_v7 = vcombine.high %v3787_v62, %v3791_v39  ;;  %v11550_v9 = vcombine.low %v3787_v62, %v3791_v39 }
 0x656   : > { %10619 = vmatpush2.bf16.msra.mxu0 %v11590_v31  ;;  %v3919_v45 = vld [vmem:[%s14445_s19 + $0x1638] sm:$0xff] }
 0x657   : > { %10660 = vmatpush2.bf16.msra.mxu1 %v11718_v32  ;;  %10620 = vmatprep.subr.bf16.mxu0 %v11583_v63  ;;  %v11679_v36 = vcombine.high %v3915_v47, %v3919_v45  ;;  %v4035_v19 = vld [vmem:[%s14445_s19 + $0x19d8] sm:$0xff]  ;;  %v11678_v30 = vcombine.low %v3915_v47, %v3919_v45 }
 0x658   : > { %10661 = vmatprep.subr.bf16.mxu1 %v11711_v54  ;;  %v4039_v8 = vld [vmem:[%s14445_s19 + $0x19f8] sm:$0xff] }
 0x659   : > { %v4163_v23 = vld [vmem:[%s14445_s19 + $0x1dd8] sm:$0xff]  ;;  %v11799_v11 = vcombine.high %v4035_v19, %v4039_v8  ;;  %v11798_v41 = vcombine.low %v4035_v19, %v4039_v8 }
 0x65a   : > { %10621 = vmatpush2.bf16.msra.mxu0 %v11582_v43  ;;  %v4167_v14 = vld [vmem:[%s14445_s19 + $0x1df8] sm:$0xff] }
 0x65b   : > { %10662 = vmatpush2.bf16.msra.mxu1 %v11710_v46  ;;  %10622 = vmatprep.subr.bf16.mxu0 %v11575_v59  ;;  %v11927_v22 = vcombine.high %v4163_v23, %v4167_v14  ;;  %v4027_v25 = vld [vmem:[%s14445_s19 + $0x1998] sm:$0xff]  ;;  %v11926_v29 = vcombine.low %v4163_v23, %v4167_v14 }
 0x65c   : > { %10663 = vmatprep.subr.bf16.mxu1 %v11703_v52  ;;  %v4031_v40 = vld [vmem:[%s14445_s19 + $0x19b8] sm:$0xff] }
 0x65d   : > { %v4155_v15 = vld [vmem:[%s14445_s19 + $0x1d98] sm:$0xff]  ;;  %v11791_v31 = vcombine.high %v4027_v25, %v4031_v40  ;;  %v11790_v46 = vcombine.low %v4027_v25, %v4031_v40 }
 0x65e   : > { %10623 = vmatpush2.bf16.msra.mxu0 %v11574_v57  ;;  %v4159_v18 = vld [vmem:[%s14445_s19 + $0x1db8] sm:$0xff] }
 0x65f   : > { %10664 = vmatpush2.bf16.msra.mxu1 %v11702_v58  ;;  %10624 = vmatprep.subr.bf16.mxu0 %v11567_v38  ;;  %v4019_v32 = vld [vmem:[%s14445_s19 + $0x1958] sm:$0xff]  ;;  %v11919_v37 = vcombine.high %v4155_v15, %v4159_v18  ;;  %v11918_v53 = vcombine.low %v4155_v15, %v4159_v18 }
 0x660   : > { %10665 = vmatprep.subr.bf16.mxu1 %v11695_v49  ;;  %v4023_v63 = vld [vmem:[%s14445_s19 + $0x1978] sm:$0xff] }
 0x661   : > { %v4147_v60 = vld [vmem:[%s14445_s19 + $0x1d58] sm:$0xff] }
 0x662   : > { %10625 = vmatpush2.bf16.msra.mxu0 %v11566_v2  ;;  %v4151_v56 = vld [vmem:[%s14445_s19 + $0x1d78] sm:$0xff] }
 0x663   : > { %10666 = vmatpush2.bf16.msra.mxu1 %v11694_v13  ;;  %10626 = vmatprep.subr.bf16.mxu0 %v11559_v20  ;;  %v15729_v59 = vld [vmem:[%s15122_s20] sm:$0xff]  ;;  %v11911_v24 = vcombine.high %v4147_v60, %v4151_v56  ;;  %v11910_v50 = vcombine.low %v4147_v60, %v4151_v56 }
 0x664   : > { %10667 = vmatprep.subr.bf16.mxu1 %v11687_v21  ;;  %v10792_v52 = vrot.slane %v15729_v59, %v14667_v3  ;;  %v4011_v57 = vld [vmem:[%s14445_s19 + $0x1918] sm:$0xff]  ;;  %v10796_v5 = vrot.slane %v15729_v59, %v14575_v35  ;;  %v10800_v17 = vrot.slane %v15729_v59, %v14664_v61 }
 0x665   : > { %v4015_v58 = vld [vmem:[%s14445_s19 + $0x1938] sm:$0xff] }
 0x666   : > { %10627 = vmatpush2.bf16.msra.mxu0 %v11558_v27  ;;  %v4139_v3 = vld [vmem:[%s14445_s19 + $0x1d18] sm:$0xff]  ;;  %v11775_v2 = vcombine.high %v4011_v57, %v4015_v58 }
 0x667   : > { %10668 = vmatpush2.bf16.msra.mxu1 %v11686_v10  ;;  %10628 = vmatprep.subr.bf16.mxu0 %v11551_v7  ;;  %v4143_v49 = vld [vmem:[%s14445_s19 + $0x1d38] sm:$0xff]  ;;  %v11774_v7 = vcombine.low %v4011_v57, %v4015_v58 }
 0x668   : > { %10669 = vmatprep.subr.bf16.mxu1 %v11679_v36  ;;  %v11903_v62 = vcombine.high %v4139_v3, %v4143_v49  ;;  %v4003_v39 = vld [vmem:[%s14445_s19 + $0x18d8] sm:$0xff]  ;;  %v11902_v36 = vcombine.low %v4139_v3, %v4143_v49 }
 0x669   : > { %v4007_v47 = vld [vmem:[%s14445_s19 + $0x18f8] sm:$0xff] }
 0x66a   : > { %10629 = vmatpush2.bf16.msra.mxu0 %v11550_v9  ;;  %v4131_v35 = vld [vmem:[%s14445_s19 + $0x1cd8] sm:$0xff]  ;;  %v11767_v19 = vcombine.high %v4003_v39, %v4007_v47 }
 0x66b   : > { %10670 = vmatpush2.bf16.msra.mxu1 %v11678_v30  ;;  %10680 = vmatprep.subr.bf16.mxu0 %v11799_v11  ;;  %v4135_v45 = vld [vmem:[%s14445_s19 + $0x1cf8] sm:$0xff] }
 0x66c   : > { %10721 = vmatprep.subr.bf16.mxu1 %v11927_v22  ;;  %v11895_v8 = vcombine.high %v4131_v35, %v4135_v45  ;;  %v3995_v23 = vld [vmem:[%s14445_s19 + $0x1898] sm:$0xff]  ;;  %v11894_v22 = vcombine.low %v4131_v35, %v4135_v45 }
 0x66d   : > { %v10386_v54 = vpop.f32.mrf.mxu0  ;;  %10631 = vmatmul.mubr.bf16.vlgmr.msra.gmra.mxu0 %v14796_v28  ;;  %v3999_v14 = vld [vmem:[%s14445_s19 + $0x18b8] sm:$0xff] }
 0x66e   : > { %v10387_v16 = vadd.f32 %v10386_v54, %v15655_v51  ;;  %v10427_v43 = vpop.f32.mrf.mxu1  ;;  %10672 = vmatmul.mubr.bf16.vlgmr.msra.gmra.mxu1 %v14794_v26  ;;  %10681 = vmatpush1.bf16.msra.mxu0 %v11798_v41  ;;  %v11783_v51 = vcombine.high %v4019_v32, %v4023_v63  ;;  %v4123_v30 = vld [vmem:[%s14445_s19 + $0x1c98] sm:$0xff]  ;;  %v11759_v25 = vcombine.high %v3995_v23, %v3999_v14 }
 0x66f   : > { %10712 = vmatprep.mubr.bf16.mxu0 %v14799_v33  ;;  %10722 = vmatpush1.bf16.msra.mxu1 %v11926_v29  ;;  %v10388_v28 = vpop.f32.mrf.mxu0  ;;  %v4127_v11 = vld [vmem:[%s14445_s19 + $0x1cb8] sm:$0xff] }
 0x670   : > { %v10428_v55 = vadd.f32 %v10427_v43, %v10387_v16  ;;  %10753 = vmatprep.mubr.bf16.mxu1 %v14801_v34  ;;  %v10389_v26 = vadd.f32 %v10388_v28, %v15663_v42  ;;  %v10429_v44 = vpop.f32.mrf.mxu1  ;;  %10682 = vmatprep.subr.bf16.mxu0 %v11791_v31  ;;  %v11782_v42 = vcombine.low %v4019_v32, %v4023_v63  ;;  %v3987_v41 = vld [vmem:[%s14445_s19 + $0x1858] sm:$0xff] }
 0x671   : > { %v10390_v38 = vpop.f32.mrf.mxu0  ;;  %10723 = vmatprep.subr.bf16.mxu1 %v11919_v37  ;;  %v11887_v40 = vcombine.high %v4123_v30, %v4127_v11  ;;  %v3991_v15 = vld [vmem:[%s14445_s19 + $0x1878] sm:$0xff]  ;;  %v11758_v31 = vcombine.low %v3995_v23, %v3999_v14  ;;  %v11886_v32 = vcombine.low %v4123_v30, %v4127_v11 }
 0x672   : > { %v10766_v33 = vmax.f32 %v10428_v55, 0.0  ;;  %v10430_v4 = vadd.f32 %v10429_v44, %v10389_v26  ;;  %v10431_v34 = vpop.f32.mrf.mxu1  ;;  %10683 = vmatpush1.bf16.msra.mxu0 %v11790_v46  ;;  %v4115_v18 = vld [vmem:[%s14445_s19 + $0x1c58] sm:$0xff]  ;;  %v11751_v63 = vcombine.high %v3987_v41, %v3991_v15  ;;  %v11750_v43 = vcombine.low %v3987_v41, %v3991_v15 }
 0x673   : > { %10724 = vmatpush1.bf16.msra.mxu1 %v11918_v53  ;;  %v10391_v6 = vpop.f32.mrf.mxu0  ;;  %10684 = vmatprep.subr.bf16.mxu0 %v11783_v51  ;;  %v4119_v29 = vld [vmem:[%s14445_s19 + $0x1c78] sm:$0xff] }
 0x674   : > { %v10817_v13 = vmul.f32 %v10792_v52, %v10766_v33  ;;  %v10767_v20 = vmax.f32 %v10430_v4, 0.0  ;;  %v10432_v21 = vpop.f32.mrf.mxu1  ;;  %10725 = vmatprep.subr.bf16.mxu1 %v11911_v24  ;;  %v11879_v54 = vcombine.high %v4115_v18, %v4119_v29  ;;  %v3979_v37 = vld [vmem:[%s14445_s19 + $0x1818] sm:$0xff]  ;;  %v11878_v46 = vcombine.low %v4115_v18, %v4119_v29 }
 0x675   : > { %v3983_v60 = vld [vmem:[%s14445_s19 + $0x1838] sm:$0xff] }
 0x676   : > { %v10824_v27 = vadd.f32 %v15444_v12, %v10817_v13  ;;  %v10818_v10 = vmul.f32 %v10796_v5, %v10767_v20  ;;  %10685 = vmatpush1.bf16.msra.mxu0 %v11782_v42  ;;  %v11766_v12 = vcombine.low %v4003_v39, %v4007_v47  ;;  %v4107_v56 = vld [vmem:[%s14445_s19 + $0x1c18] sm:$0xff]  ;;  %v11743_v52 = vcombine.high %v3979_v37, %v3983_v60 }
 0x677   : > { %10726 = vmatpush1.bf16.msra.mxu1 %v11910_v50  ;;  %10686 = vmatprep.subr.bf16.mxu0 %v11775_v2  ;;  %v4111_v16 = vld [vmem:[%s14445_s19 + $0x1c38] sm:$0xff]  ;;  %v11742_v44 = vcombine.low %v3979_v37, %v3983_v60 }
 0x678   : > { %10727 = vmatprep.subr.bf16.mxu1 %v11903_v62  ;;  %v15749_v9 = vadd.f32 %v10824_v27, %v10818_v10  ;;  %v11871_v28 = vcombine.high %v4107_v56, %v4111_v16  ;;  %v4099_v53 = vld [vmem:[%s14445_s19 + $0x1bd8] sm:$0xff]  ;;  %v11870_v24 = vcombine.low %v4107_v56, %v4111_v16 }
 0x679   : > { %v4103_v51 = vld [vmem:[%s14445_s19 + $0x1bf8] sm:$0xff] }
 0x67a   : > { %10687 = vmatpush1.bf16.msra.mxu0 %v11774_v7  ;;  %v4227_v55 = vld [vmem:[%s14445_s19 + $0x1fd8] sm:$0xff]  ;;  %v11863_v57 = vcombine.high %v4099_v53, %v4103_v51  ;;  %v11862_v4 = vcombine.low %v4099_v53, %v4103_v51 }
 0x67b   : > { %10728 = vmatpush1.bf16.msra.mxu1 %v11902_v36  ;;  %10688 = vmatprep.subr.bf16.mxu0 %v11767_v19  ;;  %v4231_v26 = vld [vmem:[%s14445_s19 + $0x1ff8] sm:$0xff] }
 0x67c   : > { %10729 = vmatprep.subr.bf16.mxu1 %v11895_v8  ;;  %v11991_v58 = vcombine.high %v4227_v55, %v4231_v26  ;;  %v4091_v38 = vld [vmem:[%s14445_s19 + $0x1b98] sm:$0xff]  ;;  %v11990_v5 = vcombine.low %v4227_v55, %v4231_v26 }
 0x67d   : > { %v4095_v3 = vld [vmem:[%s14445_s19 + $0x1bb8] sm:$0xff] }
 0x67e   : > { %10689 = vmatpush1.bf16.msra.mxu0 %v11766_v12  ;;  %v4219_v49 = vld [vmem:[%s14445_s19 + $0x1f98] sm:$0xff]  ;;  %v11855_v34 = vcombine.high %v4091_v38, %v4095_v3  ;;  %v11854_v20 = vcombine.low %v4091_v38, %v4095_v3 }
 0x67f   : > { %10730 = vmatpush1.bf16.msra.mxu1 %v11894_v22  ;;  %10690 = vmatprep.subr.bf16.mxu0 %v11759_v25  ;;  %v4223_v33 = vld [vmem:[%s14445_s19 + $0x1fb8] sm:$0xff] }
 0x680   : > { %10731 = vmatprep.subr.bf16.mxu1 %v11887_v40  ;;  %v11983_v42 = vcombine.high %v4219_v49, %v4223_v33  ;;  %v4083_v6 = vld [vmem:[%s14445_s19 + $0x1b58] sm:$0xff]  ;;  %v11982_v21 = vcombine.low %v4219_v49, %v4223_v33 }
 0x681   : > { %v4087_v50 = vld [vmem:[%s14445_s19 + $0x1b78] sm:$0xff] }
 0x682   : > { %10691 = vmatpush1.bf16.msra.mxu0 %v11758_v31  ;;  %v4211_v2 = vld [vmem:[%s14445_s19 + $0x1f58] sm:$0xff]  ;;  %v11847_v62 = vcombine.high %v4083_v6, %v4087_v50  ;;  %v11846_v10 = vcombine.low %v4083_v6, %v4087_v50 }
 0x683   : > { %10732 = vmatpush1.bf16.msra.mxu1 %v11886_v32  ;;  %10692 = vmatprep.subr.bf16.mxu0 %v11751_v63  ;;  %v4215_v13 = vld [vmem:[%s14445_s19 + $0x1f78] sm:$0xff] }
 0x684   : > { %10733 = vmatprep.subr.bf16.mxu1 %v11879_v54  ;;  %v11975_v39 = vcombine.high %v4211_v2, %v4215_v13  ;;  %v4075_v47 = vld [vmem:[%s14445_s19 + $0x1b18] sm:$0xff]  ;;  %v11974_v7 = vcombine.low %v4211_v2, %v4215_v13 }
 0x685   : > { %v4079_v35 = vld [vmem:[%s14445_s19 + $0x1b38] sm:$0xff] }
 0x686   : > { %10693 = vmatpush1.bf16.msra.mxu0 %v11750_v43  ;;  %v4203_v45 = vld [vmem:[%s14445_s19 + $0x1f18] sm:$0xff]  ;;  %v11839_v36 = vcombine.high %v4075_v47, %v4079_v35  ;;  %v11838_v11 = vcombine.low %v4075_v47, %v4079_v35 }
 0x687   : > { %10734 = vmatpush1.bf16.msra.mxu1 %v11878_v46  ;;  %10694 = vmatprep.subr.bf16.mxu0 %v11743_v52  ;;  %v4207_v27 = vld [vmem:[%s14445_s19 + $0x1f38] sm:$0xff] }
 0x688   : > { %10735 = vmatprep.subr.bf16.mxu1 %v11871_v28  ;;  %v11967_v19 = vcombine.high %v4203_v45, %v4207_v27  ;;  %v4067_v8 = vld [vmem:[%s14445_s19 + $0x1ad8] sm:$0xff]  ;;  %v11966_v12 = vcombine.low %v4203_v45, %v4207_v27 }
 0x689   : > { %v4071_v23 = vld [vmem:[%s14445_s19 + $0x1af8] sm:$0xff] }
 0x68a   : > { %10695 = vmatpush1.bf16.msra.mxu0 %v11742_v44  ;;  %v4195_v14 = vld [vmem:[%s14445_s19 + $0x1ed8] sm:$0xff]  ;;  %v11831_v22 = vcombine.high %v4067_v8, %v4071_v23  ;;  %v11830_v29 = vcombine.low %v4067_v8, %v4071_v23 }
 0x68b   : > { %10736 = vmatpush1.bf16.msra.mxu1 %v11870_v24  ;;  %10696 = vmatprep.subr.bf16.mxu0 %v11863_v57  ;;  %v4199_v30 = vld [vmem:[%s14445_s19 + $0x1ef8] sm:$0xff] }
 0x68c   : > { %10737 = vmatprep.subr.bf16.mxu1 %v11991_v58  ;;  %v11959_v25 = vcombine.high %v4195_v14, %v4199_v30  ;;  %v4059_v40 = vld [vmem:[%s14445_s19 + $0x1a98] sm:$0xff]  ;;  %v11958_v31 = vcombine.low %v4195_v14, %v4199_v30 }
 0x68d   : > { %v4063_v41 = vld [vmem:[%s14445_s19 + $0x1ab8] sm:$0xff] }
 0x68e   : > { %10697 = vmatpush2.bf16.msra.mxu0 %v11862_v4  ;;  %v4187_v15 = vld [vmem:[%s14445_s19 + $0x1e98] sm:$0xff]  ;;  %v11823_v32 = vcombine.high %v4059_v40, %v4063_v41  ;;  %v11822_v16 = vcombine.low %v4059_v40, %v4063_v41 }
 0x68f   : > { %10738 = vmatpush2.bf16.msra.mxu1 %v11990_v5  ;;  %10698 = vmatprep.subr.bf16.mxu0 %v11855_v34  ;;  %v4191_v18 = vld [vmem:[%s14445_s19 + $0x1eb8] sm:$0xff] }
 0x690   : > { %10739 = vmatprep.subr.bf16.mxu1 %v11983_v42  ;;  %v11951_v63 = vcombine.high %v4187_v15, %v4191_v18  ;;  %v4051_v54 = vld [vmem:[%s14445_s19 + $0x1a58] sm:$0xff]  ;;  %v11950_v43 = vcombine.low %v4187_v15, %v4191_v18 }
 0x691   : > { %v4055_v37 = vld [vmem:[%s14445_s19 + $0x1a78] sm:$0xff] }
 0x692   : > { %10699 = vmatpush2.bf16.msra.mxu0 %v11854_v20  ;;  %v4179_v60 = vld [vmem:[%s14445_s19 + $0x1e58] sm:$0xff]  ;;  %v11815_v46 = vcombine.high %v4051_v54, %v4055_v37  ;;  %v11814_v26 = vcombine.low %v4051_v54, %v4055_v37 }
 0x693   : > { %10740 = vmatpush2.bf16.msra.mxu1 %v11982_v21  ;;  %10700 = vmatprep.subr.bf16.mxu0 %v11847_v62  ;;  %v4183_v56 = vld [vmem:[%s14445_s19 + $0x1e78] sm:$0xff] }
 0x694   : > { %10741 = vmatprep.subr.bf16.mxu1 %v11975_v39  ;;  %v11943_v52 = vcombine.high %v4179_v60, %v4183_v56  ;;  %v4043_v28 = vld [vmem:[%s14445_s19 + $0x1a18] sm:$0xff]  ;;  %v11942_v44 = vcombine.low %v4179_v60, %v4183_v56 }
 0x695   : > { %v4047_v53 = vld [vmem:[%s14445_s19 + $0x1a38] sm:$0xff] }
 0x696   : > { %10701 = vmatpush2.bf16.msra.mxu0 %v11846_v10  ;;  %v4171_v51 = vld [vmem:[%s14445_s19 + $0x1e18] sm:$0xff]  ;;  %v11807_v24 = vcombine.high %v4043_v28, %v4047_v53  ;;  %v11806_v58 = vcombine.low %v4043_v28, %v4047_v53  ;;  %v10804_v53 = vrot.slane %v15729_v59, %v14583_v48 }
 0x697   : > { %10742 = vmatpush2.bf16.msra.mxu1 %v11974_v7  ;;  %10702 = vmatprep.subr.bf16.mxu0 %v11839_v36  ;;  %v4175_v55 = vld [vmem:[%s14445_s19 + $0x1e38] sm:$0xff]  ;;  %s10935_s19 = sshll.u32 %s15844_s23, 3 }
 0x698   : > { %10743 = vmatprep.subr.bf16.mxu1 %v11967_v19  ;;  %v11935_v57 = vcombine.high %v4171_v51, %v4175_v55  ;;  %v11934_v38 = vcombine.low %v4171_v51, %v4175_v55  ;;  %v12064_v3 = vld [vmem:[%s14885_s16] sm:$0xff]  ;;  %s2384_s28 = scalar_lea.vmem %s15833_s6, %s10935_s19 }
 0x699   : > { %v4261_v49 = vrot.slane %v12064_v3, %v14664_v61  ;;  %v4265_v33 = vrot.slane %v12064_v3, %v14583_v48  ;;  %v10770_v61 = vld [vmem:[#allocation3] sm:$0xff] }
 0x69a   : > { %10703 = vmatpush2.bf16.msra.mxu0 %v11838_v11 }
 0x69b   : > { %10744 = vmatpush2.bf16.msra.mxu1 %v11966_v12  ;;  %10704 = vmatprep.subr.bf16.mxu0 %v11831_v22 }
 0x69c   : > { %10745 = vmatprep.subr.bf16.mxu1 %v11959_v25 }
 0x69e   : > { %10705 = vmatpush2.bf16.msra.mxu0 %v11830_v29 }
 0x69f   : > { %10746 = vmatpush2.bf16.msra.mxu1 %v11958_v31  ;;  %10706 = vmatprep.subr.bf16.mxu0 %v11823_v32 }
 0x6a0   : > { %10747 = vmatprep.subr.bf16.mxu1 %v11951_v63 }
 0x6a2   : > { %10707 = vmatpush2.bf16.msra.mxu0 %v11822_v16 }
 0x6a3   : > { %10748 = vmatpush2.bf16.msra.mxu1 %v11950_v43  ;;  %10708 = vmatprep.subr.bf16.mxu0 %v11815_v46 }
 0x6a4   : > { %10749 = vmatprep.subr.bf16.mxu1 %v11943_v52 }
 0x6a6   : > { %10709 = vmatpush2.bf16.msra.mxu0 %v11814_v26 }
 0x6a7   : > { %10750 = vmatpush2.bf16.msra.mxu1 %v11942_v44  ;;  %10710 = vmatprep.subr.bf16.mxu0 %v11807_v24 }
 0x6a8   : > { %10751 = vmatprep.subr.bf16.mxu1 %v11935_v57 }
 0x6aa   : > { %10711 = vmatpush2.bf16.msra.mxu0 %v11806_v58 }
 0x6ab   : > { %10752 = vmatpush2.bf16.msra.mxu1 %v11934_v38 }
 0x6ad   : > { %v10468_v4 = vpop.f32.mrf.mxu0  ;;  %10713 = vmatmul.mubr.bf16.vlgmr.msra.gmra.mxu0 %v14893_v0 }
 0x6ae   : > { %v10469_v5 = vadd.f32 %v10468_v4, %v4261_v49  ;;  %v10509_v34 = vpop.f32.mrf.mxu1  ;;  %10754 = vmatmul.mubr.bf16.vlgmr.msra.gmra.mxu1 %v14895_v1 }
 0x6af   : > { %v10470_v42 = vpop.f32.mrf.mxu0 }
 0x6b0   : > { %v10510_v6 = vadd.f32 %v10509_v34, %v10469_v5  ;;  %v10471_v50 = vadd.f32 %v10470_v42, %v4265_v33  ;;  %v10511_v2 = vpop.f32.mrf.mxu1 }
 0x6b1   : > { %v10472_v13 = vpop.f32.mrf.mxu0 }
 0x6b2   : > { %v10512_v20 = vadd.f32 %v10511_v2, %v10471_v50  ;;  %v10513_v21 = vpop.f32.mrf.mxu1 }
 0x6b3   : > { %v10473_v62 = vpop.f32.mrf.mxu0 }
 0x6b4   : > { %v10514_v39 = vpop.f32.mrf.mxu1 }
 0x6ed   : > { %v10550_v47 = vpop.f32.mrf.mxu0 }
 0x6ee   : > { %v10551_v35 = vadd.f32 %v10550_v47, %v10510_v6  ;;  %v10591_v45 = vpop.f32.mrf.mxu1 }
 0x6ef   : > { %v10552_v27 = vpop.f32.mrf.mxu0 }
 0x6f0   : > { %v10592_v10 = vadd.f32 %v10591_v45, %v10551_v35  ;;  %v10553_v7 = vadd.f32 %v10552_v27, %v10512_v20  ;;  %v10593_v0 = vpop.f32.mrf.mxu1 }
 0x6f1   : > { %v10554_v36 = vpop.f32.mrf.mxu0 }
 0x6f2   : > { %v10594_v19 = vadd.f32 %v10593_v0, %v10553_v7  ;;  %v10595_v8 = vpop.f32.mrf.mxu1 }
 0x6f3   : > { %v10555_v1 = vpop.f32.mrf.mxu0 }
 0x6f4   : > { %v10596_v23 = vpop.f32.mrf.mxu1 }
 0x72d   : > { %v10632_v14 = vpop.f32.mrf.mxu0 }
 0x72e   : > { %v10673_v30 = vpop.f32.mrf.mxu1  ;;  %v10633_v15 = vadd.f32 %v10632_v14, %v10592_v10 }
 0x72f   : > { %v10634_v11 = vpop.f32.mrf.mxu0 }
 0x730   : > { %v10675_v12 = vpop.f32.mrf.mxu1  ;;  %v10635_v18 = vadd.f32 %v10634_v11, %v10594_v19  ;;  %v10674_v29 = vadd.f32 %v10673_v30, %v10633_v15 }
 0x731   : > { %v10636_v22 = vpop.f32.mrf.mxu0 }
 0x732   : > { %v10677_v25 = vpop.f32.mrf.mxu1  ;;  %v10676_v32 = vadd.f32 %v10675_v12, %v10635_v18 }
 0x733   : > { %v10637_v40 = vpop.f32.mrf.mxu0 }
 0x734   : > { %v10678_v41 = vpop.f32.mrf.mxu1 }
 0x76d   : > { %v10714_v31 = vpop.f32.mrf.mxu0 }
 0x76e   : > { %v10715_v63 = vadd.f32 %v10714_v31, %v10674_v29  ;;  %v10755_v54 = vpop.f32.mrf.mxu1 }
 0x76f   : > { %v10716_v37 = vpop.f32.mrf.mxu0 }
 0x770   : > { %v10756_v60 = vadd.f32 %v10755_v54, %v10715_v63  ;;  %v10717_v56 = vadd.f32 %v10716_v37, %v10676_v32  ;;  %v10757_v16 = vpop.f32.mrf.mxu1 }
 0x771   : > { %v10718_v43 = vpop.f32.mrf.mxu0 }
 0x772   : > { %v10768_v46 = vmax.f32 %v10756_v60, 0.0  ;;  %v10758_v52 = vadd.f32 %v10757_v16, %v10717_v56  ;;  %v10759_v28 = vpop.f32.mrf.mxu1 }
 0x773   : > { %v10719_v51 = vpop.f32.mrf.mxu0 }
 0x774   : > { %v10819_v55 = vmul.f32 %v10800_v17, %v10768_v46  ;;  %v10769_v26 = vmax.f32 %v10758_v52, 0.0  ;;  %v10760_v44 = vpop.f32.mrf.mxu1 }
 0x776   : > { %v10820_v24 = vmul.f32 %v10804_v53, %v10769_v26  ;;  %v10826_v57 = vadd.f32 %v15749_v9, %v10819_v55 }
 0x778   : > { %v10827_v58 = vadd.f32 %v10826_v57, %v10820_v24 }
 0x77a   : > { %10828 = vadd.xlane.f32.xlu0 %v10827_v58 }
 0x803   : > { %v10829_v38 = vpop.xlane.xlu0 %10828 }
 0x804   : > { %v10830_v3 = vadd.f32 %v10829_v38, %v10770_v61 }
 0x806   : > { %10832 = vst.msk [vmem:[#allocation3] sm:$0xff] %vm3198_vm1, %v10830_v3 }
 0x80d   : > { %v10836_v48 = vld [vmem:[#allocation3] sm:$0xff] }
 0x80e   : > { %10837 = vst.msk [vmem:[%s2384_s28] sm:$0xff] %vm3198_vm1, %v10836_v48 }
 0x80f PF: > { %s16_s25 = sadd.s32 1, %s12103_s25   ;;  %s15835_s21 = smov %s12091_s22 }
 0x810   : > { %p13_p11 = scmp.ge.s32.totalorder %s16_s25, 4   ;;  %s15836_s22 = smov %s12176_s29 }
 0x811   : > { %s15837_s23 = smov %s12099_s24  ;;  %s15838_s24 = smov %s15840_s26 }
 0x812   :  { %15 = sbr.rel (!%p13_p11) target bundleno = 3 (0x3), region = 116 }

</bundles_post_ra>
